<compile_context>
chip_gen: v6e
topology: v6e:2x2x1
jax: 0.10.0
libtpu: 0.0.40
codegen_flags: <defaults>
</compile_context>

<pallas_src>
import numpy as np
import jax
import jax.numpy as jnp
from jax import lax
from jax.experimental import pallas as pl
from jax.experimental.pallas import tpu as pltpu


def _build_fused_kernel(sizes, Kw, Mw, Rw, Pw, w0, w1, om_over_d, n_cycles, m0):
    """One Pallas kernel = fnet + all `n_cycles` V-cycles for ONE batch element.

    sizes     : per-level node counts, e.g. [17, 9, 5, 3]
    Kw, Mw    : 3x3 stiffness / consistent-mass stencils (python floats)
    Rw, Pw    : 3x3 restriction / prolongation kernels  (python floats)
    w0, w1    : frozen linear_ratio weights, folded into R / P
    om_over_d : omega / diag(K) for the weighted-Jacobi sweep
    """
    L = len(sizes)
    f32 = jnp.float32

    def valid3x3(x, w):
        # (N, N) -> (N-2, N-2): 3x3 'valid' cross-correlation, taps unrolled.
        N = x.shape[0]
        acc = None
        for dy in range(3):
            for dx in range(3):
                t = w[dy][dx] * x[dy:dy + N - 2, dx:dx + N - 2]
                acc = t if acc is None else acc + t
        return acc

    def kernel(F_ref, v0_ref, vout_ref, vm0_ref, fout_ref, *lvl_refs):
        v_refs = lvl_refs[0::2]
        f_refs = lvl_refs[1::2]
        N0 = sizes[0]

        # ---- transfer operators as tiny dense matrices, built once per kernel
        #      invocation from iota (hoisted out of the V-cycle loop; no strided
        #      slices, no captured array constants).  Restriction/prolongation
        #      become  sum_a (row_select_a @ field @ col_weights_a).
        RY, RXW, PY, PXW = [], [], [], []
        for j in range(L - 1):
            Nf, Mc = sizes[j], sizes[j + 1]
            Ni = Nf - 2                       # interior width of the fine level
            ry_a, rx_a, py_a, px_a = [], [], [], []
            for a in range(3):
                # Conv2d(k=3, stride=2) on the fine interior -> coarse interior,
                # zero-padded back to the full coarse grid (boundary rows = 0).
                yc = lax.broadcasted_iota(jnp.int32, (Mc, Ni), 0)
                fi = lax.broadcasted_iota(jnp.int32, (Mc, Ni), 1)
                sel = (fi == 2 * (yc - 1) + a) & (yc >= 1) & (yc <= Mc - 2)
                ry_a.append(jnp.where(sel, 1.0, 0.0).astype(f32))

                fj = lax.broadcasted_iota(jnp.int32, (Ni, Mc), 0)
                xc = lax.broadcasted_iota(jnp.int32, (Ni, Mc), 1)
                inb = (xc >= 1) & (xc <= Mc - 2)
                rx = jnp.zeros((Ni, Mc), f32)
                for b in range(3):
                    rx = rx + jnp.where(inb & (fj == 2 * (xc - 1) + b),
                                        w0 * Rw[a][b], 0.0)
                rx_a.append(rx.astype(f32))

                # ConvTranspose2d(k=3, stride=2, padding=1), interior rows only.
                rr = lax.broadcasted_iota(jnp.int32, (Ni, Mc), 0)
                yc2 = lax.broadcasted_iota(jnp.int32, (Ni, Mc), 1)
                py_a.append(jnp.where(rr == 2 * yc2 + a - 2, 1.0, 0.0).astype(f32))

                xc2 = lax.broadcasted_iota(jnp.int32, (Mc, Ni), 0)
                cc = lax.broadcasted_iota(jnp.int32, (Mc, Ni), 1)
                px = jnp.zeros((Mc, Ni), f32)
                for b in range(3):
                    px = px + jnp.where(cc == 2 * xc2 + b - 2, w1 * Pw[a][b], 0.0)
                px_a.append(px.astype(f32))
            RY.append(ry_a); RXW.append(rx_a); PY.append(py_a); PXW.append(px_a)

        # ---- level-local operators (all data stays in VMEM scratch) ----------
        def relax(l):
            # One weighted-Jacobi sweep; Dirichlet-0 boundary is preserved by
            # storing only the interior (boundary rows/cols of v_refs[l] are 0).
            N = sizes[l]
            v = v_refs[l][...]
            f = f_refs[l][...]
            kv = valid3x3(v, Kw)
            v_refs[l][1:N - 1, 1:N - 1] = (
                v[1:N - 1, 1:N - 1] + om_over_d * (f[1:N - 1, 1:N - 1] - kv))

        def restrict_to(j):
            # f_{j+1} = w0 * pad(Conv2d_s2(R, (f_j - K v_j)[interior]))  in one shot.
            Nf = sizes[j]
            v = v_refs[j][...]
            f = f_refs[j][...]
            r_int = f[1:Nf - 1, 1:Nf - 1] - valid3x3(v, Kw)
            fc = None
            for a in range(3):
                t = jnp.dot(jnp.dot(RY[j][a], r_int, preferred_element_type=f32),
                            RXW[j][a], preferred_element_type=f32)
                fc = t if fc is None else fc + t
            f_refs[j + 1][...] = fc            # already includes w0 + zero boundary

        def prolong_correct(j):
            # v_j[interior] += w1 * ConvTranspose2d_s2(P, v_{j+1})[interior]
            Nf = sizes[j]
            vc = v_refs[j + 1][...]
            d = None
            for a in range(3):
                t = jnp.dot(jnp.dot(PY[j][a], vc, preferred_element_type=f32),
                            PXW[j][a], preferred_element_type=f32)
                d = t if d is None else d + t
            vj = v_refs[j][...]
            v_refs[j][1:Nf - 1, 1:Nf - 1] = vj[1:Nf - 1, 1:Nf - 1] + d

        def v_cycle(_it):
            relax(0)
            for j in range(L - 1):
                restrict_to(j)
                Mc = sizes[j + 1]
                v_refs[j + 1][...] = jnp.zeros((Mc, Mc), f32)
                relax(j + 1)
            relax(L - 1)
            for j in range(L - 2, -1, -1):
                prolong_correct(j)
                relax(j)

        # ---- f = fnet(F): consistent-mass conv.  Boundary entries of f are
        #      never read by the V-cycle, so they are stored as 0.
        Fx = F_ref[0]
        f_refs[0][...] = jnp.zeros((N0, N0), f32)
        f_refs[0][1:N0 - 1, 1:N0 - 1] = valid3x3(Fx, Mw)
        fout_ref[0] = f_refs[0][...]

        # ---- v <- random initial guess with the Dirichlet-0 boundary applied.
        v0 = v0_ref[0]
        v_refs[0][...] = jnp.zeros((N0, N0), f32)
        v_refs[0][1:N0 - 1, 1:N0 - 1] = v0[1:N0 - 1, 1:N0 - 1]

        # ---- m0 V-cycles, snapshot v_m0, then the remaining cycles -----------
        pl.loop(0, m0)(v_cycle)
        vm0_ref[0] = v_refs[0][...]
        pl.loop(m0, n_cycles)(v_cycle)
        vout_ref[0] = v_refs[0][...]

    return kernel


class MultiGridPallas:
    """JAX/Pallas port of feanet.multigrid.MultiGrid (forward pass only)."""

    def __init__(self, n, linear_tensor_R, linear_tensor_P, linear_ratio):
        self.m0 = 2
        self.m = 6
        self.size = 2.0
        self.n = int(n)
        self.L = int(np.log2(n))
        self.n_arr = np.array([int(n // 2 ** i) for i in range(self.L)])
        self.sizes = [int(k) + 1 for k in self.n_arr]
        self.n_channel = 16
        self.omega = 2.0 / 3.0

        # TODO(synk): feanet's KNet/FNet/JacobiBlock/Geometry/MeshCenterInterface
        # are not provided; surrogate with the homogeneous bilinear-FEM Poisson
        # stiffness / consistent-mass 3x3 stencils and Dirichlet-0 boundaries.
        self.K_stencil = (1.0 / 3.0) * np.array(
            [[-1.0, -1.0, -1.0], [-1.0, 8.0, -1.0], [-1.0, -1.0, -1.0]],
            dtype=np.float64)
        self.K_diag = float(self.K_stencil[1, 1])
        h = self.size / self.n
        self.M_stencil = (h * h / 36.0) * np.array(
            [[1.0, 4.0, 1.0], [4.0, 16.0, 4.0], [1.0, 4.0, 1.0]],
            dtype=np.float64)

        self.R = np.asarray(linear_tensor_R, dtype=np.float32)
        self.P = np.asarray(linear_tensor_P, dtype=np.float32)
        self.w = np.asarray(linear_ratio, dtype=np.float32)       # frozen (2,)

        # TODO(synk): KNet.split_x would partition the residual into 16 material
        # channels; with the shared R/P kernels the split + channel-sum is the
        # identity, so it is folded away exactly (no 16x broadcast anywhere).
        to_list = lambda a: [[float(a[i, j]) for j in range(3)] for i in range(3)]
        self._kernel = _build_fused_kernel(
            sizes=self.sizes,
            Kw=to_list(self.K_stencil),
            Mw=to_list(self.M_stencil),
            Rw=to_list(self.R),
            Pw=to_list(self.P),
            w0=float(self.w[0]),
            w1=float(self.w[1]),
            om_over_d=float(self.omega / self.K_diag),
            n_cycles=self.m,
            m0=self.m0,
        )
        self._forward_fn = jax.jit(self._forward_impl)

    # ---- single fused forward: one pallas_call for the whole batch ----------
    def _forward_impl(self, F4, key):
        B = F4.shape[0]
        N0 = self.sizes[0]
        v0_4 = self.random_sampling(F4.shape, key)

        block = pl.BlockSpec((1, N0, N0), lambda b: (b, 0, 0))
        scratch = []
        for N_ in self.sizes:
            scratch.append(pltpu.VMEM((N_, N_), jnp.float32))     # v_l
            scratch.append(pltpu.VMEM((N_, N_), jnp.float32))     # f_l

        vout, vm0, f0 = pl.pallas_call(
            self._kernel,
            out_shape=(jax.ShapeDtypeStruct((B, N0, N0), jnp.float32),
                       jax.ShapeDtypeStruct((B, N0, N0), jnp.float32),
                       jax.ShapeDtypeStruct((B, N0, N0), jnp.float32)),
            grid=(B,),
            in_specs=[block, block],
            out_specs=(block, block, block),
            scratch_shapes=scratch,
            compiler_params=pltpu.CompilerParams(
                dimension_semantics=("parallel",)),
        )(F4[:, 0], v0_4[:, 0])
        return vout[:, None], vm0[:, None], f0[:, None], v0_4

    def random_sampling(self, shape, key):
        # Deterministic jax.random equivalent of the numpy-based random_sampling.
        d1, d2, d3, d4 = shape
        k1, k2 = jax.random.split(key)
        coef = 10.0 * jax.random.uniform(k1, (d1, d2, 1, 1, 2), jnp.float32) - 5.0
        base = jax.random.uniform(k2, (d1, d2, d3, d4), jnp.float32)
        return coef[..., 0] * base + coef[..., 1]

    def forward(self, F_rhs, key):
        vout, vm0, f0, v0 = self._forward_fn(F_rhs, key)
        self.f = f0                      # fnet(F), as in the reference module
        self.v = v0                      # random initial guess
        self.v_m0 = vm0                  # solution snapshot after m0 sweeps
        return vout


if __name__ == "__main__":
    n = 16                      # finest grid: 17x17 nodes, L = 4 levels (16,8,4,2)
    batch = 2
    key = jax.random.PRNGKey(0)
    kF, kV = jax.random.split(key)

    # Deterministic transfer operators: full-weighting R, bilinear P, unit ratios.
    linear_tensor_R = np.array([[1., 2., 1.], [2., 4., 2.], [1., 2., 1.]],
                               dtype=np.float32) / 16.0
    linear_tensor_P = np.array([[.25, .5, .25], [.5, 1., .5], [.25, .5, .25]],
                               dtype=np.float32)
    linear_ratio = np.array([1.0, 1.0], dtype=np.float32)

    mg = MultiGridPallas(n, linear_tensor_R, linear_tensor_P, linear_ratio)

    F_rhs = jax.random.normal(kF, (batch, 1, n + 1, n + 1), dtype=jnp.float32)
    out = mg.forward(F_rhs, kV)
    out = jax.block_until_ready(out)
    assert out.shape == (batch, 1, n + 1, n + 1)
    assert bool(jnp.all(jnp.isfinite(out)))
    print("KERNEL_OK")
</pallas_src>

<mosaic_0001>
module attributes {stable_mosaic.version = 11 : i64} {
  func.func @kernel(%arg0: i32, %arg1: memref<1x17x17xf32, #tpu.memory_space<vmem>>, %arg2: memref<1x17x17xf32, #tpu.memory_space<vmem>>, %arg3: memref<1x17x17xf32, #tpu.memory_space<vmem>>, %arg4: memref<1x17x17xf32, #tpu.memory_space<vmem>>, %arg5: memref<1x17x17xf32, #tpu.memory_space<vmem>>, %arg6: memref<17x17xf32, #tpu.memory_space<vmem>>, %arg7: memref<17x17xf32, #tpu.memory_space<vmem>>, %arg8: memref<9x9xf32, #tpu.memory_space<vmem>>, %arg9: memref<9x9xf32, #tpu.memory_space<vmem>>, %arg10: memref<5x5xf32, #tpu.memory_space<vmem>>, %arg11: memref<5x5xf32, #tpu.memory_space<vmem>>, %arg12: memref<3x3xf32, #tpu.memory_space<vmem>>, %arg13: memref<3x3xf32, #tpu.memory_space<vmem>>) attributes {dimension_semantics = [#tpu.dimension_semantics<parallel>], iteration_bounds = array<i64: 2>, scalar_prefetch = 0 : i64, scratch_operands = 8 : i64, tpu.core_type = #tpu.core_type<tc>, window_params = [{transform_indices = @transform_0, window_bounds = array<i64: 1, 17, 17>}, {transform_indices = @transform_1, window_bounds = array<i64: 1, 17, 17>}, {transform_indices = @transform_2, window_bounds = array<i64: 1, 17, 17>}, {transform_indices = @transform_3, window_bounds = array<i64: 1, 17, 17>}, {transform_indices = @transform_4, window_bounds = array<i64: 1, 17, 17>}]} {
    %0 = tpu.iota {dimensions = array<i32: 0>} : vector<9x15xi32>
    %1 = tpu.iota {dimensions = array<i32: 1>} : vector<9x15xi32>
    %c1_i32 = arith.constant 1 : i32
    %2 = vector.broadcast %c1_i32 : i32 to vector<9x15xi32>
    %3 = arith.subi %0, %2 : vector<9x15xi32>
    %c2_i32 = arith.constant 2 : i32
    %4 = vector.broadcast %c2_i32 : i32 to vector<9x15xi32>
    %5 = arith.muli %4, %3 : vector<9x15xi32>
    %c0_i32 = arith.constant 0 : i32
    %6 = vector.broadcast %c0_i32 : i32 to vector<9x15xi32>
    %7 = arith.addi %5, %6 : vector<9x15xi32>
    %8 = arith.cmpi eq, %1, %7 : vector<9x15xi32>
    %c1_i32_0 = arith.constant 1 : i32
    %9 = vector.broadcast %c1_i32_0 : i32 to vector<9x15xi32>
    %10 = arith.cmpi sge, %0, %9 : vector<9x15xi32>
    %11 = arith.andi %8, %10 : vector<9x15xi1>
    %c7_i32 = arith.constant 7 : i32
    %12 = vector.broadcast %c7_i32 : i32 to vector<9x15xi32>
    %13 = arith.cmpi sle, %0, %12 : vector<9x15xi32>
    %14 = arith.andi %11, %13 : vector<9x15xi1>
    %cst = arith.constant 1.000000e+00 : f32
    %cst_1 = arith.constant 0.000000e+00 : f32
    %15 = vector.broadcast %cst : f32 to vector<9x15xf32>
    %16 = vector.broadcast %cst_1 : f32 to vector<9x15xf32>
    %17 = arith.select %14, %15, %16 : vector<9x15xi1>, vector<9x15xf32>
    %18 = tpu.iota {dimensions = array<i32: 0>} : vector<15x9xi32>
    %19 = tpu.iota {dimensions = array<i32: 1>} : vector<15x9xi32>
    %c1_i32_2 = arith.constant 1 : i32
    %20 = vector.broadcast %c1_i32_2 : i32 to vector<15x9xi32>
    %21 = arith.cmpi sge, %19, %20 : vector<15x9xi32>
    %c7_i32_3 = arith.constant 7 : i32
    %22 = vector.broadcast %c7_i32_3 : i32 to vector<15x9xi32>
    %23 = arith.cmpi sle, %19, %22 : vector<15x9xi32>
    %24 = arith.andi %21, %23 : vector<15x9xi1>
    %cst_4 = arith.constant 0.000000e+00 : f32
    %25 = vector.broadcast %cst_4 : f32 to vector<15x9xf32>
    %c1_i32_5 = arith.constant 1 : i32
    %26 = vector.broadcast %c1_i32_5 : i32 to vector<15x9xi32>
    %27 = arith.subi %19, %26 : vector<15x9xi32>
    %c2_i32_6 = arith.constant 2 : i32
    %28 = vector.broadcast %c2_i32_6 : i32 to vector<15x9xi32>
    %29 = arith.muli %28, %27 : vector<15x9xi32>
    %c0_i32_7 = arith.constant 0 : i32
    %30 = vector.broadcast %c0_i32_7 : i32 to vector<15x9xi32>
    %31 = arith.addi %29, %30 : vector<15x9xi32>
    %32 = arith.cmpi eq, %18, %31 : vector<15x9xi32>
    %33 = arith.andi %24, %32 : vector<15x9xi1>
    %cst_8 = arith.constant 6.250000e-02 : f32
    %cst_9 = arith.constant 0.000000e+00 : f32
    %34 = vector.broadcast %cst_8 : f32 to vector<15x9xf32>
    %35 = vector.broadcast %cst_9 : f32 to vector<15x9xf32>
    %36 = arith.select %33, %34, %35 : vector<15x9xi1>, vector<15x9xf32>
    %37 = arith.addf %25, %36 : vector<15x9xf32>
    %c1_i32_10 = arith.constant 1 : i32
    %38 = vector.broadcast %c1_i32_10 : i32 to vector<15x9xi32>
    %39 = arith.subi %19, %38 : vector<15x9xi32>
    %c2_i32_11 = arith.constant 2 : i32
    %40 = vector.broadcast %c2_i32_11 : i32 to vector<15x9xi32>
    %41 = arith.muli %40, %39 : vector<15x9xi32>
    %c1_i32_12 = arith.constant 1 : i32
    %42 = vector.broadcast %c1_i32_12 : i32 to vector<15x9xi32>
    %43 = arith.addi %41, %42 : vector<15x9xi32>
    %44 = arith.cmpi eq, %18, %43 : vector<15x9xi32>
    %45 = arith.andi %24, %44 : vector<15x9xi1>
    %cst_13 = arith.constant 1.250000e-01 : f32
    %cst_14 = arith.constant 0.000000e+00 : f32
    %46 = vector.broadcast %cst_13 : f32 to vector<15x9xf32>
    %47 = vector.broadcast %cst_14 : f32 to vector<15x9xf32>
    %48 = arith.select %45, %46, %47 : vector<15x9xi1>, vector<15x9xf32>
    %49 = arith.addf %37, %48 : vector<15x9xf32>
    %c1_i32_15 = arith.constant 1 : i32
    %50 = vector.broadcast %c1_i32_15 : i32 to vector<15x9xi32>
    %51 = arith.subi %19, %50 : vector<15x9xi32>
    %c2_i32_16 = arith.constant 2 : i32
    %52 = vector.broadcast %c2_i32_16 : i32 to vector<15x9xi32>
    %53 = arith.muli %52, %51 : vector<15x9xi32>
    %c2_i32_17 = arith.constant 2 : i32
    %54 = vector.broadcast %c2_i32_17 : i32 to vector<15x9xi32>
    %55 = arith.addi %53, %54 : vector<15x9xi32>
    %56 = arith.cmpi eq, %18, %55 : vector<15x9xi32>
    %57 = arith.andi %24, %56 : vector<15x9xi1>
    %cst_18 = arith.constant 6.250000e-02 : f32
    %cst_19 = arith.constant 0.000000e+00 : f32
    %58 = vector.broadcast %cst_18 : f32 to vector<15x9xf32>
    %59 = vector.broadcast %cst_19 : f32 to vector<15x9xf32>
    %60 = arith.select %57, %58, %59 : vector<15x9xi1>, vector<15x9xf32>
    %61 = arith.addf %49, %60 : vector<15x9xf32>
    %62 = tpu.iota {dimensions = array<i32: 0>} : vector<15x9xi32>
    %63 = tpu.iota {dimensions = array<i32: 1>} : vector<15x9xi32>
    %c2_i32_20 = arith.constant 2 : i32
    %64 = vector.broadcast %c2_i32_20 : i32 to vector<15x9xi32>
    %65 = arith.muli %64, %63 : vector<15x9xi32>
    %c0_i32_21 = arith.constant 0 : i32
    %66 = vector.broadcast %c0_i32_21 : i32 to vector<15x9xi32>
    %67 = arith.addi %65, %66 : vector<15x9xi32>
    %c2_i32_22 = arith.constant 2 : i32
    %68 = vector.broadcast %c2_i32_22 : i32 to vector<15x9xi32>
    %69 = arith.subi %67, %68 : vector<15x9xi32>
    %70 = arith.cmpi eq, %62, %69 : vector<15x9xi32>
    %cst_23 = arith.constant 1.000000e+00 : f32
    %cst_24 = arith.constant 0.000000e+00 : f32
    %71 = vector.broadcast %cst_23 : f32 to vector<15x9xf32>
    %72 = vector.broadcast %cst_24 : f32 to vector<15x9xf32>
    %73 = arith.select %70, %71, %72 : vector<15x9xi1>, vector<15x9xf32>
    %74 = tpu.iota {dimensions = array<i32: 0>} : vector<9x15xi32>
    %75 = tpu.iota {dimensions = array<i32: 1>} : vector<9x15xi32>
    %cst_25 = arith.constant 0.000000e+00 : f32
    %76 = vector.broadcast %cst_25 : f32 to vector<9x15xf32>
    %c2_i32_26 = arith.constant 2 : i32
    %77 = vector.broadcast %c2_i32_26 : i32 to vector<9x15xi32>
    %78 = arith.muli %77, %74 : vector<9x15xi32>
    %c0_i32_27 = arith.constant 0 : i32
    %79 = vector.broadcast %c0_i32_27 : i32 to vector<9x15xi32>
    %80 = arith.addi %78, %79 : vector<9x15xi32>
    %c2_i32_28 = arith.constant 2 : i32
    %81 = vector.broadcast %c2_i32_28 : i32 to vector<9x15xi32>
    %82 = arith.subi %80, %81 : vector<9x15xi32>
    %83 = arith.cmpi eq, %75, %82 : vector<9x15xi32>
    %cst_29 = arith.constant 2.500000e-01 : f32
    %cst_30 = arith.constant 0.000000e+00 : f32
    %84 = vector.broadcast %cst_29 : f32 to vector<9x15xf32>
    %85 = vector.broadcast %cst_30 : f32 to vector<9x15xf32>
    %86 = arith.select %83, %84, %85 : vector<9x15xi1>, vector<9x15xf32>
    %87 = arith.addf %76, %86 : vector<9x15xf32>
    %c2_i32_31 = arith.constant 2 : i32
    %88 = vector.broadcast %c2_i32_31 : i32 to vector<9x15xi32>
    %89 = arith.muli %88, %74 : vector<9x15xi32>
    %c1_i32_32 = arith.constant 1 : i32
    %90 = vector.broadcast %c1_i32_32 : i32 to vector<9x15xi32>
    %91 = arith.addi %89, %90 : vector<9x15xi32>
    %c2_i32_33 = arith.constant 2 : i32
    %92 = vector.broadcast %c2_i32_33 : i32 to vector<9x15xi32>
    %93 = arith.subi %91, %92 : vector<9x15xi32>
    %94 = arith.cmpi eq, %75, %93 : vector<9x15xi32>
    %cst_34 = arith.constant 5.000000e-01 : f32
    %cst_35 = arith.constant 0.000000e+00 : f32
    %95 = vector.broadcast %cst_34 : f32 to vector<9x15xf32>
    %96 = vector.broadcast %cst_35 : f32 to vector<9x15xf32>
    %97 = arith.select %94, %95, %96 : vector<9x15xi1>, vector<9x15xf32>
    %98 = arith.addf %87, %97 : vector<9x15xf32>
    %c2_i32_36 = arith.constant 2 : i32
    %99 = vector.broadcast %c2_i32_36 : i32 to vector<9x15xi32>
    %100 = arith.muli %99, %74 : vector<9x15xi32>
    %c2_i32_37 = arith.constant 2 : i32
    %101 = vector.broadcast %c2_i32_37 : i32 to vector<9x15xi32>
    %102 = arith.addi %100, %101 : vector<9x15xi32>
    %c2_i32_38 = arith.constant 2 : i32
    %103 = vector.broadcast %c2_i32_38 : i32 to vector<9x15xi32>
    %104 = arith.subi %102, %103 : vector<9x15xi32>
    %105 = arith.cmpi eq, %75, %104 : vector<9x15xi32>
    %cst_39 = arith.constant 2.500000e-01 : f32
    %cst_40 = arith.constant 0.000000e+00 : f32
    %106 = vector.broadcast %cst_39 : f32 to vector<9x15xf32>
    %107 = vector.broadcast %cst_40 : f32 to vector<9x15xf32>
    %108 = arith.select %105, %106, %107 : vector<9x15xi1>, vector<9x15xf32>
    %109 = arith.addf %98, %108 : vector<9x15xf32>
    %110 = tpu.iota {dimensions = array<i32: 0>} : vector<9x15xi32>
    %111 = tpu.iota {dimensions = array<i32: 1>} : vector<9x15xi32>
    %c1_i32_41 = arith.constant 1 : i32
    %112 = vector.broadcast %c1_i32_41 : i32 to vector<9x15xi32>
    %113 = arith.subi %110, %112 : vector<9x15xi32>
    %c2_i32_42 = arith.constant 2 : i32
    %114 = vector.broadcast %c2_i32_42 : i32 to vector<9x15xi32>
    %115 = arith.muli %114, %113 : vector<9x15xi32>
    %c1_i32_43 = arith.constant 1 : i32
    %116 = vector.broadcast %c1_i32_43 : i32 to vector<9x15xi32>
    %117 = arith.addi %115, %116 : vector<9x15xi32>
    %118 = arith.cmpi eq, %111, %117 : vector<9x15xi32>
    %c1_i32_44 = arith.constant 1 : i32
    %119 = vector.broadcast %c1_i32_44 : i32 to vector<9x15xi32>
    %120 = arith.cmpi sge, %110, %119 : vector<9x15xi32>
    %121 = arith.andi %118, %120 : vector<9x15xi1>
    %c7_i32_45 = arith.constant 7 : i32
    %122 = vector.broadcast %c7_i32_45 : i32 to vector<9x15xi32>
    %123 = arith.cmpi sle, %110, %122 : vector<9x15xi32>
    %124 = arith.andi %121, %123 : vector<9x15xi1>
    %cst_46 = arith.constant 1.000000e+00 : f32
    %cst_47 = arith.constant 0.000000e+00 : f32
    %125 = vector.broadcast %cst_46 : f32 to vector<9x15xf32>
    %126 = vector.broadcast %cst_47 : f32 to vector<9x15xf32>
    %127 = arith.select %124, %125, %126 : vector<9x15xi1>, vector<9x15xf32>
    %128 = tpu.iota {dimensions = array<i32: 0>} : vector<15x9xi32>
    %129 = tpu.iota {dimensions = array<i32: 1>} : vector<15x9xi32>
    %c1_i32_48 = arith.constant 1 : i32
    %130 = vector.broadcast %c1_i32_48 : i32 to vector<15x9xi32>
    %131 = arith.cmpi sge, %129, %130 : vector<15x9xi32>
    %c7_i32_49 = arith.constant 7 : i32
    %132 = vector.broadcast %c7_i32_49 : i32 to vector<15x9xi32>
    %133 = arith.cmpi sle, %129, %132 : vector<15x9xi32>
    %134 = arith.andi %131, %133 : vector<15x9xi1>
    %cst_50 = arith.constant 0.000000e+00 : f32
    %135 = vector.broadcast %cst_50 : f32 to vector<15x9xf32>
    %c1_i32_51 = arith.constant 1 : i32
    %136 = vector.broadcast %c1_i32_51 : i32 to vector<15x9xi32>
    %137 = arith.subi %129, %136 : vector<15x9xi32>
    %c2_i32_52 = arith.constant 2 : i32
    %138 = vector.broadcast %c2_i32_52 : i32 to vector<15x9xi32>
    %139 = arith.muli %138, %137 : vector<15x9xi32>
    %c0_i32_53 = arith.constant 0 : i32
    %140 = vector.broadcast %c0_i32_53 : i32 to vector<15x9xi32>
    %141 = arith.addi %139, %140 : vector<15x9xi32>
    %142 = arith.cmpi eq, %128, %141 : vector<15x9xi32>
    %143 = arith.andi %134, %142 : vector<15x9xi1>
    %cst_54 = arith.constant 1.250000e-01 : f32
    %cst_55 = arith.constant 0.000000e+00 : f32
    %144 = vector.broadcast %cst_54 : f32 to vector<15x9xf32>
    %145 = vector.broadcast %cst_55 : f32 to vector<15x9xf32>
    %146 = arith.select %143, %144, %145 : vector<15x9xi1>, vector<15x9xf32>
    %147 = arith.addf %135, %146 : vector<15x9xf32>
    %c1_i32_56 = arith.constant 1 : i32
    %148 = vector.broadcast %c1_i32_56 : i32 to vector<15x9xi32>
    %149 = arith.subi %129, %148 : vector<15x9xi32>
    %c2_i32_57 = arith.constant 2 : i32
    %150 = vector.broadcast %c2_i32_57 : i32 to vector<15x9xi32>
    %151 = arith.muli %150, %149 : vector<15x9xi32>
    %c1_i32_58 = arith.constant 1 : i32
    %152 = vector.broadcast %c1_i32_58 : i32 to vector<15x9xi32>
    %153 = arith.addi %151, %152 : vector<15x9xi32>
    %154 = arith.cmpi eq, %128, %153 : vector<15x9xi32>
    %155 = arith.andi %134, %154 : vector<15x9xi1>
    %cst_59 = arith.constant 2.500000e-01 : f32
    %cst_60 = arith.constant 0.000000e+00 : f32
    %156 = vector.broadcast %cst_59 : f32 to vector<15x9xf32>
    %157 = vector.broadcast %cst_60 : f32 to vector<15x9xf32>
    %158 = arith.select %155, %156, %157 : vector<15x9xi1>, vector<15x9xf32>
    %159 = arith.addf %147, %158 : vector<15x9xf32>
    %c1_i32_61 = arith.constant 1 : i32
    %160 = vector.broadcast %c1_i32_61 : i32 to vector<15x9xi32>
    %161 = arith.subi %129, %160 : vector<15x9xi32>
    %c2_i32_62 = arith.constant 2 : i32
    %162 = vector.broadcast %c2_i32_62 : i32 to vector<15x9xi32>
    %163 = arith.muli %162, %161 : vector<15x9xi32>
    %c2_i32_63 = arith.constant 2 : i32
    %164 = vector.broadcast %c2_i32_63 : i32 to vector<15x9xi32>
    %165 = arith.addi %163, %164 : vector<15x9xi32>
    %166 = arith.cmpi eq, %128, %165 : vector<15x9xi32>
    %167 = arith.andi %134, %166 : vector<15x9xi1>
    %cst_64 = arith.constant 1.250000e-01 : f32
    %cst_65 = arith.constant 0.000000e+00 : f32
    %168 = vector.broadcast %cst_64 : f32 to vector<15x9xf32>
    %169 = vector.broadcast %cst_65 : f32 to vector<15x9xf32>
    %170 = arith.select %167, %168, %169 : vector<15x9xi1>, vector<15x9xf32>
    %171 = arith.addf %159, %170 : vector<15x9xf32>
    %172 = tpu.iota {dimensions = array<i32: 0>} : vector<15x9xi32>
    %173 = tpu.iota {dimensions = array<i32: 1>} : vector<15x9xi32>
    %c2_i32_66 = arith.constant 2 : i32
    %174 = vector.broadcast %c2_i32_66 : i32 to vector<15x9xi32>
    %175 = arith.muli %174, %173 : vector<15x9xi32>
    %c1_i32_67 = arith.constant 1 : i32
    %176 = vector.broadcast %c1_i32_67 : i32 to vector<15x9xi32>
    %177 = arith.addi %175, %176 : vector<15x9xi32>
    %c2_i32_68 = arith.constant 2 : i32
    %178 = vector.broadcast %c2_i32_68 : i32 to vector<15x9xi32>
    %179 = arith.subi %177, %178 : vector<15x9xi32>
    %180 = arith.cmpi eq, %172, %179 : vector<15x9xi32>
    %cst_69 = arith.constant 1.000000e+00 : f32
    %cst_70 = arith.constant 0.000000e+00 : f32
    %181 = vector.broadcast %cst_69 : f32 to vector<15x9xf32>
    %182 = vector.broadcast %cst_70 : f32 to vector<15x9xf32>
    %183 = arith.select %180, %181, %182 : vector<15x9xi1>, vector<15x9xf32>
    %184 = tpu.iota {dimensions = array<i32: 0>} : vector<9x15xi32>
    %185 = tpu.iota {dimensions = array<i32: 1>} : vector<9x15xi32>
    %cst_71 = arith.constant 0.000000e+00 : f32
    %186 = vector.broadcast %cst_71 : f32 to vector<9x15xf32>
    %c2_i32_72 = arith.constant 2 : i32
    %187 = vector.broadcast %c2_i32_72 : i32 to vector<9x15xi32>
    %188 = arith.muli %187, %184 : vector<9x15xi32>
    %c0_i32_73 = arith.constant 0 : i32
    %189 = vector.broadcast %c0_i32_73 : i32 to vector<9x15xi32>
    %190 = arith.addi %188, %189 : vector<9x15xi32>
    %c2_i32_74 = arith.constant 2 : i32
    %191 = vector.broadcast %c2_i32_74 : i32 to vector<9x15xi32>
    %192 = arith.subi %190, %191 : vector<9x15xi32>
    %193 = arith.cmpi eq, %185, %192 : vector<9x15xi32>
    %cst_75 = arith.constant 5.000000e-01 : f32
    %cst_76 = arith.constant 0.000000e+00 : f32
    %194 = vector.broadcast %cst_75 : f32 to vector<9x15xf32>
    %195 = vector.broadcast %cst_76 : f32 to vector<9x15xf32>
    %196 = arith.select %193, %194, %195 : vector<9x15xi1>, vector<9x15xf32>
    %197 = arith.addf %186, %196 : vector<9x15xf32>
    %c2_i32_77 = arith.constant 2 : i32
    %198 = vector.broadcast %c2_i32_77 : i32 to vector<9x15xi32>
    %199 = arith.muli %198, %184 : vector<9x15xi32>
    %c1_i32_78 = arith.constant 1 : i32
    %200 = vector.broadcast %c1_i32_78 : i32 to vector<9x15xi32>
    %201 = arith.addi %199, %200 : vector<9x15xi32>
    %c2_i32_79 = arith.constant 2 : i32
    %202 = vector.broadcast %c2_i32_79 : i32 to vector<9x15xi32>
    %203 = arith.subi %201, %202 : vector<9x15xi32>
    %204 = arith.cmpi eq, %185, %203 : vector<9x15xi32>
    %cst_80 = arith.constant 1.000000e+00 : f32
    %cst_81 = arith.constant 0.000000e+00 : f32
    %205 = vector.broadcast %cst_80 : f32 to vector<9x15xf32>
    %206 = vector.broadcast %cst_81 : f32 to vector<9x15xf32>
    %207 = arith.select %204, %205, %206 : vector<9x15xi1>, vector<9x15xf32>
    %208 = arith.addf %197, %207 : vector<9x15xf32>
    %c2_i32_82 = arith.constant 2 : i32
    %209 = vector.broadcast %c2_i32_82 : i32 to vector<9x15xi32>
    %210 = arith.muli %209, %184 : vector<9x15xi32>
    %c2_i32_83 = arith.constant 2 : i32
    %211 = vector.broadcast %c2_i32_83 : i32 to vector<9x15xi32>
    %212 = arith.addi %210, %211 : vector<9x15xi32>
    %c2_i32_84 = arith.constant 2 : i32
    %213 = vector.broadcast %c2_i32_84 : i32 to vector<9x15xi32>
    %214 = arith.subi %212, %213 : vector<9x15xi32>
    %215 = arith.cmpi eq, %185, %214 : vector<9x15xi32>
    %cst_85 = arith.constant 5.000000e-01 : f32
    %cst_86 = arith.constant 0.000000e+00 : f32
    %216 = vector.broadcast %cst_85 : f32 to vector<9x15xf32>
    %217 = vector.broadcast %cst_86 : f32 to vector<9x15xf32>
    %218 = arith.select %215, %216, %217 : vector<9x15xi1>, vector<9x15xf32>
    %219 = arith.addf %208, %218 : vector<9x15xf32>
    %220 = tpu.iota {dimensions = array<i32: 0>} : vector<9x15xi32>
    %221 = tpu.iota {dimensions = array<i32: 1>} : vector<9x15xi32>
    %c1_i32_87 = arith.constant 1 : i32
    %222 = vector.broadcast %c1_i32_87 : i32 to vector<9x15xi32>
    %223 = arith.subi %220, %222 : vector<9x15xi32>
    %c2_i32_88 = arith.constant 2 : i32
    %224 = vector.broadcast %c2_i32_88 : i32 to vector<9x15xi32>
    %225 = arith.muli %224, %223 : vector<9x15xi32>
    %c2_i32_89 = arith.constant 2 : i32
    %226 = vector.broadcast %c2_i32_89 : i32 to vector<9x15xi32>
    %227 = arith.addi %225, %226 : vector<9x15xi32>
    %228 = arith.cmpi eq, %221, %227 : vector<9x15xi32>
    %c1_i32_90 = arith.constant 1 : i32
    %229 = vector.broadcast %c1_i32_90 : i32 to vector<9x15xi32>
    %230 = arith.cmpi sge, %220, %229 : vector<9x15xi32>
    %231 = arith.andi %228, %230 : vector<9x15xi1>
    %c7_i32_91 = arith.constant 7 : i32
    %232 = vector.broadcast %c7_i32_91 : i32 to vector<9x15xi32>
    %233 = arith.cmpi sle, %220, %232 : vector<9x15xi32>
    %234 = arith.andi %231, %233 : vector<9x15xi1>
    %cst_92 = arith.constant 1.000000e+00 : f32
    %cst_93 = arith.constant 0.000000e+00 : f32
    %235 = vector.broadcast %cst_92 : f32 to vector<9x15xf32>
    %236 = vector.broadcast %cst_93 : f32 to vector<9x15xf32>
    %237 = arith.select %234, %235, %236 : vector<9x15xi1>, vector<9x15xf32>
    %238 = tpu.iota {dimensions = array<i32: 0>} : vector<15x9xi32>
    %239 = tpu.iota {dimensions = array<i32: 1>} : vector<15x9xi32>
    %c1_i32_94 = arith.constant 1 : i32
    %240 = vector.broadcast %c1_i32_94 : i32 to vector<15x9xi32>
    %241 = arith.cmpi sge, %239, %240 : vector<15x9xi32>
    %c7_i32_95 = arith.constant 7 : i32
    %242 = vector.broadcast %c7_i32_95 : i32 to vector<15x9xi32>
    %243 = arith.cmpi sle, %239, %242 : vector<15x9xi32>
    %244 = arith.andi %241, %243 : vector<15x9xi1>
    %cst_96 = arith.constant 0.000000e+00 : f32
    %245 = vector.broadcast %cst_96 : f32 to vector<15x9xf32>
    %c1_i32_97 = arith.constant 1 : i32
    %246 = vector.broadcast %c1_i32_97 : i32 to vector<15x9xi32>
    %247 = arith.subi %239, %246 : vector<15x9xi32>
    %c2_i32_98 = arith.constant 2 : i32
    %248 = vector.broadcast %c2_i32_98 : i32 to vector<15x9xi32>
    %249 = arith.muli %248, %247 : vector<15x9xi32>
    %c0_i32_99 = arith.constant 0 : i32
    %250 = vector.broadcast %c0_i32_99 : i32 to vector<15x9xi32>
    %251 = arith.addi %249, %250 : vector<15x9xi32>
    %252 = arith.cmpi eq, %238, %251 : vector<15x9xi32>
    %253 = arith.andi %244, %252 : vector<15x9xi1>
    %cst_100 = arith.constant 6.250000e-02 : f32
    %cst_101 = arith.constant 0.000000e+00 : f32
    %254 = vector.broadcast %cst_100 : f32 to vector<15x9xf32>
    %255 = vector.broadcast %cst_101 : f32 to vector<15x9xf32>
    %256 = arith.select %253, %254, %255 : vector<15x9xi1>, vector<15x9xf32>
    %257 = arith.addf %245, %256 : vector<15x9xf32>
    %c1_i32_102 = arith.constant 1 : i32
    %258 = vector.broadcast %c1_i32_102 : i32 to vector<15x9xi32>
    %259 = arith.subi %239, %258 : vector<15x9xi32>
    %c2_i32_103 = arith.constant 2 : i32
    %260 = vector.broadcast %c2_i32_103 : i32 to vector<15x9xi32>
    %261 = arith.muli %260, %259 : vector<15x9xi32>
    %c1_i32_104 = arith.constant 1 : i32
    %262 = vector.broadcast %c1_i32_104 : i32 to vector<15x9xi32>
    %263 = arith.addi %261, %262 : vector<15x9xi32>
    %264 = arith.cmpi eq, %238, %263 : vector<15x9xi32>
    %265 = arith.andi %244, %264 : vector<15x9xi1>
    %cst_105 = arith.constant 1.250000e-01 : f32
    %cst_106 = arith.constant 0.000000e+00 : f32
    %266 = vector.broadcast %cst_105 : f32 to vector<15x9xf32>
    %267 = vector.broadcast %cst_106 : f32 to vector<15x9xf32>
    %268 = arith.select %265, %266, %267 : vector<15x9xi1>, vector<15x9xf32>
    %269 = arith.addf %257, %268 : vector<15x9xf32>
    %c1_i32_107 = arith.constant 1 : i32
    %270 = vector.broadcast %c1_i32_107 : i32 to vector<15x9xi32>
    %271 = arith.subi %239, %270 : vector<15x9xi32>
    %c2_i32_108 = arith.constant 2 : i32
    %272 = vector.broadcast %c2_i32_108 : i32 to vector<15x9xi32>
    %273 = arith.muli %272, %271 : vector<15x9xi32>
    %c2_i32_109 = arith.constant 2 : i32
    %274 = vector.broadcast %c2_i32_109 : i32 to vector<15x9xi32>
    %275 = arith.addi %273, %274 : vector<15x9xi32>
    %276 = arith.cmpi eq, %238, %275 : vector<15x9xi32>
    %277 = arith.andi %244, %276 : vector<15x9xi1>
    %cst_110 = arith.constant 6.250000e-02 : f32
    %cst_111 = arith.constant 0.000000e+00 : f32
    %278 = vector.broadcast %cst_110 : f32 to vector<15x9xf32>
    %279 = vector.broadcast %cst_111 : f32 to vector<15x9xf32>
    %280 = arith.select %277, %278, %279 : vector<15x9xi1>, vector<15x9xf32>
    %281 = arith.addf %269, %280 : vector<15x9xf32>
    %282 = tpu.iota {dimensions = array<i32: 0>} : vector<15x9xi32>
    %283 = tpu.iota {dimensions = array<i32: 1>} : vector<15x9xi32>
    %c2_i32_112 = arith.constant 2 : i32
    %284 = vector.broadcast %c2_i32_112 : i32 to vector<15x9xi32>
    %285 = arith.muli %284, %283 : vector<15x9xi32>
    %c2_i32_113 = arith.constant 2 : i32
    %286 = vector.broadcast %c2_i32_113 : i32 to vector<15x9xi32>
    %287 = arith.addi %285, %286 : vector<15x9xi32>
    %c2_i32_114 = arith.constant 2 : i32
    %288 = vector.broadcast %c2_i32_114 : i32 to vector<15x9xi32>
    %289 = arith.subi %287, %288 : vector<15x9xi32>
    %290 = arith.cmpi eq, %282, %289 : vector<15x9xi32>
    %cst_115 = arith.constant 1.000000e+00 : f32
    %cst_116 = arith.constant 0.000000e+00 : f32
    %291 = vector.broadcast %cst_115 : f32 to vector<15x9xf32>
    %292 = vector.broadcast %cst_116 : f32 to vector<15x9xf32>
    %293 = arith.select %290, %291, %292 : vector<15x9xi1>, vector<15x9xf32>
    %294 = tpu.iota {dimensions = array<i32: 0>} : vector<9x15xi32>
    %295 = tpu.iota {dimensions = array<i32: 1>} : vector<9x15xi32>
    %cst_117 = arith.constant 0.000000e+00 : f32
    %296 = vector.broadcast %cst_117 : f32 to vector<9x15xf32>
    %c2_i32_118 = arith.constant 2 : i32
    %297 = vector.broadcast %c2_i32_118 : i32 to vector<9x15xi32>
    %298 = arith.muli %297, %294 : vector<9x15xi32>
    %c0_i32_119 = arith.constant 0 : i32
    %299 = vector.broadcast %c0_i32_119 : i32 to vector<9x15xi32>
    %300 = arith.addi %298, %299 : vector<9x15xi32>
    %c2_i32_120 = arith.constant 2 : i32
    %301 = vector.broadcast %c2_i32_120 : i32 to vector<9x15xi32>
    %302 = arith.subi %300, %301 : vector<9x15xi32>
    %303 = arith.cmpi eq, %295, %302 : vector<9x15xi32>
    %cst_121 = arith.constant 2.500000e-01 : f32
    %cst_122 = arith.constant 0.000000e+00 : f32
    %304 = vector.broadcast %cst_121 : f32 to vector<9x15xf32>
    %305 = vector.broadcast %cst_122 : f32 to vector<9x15xf32>
    %306 = arith.select %303, %304, %305 : vector<9x15xi1>, vector<9x15xf32>
    %307 = arith.addf %296, %306 : vector<9x15xf32>
    %c2_i32_123 = arith.constant 2 : i32
    %308 = vector.broadcast %c2_i32_123 : i32 to vector<9x15xi32>
    %309 = arith.muli %308, %294 : vector<9x15xi32>
    %c1_i32_124 = arith.constant 1 : i32
    %310 = vector.broadcast %c1_i32_124 : i32 to vector<9x15xi32>
    %311 = arith.addi %309, %310 : vector<9x15xi32>
    %c2_i32_125 = arith.constant 2 : i32
    %312 = vector.broadcast %c2_i32_125 : i32 to vector<9x15xi32>
    %313 = arith.subi %311, %312 : vector<9x15xi32>
    %314 = arith.cmpi eq, %295, %313 : vector<9x15xi32>
    %cst_126 = arith.constant 5.000000e-01 : f32
    %cst_127 = arith.constant 0.000000e+00 : f32
    %315 = vector.broadcast %cst_126 : f32 to vector<9x15xf32>
    %316 = vector.broadcast %cst_127 : f32 to vector<9x15xf32>
    %317 = arith.select %314, %315, %316 : vector<9x15xi1>, vector<9x15xf32>
    %318 = arith.addf %307, %317 : vector<9x15xf32>
    %c2_i32_128 = arith.constant 2 : i32
    %319 = vector.broadcast %c2_i32_128 : i32 to vector<9x15xi32>
    %320 = arith.muli %319, %294 : vector<9x15xi32>
    %c2_i32_129 = arith.constant 2 : i32
    %321 = vector.broadcast %c2_i32_129 : i32 to vector<9x15xi32>
    %322 = arith.addi %320, %321 : vector<9x15xi32>
    %c2_i32_130 = arith.constant 2 : i32
    %323 = vector.broadcast %c2_i32_130 : i32 to vector<9x15xi32>
    %324 = arith.subi %322, %323 : vector<9x15xi32>
    %325 = arith.cmpi eq, %295, %324 : vector<9x15xi32>
    %cst_131 = arith.constant 2.500000e-01 : f32
    %cst_132 = arith.constant 0.000000e+00 : f32
    %326 = vector.broadcast %cst_131 : f32 to vector<9x15xf32>
    %327 = vector.broadcast %cst_132 : f32 to vector<9x15xf32>
    %328 = arith.select %325, %326, %327 : vector<9x15xi1>, vector<9x15xf32>
    %329 = arith.addf %318, %328 : vector<9x15xf32>
    %330 = tpu.iota {dimensions = array<i32: 0>} : vector<5x7xi32>
    %331 = tpu.iota {dimensions = array<i32: 1>} : vector<5x7xi32>
    %c1_i32_133 = arith.constant 1 : i32
    %332 = vector.broadcast %c1_i32_133 : i32 to vector<5x7xi32>
    %333 = arith.subi %330, %332 : vector<5x7xi32>
    %c2_i32_134 = arith.constant 2 : i32
    %334 = vector.broadcast %c2_i32_134 : i32 to vector<5x7xi32>
    %335 = arith.muli %334, %333 : vector<5x7xi32>
    %c0_i32_135 = arith.constant 0 : i32
    %336 = vector.broadcast %c0_i32_135 : i32 to vector<5x7xi32>
    %337 = arith.addi %335, %336 : vector<5x7xi32>
    %338 = arith.cmpi eq, %331, %337 : vector<5x7xi32>
    %c1_i32_136 = arith.constant 1 : i32
    %339 = vector.broadcast %c1_i32_136 : i32 to vector<5x7xi32>
    %340 = arith.cmpi sge, %330, %339 : vector<5x7xi32>
    %341 = arith.andi %338, %340 : vector<5x7xi1>
    %c3_i32 = arith.constant 3 : i32
    %342 = vector.broadcast %c3_i32 : i32 to vector<5x7xi32>
    %343 = arith.cmpi sle, %330, %342 : vector<5x7xi32>
    %344 = arith.andi %341, %343 : vector<5x7xi1>
    %cst_137 = arith.constant 1.000000e+00 : f32
    %cst_138 = arith.constant 0.000000e+00 : f32
    %345 = vector.broadcast %cst_137 : f32 to vector<5x7xf32>
    %346 = vector.broadcast %cst_138 : f32 to vector<5x7xf32>
    %347 = arith.select %344, %345, %346 : vector<5x7xi1>, vector<5x7xf32>
    %348 = tpu.iota {dimensions = array<i32: 0>} : vector<7x5xi32>
    %349 = tpu.iota {dimensions = array<i32: 1>} : vector<7x5xi32>
    %c1_i32_139 = arith.constant 1 : i32
    %350 = vector.broadcast %c1_i32_139 : i32 to vector<7x5xi32>
    %351 = arith.cmpi sge, %349, %350 : vector<7x5xi32>
    %c3_i32_140 = arith.constant 3 : i32
    %352 = vector.broadcast %c3_i32_140 : i32 to vector<7x5xi32>
    %353 = arith.cmpi sle, %349, %352 : vector<7x5xi32>
    %354 = arith.andi %351, %353 : vector<7x5xi1>
    %cst_141 = arith.constant 0.000000e+00 : f32
    %355 = vector.broadcast %cst_141 : f32 to vector<7x5xf32>
    %c1_i32_142 = arith.constant 1 : i32
    %356 = vector.broadcast %c1_i32_142 : i32 to vector<7x5xi32>
    %357 = arith.subi %349, %356 : vector<7x5xi32>
    %c2_i32_143 = arith.constant 2 : i32
    %358 = vector.broadcast %c2_i32_143 : i32 to vector<7x5xi32>
    %359 = arith.muli %358, %357 : vector<7x5xi32>
    %c0_i32_144 = arith.constant 0 : i32
    %360 = vector.broadcast %c0_i32_144 : i32 to vector<7x5xi32>
    %361 = arith.addi %359, %360 : vector<7x5xi32>
    %362 = arith.cmpi eq, %348, %361 : vector<7x5xi32>
    %363 = arith.andi %354, %362 : vector<7x5xi1>
    %cst_145 = arith.constant 6.250000e-02 : f32
    %cst_146 = arith.constant 0.000000e+00 : f32
    %364 = vector.broadcast %cst_145 : f32 to vector<7x5xf32>
    %365 = vector.broadcast %cst_146 : f32 to vector<7x5xf32>
    %366 = arith.select %363, %364, %365 : vector<7x5xi1>, vector<7x5xf32>
    %367 = arith.addf %355, %366 : vector<7x5xf32>
    %c1_i32_147 = arith.constant 1 : i32
    %368 = vector.broadcast %c1_i32_147 : i32 to vector<7x5xi32>
    %369 = arith.subi %349, %368 : vector<7x5xi32>
    %c2_i32_148 = arith.constant 2 : i32
    %370 = vector.broadcast %c2_i32_148 : i32 to vector<7x5xi32>
    %371 = arith.muli %370, %369 : vector<7x5xi32>
    %c1_i32_149 = arith.constant 1 : i32
    %372 = vector.broadcast %c1_i32_149 : i32 to vector<7x5xi32>
    %373 = arith.addi %371, %372 : vector<7x5xi32>
    %374 = arith.cmpi eq, %348, %373 : vector<7x5xi32>
    %375 = arith.andi %354, %374 : vector<7x5xi1>
    %cst_150 = arith.constant 1.250000e-01 : f32
    %cst_151 = arith.constant 0.000000e+00 : f32
    %376 = vector.broadcast %cst_150 : f32 to vector<7x5xf32>
    %377 = vector.broadcast %cst_151 : f32 to vector<7x5xf32>
    %378 = arith.select %375, %376, %377 : vector<7x5xi1>, vector<7x5xf32>
    %379 = arith.addf %367, %378 : vector<7x5xf32>
    %c1_i32_152 = arith.constant 1 : i32
    %380 = vector.broadcast %c1_i32_152 : i32 to vector<7x5xi32>
    %381 = arith.subi %349, %380 : vector<7x5xi32>
    %c2_i32_153 = arith.constant 2 : i32
    %382 = vector.broadcast %c2_i32_153 : i32 to vector<7x5xi32>
    %383 = arith.muli %382, %381 : vector<7x5xi32>
    %c2_i32_154 = arith.constant 2 : i32
    %384 = vector.broadcast %c2_i32_154 : i32 to vector<7x5xi32>
    %385 = arith.addi %383, %384 : vector<7x5xi32>
    %386 = arith.cmpi eq, %348, %385 : vector<7x5xi32>
    %387 = arith.andi %354, %386 : vector<7x5xi1>
    %cst_155 = arith.constant 6.250000e-02 : f32
    %cst_156 = arith.constant 0.000000e+00 : f32
    %388 = vector.broadcast %cst_155 : f32 to vector<7x5xf32>
    %389 = vector.broadcast %cst_156 : f32 to vector<7x5xf32>
    %390 = arith.select %387, %388, %389 : vector<7x5xi1>, vector<7x5xf32>
    %391 = arith.addf %379, %390 : vector<7x5xf32>
    %392 = tpu.iota {dimensions = array<i32: 0>} : vector<7x5xi32>
    %393 = tpu.iota {dimensions = array<i32: 1>} : vector<7x5xi32>
    %c2_i32_157 = arith.constant 2 : i32
    %394 = vector.broadcast %c2_i32_157 : i32 to vector<7x5xi32>
    %395 = arith.muli %394, %393 : vector<7x5xi32>
    %c0_i32_158 = arith.constant 0 : i32
    %396 = vector.broadcast %c0_i32_158 : i32 to vector<7x5xi32>
    %397 = arith.addi %395, %396 : vector<7x5xi32>
    %c2_i32_159 = arith.constant 2 : i32
    %398 = vector.broadcast %c2_i32_159 : i32 to vector<7x5xi32>
    %399 = arith.subi %397, %398 : vector<7x5xi32>
    %400 = arith.cmpi eq, %392, %399 : vector<7x5xi32>
    %cst_160 = arith.constant 1.000000e+00 : f32
    %cst_161 = arith.constant 0.000000e+00 : f32
    %401 = vector.broadcast %cst_160 : f32 to vector<7x5xf32>
    %402 = vector.broadcast %cst_161 : f32 to vector<7x5xf32>
    %403 = arith.select %400, %401, %402 : vector<7x5xi1>, vector<7x5xf32>
    %404 = tpu.iota {dimensions = array<i32: 0>} : vector<5x7xi32>
    %405 = tpu.iota {dimensions = array<i32: 1>} : vector<5x7xi32>
    %cst_162 = arith.constant 0.000000e+00 : f32
    %406 = vector.broadcast %cst_162 : f32 to vector<5x7xf32>
    %c2_i32_163 = arith.constant 2 : i32
    %407 = vector.broadcast %c2_i32_163 : i32 to vector<5x7xi32>
    %408 = arith.muli %407, %404 : vector<5x7xi32>
    %c0_i32_164 = arith.constant 0 : i32
    %409 = vector.broadcast %c0_i32_164 : i32 to vector<5x7xi32>
    %410 = arith.addi %408, %409 : vector<5x7xi32>
    %c2_i32_165 = arith.constant 2 : i32
    %411 = vector.broadcast %c2_i32_165 : i32 to vector<5x7xi32>
    %412 = arith.subi %410, %411 : vector<5x7xi32>
    %413 = arith.cmpi eq, %405, %412 : vector<5x7xi32>
    %cst_166 = arith.constant 2.500000e-01 : f32
    %cst_167 = arith.constant 0.000000e+00 : f32
    %414 = vector.broadcast %cst_166 : f32 to vector<5x7xf32>
    %415 = vector.broadcast %cst_167 : f32 to vector<5x7xf32>
    %416 = arith.select %413, %414, %415 : vector<5x7xi1>, vector<5x7xf32>
    %417 = arith.addf %406, %416 : vector<5x7xf32>
    %c2_i32_168 = arith.constant 2 : i32
    %418 = vector.broadcast %c2_i32_168 : i32 to vector<5x7xi32>
    %419 = arith.muli %418, %404 : vector<5x7xi32>
    %c1_i32_169 = arith.constant 1 : i32
    %420 = vector.broadcast %c1_i32_169 : i32 to vector<5x7xi32>
    %421 = arith.addi %419, %420 : vector<5x7xi32>
    %c2_i32_170 = arith.constant 2 : i32
    %422 = vector.broadcast %c2_i32_170 : i32 to vector<5x7xi32>
    %423 = arith.subi %421, %422 : vector<5x7xi32>
    %424 = arith.cmpi eq, %405, %423 : vector<5x7xi32>
    %cst_171 = arith.constant 5.000000e-01 : f32
    %cst_172 = arith.constant 0.000000e+00 : f32
    %425 = vector.broadcast %cst_171 : f32 to vector<5x7xf32>
    %426 = vector.broadcast %cst_172 : f32 to vector<5x7xf32>
    %427 = arith.select %424, %425, %426 : vector<5x7xi1>, vector<5x7xf32>
    %428 = arith.addf %417, %427 : vector<5x7xf32>
    %c2_i32_173 = arith.constant 2 : i32
    %429 = vector.broadcast %c2_i32_173 : i32 to vector<5x7xi32>
    %430 = arith.muli %429, %404 : vector<5x7xi32>
    %c2_i32_174 = arith.constant 2 : i32
    %431 = vector.broadcast %c2_i32_174 : i32 to vector<5x7xi32>
    %432 = arith.addi %430, %431 : vector<5x7xi32>
    %c2_i32_175 = arith.constant 2 : i32
    %433 = vector.broadcast %c2_i32_175 : i32 to vector<5x7xi32>
    %434 = arith.subi %432, %433 : vector<5x7xi32>
    %435 = arith.cmpi eq, %405, %434 : vector<5x7xi32>
    %cst_176 = arith.constant 2.500000e-01 : f32
    %cst_177 = arith.constant 0.000000e+00 : f32
    %436 = vector.broadcast %cst_176 : f32 to vector<5x7xf32>
    %437 = vector.broadcast %cst_177 : f32 to vector<5x7xf32>
    %438 = arith.select %435, %436, %437 : vector<5x7xi1>, vector<5x7xf32>
    %439 = arith.addf %428, %438 : vector<5x7xf32>
    %440 = tpu.iota {dimensions = array<i32: 0>} : vector<5x7xi32>
    %441 = tpu.iota {dimensions = array<i32: 1>} : vector<5x7xi32>
    %c1_i32_178 = arith.constant 1 : i32
    %442 = vector.broadcast %c1_i32_178 : i32 to vector<5x7xi32>
    %443 = arith.subi %440, %442 : vector<5x7xi32>
    %c2_i32_179 = arith.constant 2 : i32
    %444 = vector.broadcast %c2_i32_179 : i32 to vector<5x7xi32>
    %445 = arith.muli %444, %443 : vector<5x7xi32>
    %c1_i32_180 = arith.constant 1 : i32
    %446 = vector.broadcast %c1_i32_180 : i32 to vector<5x7xi32>
    %447 = arith.addi %445, %446 : vector<5x7xi32>
    %448 = arith.cmpi eq, %441, %447 : vector<5x7xi32>
    %c1_i32_181 = arith.constant 1 : i32
    %449 = vector.broadcast %c1_i32_181 : i32 to vector<5x7xi32>
    %450 = arith.cmpi sge, %440, %449 : vector<5x7xi32>
    %451 = arith.andi %448, %450 : vector<5x7xi1>
    %c3_i32_182 = arith.constant 3 : i32
    %452 = vector.broadcast %c3_i32_182 : i32 to vector<5x7xi32>
    %453 = arith.cmpi sle, %440, %452 : vector<5x7xi32>
    %454 = arith.andi %451, %453 : vector<5x7xi1>
    %cst_183 = arith.constant 1.000000e+00 : f32
    %cst_184 = arith.constant 0.000000e+00 : f32
    %455 = vector.broadcast %cst_183 : f32 to vector<5x7xf32>
    %456 = vector.broadcast %cst_184 : f32 to vector<5x7xf32>
    %457 = arith.select %454, %455, %456 : vector<5x7xi1>, vector<5x7xf32>
    %458 = tpu.iota {dimensions = array<i32: 0>} : vector<7x5xi32>
    %459 = tpu.iota {dimensions = array<i32: 1>} : vector<7x5xi32>
    %c1_i32_185 = arith.constant 1 : i32
    %460 = vector.broadcast %c1_i32_185 : i32 to vector<7x5xi32>
    %461 = arith.cmpi sge, %459, %460 : vector<7x5xi32>
    %c3_i32_186 = arith.constant 3 : i32
    %462 = vector.broadcast %c3_i32_186 : i32 to vector<7x5xi32>
    %463 = arith.cmpi sle, %459, %462 : vector<7x5xi32>
    %464 = arith.andi %461, %463 : vector<7x5xi1>
    %cst_187 = arith.constant 0.000000e+00 : f32
    %465 = vector.broadcast %cst_187 : f32 to vector<7x5xf32>
    %c1_i32_188 = arith.constant 1 : i32
    %466 = vector.broadcast %c1_i32_188 : i32 to vector<7x5xi32>
    %467 = arith.subi %459, %466 : vector<7x5xi32>
    %c2_i32_189 = arith.constant 2 : i32
    %468 = vector.broadcast %c2_i32_189 : i32 to vector<7x5xi32>
    %469 = arith.muli %468, %467 : vector<7x5xi32>
    %c0_i32_190 = arith.constant 0 : i32
    %470 = vector.broadcast %c0_i32_190 : i32 to vector<7x5xi32>
    %471 = arith.addi %469, %470 : vector<7x5xi32>
    %472 = arith.cmpi eq, %458, %471 : vector<7x5xi32>
    %473 = arith.andi %464, %472 : vector<7x5xi1>
    %cst_191 = arith.constant 1.250000e-01 : f32
    %cst_192 = arith.constant 0.000000e+00 : f32
    %474 = vector.broadcast %cst_191 : f32 to vector<7x5xf32>
    %475 = vector.broadcast %cst_192 : f32 to vector<7x5xf32>
    %476 = arith.select %473, %474, %475 : vector<7x5xi1>, vector<7x5xf32>
    %477 = arith.addf %465, %476 : vector<7x5xf32>
    %c1_i32_193 = arith.constant 1 : i32
    %478 = vector.broadcast %c1_i32_193 : i32 to vector<7x5xi32>
    %479 = arith.subi %459, %478 : vector<7x5xi32>
    %c2_i32_194 = arith.constant 2 : i32
    %480 = vector.broadcast %c2_i32_194 : i32 to vector<7x5xi32>
    %481 = arith.muli %480, %479 : vector<7x5xi32>
    %c1_i32_195 = arith.constant 1 : i32
    %482 = vector.broadcast %c1_i32_195 : i32 to vector<7x5xi32>
    %483 = arith.addi %481, %482 : vector<7x5xi32>
    %484 = arith.cmpi eq, %458, %483 : vector<7x5xi32>
    %485 = arith.andi %464, %484 : vector<7x5xi1>
    %cst_196 = arith.constant 2.500000e-01 : f32
    %cst_197 = arith.constant 0.000000e+00 : f32
    %486 = vector.broadcast %cst_196 : f32 to vector<7x5xf32>
    %487 = vector.broadcast %cst_197 : f32 to vector<7x5xf32>
    %488 = arith.select %485, %486, %487 : vector<7x5xi1>, vector<7x5xf32>
    %489 = arith.addf %477, %488 : vector<7x5xf32>
    %c1_i32_198 = arith.constant 1 : i32
    %490 = vector.broadcast %c1_i32_198 : i32 to vector<7x5xi32>
    %491 = arith.subi %459, %490 : vector<7x5xi32>
    %c2_i32_199 = arith.constant 2 : i32
    %492 = vector.broadcast %c2_i32_199 : i32 to vector<7x5xi32>
    %493 = arith.muli %492, %491 : vector<7x5xi32>
    %c2_i32_200 = arith.constant 2 : i32
    %494 = vector.broadcast %c2_i32_200 : i32 to vector<7x5xi32>
    %495 = arith.addi %493, %494 : vector<7x5xi32>
    %496 = arith.cmpi eq, %458, %495 : vector<7x5xi32>
    %497 = arith.andi %464, %496 : vector<7x5xi1>
    %cst_201 = arith.constant 1.250000e-01 : f32
    %cst_202 = arith.constant 0.000000e+00 : f32
    %498 = vector.broadcast %cst_201 : f32 to vector<7x5xf32>
    %499 = vector.broadcast %cst_202 : f32 to vector<7x5xf32>
    %500 = arith.select %497, %498, %499 : vector<7x5xi1>, vector<7x5xf32>
    %501 = arith.addf %489, %500 : vector<7x5xf32>
    %502 = tpu.iota {dimensions = array<i32: 0>} : vector<7x5xi32>
    %503 = tpu.iota {dimensions = array<i32: 1>} : vector<7x5xi32>
    %c2_i32_203 = arith.constant 2 : i32
    %504 = vector.broadcast %c2_i32_203 : i32 to vector<7x5xi32>
    %505 = arith.muli %504, %503 : vector<7x5xi32>
    %c1_i32_204 = arith.constant 1 : i32
    %506 = vector.broadcast %c1_i32_204 : i32 to vector<7x5xi32>
    %507 = arith.addi %505, %506 : vector<7x5xi32>
    %c2_i32_205 = arith.constant 2 : i32
    %508 = vector.broadcast %c2_i32_205 : i32 to vector<7x5xi32>
    %509 = arith.subi %507, %508 : vector<7x5xi32>
    %510 = arith.cmpi eq, %502, %509 : vector<7x5xi32>
    %cst_206 = arith.constant 1.000000e+00 : f32
    %cst_207 = arith.constant 0.000000e+00 : f32
    %511 = vector.broadcast %cst_206 : f32 to vector<7x5xf32>
    %512 = vector.broadcast %cst_207 : f32 to vector<7x5xf32>
    %513 = arith.select %510, %511, %512 : vector<7x5xi1>, vector<7x5xf32>
    %514 = tpu.iota {dimensions = array<i32: 0>} : vector<5x7xi32>
    %515 = tpu.iota {dimensions = array<i32: 1>} : vector<5x7xi32>
    %cst_208 = arith.constant 0.000000e+00 : f32
    %516 = vector.broadcast %cst_208 : f32 to vector<5x7xf32>
    %c2_i32_209 = arith.constant 2 : i32
    %517 = vector.broadcast %c2_i32_209 : i32 to vector<5x7xi32>
    %518 = arith.muli %517, %514 : vector<5x7xi32>
    %c0_i32_210 = arith.constant 0 : i32
    %519 = vector.broadcast %c0_i32_210 : i32 to vector<5x7xi32>
    %520 = arith.addi %518, %519 : vector<5x7xi32>
    %c2_i32_211 = arith.constant 2 : i32
    %521 = vector.broadcast %c2_i32_211 : i32 to vector<5x7xi32>
    %522 = arith.subi %520, %521 : vector<5x7xi32>
    %523 = arith.cmpi eq, %515, %522 : vector<5x7xi32>
    %cst_212 = arith.constant 5.000000e-01 : f32
    %cst_213 = arith.constant 0.000000e+00 : f32
    %524 = vector.broadcast %cst_212 : f32 to vector<5x7xf32>
    %525 = vector.broadcast %cst_213 : f32 to vector<5x7xf32>
    %526 = arith.select %523, %524, %525 : vector<5x7xi1>, vector<5x7xf32>
    %527 = arith.addf %516, %526 : vector<5x7xf32>
    %c2_i32_214 = arith.constant 2 : i32
    %528 = vector.broadcast %c2_i32_214 : i32 to vector<5x7xi32>
    %529 = arith.muli %528, %514 : vector<5x7xi32>
    %c1_i32_215 = arith.constant 1 : i32
    %530 = vector.broadcast %c1_i32_215 : i32 to vector<5x7xi32>
    %531 = arith.addi %529, %530 : vector<5x7xi32>
    %c2_i32_216 = arith.constant 2 : i32
    %532 = vector.broadcast %c2_i32_216 : i32 to vector<5x7xi32>
    %533 = arith.subi %531, %532 : vector<5x7xi32>
    %534 = arith.cmpi eq, %515, %533 : vector<5x7xi32>
    %cst_217 = arith.constant 1.000000e+00 : f32
    %cst_218 = arith.constant 0.000000e+00 : f32
    %535 = vector.broadcast %cst_217 : f32 to vector<5x7xf32>
    %536 = vector.broadcast %cst_218 : f32 to vector<5x7xf32>
    %537 = arith.select %534, %535, %536 : vector<5x7xi1>, vector<5x7xf32>
    %538 = arith.addf %527, %537 : vector<5x7xf32>
    %c2_i32_219 = arith.constant 2 : i32
    %539 = vector.broadcast %c2_i32_219 : i32 to vector<5x7xi32>
    %540 = arith.muli %539, %514 : vector<5x7xi32>
    %c2_i32_220 = arith.constant 2 : i32
    %541 = vector.broadcast %c2_i32_220 : i32 to vector<5x7xi32>
    %542 = arith.addi %540, %541 : vector<5x7xi32>
    %c2_i32_221 = arith.constant 2 : i32
    %543 = vector.broadcast %c2_i32_221 : i32 to vector<5x7xi32>
    %544 = arith.subi %542, %543 : vector<5x7xi32>
    %545 = arith.cmpi eq, %515, %544 : vector<5x7xi32>
    %cst_222 = arith.constant 5.000000e-01 : f32
    %cst_223 = arith.constant 0.000000e+00 : f32
    %546 = vector.broadcast %cst_222 : f32 to vector<5x7xf32>
    %547 = vector.broadcast %cst_223 : f32 to vector<5x7xf32>
    %548 = arith.select %545, %546, %547 : vector<5x7xi1>, vector<5x7xf32>
    %549 = arith.addf %538, %548 : vector<5x7xf32>
    %550 = tpu.iota {dimensions = array<i32: 0>} : vector<5x7xi32>
    %551 = tpu.iota {dimensions = array<i32: 1>} : vector<5x7xi32>
    %c1_i32_224 = arith.constant 1 : i32
    %552 = vector.broadcast %c1_i32_224 : i32 to vector<5x7xi32>
    %553 = arith.subi %550, %552 : vector<5x7xi32>
    %c2_i32_225 = arith.constant 2 : i32
    %554 = vector.broadcast %c2_i32_225 : i32 to vector<5x7xi32>
    %555 = arith.muli %554, %553 : vector<5x7xi32>
    %c2_i32_226 = arith.constant 2 : i32
    %556 = vector.broadcast %c2_i32_226 : i32 to vector<5x7xi32>
    %557 = arith.addi %555, %556 : vector<5x7xi32>
    %558 = arith.cmpi eq, %551, %557 : vector<5x7xi32>
    %c1_i32_227 = arith.constant 1 : i32
    %559 = vector.broadcast %c1_i32_227 : i32 to vector<5x7xi32>
    %560 = arith.cmpi sge, %550, %559 : vector<5x7xi32>
    %561 = arith.andi %558, %560 : vector<5x7xi1>
    %c3_i32_228 = arith.constant 3 : i32
    %562 = vector.broadcast %c3_i32_228 : i32 to vector<5x7xi32>
    %563 = arith.cmpi sle, %550, %562 : vector<5x7xi32>
    %564 = arith.andi %561, %563 : vector<5x7xi1>
    %cst_229 = arith.constant 1.000000e+00 : f32
    %cst_230 = arith.constant 0.000000e+00 : f32
    %565 = vector.broadcast %cst_229 : f32 to vector<5x7xf32>
    %566 = vector.broadcast %cst_230 : f32 to vector<5x7xf32>
    %567 = arith.select %564, %565, %566 : vector<5x7xi1>, vector<5x7xf32>
    %568 = tpu.iota {dimensions = array<i32: 0>} : vector<7x5xi32>
    %569 = tpu.iota {dimensions = array<i32: 1>} : vector<7x5xi32>
    %c1_i32_231 = arith.constant 1 : i32
    %570 = vector.broadcast %c1_i32_231 : i32 to vector<7x5xi32>
    %571 = arith.cmpi sge, %569, %570 : vector<7x5xi32>
    %c3_i32_232 = arith.constant 3 : i32
    %572 = vector.broadcast %c3_i32_232 : i32 to vector<7x5xi32>
    %573 = arith.cmpi sle, %569, %572 : vector<7x5xi32>
    %574 = arith.andi %571, %573 : vector<7x5xi1>
    %cst_233 = arith.constant 0.000000e+00 : f32
    %575 = vector.broadcast %cst_233 : f32 to vector<7x5xf32>
    %c1_i32_234 = arith.constant 1 : i32
    %576 = vector.broadcast %c1_i32_234 : i32 to vector<7x5xi32>
    %577 = arith.subi %569, %576 : vector<7x5xi32>
    %c2_i32_235 = arith.constant 2 : i32
    %578 = vector.broadcast %c2_i32_235 : i32 to vector<7x5xi32>
    %579 = arith.muli %578, %577 : vector<7x5xi32>
    %c0_i32_236 = arith.constant 0 : i32
    %580 = vector.broadcast %c0_i32_236 : i32 to vector<7x5xi32>
    %581 = arith.addi %579, %580 : vector<7x5xi32>
    %582 = arith.cmpi eq, %568, %581 : vector<7x5xi32>
    %583 = arith.andi %574, %582 : vector<7x5xi1>
    %cst_237 = arith.constant 6.250000e-02 : f32
    %cst_238 = arith.constant 0.000000e+00 : f32
    %584 = vector.broadcast %cst_237 : f32 to vector<7x5xf32>
    %585 = vector.broadcast %cst_238 : f32 to vector<7x5xf32>
    %586 = arith.select %583, %584, %585 : vector<7x5xi1>, vector<7x5xf32>
    %587 = arith.addf %575, %586 : vector<7x5xf32>
    %c1_i32_239 = arith.constant 1 : i32
    %588 = vector.broadcast %c1_i32_239 : i32 to vector<7x5xi32>
    %589 = arith.subi %569, %588 : vector<7x5xi32>
    %c2_i32_240 = arith.constant 2 : i32
    %590 = vector.broadcast %c2_i32_240 : i32 to vector<7x5xi32>
    %591 = arith.muli %590, %589 : vector<7x5xi32>
    %c1_i32_241 = arith.constant 1 : i32
    %592 = vector.broadcast %c1_i32_241 : i32 to vector<7x5xi32>
    %593 = arith.addi %591, %592 : vector<7x5xi32>
    %594 = arith.cmpi eq, %568, %593 : vector<7x5xi32>
    %595 = arith.andi %574, %594 : vector<7x5xi1>
    %cst_242 = arith.constant 1.250000e-01 : f32
    %cst_243 = arith.constant 0.000000e+00 : f32
    %596 = vector.broadcast %cst_242 : f32 to vector<7x5xf32>
    %597 = vector.broadcast %cst_243 : f32 to vector<7x5xf32>
    %598 = arith.select %595, %596, %597 : vector<7x5xi1>, vector<7x5xf32>
    %599 = arith.addf %587, %598 : vector<7x5xf32>
    %c1_i32_244 = arith.constant 1 : i32
    %600 = vector.broadcast %c1_i32_244 : i32 to vector<7x5xi32>
    %601 = arith.subi %569, %600 : vector<7x5xi32>
    %c2_i32_245 = arith.constant 2 : i32
    %602 = vector.broadcast %c2_i32_245 : i32 to vector<7x5xi32>
    %603 = arith.muli %602, %601 : vector<7x5xi32>
    %c2_i32_246 = arith.constant 2 : i32
    %604 = vector.broadcast %c2_i32_246 : i32 to vector<7x5xi32>
    %605 = arith.addi %603, %604 : vector<7x5xi32>
    %606 = arith.cmpi eq, %568, %605 : vector<7x5xi32>
    %607 = arith.andi %574, %606 : vector<7x5xi1>
    %cst_247 = arith.constant 6.250000e-02 : f32
    %cst_248 = arith.constant 0.000000e+00 : f32
    %608 = vector.broadcast %cst_247 : f32 to vector<7x5xf32>
    %609 = vector.broadcast %cst_248 : f32 to vector<7x5xf32>
    %610 = arith.select %607, %608, %609 : vector<7x5xi1>, vector<7x5xf32>
    %611 = arith.addf %599, %610 : vector<7x5xf32>
    %612 = tpu.iota {dimensions = array<i32: 0>} : vector<7x5xi32>
    %613 = tpu.iota {dimensions = array<i32: 1>} : vector<7x5xi32>
    %c2_i32_249 = arith.constant 2 : i32
    %614 = vector.broadcast %c2_i32_249 : i32 to vector<7x5xi32>
    %615 = arith.muli %614, %613 : vector<7x5xi32>
    %c2_i32_250 = arith.constant 2 : i32
    %616 = vector.broadcast %c2_i32_250 : i32 to vector<7x5xi32>
    %617 = arith.addi %615, %616 : vector<7x5xi32>
    %c2_i32_251 = arith.constant 2 : i32
    %618 = vector.broadcast %c2_i32_251 : i32 to vector<7x5xi32>
    %619 = arith.subi %617, %618 : vector<7x5xi32>
    %620 = arith.cmpi eq, %612, %619 : vector<7x5xi32>
    %cst_252 = arith.constant 1.000000e+00 : f32
    %cst_253 = arith.constant 0.000000e+00 : f32
    %621 = vector.broadcast %cst_252 : f32 to vector<7x5xf32>
    %622 = vector.broadcast %cst_253 : f32 to vector<7x5xf32>
    %623 = arith.select %620, %621, %622 : vector<7x5xi1>, vector<7x5xf32>
    %624 = tpu.iota {dimensions = array<i32: 0>} : vector<5x7xi32>
    %625 = tpu.iota {dimensions = array<i32: 1>} : vector<5x7xi32>
    %cst_254 = arith.constant 0.000000e+00 : f32
    %626 = vector.broadcast %cst_254 : f32 to vector<5x7xf32>
    %c2_i32_255 = arith.constant 2 : i32
    %627 = vector.broadcast %c2_i32_255 : i32 to vector<5x7xi32>
    %628 = arith.muli %627, %624 : vector<5x7xi32>
    %c0_i32_256 = arith.constant 0 : i32
    %629 = vector.broadcast %c0_i32_256 : i32 to vector<5x7xi32>
    %630 = arith.addi %628, %629 : vector<5x7xi32>
    %c2_i32_257 = arith.constant 2 : i32
    %631 = vector.broadcast %c2_i32_257 : i32 to vector<5x7xi32>
    %632 = arith.subi %630, %631 : vector<5x7xi32>
    %633 = arith.cmpi eq, %625, %632 : vector<5x7xi32>
    %cst_258 = arith.constant 2.500000e-01 : f32
    %cst_259 = arith.constant 0.000000e+00 : f32
    %634 = vector.broadcast %cst_258 : f32 to vector<5x7xf32>
    %635 = vector.broadcast %cst_259 : f32 to vector<5x7xf32>
    %636 = arith.select %633, %634, %635 : vector<5x7xi1>, vector<5x7xf32>
    %637 = arith.addf %626, %636 : vector<5x7xf32>
    %c2_i32_260 = arith.constant 2 : i32
    %638 = vector.broadcast %c2_i32_260 : i32 to vector<5x7xi32>
    %639 = arith.muli %638, %624 : vector<5x7xi32>
    %c1_i32_261 = arith.constant 1 : i32
    %640 = vector.broadcast %c1_i32_261 : i32 to vector<5x7xi32>
    %641 = arith.addi %639, %640 : vector<5x7xi32>
    %c2_i32_262 = arith.constant 2 : i32
    %642 = vector.broadcast %c2_i32_262 : i32 to vector<5x7xi32>
    %643 = arith.subi %641, %642 : vector<5x7xi32>
    %644 = arith.cmpi eq, %625, %643 : vector<5x7xi32>
    %cst_263 = arith.constant 5.000000e-01 : f32
    %cst_264 = arith.constant 0.000000e+00 : f32
    %645 = vector.broadcast %cst_263 : f32 to vector<5x7xf32>
    %646 = vector.broadcast %cst_264 : f32 to vector<5x7xf32>
    %647 = arith.select %644, %645, %646 : vector<5x7xi1>, vector<5x7xf32>
    %648 = arith.addf %637, %647 : vector<5x7xf32>
    %c2_i32_265 = arith.constant 2 : i32
    %649 = vector.broadcast %c2_i32_265 : i32 to vector<5x7xi32>
    %650 = arith.muli %649, %624 : vector<5x7xi32>
    %c2_i32_266 = arith.constant 2 : i32
    %651 = vector.broadcast %c2_i32_266 : i32 to vector<5x7xi32>
    %652 = arith.addi %650, %651 : vector<5x7xi32>
    %c2_i32_267 = arith.constant 2 : i32
    %653 = vector.broadcast %c2_i32_267 : i32 to vector<5x7xi32>
    %654 = arith.subi %652, %653 : vector<5x7xi32>
    %655 = arith.cmpi eq, %625, %654 : vector<5x7xi32>
    %cst_268 = arith.constant 2.500000e-01 : f32
    %cst_269 = arith.constant 0.000000e+00 : f32
    %656 = vector.broadcast %cst_268 : f32 to vector<5x7xf32>
    %657 = vector.broadcast %cst_269 : f32 to vector<5x7xf32>
    %658 = arith.select %655, %656, %657 : vector<5x7xi1>, vector<5x7xf32>
    %659 = arith.addf %648, %658 : vector<5x7xf32>
    %660 = tpu.iota {dimensions = array<i32: 0>} : vector<3x3xi32>
    %661 = tpu.iota {dimensions = array<i32: 1>} : vector<3x3xi32>
    %c1_i32_270 = arith.constant 1 : i32
    %662 = vector.broadcast %c1_i32_270 : i32 to vector<3x3xi32>
    %663 = arith.subi %660, %662 : vector<3x3xi32>
    %c2_i32_271 = arith.constant 2 : i32
    %664 = vector.broadcast %c2_i32_271 : i32 to vector<3x3xi32>
    %665 = arith.muli %664, %663 : vector<3x3xi32>
    %c0_i32_272 = arith.constant 0 : i32
    %666 = vector.broadcast %c0_i32_272 : i32 to vector<3x3xi32>
    %667 = arith.addi %665, %666 : vector<3x3xi32>
    %668 = arith.cmpi eq, %661, %667 : vector<3x3xi32>
    %c1_i32_273 = arith.constant 1 : i32
    %669 = vector.broadcast %c1_i32_273 : i32 to vector<3x3xi32>
    %670 = arith.cmpi sge, %660, %669 : vector<3x3xi32>
    %671 = arith.andi %668, %670 : vector<3x3xi1>
    %c1_i32_274 = arith.constant 1 : i32
    %672 = vector.broadcast %c1_i32_274 : i32 to vector<3x3xi32>
    %673 = arith.cmpi sle, %660, %672 : vector<3x3xi32>
    %674 = arith.andi %671, %673 : vector<3x3xi1>
    %cst_275 = arith.constant 1.000000e+00 : f32
    %cst_276 = arith.constant 0.000000e+00 : f32
    %675 = vector.broadcast %cst_275 : f32 to vector<3x3xf32>
    %676 = vector.broadcast %cst_276 : f32 to vector<3x3xf32>
    %677 = arith.select %674, %675, %676 : vector<3x3xi1>, vector<3x3xf32>
    %678 = tpu.iota {dimensions = array<i32: 0>} : vector<3x3xi32>
    %679 = tpu.iota {dimensions = array<i32: 1>} : vector<3x3xi32>
    %c1_i32_277 = arith.constant 1 : i32
    %680 = vector.broadcast %c1_i32_277 : i32 to vector<3x3xi32>
    %681 = arith.cmpi sge, %679, %680 : vector<3x3xi32>
    %c1_i32_278 = arith.constant 1 : i32
    %682 = vector.broadcast %c1_i32_278 : i32 to vector<3x3xi32>
    %683 = arith.cmpi sle, %679, %682 : vector<3x3xi32>
    %684 = arith.andi %681, %683 : vector<3x3xi1>
    %cst_279 = arith.constant 0.000000e+00 : f32
    %685 = vector.broadcast %cst_279 : f32 to vector<3x3xf32>
    %c1_i32_280 = arith.constant 1 : i32
    %686 = vector.broadcast %c1_i32_280 : i32 to vector<3x3xi32>
    %687 = arith.subi %679, %686 : vector<3x3xi32>
    %c2_i32_281 = arith.constant 2 : i32
    %688 = vector.broadcast %c2_i32_281 : i32 to vector<3x3xi32>
    %689 = arith.muli %688, %687 : vector<3x3xi32>
    %c0_i32_282 = arith.constant 0 : i32
    %690 = vector.broadcast %c0_i32_282 : i32 to vector<3x3xi32>
    %691 = arith.addi %689, %690 : vector<3x3xi32>
    %692 = arith.cmpi eq, %678, %691 : vector<3x3xi32>
    %693 = arith.andi %684, %692 : vector<3x3xi1>
    %cst_283 = arith.constant 6.250000e-02 : f32
    %cst_284 = arith.constant 0.000000e+00 : f32
    %694 = vector.broadcast %cst_283 : f32 to vector<3x3xf32>
    %695 = vector.broadcast %cst_284 : f32 to vector<3x3xf32>
    %696 = arith.select %693, %694, %695 : vector<3x3xi1>, vector<3x3xf32>
    %697 = arith.addf %685, %696 : vector<3x3xf32>
    %c1_i32_285 = arith.constant 1 : i32
    %698 = vector.broadcast %c1_i32_285 : i32 to vector<3x3xi32>
    %699 = arith.subi %679, %698 : vector<3x3xi32>
    %c2_i32_286 = arith.constant 2 : i32
    %700 = vector.broadcast %c2_i32_286 : i32 to vector<3x3xi32>
    %701 = arith.muli %700, %699 : vector<3x3xi32>
    %c1_i32_287 = arith.constant 1 : i32
    %702 = vector.broadcast %c1_i32_287 : i32 to vector<3x3xi32>
    %703 = arith.addi %701, %702 : vector<3x3xi32>
    %704 = arith.cmpi eq, %678, %703 : vector<3x3xi32>
    %705 = arith.andi %684, %704 : vector<3x3xi1>
    %cst_288 = arith.constant 1.250000e-01 : f32
    %cst_289 = arith.constant 0.000000e+00 : f32
    %706 = vector.broadcast %cst_288 : f32 to vector<3x3xf32>
    %707 = vector.broadcast %cst_289 : f32 to vector<3x3xf32>
    %708 = arith.select %705, %706, %707 : vector<3x3xi1>, vector<3x3xf32>
    %709 = arith.addf %697, %708 : vector<3x3xf32>
    %c1_i32_290 = arith.constant 1 : i32
    %710 = vector.broadcast %c1_i32_290 : i32 to vector<3x3xi32>
    %711 = arith.subi %679, %710 : vector<3x3xi32>
    %c2_i32_291 = arith.constant 2 : i32
    %712 = vector.broadcast %c2_i32_291 : i32 to vector<3x3xi32>
    %713 = arith.muli %712, %711 : vector<3x3xi32>
    %c2_i32_292 = arith.constant 2 : i32
    %714 = vector.broadcast %c2_i32_292 : i32 to vector<3x3xi32>
    %715 = arith.addi %713, %714 : vector<3x3xi32>
    %716 = arith.cmpi eq, %678, %715 : vector<3x3xi32>
    %717 = arith.andi %684, %716 : vector<3x3xi1>
    %cst_293 = arith.constant 6.250000e-02 : f32
    %cst_294 = arith.constant 0.000000e+00 : f32
    %718 = vector.broadcast %cst_293 : f32 to vector<3x3xf32>
    %719 = vector.broadcast %cst_294 : f32 to vector<3x3xf32>
    %720 = arith.select %717, %718, %719 : vector<3x3xi1>, vector<3x3xf32>
    %721 = arith.addf %709, %720 : vector<3x3xf32>
    %722 = tpu.iota {dimensions = array<i32: 0>} : vector<3x3xi32>
    %723 = tpu.iota {dimensions = array<i32: 1>} : vector<3x3xi32>
    %c2_i32_295 = arith.constant 2 : i32
    %724 = vector.broadcast %c2_i32_295 : i32 to vector<3x3xi32>
    %725 = arith.muli %724, %723 : vector<3x3xi32>
    %c0_i32_296 = arith.constant 0 : i32
    %726 = vector.broadcast %c0_i32_296 : i32 to vector<3x3xi32>
    %727 = arith.addi %725, %726 : vector<3x3xi32>
    %c2_i32_297 = arith.constant 2 : i32
    %728 = vector.broadcast %c2_i32_297 : i32 to vector<3x3xi32>
    %729 = arith.subi %727, %728 : vector<3x3xi32>
    %730 = arith.cmpi eq, %722, %729 : vector<3x3xi32>
    %cst_298 = arith.constant 1.000000e+00 : f32
    %cst_299 = arith.constant 0.000000e+00 : f32
    %731 = vector.broadcast %cst_298 : f32 to vector<3x3xf32>
    %732 = vector.broadcast %cst_299 : f32 to vector<3x3xf32>
    %733 = arith.select %730, %731, %732 : vector<3x3xi1>, vector<3x3xf32>
    %734 = tpu.iota {dimensions = array<i32: 0>} : vector<3x3xi32>
    %735 = tpu.iota {dimensions = array<i32: 1>} : vector<3x3xi32>
    %cst_300 = arith.constant 0.000000e+00 : f32
    %736 = vector.broadcast %cst_300 : f32 to vector<3x3xf32>
    %c2_i32_301 = arith.constant 2 : i32
    %737 = vector.broadcast %c2_i32_301 : i32 to vector<3x3xi32>
    %738 = arith.muli %737, %734 : vector<3x3xi32>
    %c0_i32_302 = arith.constant 0 : i32
    %739 = vector.broadcast %c0_i32_302 : i32 to vector<3x3xi32>
    %740 = arith.addi %738, %739 : vector<3x3xi32>
    %c2_i32_303 = arith.constant 2 : i32
    %741 = vector.broadcast %c2_i32_303 : i32 to vector<3x3xi32>
    %742 = arith.subi %740, %741 : vector<3x3xi32>
    %743 = arith.cmpi eq, %735, %742 : vector<3x3xi32>
    %cst_304 = arith.constant 2.500000e-01 : f32
    %cst_305 = arith.constant 0.000000e+00 : f32
    %744 = vector.broadcast %cst_304 : f32 to vector<3x3xf32>
    %745 = vector.broadcast %cst_305 : f32 to vector<3x3xf32>
    %746 = arith.select %743, %744, %745 : vector<3x3xi1>, vector<3x3xf32>
    %747 = arith.addf %736, %746 : vector<3x3xf32>
    %c2_i32_306 = arith.constant 2 : i32
    %748 = vector.broadcast %c2_i32_306 : i32 to vector<3x3xi32>
    %749 = arith.muli %748, %734 : vector<3x3xi32>
    %c1_i32_307 = arith.constant 1 : i32
    %750 = vector.broadcast %c1_i32_307 : i32 to vector<3x3xi32>
    %751 = arith.addi %749, %750 : vector<3x3xi32>
    %c2_i32_308 = arith.constant 2 : i32
    %752 = vector.broadcast %c2_i32_308 : i32 to vector<3x3xi32>
    %753 = arith.subi %751, %752 : vector<3x3xi32>
    %754 = arith.cmpi eq, %735, %753 : vector<3x3xi32>
    %cst_309 = arith.constant 5.000000e-01 : f32
    %cst_310 = arith.constant 0.000000e+00 : f32
    %755 = vector.broadcast %cst_309 : f32 to vector<3x3xf32>
    %756 = vector.broadcast %cst_310 : f32 to vector<3x3xf32>
    %757 = arith.select %754, %755, %756 : vector<3x3xi1>, vector<3x3xf32>
    %758 = arith.addf %747, %757 : vector<3x3xf32>
    %c2_i32_311 = arith.constant 2 : i32
    %759 = vector.broadcast %c2_i32_311 : i32 to vector<3x3xi32>
    %760 = arith.muli %759, %734 : vector<3x3xi32>
    %c2_i32_312 = arith.constant 2 : i32
    %761 = vector.broadcast %c2_i32_312 : i32 to vector<3x3xi32>
    %762 = arith.addi %760, %761 : vector<3x3xi32>
    %c2_i32_313 = arith.constant 2 : i32
    %763 = vector.broadcast %c2_i32_313 : i32 to vector<3x3xi32>
    %764 = arith.subi %762, %763 : vector<3x3xi32>
    %765 = arith.cmpi eq, %735, %764 : vector<3x3xi32>
    %cst_314 = arith.constant 2.500000e-01 : f32
    %cst_315 = arith.constant 0.000000e+00 : f32
    %766 = vector.broadcast %cst_314 : f32 to vector<3x3xf32>
    %767 = vector.broadcast %cst_315 : f32 to vector<3x3xf32>
    %768 = arith.select %765, %766, %767 : vector<3x3xi1>, vector<3x3xf32>
    %769 = arith.addf %758, %768 : vector<3x3xf32>
    %770 = tpu.iota {dimensions = array<i32: 0>} : vector<3x3xi32>
    %771 = tpu.iota {dimensions = array<i32: 1>} : vector<3x3xi32>
    %c1_i32_316 = arith.constant 1 : i32
    %772 = vector.broadcast %c1_i32_316 : i32 to vector<3x3xi32>
    %773 = arith.subi %770, %772 : vector<3x3xi32>
    %c2_i32_317 = arith.constant 2 : i32
    %774 = vector.broadcast %c2_i32_317 : i32 to vector<3x3xi32>
    %775 = arith.muli %774, %773 : vector<3x3xi32>
    %c1_i32_318 = arith.constant 1 : i32
    %776 = vector.broadcast %c1_i32_318 : i32 to vector<3x3xi32>
    %777 = arith.addi %775, %776 : vector<3x3xi32>
    %778 = arith.cmpi eq, %771, %777 : vector<3x3xi32>
    %c1_i32_319 = arith.constant 1 : i32
    %779 = vector.broadcast %c1_i32_319 : i32 to vector<3x3xi32>
    %780 = arith.cmpi sge, %770, %779 : vector<3x3xi32>
    %781 = arith.andi %778, %780 : vector<3x3xi1>
    %c1_i32_320 = arith.constant 1 : i32
    %782 = vector.broadcast %c1_i32_320 : i32 to vector<3x3xi32>
    %783 = arith.cmpi sle, %770, %782 : vector<3x3xi32>
    %784 = arith.andi %781, %783 : vector<3x3xi1>
    %cst_321 = arith.constant 1.000000e+00 : f32
    %cst_322 = arith.constant 0.000000e+00 : f32
    %785 = vector.broadcast %cst_321 : f32 to vector<3x3xf32>
    %786 = vector.broadcast %cst_322 : f32 to vector<3x3xf32>
    %787 = arith.select %784, %785, %786 : vector<3x3xi1>, vector<3x3xf32>
    %788 = tpu.iota {dimensions = array<i32: 0>} : vector<3x3xi32>
    %789 = tpu.iota {dimensions = array<i32: 1>} : vector<3x3xi32>
    %c1_i32_323 = arith.constant 1 : i32
    %790 = vector.broadcast %c1_i32_323 : i32 to vector<3x3xi32>
    %791 = arith.cmpi sge, %789, %790 : vector<3x3xi32>
    %c1_i32_324 = arith.constant 1 : i32
    %792 = vector.broadcast %c1_i32_324 : i32 to vector<3x3xi32>
    %793 = arith.cmpi sle, %789, %792 : vector<3x3xi32>
    %794 = arith.andi %791, %793 : vector<3x3xi1>
    %cst_325 = arith.constant 0.000000e+00 : f32
    %795 = vector.broadcast %cst_325 : f32 to vector<3x3xf32>
    %c1_i32_326 = arith.constant 1 : i32
    %796 = vector.broadcast %c1_i32_326 : i32 to vector<3x3xi32>
    %797 = arith.subi %789, %796 : vector<3x3xi32>
    %c2_i32_327 = arith.constant 2 : i32
    %798 = vector.broadcast %c2_i32_327 : i32 to vector<3x3xi32>
    %799 = arith.muli %798, %797 : vector<3x3xi32>
    %c0_i32_328 = arith.constant 0 : i32
    %800 = vector.broadcast %c0_i32_328 : i32 to vector<3x3xi32>
    %801 = arith.addi %799, %800 : vector<3x3xi32>
    %802 = arith.cmpi eq, %788, %801 : vector<3x3xi32>
    %803 = arith.andi %794, %802 : vector<3x3xi1>
    %cst_329 = arith.constant 1.250000e-01 : f32
    %cst_330 = arith.constant 0.000000e+00 : f32
    %804 = vector.broadcast %cst_329 : f32 to vector<3x3xf32>
    %805 = vector.broadcast %cst_330 : f32 to vector<3x3xf32>
    %806 = arith.select %803, %804, %805 : vector<3x3xi1>, vector<3x3xf32>
    %807 = arith.addf %795, %806 : vector<3x3xf32>
    %c1_i32_331 = arith.constant 1 : i32
    %808 = vector.broadcast %c1_i32_331 : i32 to vector<3x3xi32>
    %809 = arith.subi %789, %808 : vector<3x3xi32>
    %c2_i32_332 = arith.constant 2 : i32
    %810 = vector.broadcast %c2_i32_332 : i32 to vector<3x3xi32>
    %811 = arith.muli %810, %809 : vector<3x3xi32>
    %c1_i32_333 = arith.constant 1 : i32
    %812 = vector.broadcast %c1_i32_333 : i32 to vector<3x3xi32>
    %813 = arith.addi %811, %812 : vector<3x3xi32>
    %814 = arith.cmpi eq, %788, %813 : vector<3x3xi32>
    %815 = arith.andi %794, %814 : vector<3x3xi1>
    %cst_334 = arith.constant 2.500000e-01 : f32
    %cst_335 = arith.constant 0.000000e+00 : f32
    %816 = vector.broadcast %cst_334 : f32 to vector<3x3xf32>
    %817 = vector.broadcast %cst_335 : f32 to vector<3x3xf32>
    %818 = arith.select %815, %816, %817 : vector<3x3xi1>, vector<3x3xf32>
    %819 = arith.addf %807, %818 : vector<3x3xf32>
    %c1_i32_336 = arith.constant 1 : i32
    %820 = vector.broadcast %c1_i32_336 : i32 to vector<3x3xi32>
    %821 = arith.subi %789, %820 : vector<3x3xi32>
    %c2_i32_337 = arith.constant 2 : i32
    %822 = vector.broadcast %c2_i32_337 : i32 to vector<3x3xi32>
    %823 = arith.muli %822, %821 : vector<3x3xi32>
    %c2_i32_338 = arith.constant 2 : i32
    %824 = vector.broadcast %c2_i32_338 : i32 to vector<3x3xi32>
    %825 = arith.addi %823, %824 : vector<3x3xi32>
    %826 = arith.cmpi eq, %788, %825 : vector<3x3xi32>
    %827 = arith.andi %794, %826 : vector<3x3xi1>
    %cst_339 = arith.constant 1.250000e-01 : f32
    %cst_340 = arith.constant 0.000000e+00 : f32
    %828 = vector.broadcast %cst_339 : f32 to vector<3x3xf32>
    %829 = vector.broadcast %cst_340 : f32 to vector<3x3xf32>
    %830 = arith.select %827, %828, %829 : vector<3x3xi1>, vector<3x3xf32>
    %831 = arith.addf %819, %830 : vector<3x3xf32>
    %832 = tpu.iota {dimensions = array<i32: 0>} : vector<3x3xi32>
    %833 = tpu.iota {dimensions = array<i32: 1>} : vector<3x3xi32>
    %c2_i32_341 = arith.constant 2 : i32
    %834 = vector.broadcast %c2_i32_341 : i32 to vector<3x3xi32>
    %835 = arith.muli %834, %833 : vector<3x3xi32>
    %c1_i32_342 = arith.constant 1 : i32
    %836 = vector.broadcast %c1_i32_342 : i32 to vector<3x3xi32>
    %837 = arith.addi %835, %836 : vector<3x3xi32>
    %c2_i32_343 = arith.constant 2 : i32
    %838 = vector.broadcast %c2_i32_343 : i32 to vector<3x3xi32>
    %839 = arith.subi %837, %838 : vector<3x3xi32>
    %840 = arith.cmpi eq, %832, %839 : vector<3x3xi32>
    %cst_344 = arith.constant 1.000000e+00 : f32
    %cst_345 = arith.constant 0.000000e+00 : f32
    %841 = vector.broadcast %cst_344 : f32 to vector<3x3xf32>
    %842 = vector.broadcast %cst_345 : f32 to vector<3x3xf32>
    %843 = arith.select %840, %841, %842 : vector<3x3xi1>, vector<3x3xf32>
    %844 = tpu.iota {dimensions = array<i32: 0>} : vector<3x3xi32>
    %845 = tpu.iota {dimensions = array<i32: 1>} : vector<3x3xi32>
    %cst_346 = arith.constant 0.000000e+00 : f32
    %846 = vector.broadcast %cst_346 : f32 to vector<3x3xf32>
    %c2_i32_347 = arith.constant 2 : i32
    %847 = vector.broadcast %c2_i32_347 : i32 to vector<3x3xi32>
    %848 = arith.muli %847, %844 : vector<3x3xi32>
    %c0_i32_348 = arith.constant 0 : i32
    %849 = vector.broadcast %c0_i32_348 : i32 to vector<3x3xi32>
    %850 = arith.addi %848, %849 : vector<3x3xi32>
    %c2_i32_349 = arith.constant 2 : i32
    %851 = vector.broadcast %c2_i32_349 : i32 to vector<3x3xi32>
    %852 = arith.subi %850, %851 : vector<3x3xi32>
    %853 = arith.cmpi eq, %845, %852 : vector<3x3xi32>
    %cst_350 = arith.constant 5.000000e-01 : f32
    %cst_351 = arith.constant 0.000000e+00 : f32
    %854 = vector.broadcast %cst_350 : f32 to vector<3x3xf32>
    %855 = vector.broadcast %cst_351 : f32 to vector<3x3xf32>
    %856 = arith.select %853, %854, %855 : vector<3x3xi1>, vector<3x3xf32>
    %857 = arith.addf %846, %856 : vector<3x3xf32>
    %c2_i32_352 = arith.constant 2 : i32
    %858 = vector.broadcast %c2_i32_352 : i32 to vector<3x3xi32>
    %859 = arith.muli %858, %844 : vector<3x3xi32>
    %c1_i32_353 = arith.constant 1 : i32
    %860 = vector.broadcast %c1_i32_353 : i32 to vector<3x3xi32>
    %861 = arith.addi %859, %860 : vector<3x3xi32>
    %c2_i32_354 = arith.constant 2 : i32
    %862 = vector.broadcast %c2_i32_354 : i32 to vector<3x3xi32>
    %863 = arith.subi %861, %862 : vector<3x3xi32>
    %864 = arith.cmpi eq, %845, %863 : vector<3x3xi32>
    %cst_355 = arith.constant 1.000000e+00 : f32
    %cst_356 = arith.constant 0.000000e+00 : f32
    %865 = vector.broadcast %cst_355 : f32 to vector<3x3xf32>
    %866 = vector.broadcast %cst_356 : f32 to vector<3x3xf32>
    %867 = arith.select %864, %865, %866 : vector<3x3xi1>, vector<3x3xf32>
    %868 = arith.addf %857, %867 : vector<3x3xf32>
    %c2_i32_357 = arith.constant 2 : i32
    %869 = vector.broadcast %c2_i32_357 : i32 to vector<3x3xi32>
    %870 = arith.muli %869, %844 : vector<3x3xi32>
    %c2_i32_358 = arith.constant 2 : i32
    %871 = vector.broadcast %c2_i32_358 : i32 to vector<3x3xi32>
    %872 = arith.addi %870, %871 : vector<3x3xi32>
    %c2_i32_359 = arith.constant 2 : i32
    %873 = vector.broadcast %c2_i32_359 : i32 to vector<3x3xi32>
    %874 = arith.subi %872, %873 : vector<3x3xi32>
    %875 = arith.cmpi eq, %845, %874 : vector<3x3xi32>
    %cst_360 = arith.constant 5.000000e-01 : f32
    %cst_361 = arith.constant 0.000000e+00 : f32
    %876 = vector.broadcast %cst_360 : f32 to vector<3x3xf32>
    %877 = vector.broadcast %cst_361 : f32 to vector<3x3xf32>
    %878 = arith.select %875, %876, %877 : vector<3x3xi1>, vector<3x3xf32>
    %879 = arith.addf %868, %878 : vector<3x3xf32>
    %880 = tpu.iota {dimensions = array<i32: 0>} : vector<3x3xi32>
    %881 = tpu.iota {dimensions = array<i32: 1>} : vector<3x3xi32>
    %c1_i32_362 = arith.constant 1 : i32
    %882 = vector.broadcast %c1_i32_362 : i32 to vector<3x3xi32>
    %883 = arith.subi %880, %882 : vector<3x3xi32>
    %c2_i32_363 = arith.constant 2 : i32
    %884 = vector.broadcast %c2_i32_363 : i32 to vector<3x3xi32>
    %885 = arith.muli %884, %883 : vector<3x3xi32>
    %c2_i32_364 = arith.constant 2 : i32
    %886 = vector.broadcast %c2_i32_364 : i32 to vector<3x3xi32>
    %887 = arith.addi %885, %886 : vector<3x3xi32>
    %888 = arith.cmpi eq, %881, %887 : vector<3x3xi32>
    %c1_i32_365 = arith.constant 1 : i32
    %889 = vector.broadcast %c1_i32_365 : i32 to vector<3x3xi32>
    %890 = arith.cmpi sge, %880, %889 : vector<3x3xi32>
    %891 = arith.andi %888, %890 : vector<3x3xi1>
    %c1_i32_366 = arith.constant 1 : i32
    %892 = vector.broadcast %c1_i32_366 : i32 to vector<3x3xi32>
    %893 = arith.cmpi sle, %880, %892 : vector<3x3xi32>
    %894 = arith.andi %891, %893 : vector<3x3xi1>
    %cst_367 = arith.constant 1.000000e+00 : f32
    %cst_368 = arith.constant 0.000000e+00 : f32
    %895 = vector.broadcast %cst_367 : f32 to vector<3x3xf32>
    %896 = vector.broadcast %cst_368 : f32 to vector<3x3xf32>
    %897 = arith.select %894, %895, %896 : vector<3x3xi1>, vector<3x3xf32>
    %898 = tpu.iota {dimensions = array<i32: 0>} : vector<3x3xi32>
    %899 = tpu.iota {dimensions = array<i32: 1>} : vector<3x3xi32>
    %c1_i32_369 = arith.constant 1 : i32
    %900 = vector.broadcast %c1_i32_369 : i32 to vector<3x3xi32>
    %901 = arith.cmpi sge, %899, %900 : vector<3x3xi32>
    %c1_i32_370 = arith.constant 1 : i32
    %902 = vector.broadcast %c1_i32_370 : i32 to vector<3x3xi32>
    %903 = arith.cmpi sle, %899, %902 : vector<3x3xi32>
    %904 = arith.andi %901, %903 : vector<3x3xi1>
    %cst_371 = arith.constant 0.000000e+00 : f32
    %905 = vector.broadcast %cst_371 : f32 to vector<3x3xf32>
    %c1_i32_372 = arith.constant 1 : i32
    %906 = vector.broadcast %c1_i32_372 : i32 to vector<3x3xi32>
    %907 = arith.subi %899, %906 : vector<3x3xi32>
    %c2_i32_373 = arith.constant 2 : i32
    %908 = vector.broadcast %c2_i32_373 : i32 to vector<3x3xi32>
    %909 = arith.muli %908, %907 : vector<3x3xi32>
    %c0_i32_374 = arith.constant 0 : i32
    %910 = vector.broadcast %c0_i32_374 : i32 to vector<3x3xi32>
    %911 = arith.addi %909, %910 : vector<3x3xi32>
    %912 = arith.cmpi eq, %898, %911 : vector<3x3xi32>
    %913 = arith.andi %904, %912 : vector<3x3xi1>
    %cst_375 = arith.constant 6.250000e-02 : f32
    %cst_376 = arith.constant 0.000000e+00 : f32
    %914 = vector.broadcast %cst_375 : f32 to vector<3x3xf32>
    %915 = vector.broadcast %cst_376 : f32 to vector<3x3xf32>
    %916 = arith.select %913, %914, %915 : vector<3x3xi1>, vector<3x3xf32>
    %917 = arith.addf %905, %916 : vector<3x3xf32>
    %c1_i32_377 = arith.constant 1 : i32
    %918 = vector.broadcast %c1_i32_377 : i32 to vector<3x3xi32>
    %919 = arith.subi %899, %918 : vector<3x3xi32>
    %c2_i32_378 = arith.constant 2 : i32
    %920 = vector.broadcast %c2_i32_378 : i32 to vector<3x3xi32>
    %921 = arith.muli %920, %919 : vector<3x3xi32>
    %c1_i32_379 = arith.constant 1 : i32
    %922 = vector.broadcast %c1_i32_379 : i32 to vector<3x3xi32>
    %923 = arith.addi %921, %922 : vector<3x3xi32>
    %924 = arith.cmpi eq, %898, %923 : vector<3x3xi32>
    %925 = arith.andi %904, %924 : vector<3x3xi1>
    %cst_380 = arith.constant 1.250000e-01 : f32
    %cst_381 = arith.constant 0.000000e+00 : f32
    %926 = vector.broadcast %cst_380 : f32 to vector<3x3xf32>
    %927 = vector.broadcast %cst_381 : f32 to vector<3x3xf32>
    %928 = arith.select %925, %926, %927 : vector<3x3xi1>, vector<3x3xf32>
    %929 = arith.addf %917, %928 : vector<3x3xf32>
    %c1_i32_382 = arith.constant 1 : i32
    %930 = vector.broadcast %c1_i32_382 : i32 to vector<3x3xi32>
    %931 = arith.subi %899, %930 : vector<3x3xi32>
    %c2_i32_383 = arith.constant 2 : i32
    %932 = vector.broadcast %c2_i32_383 : i32 to vector<3x3xi32>
    %933 = arith.muli %932, %931 : vector<3x3xi32>
    %c2_i32_384 = arith.constant 2 : i32
    %934 = vector.broadcast %c2_i32_384 : i32 to vector<3x3xi32>
    %935 = arith.addi %933, %934 : vector<3x3xi32>
    %936 = arith.cmpi eq, %898, %935 : vector<3x3xi32>
    %937 = arith.andi %904, %936 : vector<3x3xi1>
    %cst_385 = arith.constant 6.250000e-02 : f32
    %cst_386 = arith.constant 0.000000e+00 : f32
    %938 = vector.broadcast %cst_385 : f32 to vector<3x3xf32>
    %939 = vector.broadcast %cst_386 : f32 to vector<3x3xf32>
    %940 = arith.select %937, %938, %939 : vector<3x3xi1>, vector<3x3xf32>
    %941 = arith.addf %929, %940 : vector<3x3xf32>
    %942 = tpu.iota {dimensions = array<i32: 0>} : vector<3x3xi32>
    %943 = tpu.iota {dimensions = array<i32: 1>} : vector<3x3xi32>
    %c2_i32_387 = arith.constant 2 : i32
    %944 = vector.broadcast %c2_i32_387 : i32 to vector<3x3xi32>
    %945 = arith.muli %944, %943 : vector<3x3xi32>
    %c2_i32_388 = arith.constant 2 : i32
    %946 = vector.broadcast %c2_i32_388 : i32 to vector<3x3xi32>
    %947 = arith.addi %945, %946 : vector<3x3xi32>
    %c2_i32_389 = arith.constant 2 : i32
    %948 = vector.broadcast %c2_i32_389 : i32 to vector<3x3xi32>
    %949 = arith.subi %947, %948 : vector<3x3xi32>
    %950 = arith.cmpi eq, %942, %949 : vector<3x3xi32>
    %cst_390 = arith.constant 1.000000e+00 : f32
    %cst_391 = arith.constant 0.000000e+00 : f32
    %951 = vector.broadcast %cst_390 : f32 to vector<3x3xf32>
    %952 = vector.broadcast %cst_391 : f32 to vector<3x3xf32>
    %953 = arith.select %950, %951, %952 : vector<3x3xi1>, vector<3x3xf32>
    %954 = tpu.iota {dimensions = array<i32: 0>} : vector<3x3xi32>
    %955 = tpu.iota {dimensions = array<i32: 1>} : vector<3x3xi32>
    %cst_392 = arith.constant 0.000000e+00 : f32
    %956 = vector.broadcast %cst_392 : f32 to vector<3x3xf32>
    %c2_i32_393 = arith.constant 2 : i32
    %957 = vector.broadcast %c2_i32_393 : i32 to vector<3x3xi32>
    %958 = arith.muli %957, %954 : vector<3x3xi32>
    %c0_i32_394 = arith.constant 0 : i32
    %959 = vector.broadcast %c0_i32_394 : i32 to vector<3x3xi32>
    %960 = arith.addi %958, %959 : vector<3x3xi32>
    %c2_i32_395 = arith.constant 2 : i32
    %961 = vector.broadcast %c2_i32_395 : i32 to vector<3x3xi32>
    %962 = arith.subi %960, %961 : vector<3x3xi32>
    %963 = arith.cmpi eq, %955, %962 : vector<3x3xi32>
    %cst_396 = arith.constant 2.500000e-01 : f32
    %cst_397 = arith.constant 0.000000e+00 : f32
    %964 = vector.broadcast %cst_396 : f32 to vector<3x3xf32>
    %965 = vector.broadcast %cst_397 : f32 to vector<3x3xf32>
    %966 = arith.select %963, %964, %965 : vector<3x3xi1>, vector<3x3xf32>
    %967 = arith.addf %956, %966 : vector<3x3xf32>
    %c2_i32_398 = arith.constant 2 : i32
    %968 = vector.broadcast %c2_i32_398 : i32 to vector<3x3xi32>
    %969 = arith.muli %968, %954 : vector<3x3xi32>
    %c1_i32_399 = arith.constant 1 : i32
    %970 = vector.broadcast %c1_i32_399 : i32 to vector<3x3xi32>
    %971 = arith.addi %969, %970 : vector<3x3xi32>
    %c2_i32_400 = arith.constant 2 : i32
    %972 = vector.broadcast %c2_i32_400 : i32 to vector<3x3xi32>
    %973 = arith.subi %971, %972 : vector<3x3xi32>
    %974 = arith.cmpi eq, %955, %973 : vector<3x3xi32>
    %cst_401 = arith.constant 5.000000e-01 : f32
    %cst_402 = arith.constant 0.000000e+00 : f32
    %975 = vector.broadcast %cst_401 : f32 to vector<3x3xf32>
    %976 = vector.broadcast %cst_402 : f32 to vector<3x3xf32>
    %977 = arith.select %974, %975, %976 : vector<3x3xi1>, vector<3x3xf32>
    %978 = arith.addf %967, %977 : vector<3x3xf32>
    %c2_i32_403 = arith.constant 2 : i32
    %979 = vector.broadcast %c2_i32_403 : i32 to vector<3x3xi32>
    %980 = arith.muli %979, %954 : vector<3x3xi32>
    %c2_i32_404 = arith.constant 2 : i32
    %981 = vector.broadcast %c2_i32_404 : i32 to vector<3x3xi32>
    %982 = arith.addi %980, %981 : vector<3x3xi32>
    %c2_i32_405 = arith.constant 2 : i32
    %983 = vector.broadcast %c2_i32_405 : i32 to vector<3x3xi32>
    %984 = arith.subi %982, %983 : vector<3x3xi32>
    %985 = arith.cmpi eq, %955, %984 : vector<3x3xi32>
    %cst_406 = arith.constant 2.500000e-01 : f32
    %cst_407 = arith.constant 0.000000e+00 : f32
    %986 = vector.broadcast %cst_406 : f32 to vector<3x3xf32>
    %987 = vector.broadcast %cst_407 : f32 to vector<3x3xf32>
    %988 = arith.select %985, %986, %987 : vector<3x3xi1>, vector<3x3xf32>
    %989 = arith.addf %978, %988 : vector<3x3xf32>
    %c0 = arith.constant 0 : index
    %c0_408 = arith.constant 0 : index
    %c0_409 = arith.constant 0 : index
    %990 = vector.load %arg1[%c0, %c0_408, %c0_409] : memref<1x17x17xf32, #tpu.memory_space<vmem>>, vector<1x17x17xf32>
    %991 = vector.shape_cast %990 : vector<1x17x17xf32> to vector<17x17xf32>
    %cst_410 = arith.constant 0.000000e+00 : f32
    %992 = vector.broadcast %cst_410 : f32 to vector<17x17xf32>
    %c0_411 = arith.constant 0 : index
    %c0_412 = arith.constant 0 : index
    %993 = vector.load %arg7[%c0_411, %c0_412] : memref<17x17xf32, #tpu.memory_space<vmem>>, vector<17x17xf32>
    tpu.vector_store %arg7[%c0_411, %c0_412], %992 {strides = array<i32>} : memref<17x17xf32, #tpu.memory_space<vmem>>, vector<17x17xf32>,
    %994 = vector.extract_strided_slice %991 {offsets = [0, 0], sizes = [15, 15], strides = [1, 1]} : vector<17x17xf32> to vector<15x15xf32>
    %cst_413 = arith.constant 4.34027781E-4 : f32
    %995 = vector.broadcast %cst_413 : f32 to vector<15x15xf32>
    %996 = arith.mulf %995, %994 : vector<15x15xf32>
    %997 = vector.extract_strided_slice %991 {offsets = [0, 1], sizes = [15, 15], strides = [1, 1]} : vector<17x17xf32> to vector<15x15xf32>
    %cst_414 = arith.constant 0.00173611112 : f32
    %998 = vector.broadcast %cst_414 : f32 to vector<15x15xf32>
    %999 = arith.mulf %998, %997 : vector<15x15xf32>
    %1000 = arith.addf %996, %999 : vector<15x15xf32>
    %1001 = vector.extract_strided_slice %991 {offsets = [0, 2], sizes = [15, 15], strides = [1, 1]} : vector<17x17xf32> to vector<15x15xf32>
    %cst_415 = arith.constant 4.34027781E-4 : f32
    %1002 = vector.broadcast %cst_415 : f32 to vector<15x15xf32>
    %1003 = arith.mulf %1002, %1001 : vector<15x15xf32>
    %1004 = arith.addf %1000, %1003 : vector<15x15xf32>
    %1005 = vector.extract_strided_slice %991 {offsets = [1, 0], sizes = [15, 15], strides = [1, 1]} : vector<17x17xf32> to vector<15x15xf32>
    %cst_416 = arith.constant 0.00173611112 : f32
    %1006 = vector.broadcast %cst_416 : f32 to vector<15x15xf32>
    %1007 = arith.mulf %1006, %1005 : vector<15x15xf32>
    %1008 = arith.addf %1004, %1007 : vector<15x15xf32>
    %1009 = vector.extract_strided_slice %991 {offsets = [1, 1], sizes = [15, 15], strides = [1, 1]} : vector<17x17xf32> to vector<15x15xf32>
    %cst_417 = arith.constant 0.0069444445 : f32
    %1010 = vector.broadcast %cst_417 : f32 to vector<15x15xf32>
    %1011 = arith.mulf %1010, %1009 : vector<15x15xf32>
    %1012 = arith.addf %1008, %1011 : vector<15x15xf32>
    %1013 = vector.extract_strided_slice %991 {offsets = [1, 2], sizes = [15, 15], strides = [1, 1]} : vector<17x17xf32> to vector<15x15xf32>
    %cst_418 = arith.constant 0.00173611112 : f32
    %1014 = vector.broadcast %cst_418 : f32 to vector<15x15xf32>
    %1015 = arith.mulf %1014, %1013 : vector<15x15xf32>
    %1016 = arith.addf %1012, %1015 : vector<15x15xf32>
    %1017 = vector.extract_strided_slice %991 {offsets = [2, 0], sizes = [15, 15], strides = [1, 1]} : vector<17x17xf32> to vector<15x15xf32>
    %cst_419 = arith.constant 4.34027781E-4 : f32
    %1018 = vector.broadcast %cst_419 : f32 to vector<15x15xf32>
    %1019 = arith.mulf %1018, %1017 : vector<15x15xf32>
    %1020 = arith.addf %1016, %1019 : vector<15x15xf32>
    %1021 = vector.extract_strided_slice %991 {offsets = [2, 1], sizes = [15, 15], strides = [1, 1]} : vector<17x17xf32> to vector<15x15xf32>
    %cst_420 = arith.constant 0.00173611112 : f32
    %1022 = vector.broadcast %cst_420 : f32 to vector<15x15xf32>
    %1023 = arith.mulf %1022, %1021 : vector<15x15xf32>
    %1024 = arith.addf %1020, %1023 : vector<15x15xf32>
    %1025 = vector.extract_strided_slice %991 {offsets = [2, 2], sizes = [15, 15], strides = [1, 1]} : vector<17x17xf32> to vector<15x15xf32>
    %cst_421 = arith.constant 4.34027781E-4 : f32
    %1026 = vector.broadcast %cst_421 : f32 to vector<15x15xf32>
    %1027 = arith.mulf %1026, %1025 : vector<15x15xf32>
    %1028 = arith.addf %1024, %1027 : vector<15x15xf32>
    %c1 = arith.constant 1 : index
    %c1_422 = arith.constant 1 : index
    %1029 = vector.load %arg7[%c1, %c1_422] : memref<17x17xf32, #tpu.memory_space<vmem>>, vector<15x15xf32>
    tpu.vector_store %arg7[%c1, %c1_422], %1028 {strides = array<i32>} : memref<17x17xf32, #tpu.memory_space<vmem>>, vector<15x15xf32>,
    %c0_423 = arith.constant 0 : index
    %c0_424 = arith.constant 0 : index
    %1030 = vector.load %arg7[%c0_423, %c0_424] : memref<17x17xf32, #tpu.memory_space<vmem>>, vector<17x17xf32>
    %c0_425 = arith.constant 0 : index
    %c0_426 = arith.constant 0 : index
    %c0_427 = arith.constant 0 : index
    %1031 = vector.load %arg5[%c0_425, %c0_426, %c0_427] : memref<1x17x17xf32, #tpu.memory_space<vmem>>, vector<1x17x17xf32>
    %1032 = vector.shape_cast %1031 : vector<1x17x17xf32> to vector<17x17xf32>
    %1033 = vector.shape_cast %1030 : vector<17x17xf32> to vector<1x17x17xf32>
    tpu.vector_store %arg5[%c0_425, %c0_426, %c0_427], %1033 {strides = array<i32>} : memref<1x17x17xf32, #tpu.memory_space<vmem>>, vector<1x17x17xf32>,
    %c0_428 = arith.constant 0 : index
    %c0_429 = arith.constant 0 : index
    %c0_430 = arith.constant 0 : index
    %1034 = vector.load %arg2[%c0_428, %c0_429, %c0_430] : memref<1x17x17xf32, #tpu.memory_space<vmem>>, vector<1x17x17xf32>
    %1035 = vector.shape_cast %1034 : vector<1x17x17xf32> to vector<17x17xf32>
    %cst_431 = arith.constant 0.000000e+00 : f32
    %1036 = vector.broadcast %cst_431 : f32 to vector<17x17xf32>
    %c0_432 = arith.constant 0 : index
    %c0_433 = arith.constant 0 : index
    %1037 = vector.load %arg6[%c0_432, %c0_433] : memref<17x17xf32, #tpu.memory_space<vmem>>, vector<17x17xf32>
    tpu.vector_store %arg6[%c0_432, %c0_433], %1036 {strides = array<i32>} : memref<17x17xf32, #tpu.memory_space<vmem>>, vector<17x17xf32>,
    %1038 = vector.extract_strided_slice %1035 {offsets = [1, 1], sizes = [15, 15], strides = [1, 1]} : vector<17x17xf32> to vector<15x15xf32>
    %c1_434 = arith.constant 1 : index
    %c1_435 = arith.constant 1 : index
    %1039 = vector.load %arg6[%c1_434, %c1_435] : memref<17x17xf32, #tpu.memory_space<vmem>>, vector<15x15xf32>
    tpu.vector_store %arg6[%c1_434, %c1_435], %1038 {strides = array<i32>} : memref<17x17xf32, #tpu.memory_space<vmem>>, vector<15x15xf32>,
    %c0_i32_436 = arith.constant 0 : i32
    %c2_i32_437 = arith.constant 2 : i32
    %1040 = arith.addi %c0_i32_436, %c2_i32_437 : i32
    %c1_i32_438 = arith.constant 1 : i32
    scf.for %arg14 = %c0_i32_436 to %1040 step %c1_i32_438  : i32 {
      %c0_451 = arith.constant 0 : index
      %c0_452 = arith.constant 0 : index
      %1050 = vector.load %arg6[%c0_451, %c0_452] : memref<17x17xf32, #tpu.memory_space<vmem>>, vector<17x17xf32>
      %c0_453 = arith.constant 0 : index
      %c0_454 = arith.constant 0 : index
      %1051 = vector.load %arg7[%c0_453, %c0_454] : memref<17x17xf32, #tpu.memory_space<vmem>>, vector<17x17xf32>
      %1052 = vector.extract_strided_slice %1050 {offsets = [0, 0], sizes = [15, 15], strides = [1, 1]} : vector<17x17xf32> to vector<15x15xf32>
      %cst_455 = arith.constant -0.333333343 : f32
      %1053 = vector.broadcast %cst_455 : f32 to vector<15x15xf32>
      %1054 = arith.mulf %1053, %1052 : vector<15x15xf32>
      %1055 = vector.extract_strided_slice %1050 {offsets = [0, 1], sizes = [15, 15], strides = [1, 1]} : vector<17x17xf32> to vector<15x15xf32>
      %cst_456 = arith.constant -0.333333343 : f32
      %1056 = vector.broadcast %cst_456 : f32 to vector<15x15xf32>
      %1057 = arith.mulf %1056, %1055 : vector<15x15xf32>
      %1058 = arith.addf %1054, %1057 : vector<15x15xf32>
      %1059 = vector.extract_strided_slice %1050 {offsets = [0, 2], sizes = [15, 15], strides = [1, 1]} : vector<17x17xf32> to vector<15x15xf32>
      %cst_457 = arith.constant -0.333333343 : f32
      %1060 = vector.broadcast %cst_457 : f32 to vector<15x15xf32>
      %1061 = arith.mulf %1060, %1059 : vector<15x15xf32>
      %1062 = arith.addf %1058, %1061 : vector<15x15xf32>
      %1063 = vector.extract_strided_slice %1050 {offsets = [1, 0], sizes = [15, 15], strides = [1, 1]} : vector<17x17xf32> to vector<15x15xf32>
      %cst_458 = arith.constant -0.333333343 : f32
      %1064 = vector.broadcast %cst_458 : f32 to vector<15x15xf32>
      %1065 = arith.mulf %1064, %1063 : vector<15x15xf32>
      %1066 = arith.addf %1062, %1065 : vector<15x15xf32>
      %1067 = vector.extract_strided_slice %1050 {offsets = [1, 1], sizes = [15, 15], strides = [1, 1]} : vector<17x17xf32> to vector<15x15xf32>
      %cst_459 = arith.constant 2.66666675 : f32
      %1068 = vector.broadcast %cst_459 : f32 to vector<15x15xf32>
      %1069 = arith.mulf %1068, %1067 : vector<15x15xf32>
      %1070 = arith.addf %1066, %1069 : vector<15x15xf32>
      %1071 = vector.extract_strided_slice %1050 {offsets = [1, 2], sizes = [15, 15], strides = [1, 1]} : vector<17x17xf32> to vector<15x15xf32>
      %cst_460 = arith.constant -0.333333343 : f32
      %1072 = vector.broadcast %cst_460 : f32 to vector<15x15xf32>
      %1073 = arith.mulf %1072, %1071 : vector<15x15xf32>
      %1074 = arith.addf %1070, %1073 : vector<15x15xf32>
      %1075 = vector.extract_strided_slice %1050 {offsets = [2, 0], sizes = [15, 15], strides = [1, 1]} : vector<17x17xf32> to vector<15x15xf32>
      %cst_461 = arith.constant -0.333333343 : f32
      %1076 = vector.broadcast %cst_461 : f32 to vector<15x15xf32>
      %1077 = arith.mulf %1076, %1075 : vector<15x15xf32>
      %1078 = arith.addf %1074, %1077 : vector<15x15xf32>
      %1079 = vector.extract_strided_slice %1050 {offsets = [2, 1], sizes = [15, 15], strides = [1, 1]} : vector<17x17xf32> to vector<15x15xf32>
      %cst_462 = arith.constant -0.333333343 : f32
      %1080 = vector.broadcast %cst_462 : f32 to vector<15x15xf32>
      %1081 = arith.mulf %1080, %1079 : vector<15x15xf32>
      %1082 = arith.addf %1078, %1081 : vector<15x15xf32>
      %1083 = vector.extract_strided_slice %1050 {offsets = [2, 2], sizes = [15, 15], strides = [1, 1]} : vector<17x17xf32> to vector<15x15xf32>
      %cst_463 = arith.constant -0.333333343 : f32
      %1084 = vector.broadcast %cst_463 : f32 to vector<15x15xf32>
      %1085 = arith.mulf %1084, %1083 : vector<15x15xf32>
      %1086 = arith.addf %1082, %1085 : vector<15x15xf32>
      %1087 = vector.extract_strided_slice %1050 {offsets = [1, 1], sizes = [15, 15], strides = [1, 1]} : vector<17x17xf32> to vector<15x15xf32>
      %1088 = vector.extract_strided_slice %1051 {offsets = [1, 1], sizes = [15, 15], strides = [1, 1]} : vector<17x17xf32> to vector<15x15xf32>
      %1089 = arith.subf %1088, %1086 : vector<15x15xf32>
      %cst_464 = arith.constant 2.500000e-01 : f32
      %1090 = vector.broadcast %cst_464 : f32 to vector<15x15xf32>
      %1091 = arith.mulf %1090, %1089 : vector<15x15xf32>
      %1092 = arith.addf %1087, %1091 : vector<15x15xf32>
      %c1_465 = arith.constant 1 : index
      %c1_466 = arith.constant 1 : index
      %1093 = vector.load %arg6[%c1_465, %c1_466] : memref<17x17xf32, #tpu.memory_space<vmem>>, vector<15x15xf32>
      tpu.vector_store %arg6[%c1_465, %c1_466], %1092 {strides = array<i32>} : memref<17x17xf32, #tpu.memory_space<vmem>>, vector<15x15xf32>,
      %c0_467 = arith.constant 0 : index
      %c0_468 = arith.constant 0 : index
      %1094 = vector.load %arg6[%c0_467, %c0_468] : memref<17x17xf32, #tpu.memory_space<vmem>>, vector<17x17xf32>
      %c0_469 = arith.constant 0 : index
      %c0_470 = arith.constant 0 : index
      %1095 = vector.load %arg7[%c0_469, %c0_470] : memref<17x17xf32, #tpu.memory_space<vmem>>, vector<17x17xf32>
      %1096 = vector.extract_strided_slice %1095 {offsets = [1, 1], sizes = [15, 15], strides = [1, 1]} : vector<17x17xf32> to vector<15x15xf32>
      %1097 = vector.extract_strided_slice %1094 {offsets = [0, 0], sizes = [15, 15], strides = [1, 1]} : vector<17x17xf32> to vector<15x15xf32>
      %cst_471 = arith.constant -0.333333343 : f32
      %1098 = vector.broadcast %cst_471 : f32 to vector<15x15xf32>
      %1099 = arith.mulf %1098, %1097 : vector<15x15xf32>
      %1100 = vector.extract_strided_slice %1094 {offsets = [0, 1], sizes = [15, 15], strides = [1, 1]} : vector<17x17xf32> to vector<15x15xf32>
      %cst_472 = arith.constant -0.333333343 : f32
      %1101 = vector.broadcast %cst_472 : f32 to vector<15x15xf32>
      %1102 = arith.mulf %1101, %1100 : vector<15x15xf32>
      %1103 = arith.addf %1099, %1102 : vector<15x15xf32>
      %1104 = vector.extract_strided_slice %1094 {offsets = [0, 2], sizes = [15, 15], strides = [1, 1]} : vector<17x17xf32> to vector<15x15xf32>
      %cst_473 = arith.constant -0.333333343 : f32
      %1105 = vector.broadcast %cst_473 : f32 to vector<15x15xf32>
      %1106 = arith.mulf %1105, %1104 : vector<15x15xf32>
      %1107 = arith.addf %1103, %1106 : vector<15x15xf32>
      %1108 = vector.extract_strided_slice %1094 {offsets = [1, 0], sizes = [15, 15], strides = [1, 1]} : vector<17x17xf32> to vector<15x15xf32>
      %cst_474 = arith.constant -0.333333343 : f32
      %1109 = vector.broadcast %cst_474 : f32 to vector<15x15xf32>
      %1110 = arith.mulf %1109, %1108 : vector<15x15xf32>
      %1111 = arith.addf %1107, %1110 : vector<15x15xf32>
      %1112 = vector.extract_strided_slice %1094 {offsets = [1, 1], sizes = [15, 15], strides = [1, 1]} : vector<17x17xf32> to vector<15x15xf32>
      %cst_475 = arith.constant 2.66666675 : f32
      %1113 = vector.broadcast %cst_475 : f32 to vector<15x15xf32>
      %1114 = arith.mulf %1113, %1112 : vector<15x15xf32>
      %1115 = arith.addf %1111, %1114 : vector<15x15xf32>
      %1116 = vector.extract_strided_slice %1094 {offsets = [1, 2], sizes = [15, 15], strides = [1, 1]} : vector<17x17xf32> to vector<15x15xf32>
      %cst_476 = arith.constant -0.333333343 : f32
      %1117 = vector.broadcast %cst_476 : f32 to vector<15x15xf32>
      %1118 = arith.mulf %1117, %1116 : vector<15x15xf32>
      %1119 = arith.addf %1115, %1118 : vector<15x15xf32>
      %1120 = vector.extract_strided_slice %1094 {offsets = [2, 0], sizes = [15, 15], strides = [1, 1]} : vector<17x17xf32> to vector<15x15xf32>
      %cst_477 = arith.constant -0.333333343 : f32
      %1121 = vector.broadcast %cst_477 : f32 to vector<15x15xf32>
      %1122 = arith.mulf %1121, %1120 : vector<15x15xf32>
      %1123 = arith.addf %1119, %1122 : vector<15x15xf32>
      %1124 = vector.extract_strided_slice %1094 {offsets = [2, 1], sizes = [15, 15], strides = [1, 1]} : vector<17x17xf32> to vector<15x15xf32>
      %cst_478 = arith.constant -0.333333343 : f32
      %1125 = vector.broadcast %cst_478 : f32 to vector<15x15xf32>
      %1126 = arith.mulf %1125, %1124 : vector<15x15xf32>
      %1127 = arith.addf %1123, %1126 : vector<15x15xf32>
      %1128 = vector.extract_strided_slice %1094 {offsets = [2, 2], sizes = [15, 15], strides = [1, 1]} : vector<17x17xf32> to vector<15x15xf32>
      %cst_479 = arith.constant -0.333333343 : f32
      %1129 = vector.broadcast %cst_479 : f32 to vector<15x15xf32>
      %1130 = arith.mulf %1129, %1128 : vector<15x15xf32>
      %1131 = arith.addf %1127, %1130 : vector<15x15xf32>
      %1132 = arith.subf %1096, %1131 : vector<15x15xf32>
      %cst_480 = arith.constant dense<0.000000e+00> : vector<9x15xf32>
      %1133 = tpu.matmul %17, %1132, %cst_480 {dimension_numbers = #tpu.dot_dimension_numbers<[1], [0], [0], [1], [0, 0, 1, 1], [], []>} : vector<9x15xf32>, vector<15x15xf32>, vector<9x15xf32> -> vector<9x15xf32>
      %cst_481 = arith.constant dense<0.000000e+00> : vector<9x9xf32>
      %1134 = tpu.matmul %1133, %61, %cst_481 {dimension_numbers = #tpu.dot_dimension_numbers<[1], [0], [0], [1], [0, 0, 1, 1], [], []>} : vector<9x15xf32>, vector<15x9xf32>, vector<9x9xf32> -> vector<9x9xf32>
      %cst_482 = arith.constant dense<0.000000e+00> : vector<9x15xf32>
      %1135 = tpu.matmul %127, %1132, %cst_482 {dimension_numbers = #tpu.dot_dimension_numbers<[1], [0], [0], [1], [0, 0, 1, 1], [], []>} : vector<9x15xf32>, vector<15x15xf32>, vector<9x15xf32> -> vector<9x15xf32>
      %cst_483 = arith.constant dense<0.000000e+00> : vector<9x9xf32>
      %1136 = tpu.matmul %1135, %171, %cst_483 {dimension_numbers = #tpu.dot_dimension_numbers<[1], [0], [0], [1], [0, 0, 1, 1], [], []>} : vector<9x15xf32>, vector<15x9xf32>, vector<9x9xf32> -> vector<9x9xf32>
      %1137 = arith.addf %1134, %1136 : vector<9x9xf32>
      %cst_484 = arith.constant dense<0.000000e+00> : vector<9x15xf32>
      %1138 = tpu.matmul %237, %1132, %cst_484 {dimension_numbers = #tpu.dot_dimension_numbers<[1], [0], [0], [1], [0, 0, 1, 1], [], []>} : vector<9x15xf32>, vector<15x15xf32>, vector<9x15xf32> -> vector<9x15xf32>
      %cst_485 = arith.constant dense<0.000000e+00> : vector<9x9xf32>
      %1139 = tpu.matmul %1138, %281, %cst_485 {dimension_numbers = #tpu.dot_dimension_numbers<[1], [0], [0], [1], [0, 0, 1, 1], [], []>} : vector<9x15xf32>, vector<15x9xf32>, vector<9x9xf32> -> vector<9x9xf32>
      %1140 = arith.addf %1137, %1139 : vector<9x9xf32>
      %c0_486 = arith.constant 0 : index
      %c0_487 = arith.constant 0 : index
      %1141 = vector.load %arg9[%c0_486, %c0_487] : memref<9x9xf32, #tpu.memory_space<vmem>>, vector<9x9xf32>
      tpu.vector_store %arg9[%c0_486, %c0_487], %1140 {strides = array<i32>} : memref<9x9xf32, #tpu.memory_space<vmem>>, vector<9x9xf32>,
      %cst_488 = arith.constant 0.000000e+00 : f32
      %1142 = vector.broadcast %cst_488 : f32 to vector<9x9xf32>
      %c0_489 = arith.constant 0 : index
      %c0_490 = arith.constant 0 : index
      %1143 = vector.load %arg8[%c0_489, %c0_490] : memref<9x9xf32, #tpu.memory_space<vmem>>, vector<9x9xf32>
      tpu.vector_store %arg8[%c0_489, %c0_490], %1142 {strides = array<i32>} : memref<9x9xf32, #tpu.memory_space<vmem>>, vector<9x9xf32>,
      %c0_491 = arith.constant 0 : index
      %c0_492 = arith.constant 0 : index
      %1144 = vector.load %arg8[%c0_491, %c0_492] : memref<9x9xf32, #tpu.memory_space<vmem>>, vector<9x9xf32>
      %c0_493 = arith.constant 0 : index
      %c0_494 = arith.constant 0 : index
      %1145 = vector.load %arg9[%c0_493, %c0_494] : memref<9x9xf32, #tpu.memory_space<vmem>>, vector<9x9xf32>
      %1146 = vector.extract_strided_slice %1144 {offsets = [0, 0], sizes = [7, 7], strides = [1, 1]} : vector<9x9xf32> to vector<7x7xf32>
      %cst_495 = arith.constant -0.333333343 : f32
      %1147 = vector.broadcast %cst_495 : f32 to vector<7x7xf32>
      %1148 = arith.mulf %1147, %1146 : vector<7x7xf32>
      %1149 = vector.extract_strided_slice %1144 {offsets = [0, 1], sizes = [7, 7], strides = [1, 1]} : vector<9x9xf32> to vector<7x7xf32>
      %cst_496 = arith.constant -0.333333343 : f32
      %1150 = vector.broadcast %cst_496 : f32 to vector<7x7xf32>
      %1151 = arith.mulf %1150, %1149 : vector<7x7xf32>
      %1152 = arith.addf %1148, %1151 : vector<7x7xf32>
      %1153 = vector.extract_strided_slice %1144 {offsets = [0, 2], sizes = [7, 7], strides = [1, 1]} : vector<9x9xf32> to vector<7x7xf32>
      %cst_497 = arith.constant -0.333333343 : f32
      %1154 = vector.broadcast %cst_497 : f32 to vector<7x7xf32>
      %1155 = arith.mulf %1154, %1153 : vector<7x7xf32>
      %1156 = arith.addf %1152, %1155 : vector<7x7xf32>
      %1157 = vector.extract_strided_slice %1144 {offsets = [1, 0], sizes = [7, 7], strides = [1, 1]} : vector<9x9xf32> to vector<7x7xf32>
      %cst_498 = arith.constant -0.333333343 : f32
      %1158 = vector.broadcast %cst_498 : f32 to vector<7x7xf32>
      %1159 = arith.mulf %1158, %1157 : vector<7x7xf32>
      %1160 = arith.addf %1156, %1159 : vector<7x7xf32>
      %1161 = vector.extract_strided_slice %1144 {offsets = [1, 1], sizes = [7, 7], strides = [1, 1]} : vector<9x9xf32> to vector<7x7xf32>
      %cst_499 = arith.constant 2.66666675 : f32
      %1162 = vector.broadcast %cst_499 : f32 to vector<7x7xf32>
      %1163 = arith.mulf %1162, %1161 : vector<7x7xf32>
      %1164 = arith.addf %1160, %1163 : vector<7x7xf32>
      %1165 = vector.extract_strided_slice %1144 {offsets = [1, 2], sizes = [7, 7], strides = [1, 1]} : vector<9x9xf32> to vector<7x7xf32>
      %cst_500 = arith.constant -0.333333343 : f32
      %1166 = vector.broadcast %cst_500 : f32 to vector<7x7xf32>
      %1167 = arith.mulf %1166, %1165 : vector<7x7xf32>
      %1168 = arith.addf %1164, %1167 : vector<7x7xf32>
      %1169 = vector.extract_strided_slice %1144 {offsets = [2, 0], sizes = [7, 7], strides = [1, 1]} : vector<9x9xf32> to vector<7x7xf32>
      %cst_501 = arith.constant -0.333333343 : f32
      %1170 = vector.broadcast %cst_501 : f32 to vector<7x7xf32>
      %1171 = arith.mulf %1170, %1169 : vector<7x7xf32>
      %1172 = arith.addf %1168, %1171 : vector<7x7xf32>
      %1173 = vector.extract_strided_slice %1144 {offsets = [2, 1], sizes = [7, 7], strides = [1, 1]} : vector<9x9xf32> to vector<7x7xf32>
      %cst_502 = arith.constant -0.333333343 : f32
      %1174 = vector.broadcast %cst_502 : f32 to vector<7x7xf32>
      %1175 = arith.mulf %1174, %1173 : vector<7x7xf32>
      %1176 = arith.addf %1172, %1175 : vector<7x7xf32>
      %1177 = vector.extract_strided_slice %1144 {offsets = [2, 2], sizes = [7, 7], strides = [1, 1]} : vector<9x9xf32> to vector<7x7xf32>
      %cst_503 = arith.constant -0.333333343 : f32
      %1178 = vector.broadcast %cst_503 : f32 to vector<7x7xf32>
      %1179 = arith.mulf %1178, %1177 : vector<7x7xf32>
      %1180 = arith.addf %1176, %1179 : vector<7x7xf32>
      %1181 = vector.extract_strided_slice %1144 {offsets = [1, 1], sizes = [7, 7], strides = [1, 1]} : vector<9x9xf32> to vector<7x7xf32>
      %1182 = vector.extract_strided_slice %1145 {offsets = [1, 1], sizes = [7, 7], strides = [1, 1]} : vector<9x9xf32> to vector<7x7xf32>
      %1183 = arith.subf %1182, %1180 : vector<7x7xf32>
      %cst_504 = arith.constant 2.500000e-01 : f32
      %1184 = vector.broadcast %cst_504 : f32 to vector<7x7xf32>
      %1185 = arith.mulf %1184, %1183 : vector<7x7xf32>
      %1186 = arith.addf %1181, %1185 : vector<7x7xf32>
      %c1_505 = arith.constant 1 : index
      %c1_506 = arith.constant 1 : index
      %1187 = vector.load %arg8[%c1_505, %c1_506] : memref<9x9xf32, #tpu.memory_space<vmem>>, vector<7x7xf32>
      tpu.vector_store %arg8[%c1_505, %c1_506], %1186 {strides = array<i32>} : memref<9x9xf32, #tpu.memory_space<vmem>>, vector<7x7xf32>,
      %c0_507 = arith.constant 0 : index
      %c0_508 = arith.constant 0 : index
      %1188 = vector.load %arg8[%c0_507, %c0_508] : memref<9x9xf32, #tpu.memory_space<vmem>>, vector<9x9xf32>
      %c0_509 = arith.constant 0 : index
      %c0_510 = arith.constant 0 : index
      %1189 = vector.load %arg9[%c0_509, %c0_510] : memref<9x9xf32, #tpu.memory_space<vmem>>, vector<9x9xf32>
      %1190 = vector.extract_strided_slice %1189 {offsets = [1, 1], sizes = [7, 7], strides = [1, 1]} : vector<9x9xf32> to vector<7x7xf32>
      %1191 = vector.extract_strided_slice %1188 {offsets = [0, 0], sizes = [7, 7], strides = [1, 1]} : vector<9x9xf32> to vector<7x7xf32>
      %cst_511 = arith.constant -0.333333343 : f32
      %1192 = vector.broadcast %cst_511 : f32 to vector<7x7xf32>
      %1193 = arith.mulf %1192, %1191 : vector<7x7xf32>
      %1194 = vector.extract_strided_slice %1188 {offsets = [0, 1], sizes = [7, 7], strides = [1, 1]} : vector<9x9xf32> to vector<7x7xf32>
      %cst_512 = arith.constant -0.333333343 : f32
      %1195 = vector.broadcast %cst_512 : f32 to vector<7x7xf32>
      %1196 = arith.mulf %1195, %1194 : vector<7x7xf32>
      %1197 = arith.addf %1193, %1196 : vector<7x7xf32>
      %1198 = vector.extract_strided_slice %1188 {offsets = [0, 2], sizes = [7, 7], strides = [1, 1]} : vector<9x9xf32> to vector<7x7xf32>
      %cst_513 = arith.constant -0.333333343 : f32
      %1199 = vector.broadcast %cst_513 : f32 to vector<7x7xf32>
      %1200 = arith.mulf %1199, %1198 : vector<7x7xf32>
      %1201 = arith.addf %1197, %1200 : vector<7x7xf32>
      %1202 = vector.extract_strided_slice %1188 {offsets = [1, 0], sizes = [7, 7], strides = [1, 1]} : vector<9x9xf32> to vector<7x7xf32>
      %cst_514 = arith.constant -0.333333343 : f32
      %1203 = vector.broadcast %cst_514 : f32 to vector<7x7xf32>
      %1204 = arith.mulf %1203, %1202 : vector<7x7xf32>
      %1205 = arith.addf %1201, %1204 : vector<7x7xf32>
      %1206 = vector.extract_strided_slice %1188 {offsets = [1, 1], sizes = [7, 7], strides = [1, 1]} : vector<9x9xf32> to vector<7x7xf32>
      %cst_515 = arith.constant 2.66666675 : f32
      %1207 = vector.broadcast %cst_515 : f32 to vector<7x7xf32>
      %1208 = arith.mulf %1207, %1206 : vector<7x7xf32>
      %1209 = arith.addf %1205, %1208 : vector<7x7xf32>
      %1210 = vector.extract_strided_slice %1188 {offsets = [1, 2], sizes = [7, 7], strides = [1, 1]} : vector<9x9xf32> to vector<7x7xf32>
      %cst_516 = arith.constant -0.333333343 : f32
      %1211 = vector.broadcast %cst_516 : f32 to vector<7x7xf32>
      %1212 = arith.mulf %1211, %1210 : vector<7x7xf32>
      %1213 = arith.addf %1209, %1212 : vector<7x7xf32>
      %1214 = vector.extract_strided_slice %1188 {offsets = [2, 0], sizes = [7, 7], strides = [1, 1]} : vector<9x9xf32> to vector<7x7xf32>
      %cst_517 = arith.constant -0.333333343 : f32
      %1215 = vector.broadcast %cst_517 : f32 to vector<7x7xf32>
      %1216 = arith.mulf %1215, %1214 : vector<7x7xf32>
      %1217 = arith.addf %1213, %1216 : vector<7x7xf32>
      %1218 = vector.extract_strided_slice %1188 {offsets = [2, 1], sizes = [7, 7], strides = [1, 1]} : vector<9x9xf32> to vector<7x7xf32>
      %cst_518 = arith.constant -0.333333343 : f32
      %1219 = vector.broadcast %cst_518 : f32 to vector<7x7xf32>
      %1220 = arith.mulf %1219, %1218 : vector<7x7xf32>
      %1221 = arith.addf %1217, %1220 : vector<7x7xf32>
      %1222 = vector.extract_strided_slice %1188 {offsets = [2, 2], sizes = [7, 7], strides = [1, 1]} : vector<9x9xf32> to vector<7x7xf32>
      %cst_519 = arith.constant -0.333333343 : f32
      %1223 = vector.broadcast %cst_519 : f32 to vector<7x7xf32>
      %1224 = arith.mulf %1223, %1222 : vector<7x7xf32>
      %1225 = arith.addf %1221, %1224 : vector<7x7xf32>
      %1226 = arith.subf %1190, %1225 : vector<7x7xf32>
      %cst_520 = arith.constant dense<0.000000e+00> : vector<5x7xf32>
      %1227 = tpu.matmul %347, %1226, %cst_520 {dimension_numbers = #tpu.dot_dimension_numbers<[1], [0], [0], [1], [0, 0, 1, 1], [], []>} : vector<5x7xf32>, vector<7x7xf32>, vector<5x7xf32> -> vector<5x7xf32>
      %cst_521 = arith.constant dense<0.000000e+00> : vector<5x5xf32>
      %1228 = tpu.matmul %1227, %391, %cst_521 {dimension_numbers = #tpu.dot_dimension_numbers<[1], [0], [0], [1], [0, 0, 1, 1], [], []>} : vector<5x7xf32>, vector<7x5xf32>, vector<5x5xf32> -> vector<5x5xf32>
      %cst_522 = arith.constant dense<0.000000e+00> : vector<5x7xf32>
      %1229 = tpu.matmul %457, %1226, %cst_522 {dimension_numbers = #tpu.dot_dimension_numbers<[1], [0], [0], [1], [0, 0, 1, 1], [], []>} : vector<5x7xf32>, vector<7x7xf32>, vector<5x7xf32> -> vector<5x7xf32>
      %cst_523 = arith.constant dense<0.000000e+00> : vector<5x5xf32>
      %1230 = tpu.matmul %1229, %501, %cst_523 {dimension_numbers = #tpu.dot_dimension_numbers<[1], [0], [0], [1], [0, 0, 1, 1], [], []>} : vector<5x7xf32>, vector<7x5xf32>, vector<5x5xf32> -> vector<5x5xf32>
      %1231 = arith.addf %1228, %1230 : vector<5x5xf32>
      %cst_524 = arith.constant dense<0.000000e+00> : vector<5x7xf32>
      %1232 = tpu.matmul %567, %1226, %cst_524 {dimension_numbers = #tpu.dot_dimension_numbers<[1], [0], [0], [1], [0, 0, 1, 1], [], []>} : vector<5x7xf32>, vector<7x7xf32>, vector<5x7xf32> -> vector<5x7xf32>
      %cst_525 = arith.constant dense<0.000000e+00> : vector<5x5xf32>
      %1233 = tpu.matmul %1232, %611, %cst_525 {dimension_numbers = #tpu.dot_dimension_numbers<[1], [0], [0], [1], [0, 0, 1, 1], [], []>} : vector<5x7xf32>, vector<7x5xf32>, vector<5x5xf32> -> vector<5x5xf32>
      %1234 = arith.addf %1231, %1233 : vector<5x5xf32>
      %c0_526 = arith.constant 0 : index
      %c0_527 = arith.constant 0 : index
      %1235 = vector.load %arg11[%c0_526, %c0_527] : memref<5x5xf32, #tpu.memory_space<vmem>>, vector<5x5xf32>
      tpu.vector_store %arg11[%c0_526, %c0_527], %1234 {strides = array<i32>} : memref<5x5xf32, #tpu.memory_space<vmem>>, vector<5x5xf32>,
      %cst_528 = arith.constant 0.000000e+00 : f32
      %1236 = vector.broadcast %cst_528 : f32 to vector<5x5xf32>
      %c0_529 = arith.constant 0 : index
      %c0_530 = arith.constant 0 : index
      %1237 = vector.load %arg10[%c0_529, %c0_530] : memref<5x5xf32, #tpu.memory_space<vmem>>, vector<5x5xf32>
      tpu.vector_store %arg10[%c0_529, %c0_530], %1236 {strides = array<i32>} : memref<5x5xf32, #tpu.memory_space<vmem>>, vector<5x5xf32>,
      %c0_531 = arith.constant 0 : index
      %c0_532 = arith.constant 0 : index
      %1238 = vector.load %arg10[%c0_531, %c0_532] : memref<5x5xf32, #tpu.memory_space<vmem>>, vector<5x5xf32>
      %c0_533 = arith.constant 0 : index
      %c0_534 = arith.constant 0 : index
      %1239 = vector.load %arg11[%c0_533, %c0_534] : memref<5x5xf32, #tpu.memory_space<vmem>>, vector<5x5xf32>
      %1240 = vector.extract_strided_slice %1238 {offsets = [0, 0], sizes = [3, 3], strides = [1, 1]} : vector<5x5xf32> to vector<3x3xf32>
      %cst_535 = arith.constant -0.333333343 : f32
      %1241 = vector.broadcast %cst_535 : f32 to vector<3x3xf32>
      %1242 = arith.mulf %1241, %1240 : vector<3x3xf32>
      %1243 = vector.extract_strided_slice %1238 {offsets = [0, 1], sizes = [3, 3], strides = [1, 1]} : vector<5x5xf32> to vector<3x3xf32>
      %cst_536 = arith.constant -0.333333343 : f32
      %1244 = vector.broadcast %cst_536 : f32 to vector<3x3xf32>
      %1245 = arith.mulf %1244, %1243 : vector<3x3xf32>
      %1246 = arith.addf %1242, %1245 : vector<3x3xf32>
      %1247 = vector.extract_strided_slice %1238 {offsets = [0, 2], sizes = [3, 3], strides = [1, 1]} : vector<5x5xf32> to vector<3x3xf32>
      %cst_537 = arith.constant -0.333333343 : f32
      %1248 = vector.broadcast %cst_537 : f32 to vector<3x3xf32>
      %1249 = arith.mulf %1248, %1247 : vector<3x3xf32>
      %1250 = arith.addf %1246, %1249 : vector<3x3xf32>
      %1251 = vector.extract_strided_slice %1238 {offsets = [1, 0], sizes = [3, 3], strides = [1, 1]} : vector<5x5xf32> to vector<3x3xf32>
      %cst_538 = arith.constant -0.333333343 : f32
      %1252 = vector.broadcast %cst_538 : f32 to vector<3x3xf32>
      %1253 = arith.mulf %1252, %1251 : vector<3x3xf32>
      %1254 = arith.addf %1250, %1253 : vector<3x3xf32>
      %1255 = vector.extract_strided_slice %1238 {offsets = [1, 1], sizes = [3, 3], strides = [1, 1]} : vector<5x5xf32> to vector<3x3xf32>
      %cst_539 = arith.constant 2.66666675 : f32
      %1256 = vector.broadcast %cst_539 : f32 to vector<3x3xf32>
      %1257 = arith.mulf %1256, %1255 : vector<3x3xf32>
      %1258 = arith.addf %1254, %1257 : vector<3x3xf32>
      %1259 = vector.extract_strided_slice %1238 {offsets = [1, 2], sizes = [3, 3], strides = [1, 1]} : vector<5x5xf32> to vector<3x3xf32>
      %cst_540 = arith.constant -0.333333343 : f32
      %1260 = vector.broadcast %cst_540 : f32 to vector<3x3xf32>
      %1261 = arith.mulf %1260, %1259 : vector<3x3xf32>
      %1262 = arith.addf %1258, %1261 : vector<3x3xf32>
      %1263 = vector.extract_strided_slice %1238 {offsets = [2, 0], sizes = [3, 3], strides = [1, 1]} : vector<5x5xf32> to vector<3x3xf32>
      %cst_541 = arith.constant -0.333333343 : f32
      %1264 = vector.broadcast %cst_541 : f32 to vector<3x3xf32>
      %1265 = arith.mulf %1264, %1263 : vector<3x3xf32>
      %1266 = arith.addf %1262, %1265 : vector<3x3xf32>
      %1267 = vector.extract_strided_slice %1238 {offsets = [2, 1], sizes = [3, 3], strides = [1, 1]} : vector<5x5xf32> to vector<3x3xf32>
      %cst_542 = arith.constant -0.333333343 : f32
      %1268 = vector.broadcast %cst_542 : f32 to vector<3x3xf32>
      %1269 = arith.mulf %1268, %1267 : vector<3x3xf32>
      %1270 = arith.addf %1266, %1269 : vector<3x3xf32>
      %1271 = vector.extract_strided_slice %1238 {offsets = [2, 2], sizes = [3, 3], strides = [1, 1]} : vector<5x5xf32> to vector<3x3xf32>
      %cst_543 = arith.constant -0.333333343 : f32
      %1272 = vector.broadcast %cst_543 : f32 to vector<3x3xf32>
      %1273 = arith.mulf %1272, %1271 : vector<3x3xf32>
      %1274 = arith.addf %1270, %1273 : vector<3x3xf32>
      %1275 = vector.extract_strided_slice %1238 {offsets = [1, 1], sizes = [3, 3], strides = [1, 1]} : vector<5x5xf32> to vector<3x3xf32>
      %1276 = vector.extract_strided_slice %1239 {offsets = [1, 1], sizes = [3, 3], strides = [1, 1]} : vector<5x5xf32> to vector<3x3xf32>
      %1277 = arith.subf %1276, %1274 : vector<3x3xf32>
      %cst_544 = arith.constant 2.500000e-01 : f32
      %1278 = vector.broadcast %cst_544 : f32 to vector<3x3xf32>
      %1279 = arith.mulf %1278, %1277 : vector<3x3xf32>
      %1280 = arith.addf %1275, %1279 : vector<3x3xf32>
      %c1_545 = arith.constant 1 : index
      %c1_546 = arith.constant 1 : index
      %1281 = vector.load %arg10[%c1_545, %c1_546] : memref<5x5xf32, #tpu.memory_space<vmem>>, vector<3x3xf32>
      tpu.vector_store %arg10[%c1_545, %c1_546], %1280 {strides = array<i32>} : memref<5x5xf32, #tpu.memory_space<vmem>>, vector<3x3xf32>,
      %c0_547 = arith.constant 0 : index
      %c0_548 = arith.constant 0 : index
      %1282 = vector.load %arg10[%c0_547, %c0_548] : memref<5x5xf32, #tpu.memory_space<vmem>>, vector<5x5xf32>
      %c0_549 = arith.constant 0 : index
      %c0_550 = arith.constant 0 : index
      %1283 = vector.load %arg11[%c0_549, %c0_550] : memref<5x5xf32, #tpu.memory_space<vmem>>, vector<5x5xf32>
      %1284 = vector.extract_strided_slice %1283 {offsets = [1, 1], sizes = [3, 3], strides = [1, 1]} : vector<5x5xf32> to vector<3x3xf32>
      %1285 = vector.extract_strided_slice %1282 {offsets = [0, 0], sizes = [3, 3], strides = [1, 1]} : vector<5x5xf32> to vector<3x3xf32>
      %cst_551 = arith.constant -0.333333343 : f32
      %1286 = vector.broadcast %cst_551 : f32 to vector<3x3xf32>
      %1287 = arith.mulf %1286, %1285 : vector<3x3xf32>
      %1288 = vector.extract_strided_slice %1282 {offsets = [0, 1], sizes = [3, 3], strides = [1, 1]} : vector<5x5xf32> to vector<3x3xf32>
      %cst_552 = arith.constant -0.333333343 : f32
      %1289 = vector.broadcast %cst_552 : f32 to vector<3x3xf32>
      %1290 = arith.mulf %1289, %1288 : vector<3x3xf32>
      %1291 = arith.addf %1287, %1290 : vector<3x3xf32>
      %1292 = vector.extract_strided_slice %1282 {offsets = [0, 2], sizes = [3, 3], strides = [1, 1]} : vector<5x5xf32> to vector<3x3xf32>
      %cst_553 = arith.constant -0.333333343 : f32
      %1293 = vector.broadcast %cst_553 : f32 to vector<3x3xf32>
      %1294 = arith.mulf %1293, %1292 : vector<3x3xf32>
      %1295 = arith.addf %1291, %1294 : vector<3x3xf32>
      %1296 = vector.extract_strided_slice %1282 {offsets = [1, 0], sizes = [3, 3], strides = [1, 1]} : vector<5x5xf32> to vector<3x3xf32>
      %cst_554 = arith.constant -0.333333343 : f32
      %1297 = vector.broadcast %cst_554 : f32 to vector<3x3xf32>
      %1298 = arith.mulf %1297, %1296 : vector<3x3xf32>
      %1299 = arith.addf %1295, %1298 : vector<3x3xf32>
      %1300 = vector.extract_strided_slice %1282 {offsets = [1, 1], sizes = [3, 3], strides = [1, 1]} : vector<5x5xf32> to vector<3x3xf32>
      %cst_555 = arith.constant 2.66666675 : f32
      %1301 = vector.broadcast %cst_555 : f32 to vector<3x3xf32>
      %1302 = arith.mulf %1301, %1300 : vector<3x3xf32>
      %1303 = arith.addf %1299, %1302 : vector<3x3xf32>
      %1304 = vector.extract_strided_slice %1282 {offsets = [1, 2], sizes = [3, 3], strides = [1, 1]} : vector<5x5xf32> to vector<3x3xf32>
      %cst_556 = arith.constant -0.333333343 : f32
      %1305 = vector.broadcast %cst_556 : f32 to vector<3x3xf32>
      %1306 = arith.mulf %1305, %1304 : vector<3x3xf32>
      %1307 = arith.addf %1303, %1306 : vector<3x3xf32>
      %1308 = vector.extract_strided_slice %1282 {offsets = [2, 0], sizes = [3, 3], strides = [1, 1]} : vector<5x5xf32> to vector<3x3xf32>
      %cst_557 = arith.constant -0.333333343 : f32
      %1309 = vector.broadcast %cst_557 : f32 to vector<3x3xf32>
      %1310 = arith.mulf %1309, %1308 : vector<3x3xf32>
      %1311 = arith.addf %1307, %1310 : vector<3x3xf32>
      %1312 = vector.extract_strided_slice %1282 {offsets = [2, 1], sizes = [3, 3], strides = [1, 1]} : vector<5x5xf32> to vector<3x3xf32>
      %cst_558 = arith.constant -0.333333343 : f32
      %1313 = vector.broadcast %cst_558 : f32 to vector<3x3xf32>
      %1314 = arith.mulf %1313, %1312 : vector<3x3xf32>
      %1315 = arith.addf %1311, %1314 : vector<3x3xf32>
      %1316 = vector.extract_strided_slice %1282 {offsets = [2, 2], sizes = [3, 3], strides = [1, 1]} : vector<5x5xf32> to vector<3x3xf32>
      %cst_559 = arith.constant -0.333333343 : f32
      %1317 = vector.broadcast %cst_559 : f32 to vector<3x3xf32>
      %1318 = arith.mulf %1317, %1316 : vector<3x3xf32>
      %1319 = arith.addf %1315, %1318 : vector<3x3xf32>
      %1320 = arith.subf %1284, %1319 : vector<3x3xf32>
      %cst_560 = arith.constant dense<0.000000e+00> : vector<3x3xf32>
      %1321 = tpu.matmul %677, %1320, %cst_560 {dimension_numbers = #tpu.dot_dimension_numbers<[1], [0], [0], [1], [0, 0, 1, 1], [], []>} : vector<3x3xf32>, vector<3x3xf32>, vector<3x3xf32> -> vector<3x3xf32>
      %cst_561 = arith.constant dense<0.000000e+00> : vector<3x3xf32>
      %1322 = tpu.matmul %1321, %721, %cst_561 {dimension_numbers = #tpu.dot_dimension_numbers<[1], [0], [0], [1], [0, 0, 1, 1], [], []>} : vector<3x3xf32>, vector<3x3xf32>, vector<3x3xf32> -> vector<3x3xf32>
      %cst_562 = arith.constant dense<0.000000e+00> : vector<3x3xf32>
      %1323 = tpu.matmul %787, %1320, %cst_562 {dimension_numbers = #tpu.dot_dimension_numbers<[1], [0], [0], [1], [0, 0, 1, 1], [], []>} : vector<3x3xf32>, vector<3x3xf32>, vector<3x3xf32> -> vector<3x3xf32>
      %cst_563 = arith.constant dense<0.000000e+00> : vector<3x3xf32>
      %1324 = tpu.matmul %1323, %831, %cst_563 {dimension_numbers = #tpu.dot_dimension_numbers<[1], [0], [0], [1], [0, 0, 1, 1], [], []>} : vector<3x3xf32>, vector<3x3xf32>, vector<3x3xf32> -> vector<3x3xf32>
      %1325 = arith.addf %1322, %1324 : vector<3x3xf32>
      %cst_564 = arith.constant dense<0.000000e+00> : vector<3x3xf32>
      %1326 = tpu.matmul %897, %1320, %cst_564 {dimension_numbers = #tpu.dot_dimension_numbers<[1], [0], [0], [1], [0, 0, 1, 1], [], []>} : vector<3x3xf32>, vector<3x3xf32>, vector<3x3xf32> -> vector<3x3xf32>
      %cst_565 = arith.constant dense<0.000000e+00> : vector<3x3xf32>
      %1327 = tpu.matmul %1326, %941, %cst_565 {dimension_numbers = #tpu.dot_dimension_numbers<[1], [0], [0], [1], [0, 0, 1, 1], [], []>} : vector<3x3xf32>, vector<3x3xf32>, vector<3x3xf32> -> vector<3x3xf32>
      %1328 = arith.addf %1325, %1327 : vector<3x3xf32>
      %c0_566 = arith.constant 0 : index
      %c0_567 = arith.constant 0 : index
      %1329 = vector.load %arg13[%c0_566, %c0_567] : memref<3x3xf32, #tpu.memory_space<vmem>>, vector<3x3xf32>
      tpu.vector_store %arg13[%c0_566, %c0_567], %1328 {strides = array<i32>} : memref<3x3xf32, #tpu.memory_space<vmem>>, vector<3x3xf32>,
      %cst_568 = arith.constant 0.000000e+00 : f32
      %1330 = vector.broadcast %cst_568 : f32 to vector<3x3xf32>
      %c0_569 = arith.constant 0 : index
      %c0_570 = arith.constant 0 : index
      %1331 = vector.load %arg12[%c0_569, %c0_570] : memref<3x3xf32, #tpu.memory_space<vmem>>, vector<3x3xf32>
      tpu.vector_store %arg12[%c0_569, %c0_570], %1330 {strides = array<i32>} : memref<3x3xf32, #tpu.memory_space<vmem>>, vector<3x3xf32>,
      %c0_571 = arith.constant 0 : index
      %c0_572 = arith.constant 0 : index
      %1332 = vector.load %arg12[%c0_571, %c0_572] : memref<3x3xf32, #tpu.memory_space<vmem>>, vector<3x3xf32>
      %c0_573 = arith.constant 0 : index
      %c0_574 = arith.constant 0 : index
      %1333 = vector.load %arg13[%c0_573, %c0_574] : memref<3x3xf32, #tpu.memory_space<vmem>>, vector<3x3xf32>
      %1334 = vector.extract_strided_slice %1332 {offsets = [0, 0], sizes = [1, 1], strides = [1, 1]} : vector<3x3xf32> to vector<1x1xf32>
      %cst_575 = arith.constant -0.333333343 : f32
      %1335 = vector.broadcast %cst_575 : f32 to vector<1x1xf32>
      %1336 = arith.mulf %1335, %1334 : vector<1x1xf32>
      %1337 = vector.extract_strided_slice %1332 {offsets = [0, 1], sizes = [1, 1], strides = [1, 1]} : vector<3x3xf32> to vector<1x1xf32>
      %cst_576 = arith.constant -0.333333343 : f32
      %1338 = vector.broadcast %cst_576 : f32 to vector<1x1xf32>
      %1339 = arith.mulf %1338, %1337 : vector<1x1xf32>
      %1340 = arith.addf %1336, %1339 : vector<1x1xf32>
      %1341 = vector.extract_strided_slice %1332 {offsets = [0, 2], sizes = [1, 1], strides = [1, 1]} : vector<3x3xf32> to vector<1x1xf32>
      %cst_577 = arith.constant -0.333333343 : f32
      %1342 = vector.broadcast %cst_577 : f32 to vector<1x1xf32>
      %1343 = arith.mulf %1342, %1341 : vector<1x1xf32>
      %1344 = arith.addf %1340, %1343 : vector<1x1xf32>
      %1345 = vector.extract_strided_slice %1332 {offsets = [1, 0], sizes = [1, 1], strides = [1, 1]} : vector<3x3xf32> to vector<1x1xf32>
      %cst_578 = arith.constant -0.333333343 : f32
      %1346 = vector.broadcast %cst_578 : f32 to vector<1x1xf32>
      %1347 = arith.mulf %1346, %1345 : vector<1x1xf32>
      %1348 = arith.addf %1344, %1347 : vector<1x1xf32>
      %1349 = vector.extract_strided_slice %1332 {offsets = [1, 1], sizes = [1, 1], strides = [1, 1]} : vector<3x3xf32> to vector<1x1xf32>
      %cst_579 = arith.constant 2.66666675 : f32
      %1350 = vector.broadcast %cst_579 : f32 to vector<1x1xf32>
      %1351 = arith.mulf %1350, %1349 : vector<1x1xf32>
      %1352 = arith.addf %1348, %1351 : vector<1x1xf32>
      %1353 = vector.extract_strided_slice %1332 {offsets = [1, 2], sizes = [1, 1], strides = [1, 1]} : vector<3x3xf32> to vector<1x1xf32>
      %cst_580 = arith.constant -0.333333343 : f32
      %1354 = vector.broadcast %cst_580 : f32 to vector<1x1xf32>
      %1355 = arith.mulf %1354, %1353 : vector<1x1xf32>
      %1356 = arith.addf %1352, %1355 : vector<1x1xf32>
      %1357 = vector.extract_strided_slice %1332 {offsets = [2, 0], sizes = [1, 1], strides = [1, 1]} : vector<3x3xf32> to vector<1x1xf32>
      %cst_581 = arith.constant -0.333333343 : f32
      %1358 = vector.broadcast %cst_581 : f32 to vector<1x1xf32>
      %1359 = arith.mulf %1358, %1357 : vector<1x1xf32>
      %1360 = arith.addf %1356, %1359 : vector<1x1xf32>
      %1361 = vector.extract_strided_slice %1332 {offsets = [2, 1], sizes = [1, 1], strides = [1, 1]} : vector<3x3xf32> to vector<1x1xf32>
      %cst_582 = arith.constant -0.333333343 : f32
      %1362 = vector.broadcast %cst_582 : f32 to vector<1x1xf32>
      %1363 = arith.mulf %1362, %1361 : vector<1x1xf32>
      %1364 = arith.addf %1360, %1363 : vector<1x1xf32>
      %1365 = vector.extract_strided_slice %1332 {offsets = [2, 2], sizes = [1, 1], strides = [1, 1]} : vector<3x3xf32> to vector<1x1xf32>
      %cst_583 = arith.constant -0.333333343 : f32
      %1366 = vector.broadcast %cst_583 : f32 to vector<1x1xf32>
      %1367 = arith.mulf %1366, %1365 : vector<1x1xf32>
      %1368 = arith.addf %1364, %1367 : vector<1x1xf32>
      %1369 = vector.extract_strided_slice %1332 {offsets = [1, 1], sizes = [1, 1], strides = [1, 1]} : vector<3x3xf32> to vector<1x1xf32>
      %1370 = vector.extract_strided_slice %1333 {offsets = [1, 1], sizes = [1, 1], strides = [1, 1]} : vector<3x3xf32> to vector<1x1xf32>
      %1371 = arith.subf %1370, %1368 : vector<1x1xf32>
      %cst_584 = arith.constant 2.500000e-01 : f32
      %1372 = vector.broadcast %cst_584 : f32 to vector<1x1xf32>
      %1373 = arith.mulf %1372, %1371 : vector<1x1xf32>
      %1374 = arith.addf %1369, %1373 : vector<1x1xf32>
      %c1_585 = arith.constant 1 : index
      %c1_586 = arith.constant 1 : index
      %1375 = vector.load %arg12[%c1_585, %c1_586] : memref<3x3xf32, #tpu.memory_space<vmem>>, vector<1x1xf32>
      tpu.vector_store %arg12[%c1_585, %c1_586], %1374 {strides = array<i32>} : memref<3x3xf32, #tpu.memory_space<vmem>>, vector<1x1xf32>,
      %c0_587 = arith.constant 0 : index
      %c0_588 = arith.constant 0 : index
      %1376 = vector.load %arg12[%c0_587, %c0_588] : memref<3x3xf32, #tpu.memory_space<vmem>>, vector<3x3xf32>
      %c0_589 = arith.constant 0 : index
      %c0_590 = arith.constant 0 : index
      %1377 = vector.load %arg13[%c0_589, %c0_590] : memref<3x3xf32, #tpu.memory_space<vmem>>, vector<3x3xf32>
      %1378 = vector.extract_strided_slice %1376 {offsets = [0, 0], sizes = [1, 1], strides = [1, 1]} : vector<3x3xf32> to vector<1x1xf32>
      %cst_591 = arith.constant -0.333333343 : f32
      %1379 = vector.broadcast %cst_591 : f32 to vector<1x1xf32>
      %1380 = arith.mulf %1379, %1378 : vector<1x1xf32>
      %1381 = vector.extract_strided_slice %1376 {offsets = [0, 1], sizes = [1, 1], strides = [1, 1]} : vector<3x3xf32> to vector<1x1xf32>
      %cst_592 = arith.constant -0.333333343 : f32
      %1382 = vector.broadcast %cst_592 : f32 to vector<1x1xf32>
      %1383 = arith.mulf %1382, %1381 : vector<1x1xf32>
      %1384 = arith.addf %1380, %1383 : vector<1x1xf32>
      %1385 = vector.extract_strided_slice %1376 {offsets = [0, 2], sizes = [1, 1], strides = [1, 1]} : vector<3x3xf32> to vector<1x1xf32>
      %cst_593 = arith.constant -0.333333343 : f32
      %1386 = vector.broadcast %cst_593 : f32 to vector<1x1xf32>
      %1387 = arith.mulf %1386, %1385 : vector<1x1xf32>
      %1388 = arith.addf %1384, %1387 : vector<1x1xf32>
      %1389 = vector.extract_strided_slice %1376 {offsets = [1, 0], sizes = [1, 1], strides = [1, 1]} : vector<3x3xf32> to vector<1x1xf32>
      %cst_594 = arith.constant -0.333333343 : f32
      %1390 = vector.broadcast %cst_594 : f32 to vector<1x1xf32>
      %1391 = arith.mulf %1390, %1389 : vector<1x1xf32>
      %1392 = arith.addf %1388, %1391 : vector<1x1xf32>
      %1393 = vector.extract_strided_slice %1376 {offsets = [1, 1], sizes = [1, 1], strides = [1, 1]} : vector<3x3xf32> to vector<1x1xf32>
      %cst_595 = arith.constant 2.66666675 : f32
      %1394 = vector.broadcast %cst_595 : f32 to vector<1x1xf32>
      %1395 = arith.mulf %1394, %1393 : vector<1x1xf32>
      %1396 = arith.addf %1392, %1395 : vector<1x1xf32>
      %1397 = vector.extract_strided_slice %1376 {offsets = [1, 2], sizes = [1, 1], strides = [1, 1]} : vector<3x3xf32> to vector<1x1xf32>
      %cst_596 = arith.constant -0.333333343 : f32
      %1398 = vector.broadcast %cst_596 : f32 to vector<1x1xf32>
      %1399 = arith.mulf %1398, %1397 : vector<1x1xf32>
      %1400 = arith.addf %1396, %1399 : vector<1x1xf32>
      %1401 = vector.extract_strided_slice %1376 {offsets = [2, 0], sizes = [1, 1], strides = [1, 1]} : vector<3x3xf32> to vector<1x1xf32>
      %cst_597 = arith.constant -0.333333343 : f32
      %1402 = vector.broadcast %cst_597 : f32 to vector<1x1xf32>
      %1403 = arith.mulf %1402, %1401 : vector<1x1xf32>
      %1404 = arith.addf %1400, %1403 : vector<1x1xf32>
      %1405 = vector.extract_strided_slice %1376 {offsets = [2, 1], sizes = [1, 1], strides = [1, 1]} : vector<3x3xf32> to vector<1x1xf32>
      %cst_598 = arith.constant -0.333333343 : f32
      %1406 = vector.broadcast %cst_598 : f32 to vector<1x1xf32>
      %1407 = arith.mulf %1406, %1405 : vector<1x1xf32>
      %1408 = arith.addf %1404, %1407 : vector<1x1xf32>
      %1409 = vector.extract_strided_slice %1376 {offsets = [2, 2], sizes = [1, 1], strides = [1, 1]} : vector<3x3xf32> to vector<1x1xf32>
      %cst_599 = arith.constant -0.333333343 : f32
      %1410 = vector.broadcast %cst_599 : f32 to vector<1x1xf32>
      %1411 = arith.mulf %1410, %1409 : vector<1x1xf32>
      %1412 = arith.addf %1408, %1411 : vector<1x1xf32>
      %1413 = vector.extract_strided_slice %1376 {offsets = [1, 1], sizes = [1, 1], strides = [1, 1]} : vector<3x3xf32> to vector<1x1xf32>
      %1414 = vector.extract_strided_slice %1377 {offsets = [1, 1], sizes = [1, 1], strides = [1, 1]} : vector<3x3xf32> to vector<1x1xf32>
      %1415 = arith.subf %1414, %1412 : vector<1x1xf32>
      %cst_600 = arith.constant 2.500000e-01 : f32
      %1416 = vector.broadcast %cst_600 : f32 to vector<1x1xf32>
      %1417 = arith.mulf %1416, %1415 : vector<1x1xf32>
      %1418 = arith.addf %1413, %1417 : vector<1x1xf32>
      %c1_601 = arith.constant 1 : index
      %c1_602 = arith.constant 1 : index
      %1419 = vector.load %arg12[%c1_601, %c1_602] : memref<3x3xf32, #tpu.memory_space<vmem>>, vector<1x1xf32>
      tpu.vector_store %arg12[%c1_601, %c1_602], %1418 {strides = array<i32>} : memref<3x3xf32, #tpu.memory_space<vmem>>, vector<1x1xf32>,
      %c0_603 = arith.constant 0 : index
      %c0_604 = arith.constant 0 : index
      %1420 = vector.load %arg12[%c0_603, %c0_604] : memref<3x3xf32, #tpu.memory_space<vmem>>, vector<3x3xf32>
      %cst_605 = arith.constant dense<0.000000e+00> : vector<3x3xf32>
      %1421 = tpu.matmul %733, %1420, %cst_605 {dimension_numbers = #tpu.dot_dimension_numbers<[1], [0], [0], [1], [0, 0, 1, 1], [], []>} : vector<3x3xf32>, vector<3x3xf32>, vector<3x3xf32> -> vector<3x3xf32>
      %cst_606 = arith.constant dense<0.000000e+00> : vector<3x3xf32>
      %1422 = tpu.matmul %1421, %769, %cst_606 {dimension_numbers = #tpu.dot_dimension_numbers<[1], [0], [0], [1], [0, 0, 1, 1], [], []>} : vector<3x3xf32>, vector<3x3xf32>, vector<3x3xf32> -> vector<3x3xf32>
      %cst_607 = arith.constant dense<0.000000e+00> : vector<3x3xf32>
      %1423 = tpu.matmul %843, %1420, %cst_607 {dimension_numbers = #tpu.dot_dimension_numbers<[1], [0], [0], [1], [0, 0, 1, 1], [], []>} : vector<3x3xf32>, vector<3x3xf32>, vector<3x3xf32> -> vector<3x3xf32>
      %cst_608 = arith.constant dense<0.000000e+00> : vector<3x3xf32>
      %1424 = tpu.matmul %1423, %879, %cst_608 {dimension_numbers = #tpu.dot_dimension_numbers<[1], [0], [0], [1], [0, 0, 1, 1], [], []>} : vector<3x3xf32>, vector<3x3xf32>, vector<3x3xf32> -> vector<3x3xf32>
      %1425 = arith.addf %1422, %1424 : vector<3x3xf32>
      %cst_609 = arith.constant dense<0.000000e+00> : vector<3x3xf32>
      %1426 = tpu.matmul %953, %1420, %cst_609 {dimension_numbers = #tpu.dot_dimension_numbers<[1], [0], [0], [1], [0, 0, 1, 1], [], []>} : vector<3x3xf32>, vector<3x3xf32>, vector<3x3xf32> -> vector<3x3xf32>
      %cst_610 = arith.constant dense<0.000000e+00> : vector<3x3xf32>
      %1427 = tpu.matmul %1426, %989, %cst_610 {dimension_numbers = #tpu.dot_dimension_numbers<[1], [0], [0], [1], [0, 0, 1, 1], [], []>} : vector<3x3xf32>, vector<3x3xf32>, vector<3x3xf32> -> vector<3x3xf32>
      %1428 = arith.addf %1425, %1427 : vector<3x3xf32>
      %c0_611 = arith.constant 0 : index
      %c0_612 = arith.constant 0 : index
      %1429 = vector.load %arg10[%c0_611, %c0_612] : memref<5x5xf32, #tpu.memory_space<vmem>>, vector<5x5xf32>
      %1430 = vector.extract_strided_slice %1429 {offsets = [1, 1], sizes = [3, 3], strides = [1, 1]} : vector<5x5xf32> to vector<3x3xf32>
      %1431 = arith.addf %1430, %1428 : vector<3x3xf32>
      %c1_613 = arith.constant 1 : index
      %c1_614 = arith.constant 1 : index
      %1432 = vector.load %arg10[%c1_613, %c1_614] : memref<5x5xf32, #tpu.memory_space<vmem>>, vector<3x3xf32>
      tpu.vector_store %arg10[%c1_613, %c1_614], %1431 {strides = array<i32>} : memref<5x5xf32, #tpu.memory_space<vmem>>, vector<3x3xf32>,
      %c0_615 = arith.constant 0 : index
      %c0_616 = arith.constant 0 : index
      %1433 = vector.load %arg10[%c0_615, %c0_616] : memref<5x5xf32, #tpu.memory_space<vmem>>, vector<5x5xf32>
      %c0_617 = arith.constant 0 : index
      %c0_618 = arith.constant 0 : index
      %1434 = vector.load %arg11[%c0_617, %c0_618] : memref<5x5xf32, #tpu.memory_space<vmem>>, vector<5x5xf32>
      %1435 = vector.extract_strided_slice %1433 {offsets = [0, 0], sizes = [3, 3], strides = [1, 1]} : vector<5x5xf32> to vector<3x3xf32>
      %cst_619 = arith.constant -0.333333343 : f32
      %1436 = vector.broadcast %cst_619 : f32 to vector<3x3xf32>
      %1437 = arith.mulf %1436, %1435 : vector<3x3xf32>
      %1438 = vector.extract_strided_slice %1433 {offsets = [0, 1], sizes = [3, 3], strides = [1, 1]} : vector<5x5xf32> to vector<3x3xf32>
      %cst_620 = arith.constant -0.333333343 : f32
      %1439 = vector.broadcast %cst_620 : f32 to vector<3x3xf32>
      %1440 = arith.mulf %1439, %1438 : vector<3x3xf32>
      %1441 = arith.addf %1437, %1440 : vector<3x3xf32>
      %1442 = vector.extract_strided_slice %1433 {offsets = [0, 2], sizes = [3, 3], strides = [1, 1]} : vector<5x5xf32> to vector<3x3xf32>
      %cst_621 = arith.constant -0.333333343 : f32
      %1443 = vector.broadcast %cst_621 : f32 to vector<3x3xf32>
      %1444 = arith.mulf %1443, %1442 : vector<3x3xf32>
      %1445 = arith.addf %1441, %1444 : vector<3x3xf32>
      %1446 = vector.extract_strided_slice %1433 {offsets = [1, 0], sizes = [3, 3], strides = [1, 1]} : vector<5x5xf32> to vector<3x3xf32>
      %cst_622 = arith.constant -0.333333343 : f32
      %1447 = vector.broadcast %cst_622 : f32 to vector<3x3xf32>
      %1448 = arith.mulf %1447, %1446 : vector<3x3xf32>
      %1449 = arith.addf %1445, %1448 : vector<3x3xf32>
      %1450 = vector.extract_strided_slice %1433 {offsets = [1, 1], sizes = [3, 3], strides = [1, 1]} : vector<5x5xf32> to vector<3x3xf32>
      %cst_623 = arith.constant 2.66666675 : f32
      %1451 = vector.broadcast %cst_623 : f32 to vector<3x3xf32>
      %1452 = arith.mulf %1451, %1450 : vector<3x3xf32>
      %1453 = arith.addf %1449, %1452 : vector<3x3xf32>
      %1454 = vector.extract_strided_slice %1433 {offsets = [1, 2], sizes = [3, 3], strides = [1, 1]} : vector<5x5xf32> to vector<3x3xf32>
      %cst_624 = arith.constant -0.333333343 : f32
      %1455 = vector.broadcast %cst_624 : f32 to vector<3x3xf32>
      %1456 = arith.mulf %1455, %1454 : vector<3x3xf32>
      %1457 = arith.addf %1453, %1456 : vector<3x3xf32>
      %1458 = vector.extract_strided_slice %1433 {offsets = [2, 0], sizes = [3, 3], strides = [1, 1]} : vector<5x5xf32> to vector<3x3xf32>
      %cst_625 = arith.constant -0.333333343 : f32
      %1459 = vector.broadcast %cst_625 : f32 to vector<3x3xf32>
      %1460 = arith.mulf %1459, %1458 : vector<3x3xf32>
      %1461 = arith.addf %1457, %1460 : vector<3x3xf32>
      %1462 = vector.extract_strided_slice %1433 {offsets = [2, 1], sizes = [3, 3], strides = [1, 1]} : vector<5x5xf32> to vector<3x3xf32>
      %cst_626 = arith.constant -0.333333343 : f32
      %1463 = vector.broadcast %cst_626 : f32 to vector<3x3xf32>
      %1464 = arith.mulf %1463, %1462 : vector<3x3xf32>
      %1465 = arith.addf %1461, %1464 : vector<3x3xf32>
      %1466 = vector.extract_strided_slice %1433 {offsets = [2, 2], sizes = [3, 3], strides = [1, 1]} : vector<5x5xf32> to vector<3x3xf32>
      %cst_627 = arith.constant -0.333333343 : f32
      %1467 = vector.broadcast %cst_627 : f32 to vector<3x3xf32>
      %1468 = arith.mulf %1467, %1466 : vector<3x3xf32>
      %1469 = arith.addf %1465, %1468 : vector<3x3xf32>
      %1470 = vector.extract_strided_slice %1433 {offsets = [1, 1], sizes = [3, 3], strides = [1, 1]} : vector<5x5xf32> to vector<3x3xf32>
      %1471 = vector.extract_strided_slice %1434 {offsets = [1, 1], sizes = [3, 3], strides = [1, 1]} : vector<5x5xf32> to vector<3x3xf32>
      %1472 = arith.subf %1471, %1469 : vector<3x3xf32>
      %cst_628 = arith.constant 2.500000e-01 : f32
      %1473 = vector.broadcast %cst_628 : f32 to vector<3x3xf32>
      %1474 = arith.mulf %1473, %1472 : vector<3x3xf32>
      %1475 = arith.addf %1470, %1474 : vector<3x3xf32>
      %c1_629 = arith.constant 1 : index
      %c1_630 = arith.constant 1 : index
      %1476 = vector.load %arg10[%c1_629, %c1_630] : memref<5x5xf32, #tpu.memory_space<vmem>>, vector<3x3xf32>
      tpu.vector_store %arg10[%c1_629, %c1_630], %1475 {strides = array<i32>} : memref<5x5xf32, #tpu.memory_space<vmem>>, vector<3x3xf32>,
      %c0_631 = arith.constant 0 : index
      %c0_632 = arith.constant 0 : index
      %1477 = vector.load %arg10[%c0_631, %c0_632] : memref<5x5xf32, #tpu.memory_space<vmem>>, vector<5x5xf32>
      %cst_633 = arith.constant dense<0.000000e+00> : vector<7x5xf32>
      %1478 = tpu.matmul %403, %1477, %cst_633 {dimension_numbers = #tpu.dot_dimension_numbers<[1], [0], [0], [1], [0, 0, 1, 1], [], []>} : vector<7x5xf32>, vector<5x5xf32>, vector<7x5xf32> -> vector<7x5xf32>
      %cst_634 = arith.constant dense<0.000000e+00> : vector<7x7xf32>
      %1479 = tpu.matmul %1478, %439, %cst_634 {dimension_numbers = #tpu.dot_dimension_numbers<[1], [0], [0], [1], [0, 0, 1, 1], [], []>} : vector<7x5xf32>, vector<5x7xf32>, vector<7x7xf32> -> vector<7x7xf32>
      %cst_635 = arith.constant dense<0.000000e+00> : vector<7x5xf32>
      %1480 = tpu.matmul %513, %1477, %cst_635 {dimension_numbers = #tpu.dot_dimension_numbers<[1], [0], [0], [1], [0, 0, 1, 1], [], []>} : vector<7x5xf32>, vector<5x5xf32>, vector<7x5xf32> -> vector<7x5xf32>
      %cst_636 = arith.constant dense<0.000000e+00> : vector<7x7xf32>
      %1481 = tpu.matmul %1480, %549, %cst_636 {dimension_numbers = #tpu.dot_dimension_numbers<[1], [0], [0], [1], [0, 0, 1, 1], [], []>} : vector<7x5xf32>, vector<5x7xf32>, vector<7x7xf32> -> vector<7x7xf32>
      %1482 = arith.addf %1479, %1481 : vector<7x7xf32>
      %cst_637 = arith.constant dense<0.000000e+00> : vector<7x5xf32>
      %1483 = tpu.matmul %623, %1477, %cst_637 {dimension_numbers = #tpu.dot_dimension_numbers<[1], [0], [0], [1], [0, 0, 1, 1], [], []>} : vector<7x5xf32>, vector<5x5xf32>, vector<7x5xf32> -> vector<7x5xf32>
      %cst_638 = arith.constant dense<0.000000e+00> : vector<7x7xf32>
      %1484 = tpu.matmul %1483, %659, %cst_638 {dimension_numbers = #tpu.dot_dimension_numbers<[1], [0], [0], [1], [0, 0, 1, 1], [], []>} : vector<7x5xf32>, vector<5x7xf32>, vector<7x7xf32> -> vector<7x7xf32>
      %1485 = arith.addf %1482, %1484 : vector<7x7xf32>
      %c0_639 = arith.constant 0 : index
      %c0_640 = arith.constant 0 : index
      %1486 = vector.load %arg8[%c0_639, %c0_640] : memref<9x9xf32, #tpu.memory_space<vmem>>, vector<9x9xf32>
      %1487 = vector.extract_strided_slice %1486 {offsets = [1, 1], sizes = [7, 7], strides = [1, 1]} : vector<9x9xf32> to vector<7x7xf32>
      %1488 = arith.addf %1487, %1485 : vector<7x7xf32>
      %c1_641 = arith.constant 1 : index
      %c1_642 = arith.constant 1 : index
      %1489 = vector.load %arg8[%c1_641, %c1_642] : memref<9x9xf32, #tpu.memory_space<vmem>>, vector<7x7xf32>
      tpu.vector_store %arg8[%c1_641, %c1_642], %1488 {strides = array<i32>} : memref<9x9xf32, #tpu.memory_space<vmem>>, vector<7x7xf32>,
      %c0_643 = arith.constant 0 : index
      %c0_644 = arith.constant 0 : index
      %1490 = vector.load %arg8[%c0_643, %c0_644] : memref<9x9xf32, #tpu.memory_space<vmem>>, vector<9x9xf32>
      %c0_645 = arith.constant 0 : index
      %c0_646 = arith.constant 0 : index
      %1491 = vector.load %arg9[%c0_645, %c0_646] : memref<9x9xf32, #tpu.memory_space<vmem>>, vector<9x9xf32>
      %1492 = vector.extract_strided_slice %1490 {offsets = [0, 0], sizes = [7, 7], strides = [1, 1]} : vector<9x9xf32> to vector<7x7xf32>
      %cst_647 = arith.constant -0.333333343 : f32
      %1493 = vector.broadcast %cst_647 : f32 to vector<7x7xf32>
      %1494 = arith.mulf %1493, %1492 : vector<7x7xf32>
      %1495 = vector.extract_strided_slice %1490 {offsets = [0, 1], sizes = [7, 7], strides = [1, 1]} : vector<9x9xf32> to vector<7x7xf32>
      %cst_648 = arith.constant -0.333333343 : f32
      %1496 = vector.broadcast %cst_648 : f32 to vector<7x7xf32>
      %1497 = arith.mulf %1496, %1495 : vector<7x7xf32>
      %1498 = arith.addf %1494, %1497 : vector<7x7xf32>
      %1499 = vector.extract_strided_slice %1490 {offsets = [0, 2], sizes = [7, 7], strides = [1, 1]} : vector<9x9xf32> to vector<7x7xf32>
      %cst_649 = arith.constant -0.333333343 : f32
      %1500 = vector.broadcast %cst_649 : f32 to vector<7x7xf32>
      %1501 = arith.mulf %1500, %1499 : vector<7x7xf32>
      %1502 = arith.addf %1498, %1501 : vector<7x7xf32>
      %1503 = vector.extract_strided_slice %1490 {offsets = [1, 0], sizes = [7, 7], strides = [1, 1]} : vector<9x9xf32> to vector<7x7xf32>
      %cst_650 = arith.constant -0.333333343 : f32
      %1504 = vector.broadcast %cst_650 : f32 to vector<7x7xf32>
      %1505 = arith.mulf %1504, %1503 : vector<7x7xf32>
      %1506 = arith.addf %1502, %1505 : vector<7x7xf32>
      %1507 = vector.extract_strided_slice %1490 {offsets = [1, 1], sizes = [7, 7], strides = [1, 1]} : vector<9x9xf32> to vector<7x7xf32>
      %cst_651 = arith.constant 2.66666675 : f32
      %1508 = vector.broadcast %cst_651 : f32 to vector<7x7xf32>
      %1509 = arith.mulf %1508, %1507 : vector<7x7xf32>
      %1510 = arith.addf %1506, %1509 : vector<7x7xf32>
      %1511 = vector.extract_strided_slice %1490 {offsets = [1, 2], sizes = [7, 7], strides = [1, 1]} : vector<9x9xf32> to vector<7x7xf32>
      %cst_652 = arith.constant -0.333333343 : f32
      %1512 = vector.broadcast %cst_652 : f32 to vector<7x7xf32>
      %1513 = arith.mulf %1512, %1511 : vector<7x7xf32>
      %1514 = arith.addf %1510, %1513 : vector<7x7xf32>
      %1515 = vector.extract_strided_slice %1490 {offsets = [2, 0], sizes = [7, 7], strides = [1, 1]} : vector<9x9xf32> to vector<7x7xf32>
      %cst_653 = arith.constant -0.333333343 : f32
      %1516 = vector.broadcast %cst_653 : f32 to vector<7x7xf32>
      %1517 = arith.mulf %1516, %1515 : vector<7x7xf32>
      %1518 = arith.addf %1514, %1517 : vector<7x7xf32>
      %1519 = vector.extract_strided_slice %1490 {offsets = [2, 1], sizes = [7, 7], strides = [1, 1]} : vector<9x9xf32> to vector<7x7xf32>
      %cst_654 = arith.constant -0.333333343 : f32
      %1520 = vector.broadcast %cst_654 : f32 to vector<7x7xf32>
      %1521 = arith.mulf %1520, %1519 : vector<7x7xf32>
      %1522 = arith.addf %1518, %1521 : vector<7x7xf32>
      %1523 = vector.extract_strided_slice %1490 {offsets = [2, 2], sizes = [7, 7], strides = [1, 1]} : vector<9x9xf32> to vector<7x7xf32>
      %cst_655 = arith.constant -0.333333343 : f32
      %1524 = vector.broadcast %cst_655 : f32 to vector<7x7xf32>
      %1525 = arith.mulf %1524, %1523 : vector<7x7xf32>
      %1526 = arith.addf %1522, %1525 : vector<7x7xf32>
      %1527 = vector.extract_strided_slice %1490 {offsets = [1, 1], sizes = [7, 7], strides = [1, 1]} : vector<9x9xf32> to vector<7x7xf32>
      %1528 = vector.extract_strided_slice %1491 {offsets = [1, 1], sizes = [7, 7], strides = [1, 1]} : vector<9x9xf32> to vector<7x7xf32>
      %1529 = arith.subf %1528, %1526 : vector<7x7xf32>
      %cst_656 = arith.constant 2.500000e-01 : f32
      %1530 = vector.broadcast %cst_656 : f32 to vector<7x7xf32>
      %1531 = arith.mulf %1530, %1529 : vector<7x7xf32>
      %1532 = arith.addf %1527, %1531 : vector<7x7xf32>
      %c1_657 = arith.constant 1 : index
      %c1_658 = arith.constant 1 : index
      %1533 = vector.load %arg8[%c1_657, %c1_658] : memref<9x9xf32, #tpu.memory_space<vmem>>, vector<7x7xf32>
      tpu.vector_store %arg8[%c1_657, %c1_658], %1532 {strides = array<i32>} : memref<9x9xf32, #tpu.memory_space<vmem>>, vector<7x7xf32>,
      %c0_659 = arith.constant 0 : index
      %c0_660 = arith.constant 0 : index
      %1534 = vector.load %arg8[%c0_659, %c0_660] : memref<9x9xf32, #tpu.memory_space<vmem>>, vector<9x9xf32>
      %cst_661 = arith.constant dense<0.000000e+00> : vector<15x9xf32>
      %1535 = tpu.matmul %73, %1534, %cst_661 {dimension_numbers = #tpu.dot_dimension_numbers<[1], [0], [0], [1], [0, 0, 1, 1], [], []>} : vector<15x9xf32>, vector<9x9xf32>, vector<15x9xf32> -> vector<15x9xf32>
      %cst_662 = arith.constant dense<0.000000e+00> : vector<15x15xf32>
      %1536 = tpu.matmul %1535, %109, %cst_662 {dimension_numbers = #tpu.dot_dimension_numbers<[1], [0], [0], [1], [0, 0, 1, 1], [], []>} : vector<15x9xf32>, vector<9x15xf32>, vector<15x15xf32> -> vector<15x15xf32>
      %cst_663 = arith.constant dense<0.000000e+00> : vector<15x9xf32>
      %1537 = tpu.matmul %183, %1534, %cst_663 {dimension_numbers = #tpu.dot_dimension_numbers<[1], [0], [0], [1], [0, 0, 1, 1], [], []>} : vector<15x9xf32>, vector<9x9xf32>, vector<15x9xf32> -> vector<15x9xf32>
      %cst_664 = arith.constant dense<0.000000e+00> : vector<15x15xf32>
      %1538 = tpu.matmul %1537, %219, %cst_664 {dimension_numbers = #tpu.dot_dimension_numbers<[1], [0], [0], [1], [0, 0, 1, 1], [], []>} : vector<15x9xf32>, vector<9x15xf32>, vector<15x15xf32> -> vector<15x15xf32>
      %1539 = arith.addf %1536, %1538 : vector<15x15xf32>
      %cst_665 = arith.constant dense<0.000000e+00> : vector<15x9xf32>
      %1540 = tpu.matmul %293, %1534, %cst_665 {dimension_numbers = #tpu.dot_dimension_numbers<[1], [0], [0], [1], [0, 0, 1, 1], [], []>} : vector<15x9xf32>, vector<9x9xf32>, vector<15x9xf32> -> vector<15x9xf32>
      %cst_666 = arith.constant dense<0.000000e+00> : vector<15x15xf32>
      %1541 = tpu.matmul %1540, %329, %cst_666 {dimension_numbers = #tpu.dot_dimension_numbers<[1], [0], [0], [1], [0, 0, 1, 1], [], []>} : vector<15x9xf32>, vector<9x15xf32>, vector<15x15xf32> -> vector<15x15xf32>
      %1542 = arith.addf %1539, %1541 : vector<15x15xf32>
      %c0_667 = arith.constant 0 : index
      %c0_668 = arith.constant 0 : index
      %1543 = vector.load %arg6[%c0_667, %c0_668] : memref<17x17xf32, #tpu.memory_space<vmem>>, vector<17x17xf32>
      %1544 = vector.extract_strided_slice %1543 {offsets = [1, 1], sizes = [15, 15], strides = [1, 1]} : vector<17x17xf32> to vector<15x15xf32>
      %1545 = arith.addf %1544, %1542 : vector<15x15xf32>
      %c1_669 = arith.constant 1 : index
      %c1_670 = arith.constant 1 : index
      %1546 = vector.load %arg6[%c1_669, %c1_670] : memref<17x17xf32, #tpu.memory_space<vmem>>, vector<15x15xf32>
      tpu.vector_store %arg6[%c1_669, %c1_670], %1545 {strides = array<i32>} : memref<17x17xf32, #tpu.memory_space<vmem>>, vector<15x15xf32>,
      %c0_671 = arith.constant 0 : index
      %c0_672 = arith.constant 0 : index
      %1547 = vector.load %arg6[%c0_671, %c0_672] : memref<17x17xf32, #tpu.memory_space<vmem>>, vector<17x17xf32>
      %c0_673 = arith.constant 0 : index
      %c0_674 = arith.constant 0 : index
      %1548 = vector.load %arg7[%c0_673, %c0_674] : memref<17x17xf32, #tpu.memory_space<vmem>>, vector<17x17xf32>
      %1549 = vector.extract_strided_slice %1547 {offsets = [0, 0], sizes = [15, 15], strides = [1, 1]} : vector<17x17xf32> to vector<15x15xf32>
      %cst_675 = arith.constant -0.333333343 : f32
      %1550 = vector.broadcast %cst_675 : f32 to vector<15x15xf32>
      %1551 = arith.mulf %1550, %1549 : vector<15x15xf32>
      %1552 = vector.extract_strided_slice %1547 {offsets = [0, 1], sizes = [15, 15], strides = [1, 1]} : vector<17x17xf32> to vector<15x15xf32>
      %cst_676 = arith.constant -0.333333343 : f32
      %1553 = vector.broadcast %cst_676 : f32 to vector<15x15xf32>
      %1554 = arith.mulf %1553, %1552 : vector<15x15xf32>
      %1555 = arith.addf %1551, %1554 : vector<15x15xf32>
      %1556 = vector.extract_strided_slice %1547 {offsets = [0, 2], sizes = [15, 15], strides = [1, 1]} : vector<17x17xf32> to vector<15x15xf32>
      %cst_677 = arith.constant -0.333333343 : f32
      %1557 = vector.broadcast %cst_677 : f32 to vector<15x15xf32>
      %1558 = arith.mulf %1557, %1556 : vector<15x15xf32>
      %1559 = arith.addf %1555, %1558 : vector<15x15xf32>
      %1560 = vector.extract_strided_slice %1547 {offsets = [1, 0], sizes = [15, 15], strides = [1, 1]} : vector<17x17xf32> to vector<15x15xf32>
      %cst_678 = arith.constant -0.333333343 : f32
      %1561 = vector.broadcast %cst_678 : f32 to vector<15x15xf32>
      %1562 = arith.mulf %1561, %1560 : vector<15x15xf32>
      %1563 = arith.addf %1559, %1562 : vector<15x15xf32>
      %1564 = vector.extract_strided_slice %1547 {offsets = [1, 1], sizes = [15, 15], strides = [1, 1]} : vector<17x17xf32> to vector<15x15xf32>
      %cst_679 = arith.constant 2.66666675 : f32
      %1565 = vector.broadcast %cst_679 : f32 to vector<15x15xf32>
      %1566 = arith.mulf %1565, %1564 : vector<15x15xf32>
      %1567 = arith.addf %1563, %1566 : vector<15x15xf32>
      %1568 = vector.extract_strided_slice %1547 {offsets = [1, 2], sizes = [15, 15], strides = [1, 1]} : vector<17x17xf32> to vector<15x15xf32>
      %cst_680 = arith.constant -0.333333343 : f32
      %1569 = vector.broadcast %cst_680 : f32 to vector<15x15xf32>
      %1570 = arith.mulf %1569, %1568 : vector<15x15xf32>
      %1571 = arith.addf %1567, %1570 : vector<15x15xf32>
      %1572 = vector.extract_strided_slice %1547 {offsets = [2, 0], sizes = [15, 15], strides = [1, 1]} : vector<17x17xf32> to vector<15x15xf32>
      %cst_681 = arith.constant -0.333333343 : f32
      %1573 = vector.broadcast %cst_681 : f32 to vector<15x15xf32>
      %1574 = arith.mulf %1573, %1572 : vector<15x15xf32>
      %1575 = arith.addf %1571, %1574 : vector<15x15xf32>
      %1576 = vector.extract_strided_slice %1547 {offsets = [2, 1], sizes = [15, 15], strides = [1, 1]} : vector<17x17xf32> to vector<15x15xf32>
      %cst_682 = arith.constant -0.333333343 : f32
      %1577 = vector.broadcast %cst_682 : f32 to vector<15x15xf32>
      %1578 = arith.mulf %1577, %1576 : vector<15x15xf32>
      %1579 = arith.addf %1575, %1578 : vector<15x15xf32>
      %1580 = vector.extract_strided_slice %1547 {offsets = [2, 2], sizes = [15, 15], strides = [1, 1]} : vector<17x17xf32> to vector<15x15xf32>
      %cst_683 = arith.constant -0.333333343 : f32
      %1581 = vector.broadcast %cst_683 : f32 to vector<15x15xf32>
      %1582 = arith.mulf %1581, %1580 : vector<15x15xf32>
      %1583 = arith.addf %1579, %1582 : vector<15x15xf32>
      %1584 = vector.extract_strided_slice %1547 {offsets = [1, 1], sizes = [15, 15], strides = [1, 1]} : vector<17x17xf32> to vector<15x15xf32>
      %1585 = vector.extract_strided_slice %1548 {offsets = [1, 1], sizes = [15, 15], strides = [1, 1]} : vector<17x17xf32> to vector<15x15xf32>
      %1586 = arith.subf %1585, %1583 : vector<15x15xf32>
      %cst_684 = arith.constant 2.500000e-01 : f32
      %1587 = vector.broadcast %cst_684 : f32 to vector<15x15xf32>
      %1588 = arith.mulf %1587, %1586 : vector<15x15xf32>
      %1589 = arith.addf %1584, %1588 : vector<15x15xf32>
      %c1_685 = arith.constant 1 : index
      %c1_686 = arith.constant 1 : index
      %1590 = vector.load %arg6[%c1_685, %c1_686] : memref<17x17xf32, #tpu.memory_space<vmem>>, vector<15x15xf32>
      tpu.vector_store %arg6[%c1_685, %c1_686], %1589 {strides = array<i32>} : memref<17x17xf32, #tpu.memory_space<vmem>>, vector<15x15xf32>,
    }
    %c0_439 = arith.constant 0 : index
    %c0_440 = arith.constant 0 : index
    %1041 = vector.load %arg6[%c0_439, %c0_440] : memref<17x17xf32, #tpu.memory_space<vmem>>, vector<17x17xf32>
    %c0_441 = arith.constant 0 : index
    %c0_442 = arith.constant 0 : index
    %c0_443 = arith.constant 0 : index
    %1042 = vector.load %arg4[%c0_441, %c0_442, %c0_443] : memref<1x17x17xf32, #tpu.memory_space<vmem>>, vector<1x17x17xf32>
    %1043 = vector.shape_cast %1042 : vector<1x17x17xf32> to vector<17x17xf32>
    %1044 = vector.shape_cast %1041 : vector<17x17xf32> to vector<1x17x17xf32>
    tpu.vector_store %arg4[%c0_441, %c0_442, %c0_443], %1044 {strides = array<i32>} : memref<1x17x17xf32, #tpu.memory_space<vmem>>, vector<1x17x17xf32>,
    %c0_i32_444 = arith.constant 0 : i32
    %c4_i32 = arith.constant 4 : i32
    %1045 = arith.addi %c0_i32_444, %c4_i32 : i32
    %c1_i32_445 = arith.constant 1 : i32
    scf.for %arg14 = %c0_i32_444 to %1045 step %c1_i32_445  : i32 {
      %c0_451 = arith.constant 0 : index
      %c0_452 = arith.constant 0 : index
      %1050 = vector.load %arg6[%c0_451, %c0_452] : memref<17x17xf32, #tpu.memory_space<vmem>>, vector<17x17xf32>
      %c0_453 = arith.constant 0 : index
      %c0_454 = arith.constant 0 : index
      %1051 = vector.load %arg7[%c0_453, %c0_454] : memref<17x17xf32, #tpu.memory_space<vmem>>, vector<17x17xf32>
      %1052 = vector.extract_strided_slice %1050 {offsets = [0, 0], sizes = [15, 15], strides = [1, 1]} : vector<17x17xf32> to vector<15x15xf32>
      %cst_455 = arith.constant -0.333333343 : f32
      %1053 = vector.broadcast %cst_455 : f32 to vector<15x15xf32>
      %1054 = arith.mulf %1053, %1052 : vector<15x15xf32>
      %1055 = vector.extract_strided_slice %1050 {offsets = [0, 1], sizes = [15, 15], strides = [1, 1]} : vector<17x17xf32> to vector<15x15xf32>
      %cst_456 = arith.constant -0.333333343 : f32
      %1056 = vector.broadcast %cst_456 : f32 to vector<15x15xf32>
      %1057 = arith.mulf %1056, %1055 : vector<15x15xf32>
      %1058 = arith.addf %1054, %1057 : vector<15x15xf32>
      %1059 = vector.extract_strided_slice %1050 {offsets = [0, 2], sizes = [15, 15], strides = [1, 1]} : vector<17x17xf32> to vector<15x15xf32>
      %cst_457 = arith.constant -0.333333343 : f32
      %1060 = vector.broadcast %cst_457 : f32 to vector<15x15xf32>
      %1061 = arith.mulf %1060, %1059 : vector<15x15xf32>
      %1062 = arith.addf %1058, %1061 : vector<15x15xf32>
      %1063 = vector.extract_strided_slice %1050 {offsets = [1, 0], sizes = [15, 15], strides = [1, 1]} : vector<17x17xf32> to vector<15x15xf32>
      %cst_458 = arith.constant -0.333333343 : f32
      %1064 = vector.broadcast %cst_458 : f32 to vector<15x15xf32>
      %1065 = arith.mulf %1064, %1063 : vector<15x15xf32>
      %1066 = arith.addf %1062, %1065 : vector<15x15xf32>
      %1067 = vector.extract_strided_slice %1050 {offsets = [1, 1], sizes = [15, 15], strides = [1, 1]} : vector<17x17xf32> to vector<15x15xf32>
      %cst_459 = arith.constant 2.66666675 : f32
      %1068 = vector.broadcast %cst_459 : f32 to vector<15x15xf32>
      %1069 = arith.mulf %1068, %1067 : vector<15x15xf32>
      %1070 = arith.addf %1066, %1069 : vector<15x15xf32>
      %1071 = vector.extract_strided_slice %1050 {offsets = [1, 2], sizes = [15, 15], strides = [1, 1]} : vector<17x17xf32> to vector<15x15xf32>
      %cst_460 = arith.constant -0.333333343 : f32
      %1072 = vector.broadcast %cst_460 : f32 to vector<15x15xf32>
      %1073 = arith.mulf %1072, %1071 : vector<15x15xf32>
      %1074 = arith.addf %1070, %1073 : vector<15x15xf32>
      %1075 = vector.extract_strided_slice %1050 {offsets = [2, 0], sizes = [15, 15], strides = [1, 1]} : vector<17x17xf32> to vector<15x15xf32>
      %cst_461 = arith.constant -0.333333343 : f32
      %1076 = vector.broadcast %cst_461 : f32 to vector<15x15xf32>
      %1077 = arith.mulf %1076, %1075 : vector<15x15xf32>
      %1078 = arith.addf %1074, %1077 : vector<15x15xf32>
      %1079 = vector.extract_strided_slice %1050 {offsets = [2, 1], sizes = [15, 15], strides = [1, 1]} : vector<17x17xf32> to vector<15x15xf32>
      %cst_462 = arith.constant -0.333333343 : f32
      %1080 = vector.broadcast %cst_462 : f32 to vector<15x15xf32>
      %1081 = arith.mulf %1080, %1079 : vector<15x15xf32>
      %1082 = arith.addf %1078, %1081 : vector<15x15xf32>
      %1083 = vector.extract_strided_slice %1050 {offsets = [2, 2], sizes = [15, 15], strides = [1, 1]} : vector<17x17xf32> to vector<15x15xf32>
      %cst_463 = arith.constant -0.333333343 : f32
      %1084 = vector.broadcast %cst_463 : f32 to vector<15x15xf32>
      %1085 = arith.mulf %1084, %1083 : vector<15x15xf32>
      %1086 = arith.addf %1082, %1085 : vector<15x15xf32>
      %1087 = vector.extract_strided_slice %1050 {offsets = [1, 1], sizes = [15, 15], strides = [1, 1]} : vector<17x17xf32> to vector<15x15xf32>
      %1088 = vector.extract_strided_slice %1051 {offsets = [1, 1], sizes = [15, 15], strides = [1, 1]} : vector<17x17xf32> to vector<15x15xf32>
      %1089 = arith.subf %1088, %1086 : vector<15x15xf32>
      %cst_464 = arith.constant 2.500000e-01 : f32
      %1090 = vector.broadcast %cst_464 : f32 to vector<15x15xf32>
      %1091 = arith.mulf %1090, %1089 : vector<15x15xf32>
      %1092 = arith.addf %1087, %1091 : vector<15x15xf32>
      %c1_465 = arith.constant 1 : index
      %c1_466 = arith.constant 1 : index
      %1093 = vector.load %arg6[%c1_465, %c1_466] : memref<17x17xf32, #tpu.memory_space<vmem>>, vector<15x15xf32>
      tpu.vector_store %arg6[%c1_465, %c1_466], %1092 {strides = array<i32>} : memref<17x17xf32, #tpu.memory_space<vmem>>, vector<15x15xf32>,
      %c0_467 = arith.constant 0 : index
      %c0_468 = arith.constant 0 : index
      %1094 = vector.load %arg6[%c0_467, %c0_468] : memref<17x17xf32, #tpu.memory_space<vmem>>, vector<17x17xf32>
      %c0_469 = arith.constant 0 : index
      %c0_470 = arith.constant 0 : index
      %1095 = vector.load %arg7[%c0_469, %c0_470] : memref<17x17xf32, #tpu.memory_space<vmem>>, vector<17x17xf32>
      %1096 = vector.extract_strided_slice %1095 {offsets = [1, 1], sizes = [15, 15], strides = [1, 1]} : vector<17x17xf32> to vector<15x15xf32>
      %1097 = vector.extract_strided_slice %1094 {offsets = [0, 0], sizes = [15, 15], strides = [1, 1]} : vector<17x17xf32> to vector<15x15xf32>
      %cst_471 = arith.constant -0.333333343 : f32
      %1098 = vector.broadcast %cst_471 : f32 to vector<15x15xf32>
      %1099 = arith.mulf %1098, %1097 : vector<15x15xf32>
      %1100 = vector.extract_strided_slice %1094 {offsets = [0, 1], sizes = [15, 15], strides = [1, 1]} : vector<17x17xf32> to vector<15x15xf32>
      %cst_472 = arith.constant -0.333333343 : f32
      %1101 = vector.broadcast %cst_472 : f32 to vector<15x15xf32>
      %1102 = arith.mulf %1101, %1100 : vector<15x15xf32>
      %1103 = arith.addf %1099, %1102 : vector<15x15xf32>
      %1104 = vector.extract_strided_slice %1094 {offsets = [0, 2], sizes = [15, 15], strides = [1, 1]} : vector<17x17xf32> to vector<15x15xf32>
      %cst_473 = arith.constant -0.333333343 : f32
      %1105 = vector.broadcast %cst_473 : f32 to vector<15x15xf32>
      %1106 = arith.mulf %1105, %1104 : vector<15x15xf32>
      %1107 = arith.addf %1103, %1106 : vector<15x15xf32>
      %1108 = vector.extract_strided_slice %1094 {offsets = [1, 0], sizes = [15, 15], strides = [1, 1]} : vector<17x17xf32> to vector<15x15xf32>
      %cst_474 = arith.constant -0.333333343 : f32
      %1109 = vector.broadcast %cst_474 : f32 to vector<15x15xf32>
      %1110 = arith.mulf %1109, %1108 : vector<15x15xf32>
      %1111 = arith.addf %1107, %1110 : vector<15x15xf32>
      %1112 = vector.extract_strided_slice %1094 {offsets = [1, 1], sizes = [15, 15], strides = [1, 1]} : vector<17x17xf32> to vector<15x15xf32>
      %cst_475 = arith.constant 2.66666675 : f32
      %1113 = vector.broadcast %cst_475 : f32 to vector<15x15xf32>
      %1114 = arith.mulf %1113, %1112 : vector<15x15xf32>
      %1115 = arith.addf %1111, %1114 : vector<15x15xf32>
      %1116 = vector.extract_strided_slice %1094 {offsets = [1, 2], sizes = [15, 15], strides = [1, 1]} : vector<17x17xf32> to vector<15x15xf32>
      %cst_476 = arith.constant -0.333333343 : f32
      %1117 = vector.broadcast %cst_476 : f32 to vector<15x15xf32>
      %1118 = arith.mulf %1117, %1116 : vector<15x15xf32>
      %1119 = arith.addf %1115, %1118 : vector<15x15xf32>
      %1120 = vector.extract_strided_slice %1094 {offsets = [2, 0], sizes = [15, 15], strides = [1, 1]} : vector<17x17xf32> to vector<15x15xf32>
      %cst_477 = arith.constant -0.333333343 : f32
      %1121 = vector.broadcast %cst_477 : f32 to vector<15x15xf32>
      %1122 = arith.mulf %1121, %1120 : vector<15x15xf32>
      %1123 = arith.addf %1119, %1122 : vector<15x15xf32>
      %1124 = vector.extract_strided_slice %1094 {offsets = [2, 1], sizes = [15, 15], strides = [1, 1]} : vector<17x17xf32> to vector<15x15xf32>
      %cst_478 = arith.constant -0.333333343 : f32
      %1125 = vector.broadcast %cst_478 : f32 to vector<15x15xf32>
      %1126 = arith.mulf %1125, %1124 : vector<15x15xf32>
      %1127 = arith.addf %1123, %1126 : vector<15x15xf32>
      %1128 = vector.extract_strided_slice %1094 {offsets = [2, 2], sizes = [15, 15], strides = [1, 1]} : vector<17x17xf32> to vector<15x15xf32>
      %cst_479 = arith.constant -0.333333343 : f32
      %1129 = vector.broadcast %cst_479 : f32 to vector<15x15xf32>
      %1130 = arith.mulf %1129, %1128 : vector<15x15xf32>
      %1131 = arith.addf %1127, %1130 : vector<15x15xf32>
      %1132 = arith.subf %1096, %1131 : vector<15x15xf32>
      %cst_480 = arith.constant dense<0.000000e+00> : vector<9x15xf32>
      %1133 = tpu.matmul %17, %1132, %cst_480 {dimension_numbers = #tpu.dot_dimension_numbers<[1], [0], [0], [1], [0, 0, 1, 1], [], []>} : vector<9x15xf32>, vector<15x15xf32>, vector<9x15xf32> -> vector<9x15xf32>
      %cst_481 = arith.constant dense<0.000000e+00> : vector<9x9xf32>
      %1134 = tpu.matmul %1133, %61, %cst_481 {dimension_numbers = #tpu.dot_dimension_numbers<[1], [0], [0], [1], [0, 0, 1, 1], [], []>} : vector<9x15xf32>, vector<15x9xf32>, vector<9x9xf32> -> vector<9x9xf32>
      %cst_482 = arith.constant dense<0.000000e+00> : vector<9x15xf32>
      %1135 = tpu.matmul %127, %1132, %cst_482 {dimension_numbers = #tpu.dot_dimension_numbers<[1], [0], [0], [1], [0, 0, 1, 1], [], []>} : vector<9x15xf32>, vector<15x15xf32>, vector<9x15xf32> -> vector<9x15xf32>
      %cst_483 = arith.constant dense<0.000000e+00> : vector<9x9xf32>
      %1136 = tpu.matmul %1135, %171, %cst_483 {dimension_numbers = #tpu.dot_dimension_numbers<[1], [0], [0], [1], [0, 0, 1, 1], [], []>} : vector<9x15xf32>, vector<15x9xf32>, vector<9x9xf32> -> vector<9x9xf32>
      %1137 = arith.addf %1134, %1136 : vector<9x9xf32>
      %cst_484 = arith.constant dense<0.000000e+00> : vector<9x15xf32>
      %1138 = tpu.matmul %237, %1132, %cst_484 {dimension_numbers = #tpu.dot_dimension_numbers<[1], [0], [0], [1], [0, 0, 1, 1], [], []>} : vector<9x15xf32>, vector<15x15xf32>, vector<9x15xf32> -> vector<9x15xf32>
      %cst_485 = arith.constant dense<0.000000e+00> : vector<9x9xf32>
      %1139 = tpu.matmul %1138, %281, %cst_485 {dimension_numbers = #tpu.dot_dimension_numbers<[1], [0], [0], [1], [0, 0, 1, 1], [], []>} : vector<9x15xf32>, vector<15x9xf32>, vector<9x9xf32> -> vector<9x9xf32>
      %1140 = arith.addf %1137, %1139 : vector<9x9xf32>
      %c0_486 = arith.constant 0 : index
      %c0_487 = arith.constant 0 : index
      %1141 = vector.load %arg9[%c0_486, %c0_487] : memref<9x9xf32, #tpu.memory_space<vmem>>, vector<9x9xf32>
      tpu.vector_store %arg9[%c0_486, %c0_487], %1140 {strides = array<i32>} : memref<9x9xf32, #tpu.memory_space<vmem>>, vector<9x9xf32>,
      %cst_488 = arith.constant 0.000000e+00 : f32
      %1142 = vector.broadcast %cst_488 : f32 to vector<9x9xf32>
      %c0_489 = arith.constant 0 : index
      %c0_490 = arith.constant 0 : index
      %1143 = vector.load %arg8[%c0_489, %c0_490] : memref<9x9xf32, #tpu.memory_space<vmem>>, vector<9x9xf32>
      tpu.vector_store %arg8[%c0_489, %c0_490], %1142 {strides = array<i32>} : memref<9x9xf32, #tpu.memory_space<vmem>>, vector<9x9xf32>,
      %c0_491 = arith.constant 0 : index
      %c0_492 = arith.constant 0 : index
      %1144 = vector.load %arg8[%c0_491, %c0_492] : memref<9x9xf32, #tpu.memory_space<vmem>>, vector<9x9xf32>
      %c0_493 = arith.constant 0 : index
      %c0_494 = arith.constant 0 : index
      %1145 = vector.load %arg9[%c0_493, %c0_494] : memref<9x9xf32, #tpu.memory_space<vmem>>, vector<9x9xf32>
      %1146 = vector.extract_strided_slice %1144 {offsets = [0, 0], sizes = [7, 7], strides = [1, 1]} : vector<9x9xf32> to vector<7x7xf32>
      %cst_495 = arith.constant -0.333333343 : f32
      %1147 = vector.broadcast %cst_495 : f32 to vector<7x7xf32>
      %1148 = arith.mulf %1147, %1146 : vector<7x7xf32>
      %1149 = vector.extract_strided_slice %1144 {offsets = [0, 1], sizes = [7, 7], strides = [1, 1]} : vector<9x9xf32> to vector<7x7xf32>
      %cst_496 = arith.constant -0.333333343 : f32
      %1150 = vector.broadcast %cst_496 : f32 to vector<7x7xf32>
      %1151 = arith.mulf %1150, %1149 : vector<7x7xf32>
      %1152 = arith.addf %1148, %1151 : vector<7x7xf32>
      %1153 = vector.extract_strided_slice %1144 {offsets = [0, 2], sizes = [7, 7], strides = [1, 1]} : vector<9x9xf32> to vector<7x7xf32>
      %cst_497 = arith.constant -0.333333343 : f32
      %1154 = vector.broadcast %cst_497 : f32 to vector<7x7xf32>
      %1155 = arith.mulf %1154, %1153 : vector<7x7xf32>
      %1156 = arith.addf %1152, %1155 : vector<7x7xf32>
      %1157 = vector.extract_strided_slice %1144 {offsets = [1, 0], sizes = [7, 7], strides = [1, 1]} : vector<9x9xf32> to vector<7x7xf32>
      %cst_498 = arith.constant -0.333333343 : f32
      %1158 = vector.broadcast %cst_498 : f32 to vector<7x7xf32>
      %1159 = arith.mulf %1158, %1157 : vector<7x7xf32>
      %1160 = arith.addf %1156, %1159 : vector<7x7xf32>
      %1161 = vector.extract_strided_slice %1144 {offsets = [1, 1], sizes = [7, 7], strides = [1, 1]} : vector<9x9xf32> to vector<7x7xf32>
      %cst_499 = arith.constant 2.66666675 : f32
      %1162 = vector.broadcast %cst_499 : f32 to vector<7x7xf32>
      %1163 = arith.mulf %1162, %1161 : vector<7x7xf32>
      %1164 = arith.addf %1160, %1163 : vector<7x7xf32>
      %1165 = vector.extract_strided_slice %1144 {offsets = [1, 2], sizes = [7, 7], strides = [1, 1]} : vector<9x9xf32> to vector<7x7xf32>
      %cst_500 = arith.constant -0.333333343 : f32
      %1166 = vector.broadcast %cst_500 : f32 to vector<7x7xf32>
      %1167 = arith.mulf %1166, %1165 : vector<7x7xf32>
      %1168 = arith.addf %1164, %1167 : vector<7x7xf32>
      %1169 = vector.extract_strided_slice %1144 {offsets = [2, 0], sizes = [7, 7], strides = [1, 1]} : vector<9x9xf32> to vector<7x7xf32>
      %cst_501 = arith.constant -0.333333343 : f32
      %1170 = vector.broadcast %cst_501 : f32 to vector<7x7xf32>
      %1171 = arith.mulf %1170, %1169 : vector<7x7xf32>
      %1172 = arith.addf %1168, %1171 : vector<7x7xf32>
      %1173 = vector.extract_strided_slice %1144 {offsets = [2, 1], sizes = [7, 7], strides = [1, 1]} : vector<9x9xf32> to vector<7x7xf32>
      %cst_502 = arith.constant -0.333333343 : f32
      %1174 = vector.broadcast %cst_502 : f32 to vector<7x7xf32>
      %1175 = arith.mulf %1174, %1173 : vector<7x7xf32>
      %1176 = arith.addf %1172, %1175 : vector<7x7xf32>
      %1177 = vector.extract_strided_slice %1144 {offsets = [2, 2], sizes = [7, 7], strides = [1, 1]} : vector<9x9xf32> to vector<7x7xf32>
      %cst_503 = arith.constant -0.333333343 : f32
      %1178 = vector.broadcast %cst_503 : f32 to vector<7x7xf32>
      %1179 = arith.mulf %1178, %1177 : vector<7x7xf32>
      %1180 = arith.addf %1176, %1179 : vector<7x7xf32>
      %1181 = vector.extract_strided_slice %1144 {offsets = [1, 1], sizes = [7, 7], strides = [1, 1]} : vector<9x9xf32> to vector<7x7xf32>
      %1182 = vector.extract_strided_slice %1145 {offsets = [1, 1], sizes = [7, 7], strides = [1, 1]} : vector<9x9xf32> to vector<7x7xf32>
      %1183 = arith.subf %1182, %1180 : vector<7x7xf32>
      %cst_504 = arith.constant 2.500000e-01 : f32
      %1184 = vector.broadcast %cst_504 : f32 to vector<7x7xf32>
      %1185 = arith.mulf %1184, %1183 : vector<7x7xf32>
      %1186 = arith.addf %1181, %1185 : vector<7x7xf32>
      %c1_505 = arith.constant 1 : index
      %c1_506 = arith.constant 1 : index
      %1187 = vector.load %arg8[%c1_505, %c1_506] : memref<9x9xf32, #tpu.memory_space<vmem>>, vector<7x7xf32>
      tpu.vector_store %arg8[%c1_505, %c1_506], %1186 {strides = array<i32>} : memref<9x9xf32, #tpu.memory_space<vmem>>, vector<7x7xf32>,
      %c0_507 = arith.constant 0 : index
      %c0_508 = arith.constant 0 : index
      %1188 = vector.load %arg8[%c0_507, %c0_508] : memref<9x9xf32, #tpu.memory_space<vmem>>, vector<9x9xf32>
      %c0_509 = arith.constant 0 : index
      %c0_510 = arith.constant 0 : index
      %1189 = vector.load %arg9[%c0_509, %c0_510] : memref<9x9xf32, #tpu.memory_space<vmem>>, vector<9x9xf32>
      %1190 = vector.extract_strided_slice %1189 {offsets = [1, 1], sizes = [7, 7], strides = [1, 1]} : vector<9x9xf32> to vector<7x7xf32>
      %1191 = vector.extract_strided_slice %1188 {offsets = [0, 0], sizes = [7, 7], strides = [1, 1]} : vector<9x9xf32> to vector<7x7xf32>
      %cst_511 = arith.constant -0.333333343 : f32
      %1192 = vector.broadcast %cst_511 : f32 to vector<7x7xf32>
      %1193 = arith.mulf %1192, %1191 : vector<7x7xf32>
      %1194 = vector.extract_strided_slice %1188 {offsets = [0, 1], sizes = [7, 7], strides = [1, 1]} : vector<9x9xf32> to vector<7x7xf32>
      %cst_512 = arith.constant -0.333333343 : f32
      %1195 = vector.broadcast %cst_512 : f32 to vector<7x7xf32>
      %1196 = arith.mulf %1195, %1194 : vector<7x7xf32>
      %1197 = arith.addf %1193, %1196 : vector<7x7xf32>
      %1198 = vector.extract_strided_slice %1188 {offsets = [0, 2], sizes = [7, 7], strides = [1, 1]} : vector<9x9xf32> to vector<7x7xf32>
      %cst_513 = arith.constant -0.333333343 : f32
      %1199 = vector.broadcast %cst_513 : f32 to vector<7x7xf32>
      %1200 = arith.mulf %1199, %1198 : vector<7x7xf32>
      %1201 = arith.addf %1197, %1200 : vector<7x7xf32>
      %1202 = vector.extract_strided_slice %1188 {offsets = [1, 0], sizes = [7, 7], strides = [1, 1]} : vector<9x9xf32> to vector<7x7xf32>
      %cst_514 = arith.constant -0.333333343 : f32
      %1203 = vector.broadcast %cst_514 : f32 to vector<7x7xf32>
      %1204 = arith.mulf %1203, %1202 : vector<7x7xf32>
      %1205 = arith.addf %1201, %1204 : vector<7x7xf32>
      %1206 = vector.extract_strided_slice %1188 {offsets = [1, 1], sizes = [7, 7], strides = [1, 1]} : vector<9x9xf32> to vector<7x7xf32>
      %cst_515 = arith.constant 2.66666675 : f32
      %1207 = vector.broadcast %cst_515 : f32 to vector<7x7xf32>
      %1208 = arith.mulf %1207, %1206 : vector<7x7xf32>
      %1209 = arith.addf %1205, %1208 : vector<7x7xf32>
      %1210 = vector.extract_strided_slice %1188 {offsets = [1, 2], sizes = [7, 7], strides = [1, 1]} : vector<9x9xf32> to vector<7x7xf32>
      %cst_516 = arith.constant -0.333333343 : f32
      %1211 = vector.broadcast %cst_516 : f32 to vector<7x7xf32>
      %1212 = arith.mulf %1211, %1210 : vector<7x7xf32>
      %1213 = arith.addf %1209, %1212 : vector<7x7xf32>
      %1214 = vector.extract_strided_slice %1188 {offsets = [2, 0], sizes = [7, 7], strides = [1, 1]} : vector<9x9xf32> to vector<7x7xf32>
      %cst_517 = arith.constant -0.333333343 : f32
      %1215 = vector.broadcast %cst_517 : f32 to vector<7x7xf32>
      %1216 = arith.mulf %1215, %1214 : vector<7x7xf32>
      %1217 = arith.addf %1213, %1216 : vector<7x7xf32>
      %1218 = vector.extract_strided_slice %1188 {offsets = [2, 1], sizes = [7, 7], strides = [1, 1]} : vector<9x9xf32> to vector<7x7xf32>
      %cst_518 = arith.constant -0.333333343 : f32
      %1219 = vector.broadcast %cst_518 : f32 to vector<7x7xf32>
      %1220 = arith.mulf %1219, %1218 : vector<7x7xf32>
      %1221 = arith.addf %1217, %1220 : vector<7x7xf32>
      %1222 = vector.extract_strided_slice %1188 {offsets = [2, 2], sizes = [7, 7], strides = [1, 1]} : vector<9x9xf32> to vector<7x7xf32>
      %cst_519 = arith.constant -0.333333343 : f32
      %1223 = vector.broadcast %cst_519 : f32 to vector<7x7xf32>
      %1224 = arith.mulf %1223, %1222 : vector<7x7xf32>
      %1225 = arith.addf %1221, %1224 : vector<7x7xf32>
      %1226 = arith.subf %1190, %1225 : vector<7x7xf32>
      %cst_520 = arith.constant dense<0.000000e+00> : vector<5x7xf32>
      %1227 = tpu.matmul %347, %1226, %cst_520 {dimension_numbers = #tpu.dot_dimension_numbers<[1], [0], [0], [1], [0, 0, 1, 1], [], []>} : vector<5x7xf32>, vector<7x7xf32>, vector<5x7xf32> -> vector<5x7xf32>
      %cst_521 = arith.constant dense<0.000000e+00> : vector<5x5xf32>
      %1228 = tpu.matmul %1227, %391, %cst_521 {dimension_numbers = #tpu.dot_dimension_numbers<[1], [0], [0], [1], [0, 0, 1, 1], [], []>} : vector<5x7xf32>, vector<7x5xf32>, vector<5x5xf32> -> vector<5x5xf32>
      %cst_522 = arith.constant dense<0.000000e+00> : vector<5x7xf32>
      %1229 = tpu.matmul %457, %1226, %cst_522 {dimension_numbers = #tpu.dot_dimension_numbers<[1], [0], [0], [1], [0, 0, 1, 1], [], []>} : vector<5x7xf32>, vector<7x7xf32>, vector<5x7xf32> -> vector<5x7xf32>
      %cst_523 = arith.constant dense<0.000000e+00> : vector<5x5xf32>
      %1230 = tpu.matmul %1229, %501, %cst_523 {dimension_numbers = #tpu.dot_dimension_numbers<[1], [0], [0], [1], [0, 0, 1, 1], [], []>} : vector<5x7xf32>, vector<7x5xf32>, vector<5x5xf32> -> vector<5x5xf32>
      %1231 = arith.addf %1228, %1230 : vector<5x5xf32>
      %cst_524 = arith.constant dense<0.000000e+00> : vector<5x7xf32>
      %1232 = tpu.matmul %567, %1226, %cst_524 {dimension_numbers = #tpu.dot_dimension_numbers<[1], [0], [0], [1], [0, 0, 1, 1], [], []>} : vector<5x7xf32>, vector<7x7xf32>, vector<5x7xf32> -> vector<5x7xf32>
      %cst_525 = arith.constant dense<0.000000e+00> : vector<5x5xf32>
      %1233 = tpu.matmul %1232, %611, %cst_525 {dimension_numbers = #tpu.dot_dimension_numbers<[1], [0], [0], [1], [0, 0, 1, 1], [], []>} : vector<5x7xf32>, vector<7x5xf32>, vector<5x5xf32> -> vector<5x5xf32>
      %1234 = arith.addf %1231, %1233 : vector<5x5xf32>
      %c0_526 = arith.constant 0 : index
      %c0_527 = arith.constant 0 : index
      %1235 = vector.load %arg11[%c0_526, %c0_527] : memref<5x5xf32, #tpu.memory_space<vmem>>, vector<5x5xf32>
      tpu.vector_store %arg11[%c0_526, %c0_527], %1234 {strides = array<i32>} : memref<5x5xf32, #tpu.memory_space<vmem>>, vector<5x5xf32>,
      %cst_528 = arith.constant 0.000000e+00 : f32
      %1236 = vector.broadcast %cst_528 : f32 to vector<5x5xf32>
      %c0_529 = arith.constant 0 : index
      %c0_530 = arith.constant 0 : index
      %1237 = vector.load %arg10[%c0_529, %c0_530] : memref<5x5xf32, #tpu.memory_space<vmem>>, vector<5x5xf32>
      tpu.vector_store %arg10[%c0_529, %c0_530], %1236 {strides = array<i32>} : memref<5x5xf32, #tpu.memory_space<vmem>>, vector<5x5xf32>,
      %c0_531 = arith.constant 0 : index
      %c0_532 = arith.constant 0 : index
      %1238 = vector.load %arg10[%c0_531, %c0_532] : memref<5x5xf32, #tpu.memory_space<vmem>>, vector<5x5xf32>
      %c0_533 = arith.constant 0 : index
      %c0_534 = arith.constant 0 : index
      %1239 = vector.load %arg11[%c0_533, %c0_534] : memref<5x5xf32, #tpu.memory_space<vmem>>, vector<5x5xf32>
      %1240 = vector.extract_strided_slice %1238 {offsets = [0, 0], sizes = [3, 3], strides = [1, 1]} : vector<5x5xf32> to vector<3x3xf32>
      %cst_535 = arith.constant -0.333333343 : f32
      %1241 = vector.broadcast %cst_535 : f32 to vector<3x3xf32>
      %1242 = arith.mulf %1241, %1240 : vector<3x3xf32>
      %1243 = vector.extract_strided_slice %1238 {offsets = [0, 1], sizes = [3, 3], strides = [1, 1]} : vector<5x5xf32> to vector<3x3xf32>
      %cst_536 = arith.constant -0.333333343 : f32
      %1244 = vector.broadcast %cst_536 : f32 to vector<3x3xf32>
      %1245 = arith.mulf %1244, %1243 : vector<3x3xf32>
      %1246 = arith.addf %1242, %1245 : vector<3x3xf32>
      %1247 = vector.extract_strided_slice %1238 {offsets = [0, 2], sizes = [3, 3], strides = [1, 1]} : vector<5x5xf32> to vector<3x3xf32>
      %cst_537 = arith.constant -0.333333343 : f32
      %1248 = vector.broadcast %cst_537 : f32 to vector<3x3xf32>
      %1249 = arith.mulf %1248, %1247 : vector<3x3xf32>
      %1250 = arith.addf %1246, %1249 : vector<3x3xf32>
      %1251 = vector.extract_strided_slice %1238 {offsets = [1, 0], sizes = [3, 3], strides = [1, 1]} : vector<5x5xf32> to vector<3x3xf32>
      %cst_538 = arith.constant -0.333333343 : f32
      %1252 = vector.broadcast %cst_538 : f32 to vector<3x3xf32>
      %1253 = arith.mulf %1252, %1251 : vector<3x3xf32>
      %1254 = arith.addf %1250, %1253 : vector<3x3xf32>
      %1255 = vector.extract_strided_slice %1238 {offsets = [1, 1], sizes = [3, 3], strides = [1, 1]} : vector<5x5xf32> to vector<3x3xf32>
      %cst_539 = arith.constant 2.66666675 : f32
      %1256 = vector.broadcast %cst_539 : f32 to vector<3x3xf32>
      %1257 = arith.mulf %1256, %1255 : vector<3x3xf32>
      %1258 = arith.addf %1254, %1257 : vector<3x3xf32>
      %1259 = vector.extract_strided_slice %1238 {offsets = [1, 2], sizes = [3, 3], strides = [1, 1]} : vector<5x5xf32> to vector<3x3xf32>
      %cst_540 = arith.constant -0.333333343 : f32
      %1260 = vector.broadcast %cst_540 : f32 to vector<3x3xf32>
      %1261 = arith.mulf %1260, %1259 : vector<3x3xf32>
      %1262 = arith.addf %1258, %1261 : vector<3x3xf32>
      %1263 = vector.extract_strided_slice %1238 {offsets = [2, 0], sizes = [3, 3], strides = [1, 1]} : vector<5x5xf32> to vector<3x3xf32>
      %cst_541 = arith.constant -0.333333343 : f32
      %1264 = vector.broadcast %cst_541 : f32 to vector<3x3xf32>
      %1265 = arith.mulf %1264, %1263 : vector<3x3xf32>
      %1266 = arith.addf %1262, %1265 : vector<3x3xf32>
      %1267 = vector.extract_strided_slice %1238 {offsets = [2, 1], sizes = [3, 3], strides = [1, 1]} : vector<5x5xf32> to vector<3x3xf32>
      %cst_542 = arith.constant -0.333333343 : f32
      %1268 = vector.broadcast %cst_542 : f32 to vector<3x3xf32>
      %1269 = arith.mulf %1268, %1267 : vector<3x3xf32>
      %1270 = arith.addf %1266, %1269 : vector<3x3xf32>
      %1271 = vector.extract_strided_slice %1238 {offsets = [2, 2], sizes = [3, 3], strides = [1, 1]} : vector<5x5xf32> to vector<3x3xf32>
      %cst_543 = arith.constant -0.333333343 : f32
      %1272 = vector.broadcast %cst_543 : f32 to vector<3x3xf32>
      %1273 = arith.mulf %1272, %1271 : vector<3x3xf32>
      %1274 = arith.addf %1270, %1273 : vector<3x3xf32>
      %1275 = vector.extract_strided_slice %1238 {offsets = [1, 1], sizes = [3, 3], strides = [1, 1]} : vector<5x5xf32> to vector<3x3xf32>
      %1276 = vector.extract_strided_slice %1239 {offsets = [1, 1], sizes = [3, 3], strides = [1, 1]} : vector<5x5xf32> to vector<3x3xf32>
      %1277 = arith.subf %1276, %1274 : vector<3x3xf32>
      %cst_544 = arith.constant 2.500000e-01 : f32
      %1278 = vector.broadcast %cst_544 : f32 to vector<3x3xf32>
      %1279 = arith.mulf %1278, %1277 : vector<3x3xf32>
      %1280 = arith.addf %1275, %1279 : vector<3x3xf32>
      %c1_545 = arith.constant 1 : index
      %c1_546 = arith.constant 1 : index
      %1281 = vector.load %arg10[%c1_545, %c1_546] : memref<5x5xf32, #tpu.memory_space<vmem>>, vector<3x3xf32>
      tpu.vector_store %arg10[%c1_545, %c1_546], %1280 {strides = array<i32>} : memref<5x5xf32, #tpu.memory_space<vmem>>, vector<3x3xf32>,
      %c0_547 = arith.constant 0 : index
      %c0_548 = arith.constant 0 : index
      %1282 = vector.load %arg10[%c0_547, %c0_548] : memref<5x5xf32, #tpu.memory_space<vmem>>, vector<5x5xf32>
      %c0_549 = arith.constant 0 : index
      %c0_550 = arith.constant 0 : index
      %1283 = vector.load %arg11[%c0_549, %c0_550] : memref<5x5xf32, #tpu.memory_space<vmem>>, vector<5x5xf32>
      %1284 = vector.extract_strided_slice %1283 {offsets = [1, 1], sizes = [3, 3], strides = [1, 1]} : vector<5x5xf32> to vector<3x3xf32>
      %1285 = vector.extract_strided_slice %1282 {offsets = [0, 0], sizes = [3, 3], strides = [1, 1]} : vector<5x5xf32> to vector<3x3xf32>
      %cst_551 = arith.constant -0.333333343 : f32
      %1286 = vector.broadcast %cst_551 : f32 to vector<3x3xf32>
      %1287 = arith.mulf %1286, %1285 : vector<3x3xf32>
      %1288 = vector.extract_strided_slice %1282 {offsets = [0, 1], sizes = [3, 3], strides = [1, 1]} : vector<5x5xf32> to vector<3x3xf32>
      %cst_552 = arith.constant -0.333333343 : f32
      %1289 = vector.broadcast %cst_552 : f32 to vector<3x3xf32>
      %1290 = arith.mulf %1289, %1288 : vector<3x3xf32>
      %1291 = arith.addf %1287, %1290 : vector<3x3xf32>
      %1292 = vector.extract_strided_slice %1282 {offsets = [0, 2], sizes = [3, 3], strides = [1, 1]} : vector<5x5xf32> to vector<3x3xf32>
      %cst_553 = arith.constant -0.333333343 : f32
      %1293 = vector.broadcast %cst_553 : f32 to vector<3x3xf32>
      %1294 = arith.mulf %1293, %1292 : vector<3x3xf32>
      %1295 = arith.addf %1291, %1294 : vector<3x3xf32>
      %1296 = vector.extract_strided_slice %1282 {offsets = [1, 0], sizes = [3, 3], strides = [1, 1]} : vector<5x5xf32> to vector<3x3xf32>
      %cst_554 = arith.constant -0.333333343 : f32
      %1297 = vector.broadcast %cst_554 : f32 to vector<3x3xf32>
      %1298 = arith.mulf %1297, %1296 : vector<3x3xf32>
      %1299 = arith.addf %1295, %1298 : vector<3x3xf32>
      %1300 = vector.extract_strided_slice %1282 {offsets = [1, 1], sizes = [3, 3], strides = [1, 1]} : vector<5x5xf32> to vector<3x3xf32>
      %cst_555 = arith.constant 2.66666675 : f32
      %1301 = vector.broadcast %cst_555 : f32 to vector<3x3xf32>
      %1302 = arith.mulf %1301, %1300 : vector<3x3xf32>
      %1303 = arith.addf %1299, %1302 : vector<3x3xf32>
      %1304 = vector.extract_strided_slice %1282 {offsets = [1, 2], sizes = [3, 3], strides = [1, 1]} : vector<5x5xf32> to vector<3x3xf32>
      %cst_556 = arith.constant -0.333333343 : f32
      %1305 = vector.broadcast %cst_556 : f32 to vector<3x3xf32>
      %1306 = arith.mulf %1305, %1304 : vector<3x3xf32>
      %1307 = arith.addf %1303, %1306 : vector<3x3xf32>
      %1308 = vector.extract_strided_slice %1282 {offsets = [2, 0], sizes = [3, 3], strides = [1, 1]} : vector<5x5xf32> to vector<3x3xf32>
      %cst_557 = arith.constant -0.333333343 : f32
      %1309 = vector.broadcast %cst_557 : f32 to vector<3x3xf32>
      %1310 = arith.mulf %1309, %1308 : vector<3x3xf32>
      %1311 = arith.addf %1307, %1310 : vector<3x3xf32>
      %1312 = vector.extract_strided_slice %1282 {offsets = [2, 1], sizes = [3, 3], strides = [1, 1]} : vector<5x5xf32> to vector<3x3xf32>
      %cst_558 = arith.constant -0.333333343 : f32
      %1313 = vector.broadcast %cst_558 : f32 to vector<3x3xf32>
      %1314 = arith.mulf %1313, %1312 : vector<3x3xf32>
      %1315 = arith.addf %1311, %1314 : vector<3x3xf32>
      %1316 = vector.extract_strided_slice %1282 {offsets = [2, 2], sizes = [3, 3], strides = [1, 1]} : vector<5x5xf32> to vector<3x3xf32>
      %cst_559 = arith.constant -0.333333343 : f32
      %1317 = vector.broadcast %cst_559 : f32 to vector<3x3xf32>
      %1318 = arith.mulf %1317, %1316 : vector<3x3xf32>
      %1319 = arith.addf %1315, %1318 : vector<3x3xf32>
      %1320 = arith.subf %1284, %1319 : vector<3x3xf32>
      %cst_560 = arith.constant dense<0.000000e+00> : vector<3x3xf32>
      %1321 = tpu.matmul %677, %1320, %cst_560 {dimension_numbers = #tpu.dot_dimension_numbers<[1], [0], [0], [1], [0, 0, 1, 1], [], []>} : vector<3x3xf32>, vector<3x3xf32>, vector<3x3xf32> -> vector<3x3xf32>
      %cst_561 = arith.constant dense<0.000000e+00> : vector<3x3xf32>
      %1322 = tpu.matmul %1321, %721, %cst_561 {dimension_numbers = #tpu.dot_dimension_numbers<[1], [0], [0], [1], [0, 0, 1, 1], [], []>} : vector<3x3xf32>, vector<3x3xf32>, vector<3x3xf32> -> vector<3x3xf32>
      %cst_562 = arith.constant dense<0.000000e+00> : vector<3x3xf32>
      %1323 = tpu.matmul %787, %1320, %cst_562 {dimension_numbers = #tpu.dot_dimension_numbers<[1], [0], [0], [1], [0, 0, 1, 1], [], []>} : vector<3x3xf32>, vector<3x3xf32>, vector<3x3xf32> -> vector<3x3xf32>
      %cst_563 = arith.constant dense<0.000000e+00> : vector<3x3xf32>
      %1324 = tpu.matmul %1323, %831, %cst_563 {dimension_numbers = #tpu.dot_dimension_numbers<[1], [0], [0], [1], [0, 0, 1, 1], [], []>} : vector<3x3xf32>, vector<3x3xf32>, vector<3x3xf32> -> vector<3x3xf32>
      %1325 = arith.addf %1322, %1324 : vector<3x3xf32>
      %cst_564 = arith.constant dense<0.000000e+00> : vector<3x3xf32>
      %1326 = tpu.matmul %897, %1320, %cst_564 {dimension_numbers = #tpu.dot_dimension_numbers<[1], [0], [0], [1], [0, 0, 1, 1], [], []>} : vector<3x3xf32>, vector<3x3xf32>, vector<3x3xf32> -> vector<3x3xf32>
      %cst_565 = arith.constant dense<0.000000e+00> : vector<3x3xf32>
      %1327 = tpu.matmul %1326, %941, %cst_565 {dimension_numbers = #tpu.dot_dimension_numbers<[1], [0], [0], [1], [0, 0, 1, 1], [], []>} : vector<3x3xf32>, vector<3x3xf32>, vector<3x3xf32> -> vector<3x3xf32>
      %1328 = arith.addf %1325, %1327 : vector<3x3xf32>
      %c0_566 = arith.constant 0 : index
      %c0_567 = arith.constant 0 : index
      %1329 = vector.load %arg13[%c0_566, %c0_567] : memref<3x3xf32, #tpu.memory_space<vmem>>, vector<3x3xf32>
      tpu.vector_store %arg13[%c0_566, %c0_567], %1328 {strides = array<i32>} : memref<3x3xf32, #tpu.memory_space<vmem>>, vector<3x3xf32>,
      %cst_568 = arith.constant 0.000000e+00 : f32
      %1330 = vector.broadcast %cst_568 : f32 to vector<3x3xf32>
      %c0_569 = arith.constant 0 : index
      %c0_570 = arith.constant 0 : index
      %1331 = vector.load %arg12[%c0_569, %c0_570] : memref<3x3xf32, #tpu.memory_space<vmem>>, vector<3x3xf32>
      tpu.vector_store %arg12[%c0_569, %c0_570], %1330 {strides = array<i32>} : memref<3x3xf32, #tpu.memory_space<vmem>>, vector<3x3xf32>,
      %c0_571 = arith.constant 0 : index
      %c0_572 = arith.constant 0 : index
      %1332 = vector.load %arg12[%c0_571, %c0_572] : memref<3x3xf32, #tpu.memory_space<vmem>>, vector<3x3xf32>
      %c0_573 = arith.constant 0 : index
      %c0_574 = arith.constant 0 : index
      %1333 = vector.load %arg13[%c0_573, %c0_574] : memref<3x3xf32, #tpu.memory_space<vmem>>, vector<3x3xf32>
      %1334 = vector.extract_strided_slice %1332 {offsets = [0, 0], sizes = [1, 1], strides = [1, 1]} : vector<3x3xf32> to vector<1x1xf32>
      %cst_575 = arith.constant -0.333333343 : f32
      %1335 = vector.broadcast %cst_575 : f32 to vector<1x1xf32>
      %1336 = arith.mulf %1335, %1334 : vector<1x1xf32>
      %1337 = vector.extract_strided_slice %1332 {offsets = [0, 1], sizes = [1, 1], strides = [1, 1]} : vector<3x3xf32> to vector<1x1xf32>
      %cst_576 = arith.constant -0.333333343 : f32
      %1338 = vector.broadcast %cst_576 : f32 to vector<1x1xf32>
      %1339 = arith.mulf %1338, %1337 : vector<1x1xf32>
      %1340 = arith.addf %1336, %1339 : vector<1x1xf32>
      %1341 = vector.extract_strided_slice %1332 {offsets = [0, 2], sizes = [1, 1], strides = [1, 1]} : vector<3x3xf32> to vector<1x1xf32>
      %cst_577 = arith.constant -0.333333343 : f32
      %1342 = vector.broadcast %cst_577 : f32 to vector<1x1xf32>
      %1343 = arith.mulf %1342, %1341 : vector<1x1xf32>
      %1344 = arith.addf %1340, %1343 : vector<1x1xf32>
      %1345 = vector.extract_strided_slice %1332 {offsets = [1, 0], sizes = [1, 1], strides = [1, 1]} : vector<3x3xf32> to vector<1x1xf32>
      %cst_578 = arith.constant -0.333333343 : f32
      %1346 = vector.broadcast %cst_578 : f32 to vector<1x1xf32>
      %1347 = arith.mulf %1346, %1345 : vector<1x1xf32>
      %1348 = arith.addf %1344, %1347 : vector<1x1xf32>
      %1349 = vector.extract_strided_slice %1332 {offsets = [1, 1], sizes = [1, 1], strides = [1, 1]} : vector<3x3xf32> to vector<1x1xf32>
      %cst_579 = arith.constant 2.66666675 : f32
      %1350 = vector.broadcast %cst_579 : f32 to vector<1x1xf32>
      %1351 = arith.mulf %1350, %1349 : vector<1x1xf32>
      %1352 = arith.addf %1348, %1351 : vector<1x1xf32>
      %1353 = vector.extract_strided_slice %1332 {offsets = [1, 2], sizes = [1, 1], strides = [1, 1]} : vector<3x3xf32> to vector<1x1xf32>
      %cst_580 = arith.constant -0.333333343 : f32
      %1354 = vector.broadcast %cst_580 : f32 to vector<1x1xf32>
      %1355 = arith.mulf %1354, %1353 : vector<1x1xf32>
      %1356 = arith.addf %1352, %1355 : vector<1x1xf32>
      %1357 = vector.extract_strided_slice %1332 {offsets = [2, 0], sizes = [1, 1], strides = [1, 1]} : vector<3x3xf32> to vector<1x1xf32>
      %cst_581 = arith.constant -0.333333343 : f32
      %1358 = vector.broadcast %cst_581 : f32 to vector<1x1xf32>
      %1359 = arith.mulf %1358, %1357 : vector<1x1xf32>
      %1360 = arith.addf %1356, %1359 : vector<1x1xf32>
      %1361 = vector.extract_strided_slice %1332 {offsets = [2, 1], sizes = [1, 1], strides = [1, 1]} : vector<3x3xf32> to vector<1x1xf32>
      %cst_582 = arith.constant -0.333333343 : f32
      %1362 = vector.broadcast %cst_582 : f32 to vector<1x1xf32>
      %1363 = arith.mulf %1362, %1361 : vector<1x1xf32>
      %1364 = arith.addf %1360, %1363 : vector<1x1xf32>
      %1365 = vector.extract_strided_slice %1332 {offsets = [2, 2], sizes = [1, 1], strides = [1, 1]} : vector<3x3xf32> to vector<1x1xf32>
      %cst_583 = arith.constant -0.333333343 : f32
      %1366 = vector.broadcast %cst_583 : f32 to vector<1x1xf32>
      %1367 = arith.mulf %1366, %1365 : vector<1x1xf32>
      %1368 = arith.addf %1364, %1367 : vector<1x1xf32>
      %1369 = vector.extract_strided_slice %1332 {offsets = [1, 1], sizes = [1, 1], strides = [1, 1]} : vector<3x3xf32> to vector<1x1xf32>
      %1370 = vector.extract_strided_slice %1333 {offsets = [1, 1], sizes = [1, 1], strides = [1, 1]} : vector<3x3xf32> to vector<1x1xf32>
      %1371 = arith.subf %1370, %1368 : vector<1x1xf32>
      %cst_584 = arith.constant 2.500000e-01 : f32
      %1372 = vector.broadcast %cst_584 : f32 to vector<1x1xf32>
      %1373 = arith.mulf %1372, %1371 : vector<1x1xf32>
      %1374 = arith.addf %1369, %1373 : vector<1x1xf32>
      %c1_585 = arith.constant 1 : index
      %c1_586 = arith.constant 1 : index
      %1375 = vector.load %arg12[%c1_585, %c1_586] : memref<3x3xf32, #tpu.memory_space<vmem>>, vector<1x1xf32>
      tpu.vector_store %arg12[%c1_585, %c1_586], %1374 {strides = array<i32>} : memref<3x3xf32, #tpu.memory_space<vmem>>, vector<1x1xf32>,
      %c0_587 = arith.constant 0 : index
      %c0_588 = arith.constant 0 : index
      %1376 = vector.load %arg12[%c0_587, %c0_588] : memref<3x3xf32, #tpu.memory_space<vmem>>, vector<3x3xf32>
      %c0_589 = arith.constant 0 : index
      %c0_590 = arith.constant 0 : index
      %1377 = vector.load %arg13[%c0_589, %c0_590] : memref<3x3xf32, #tpu.memory_space<vmem>>, vector<3x3xf32>
      %1378 = vector.extract_strided_slice %1376 {offsets = [0, 0], sizes = [1, 1], strides = [1, 1]} : vector<3x3xf32> to vector<1x1xf32>
      %cst_591 = arith.constant -0.333333343 : f32
      %1379 = vector.broadcast %cst_591 : f32 to vector<1x1xf32>
      %1380 = arith.mulf %1379, %1378 : vector<1x1xf32>
      %1381 = vector.extract_strided_slice %1376 {offsets = [0, 1], sizes = [1, 1], strides = [1, 1]} : vector<3x3xf32> to vector<1x1xf32>
      %cst_592 = arith.constant -0.333333343 : f32
      %1382 = vector.broadcast %cst_592 : f32 to vector<1x1xf32>
      %1383 = arith.mulf %1382, %1381 : vector<1x1xf32>
      %1384 = arith.addf %1380, %1383 : vector<1x1xf32>
      %1385 = vector.extract_strided_slice %1376 {offsets = [0, 2], sizes = [1, 1], strides = [1, 1]} : vector<3x3xf32> to vector<1x1xf32>
      %cst_593 = arith.constant -0.333333343 : f32
      %1386 = vector.broadcast %cst_593 : f32 to vector<1x1xf32>
      %1387 = arith.mulf %1386, %1385 : vector<1x1xf32>
      %1388 = arith.addf %1384, %1387 : vector<1x1xf32>
      %1389 = vector.extract_strided_slice %1376 {offsets = [1, 0], sizes = [1, 1], strides = [1, 1]} : vector<3x3xf32> to vector<1x1xf32>
      %cst_594 = arith.constant -0.333333343 : f32
      %1390 = vector.broadcast %cst_594 : f32 to vector<1x1xf32>
      %1391 = arith.mulf %1390, %1389 : vector<1x1xf32>
      %1392 = arith.addf %1388, %1391 : vector<1x1xf32>
      %1393 = vector.extract_strided_slice %1376 {offsets = [1, 1], sizes = [1, 1], strides = [1, 1]} : vector<3x3xf32> to vector<1x1xf32>
      %cst_595 = arith.constant 2.66666675 : f32
      %1394 = vector.broadcast %cst_595 : f32 to vector<1x1xf32>
      %1395 = arith.mulf %1394, %1393 : vector<1x1xf32>
      %1396 = arith.addf %1392, %1395 : vector<1x1xf32>
      %1397 = vector.extract_strided_slice %1376 {offsets = [1, 2], sizes = [1, 1], strides = [1, 1]} : vector<3x3xf32> to vector<1x1xf32>
      %cst_596 = arith.constant -0.333333343 : f32
      %1398 = vector.broadcast %cst_596 : f32 to vector<1x1xf32>
      %1399 = arith.mulf %1398, %1397 : vector<1x1xf32>
      %1400 = arith.addf %1396, %1399 : vector<1x1xf32>
      %1401 = vector.extract_strided_slice %1376 {offsets = [2, 0], sizes = [1, 1], strides = [1, 1]} : vector<3x3xf32> to vector<1x1xf32>
      %cst_597 = arith.constant -0.333333343 : f32
      %1402 = vector.broadcast %cst_597 : f32 to vector<1x1xf32>
      %1403 = arith.mulf %1402, %1401 : vector<1x1xf32>
      %1404 = arith.addf %1400, %1403 : vector<1x1xf32>
      %1405 = vector.extract_strided_slice %1376 {offsets = [2, 1], sizes = [1, 1], strides = [1, 1]} : vector<3x3xf32> to vector<1x1xf32>
      %cst_598 = arith.constant -0.333333343 : f32
      %1406 = vector.broadcast %cst_598 : f32 to vector<1x1xf32>
      %1407 = arith.mulf %1406, %1405 : vector<1x1xf32>
      %1408 = arith.addf %1404, %1407 : vector<1x1xf32>
      %1409 = vector.extract_strided_slice %1376 {offsets = [2, 2], sizes = [1, 1], strides = [1, 1]} : vector<3x3xf32> to vector<1x1xf32>
      %cst_599 = arith.constant -0.333333343 : f32
      %1410 = vector.broadcast %cst_599 : f32 to vector<1x1xf32>
      %1411 = arith.mulf %1410, %1409 : vector<1x1xf32>
      %1412 = arith.addf %1408, %1411 : vector<1x1xf32>
      %1413 = vector.extract_strided_slice %1376 {offsets = [1, 1], sizes = [1, 1], strides = [1, 1]} : vector<3x3xf32> to vector<1x1xf32>
      %1414 = vector.extract_strided_slice %1377 {offsets = [1, 1], sizes = [1, 1], strides = [1, 1]} : vector<3x3xf32> to vector<1x1xf32>
      %1415 = arith.subf %1414, %1412 : vector<1x1xf32>
      %cst_600 = arith.constant 2.500000e-01 : f32
      %1416 = vector.broadcast %cst_600 : f32 to vector<1x1xf32>
      %1417 = arith.mulf %1416, %1415 : vector<1x1xf32>
      %1418 = arith.addf %1413, %1417 : vector<1x1xf32>
      %c1_601 = arith.constant 1 : index
      %c1_602 = arith.constant 1 : index
      %1419 = vector.load %arg12[%c1_601, %c1_602] : memref<3x3xf32, #tpu.memory_space<vmem>>, vector<1x1xf32>
      tpu.vector_store %arg12[%c1_601, %c1_602], %1418 {strides = array<i32>} : memref<3x3xf32, #tpu.memory_space<vmem>>, vector<1x1xf32>,
      %c0_603 = arith.constant 0 : index
      %c0_604 = arith.constant 0 : index
      %1420 = vector.load %arg12[%c0_603, %c0_604] : memref<3x3xf32, #tpu.memory_space<vmem>>, vector<3x3xf32>
      %cst_605 = arith.constant dense<0.000000e+00> : vector<3x3xf32>
      %1421 = tpu.matmul %733, %1420, %cst_605 {dimension_numbers = #tpu.dot_dimension_numbers<[1], [0], [0], [1], [0, 0, 1, 1], [], []>} : vector<3x3xf32>, vector<3x3xf32>, vector<3x3xf32> -> vector<3x3xf32>
      %cst_606 = arith.constant dense<0.000000e+00> : vector<3x3xf32>
      %1422 = tpu.matmul %1421, %769, %cst_606 {dimension_numbers = #tpu.dot_dimension_numbers<[1], [0], [0], [1], [0, 0, 1, 1], [], []>} : vector<3x3xf32>, vector<3x3xf32>, vector<3x3xf32> -> vector<3x3xf32>
      %cst_607 = arith.constant dense<0.000000e+00> : vector<3x3xf32>
      %1423 = tpu.matmul %843, %1420, %cst_607 {dimension_numbers = #tpu.dot_dimension_numbers<[1], [0], [0], [1], [0, 0, 1, 1], [], []>} : vector<3x3xf32>, vector<3x3xf32>, vector<3x3xf32> -> vector<3x3xf32>
      %cst_608 = arith.constant dense<0.000000e+00> : vector<3x3xf32>
      %1424 = tpu.matmul %1423, %879, %cst_608 {dimension_numbers = #tpu.dot_dimension_numbers<[1], [0], [0], [1], [0, 0, 1, 1], [], []>} : vector<3x3xf32>, vector<3x3xf32>, vector<3x3xf32> -> vector<3x3xf32>
      %1425 = arith.addf %1422, %1424 : vector<3x3xf32>
      %cst_609 = arith.constant dense<0.000000e+00> : vector<3x3xf32>
      %1426 = tpu.matmul %953, %1420, %cst_609 {dimension_numbers = #tpu.dot_dimension_numbers<[1], [0], [0], [1], [0, 0, 1, 1], [], []>} : vector<3x3xf32>, vector<3x3xf32>, vector<3x3xf32> -> vector<3x3xf32>
      %cst_610 = arith.constant dense<0.000000e+00> : vector<3x3xf32>
      %1427 = tpu.matmul %1426, %989, %cst_610 {dimension_numbers = #tpu.dot_dimension_numbers<[1], [0], [0], [1], [0, 0, 1, 1], [], []>} : vector<3x3xf32>, vector<3x3xf32>, vector<3x3xf32> -> vector<3x3xf32>
      %1428 = arith.addf %1425, %1427 : vector<3x3xf32>
      %c0_611 = arith.constant 0 : index
      %c0_612 = arith.constant 0 : index
      %1429 = vector.load %arg10[%c0_611, %c0_612] : memref<5x5xf32, #tpu.memory_space<vmem>>, vector<5x5xf32>
      %1430 = vector.extract_strided_slice %1429 {offsets = [1, 1], sizes = [3, 3], strides = [1, 1]} : vector<5x5xf32> to vector<3x3xf32>
      %1431 = arith.addf %1430, %1428 : vector<3x3xf32>
      %c1_613 = arith.constant 1 : index
      %c1_614 = arith.constant 1 : index
      %1432 = vector.load %arg10[%c1_613, %c1_614] : memref<5x5xf32, #tpu.memory_space<vmem>>, vector<3x3xf32>
      tpu.vector_store %arg10[%c1_613, %c1_614], %1431 {strides = array<i32>} : memref<5x5xf32, #tpu.memory_space<vmem>>, vector<3x3xf32>,
      %c0_615 = arith.constant 0 : index
      %c0_616 = arith.constant 0 : index
      %1433 = vector.load %arg10[%c0_615, %c0_616] : memref<5x5xf32, #tpu.memory_space<vmem>>, vector<5x5xf32>
      %c0_617 = arith.constant 0 : index
      %c0_618 = arith.constant 0 : index
      %1434 = vector.load %arg11[%c0_617, %c0_618] : memref<5x5xf32, #tpu.memory_space<vmem>>, vector<5x5xf32>
      %1435 = vector.extract_strided_slice %1433 {offsets = [0, 0], sizes = [3, 3], strides = [1, 1]} : vector<5x5xf32> to vector<3x3xf32>
      %cst_619 = arith.constant -0.333333343 : f32
      %1436 = vector.broadcast %cst_619 : f32 to vector<3x3xf32>
      %1437 = arith.mulf %1436, %1435 : vector<3x3xf32>
      %1438 = vector.extract_strided_slice %1433 {offsets = [0, 1], sizes = [3, 3], strides = [1, 1]} : vector<5x5xf32> to vector<3x3xf32>
      %cst_620 = arith.constant -0.333333343 : f32
      %1439 = vector.broadcast %cst_620 : f32 to vector<3x3xf32>
      %1440 = arith.mulf %1439, %1438 : vector<3x3xf32>
      %1441 = arith.addf %1437, %1440 : vector<3x3xf32>
      %1442 = vector.extract_strided_slice %1433 {offsets = [0, 2], sizes = [3, 3], strides = [1, 1]} : vector<5x5xf32> to vector<3x3xf32>
      %cst_621 = arith.constant -0.333333343 : f32
      %1443 = vector.broadcast %cst_621 : f32 to vector<3x3xf32>
      %1444 = arith.mulf %1443, %1442 : vector<3x3xf32>
      %1445 = arith.addf %1441, %1444 : vector<3x3xf32>
      %1446 = vector.extract_strided_slice %1433 {offsets = [1, 0], sizes = [3, 3], strides = [1, 1]} : vector<5x5xf32> to vector<3x3xf32>
      %cst_622 = arith.constant -0.333333343 : f32
      %1447 = vector.broadcast %cst_622 : f32 to vector<3x3xf32>
      %1448 = arith.mulf %1447, %1446 : vector<3x3xf32>
      %1449 = arith.addf %1445, %1448 : vector<3x3xf32>
      %1450 = vector.extract_strided_slice %1433 {offsets = [1, 1], sizes = [3, 3], strides = [1, 1]} : vector<5x5xf32> to vector<3x3xf32>
      %cst_623 = arith.constant 2.66666675 : f32
      %1451 = vector.broadcast %cst_623 : f32 to vector<3x3xf32>
      %1452 = arith.mulf %1451, %1450 : vector<3x3xf32>
      %1453 = arith.addf %1449, %1452 : vector<3x3xf32>
      %1454 = vector.extract_strided_slice %1433 {offsets = [1, 2], sizes = [3, 3], strides = [1, 1]} : vector<5x5xf32> to vector<3x3xf32>
      %cst_624 = arith.constant -0.333333343 : f32
      %1455 = vector.broadcast %cst_624 : f32 to vector<3x3xf32>
      %1456 = arith.mulf %1455, %1454 : vector<3x3xf32>
      %1457 = arith.addf %1453, %1456 : vector<3x3xf32>
      %1458 = vector.extract_strided_slice %1433 {offsets = [2, 0], sizes = [3, 3], strides = [1, 1]} : vector<5x5xf32> to vector<3x3xf32>
      %cst_625 = arith.constant -0.333333343 : f32
      %1459 = vector.broadcast %cst_625 : f32 to vector<3x3xf32>
      %1460 = arith.mulf %1459, %1458 : vector<3x3xf32>
      %1461 = arith.addf %1457, %1460 : vector<3x3xf32>
      %1462 = vector.extract_strided_slice %1433 {offsets = [2, 1], sizes = [3, 3], strides = [1, 1]} : vector<5x5xf32> to vector<3x3xf32>
      %cst_626 = arith.constant -0.333333343 : f32
      %1463 = vector.broadcast %cst_626 : f32 to vector<3x3xf32>
      %1464 = arith.mulf %1463, %1462 : vector<3x3xf32>
      %1465 = arith.addf %1461, %1464 : vector<3x3xf32>
      %1466 = vector.extract_strided_slice %1433 {offsets = [2, 2], sizes = [3, 3], strides = [1, 1]} : vector<5x5xf32> to vector<3x3xf32>
      %cst_627 = arith.constant -0.333333343 : f32
      %1467 = vector.broadcast %cst_627 : f32 to vector<3x3xf32>
      %1468 = arith.mulf %1467, %1466 : vector<3x3xf32>
      %1469 = arith.addf %1465, %1468 : vector<3x3xf32>
      %1470 = vector.extract_strided_slice %1433 {offsets = [1, 1], sizes = [3, 3], strides = [1, 1]} : vector<5x5xf32> to vector<3x3xf32>
      %1471 = vector.extract_strided_slice %1434 {offsets = [1, 1], sizes = [3, 3], strides = [1, 1]} : vector<5x5xf32> to vector<3x3xf32>
      %1472 = arith.subf %1471, %1469 : vector<3x3xf32>
      %cst_628 = arith.constant 2.500000e-01 : f32
      %1473 = vector.broadcast %cst_628 : f32 to vector<3x3xf32>
      %1474 = arith.mulf %1473, %1472 : vector<3x3xf32>
      %1475 = arith.addf %1470, %1474 : vector<3x3xf32>
      %c1_629 = arith.constant 1 : index
      %c1_630 = arith.constant 1 : index
      %1476 = vector.load %arg10[%c1_629, %c1_630] : memref<5x5xf32, #tpu.memory_space<vmem>>, vector<3x3xf32>
      tpu.vector_store %arg10[%c1_629, %c1_630], %1475 {strides = array<i32>} : memref<5x5xf32, #tpu.memory_space<vmem>>, vector<3x3xf32>,
      %c0_631 = arith.constant 0 : index
      %c0_632 = arith.constant 0 : index
      %1477 = vector.load %arg10[%c0_631, %c0_632] : memref<5x5xf32, #tpu.memory_space<vmem>>, vector<5x5xf32>
      %cst_633 = arith.constant dense<0.000000e+00> : vector<7x5xf32>
      %1478 = tpu.matmul %403, %1477, %cst_633 {dimension_numbers = #tpu.dot_dimension_numbers<[1], [0], [0], [1], [0, 0, 1, 1], [], []>} : vector<7x5xf32>, vector<5x5xf32>, vector<7x5xf32> -> vector<7x5xf32>
      %cst_634 = arith.constant dense<0.000000e+00> : vector<7x7xf32>
      %1479 = tpu.matmul %1478, %439, %cst_634 {dimension_numbers = #tpu.dot_dimension_numbers<[1], [0], [0], [1], [0, 0, 1, 1], [], []>} : vector<7x5xf32>, vector<5x7xf32>, vector<7x7xf32> -> vector<7x7xf32>
      %cst_635 = arith.constant dense<0.000000e+00> : vector<7x5xf32>
      %1480 = tpu.matmul %513, %1477, %cst_635 {dimension_numbers = #tpu.dot_dimension_numbers<[1], [0], [0], [1], [0, 0, 1, 1], [], []>} : vector<7x5xf32>, vector<5x5xf32>, vector<7x5xf32> -> vector<7x5xf32>
      %cst_636 = arith.constant dense<0.000000e+00> : vector<7x7xf32>
      %1481 = tpu.matmul %1480, %549, %cst_636 {dimension_numbers = #tpu.dot_dimension_numbers<[1], [0], [0], [1], [0, 0, 1, 1], [], []>} : vector<7x5xf32>, vector<5x7xf32>, vector<7x7xf32> -> vector<7x7xf32>
      %1482 = arith.addf %1479, %1481 : vector<7x7xf32>
      %cst_637 = arith.constant dense<0.000000e+00> : vector<7x5xf32>
      %1483 = tpu.matmul %623, %1477, %cst_637 {dimension_numbers = #tpu.dot_dimension_numbers<[1], [0], [0], [1], [0, 0, 1, 1], [], []>} : vector<7x5xf32>, vector<5x5xf32>, vector<7x5xf32> -> vector<7x5xf32>
      %cst_638 = arith.constant dense<0.000000e+00> : vector<7x7xf32>
      %1484 = tpu.matmul %1483, %659, %cst_638 {dimension_numbers = #tpu.dot_dimension_numbers<[1], [0], [0], [1], [0, 0, 1, 1], [], []>} : vector<7x5xf32>, vector<5x7xf32>, vector<7x7xf32> -> vector<7x7xf32>
      %1485 = arith.addf %1482, %1484 : vector<7x7xf32>
      %c0_639 = arith.constant 0 : index
      %c0_640 = arith.constant 0 : index
      %1486 = vector.load %arg8[%c0_639, %c0_640] : memref<9x9xf32, #tpu.memory_space<vmem>>, vector<9x9xf32>
      %1487 = vector.extract_strided_slice %1486 {offsets = [1, 1], sizes = [7, 7], strides = [1, 1]} : vector<9x9xf32> to vector<7x7xf32>
      %1488 = arith.addf %1487, %1485 : vector<7x7xf32>
      %c1_641 = arith.constant 1 : index
      %c1_642 = arith.constant 1 : index
      %1489 = vector.load %arg8[%c1_641, %c1_642] : memref<9x9xf32, #tpu.memory_space<vmem>>, vector<7x7xf32>
      tpu.vector_store %arg8[%c1_641, %c1_642], %1488 {strides = array<i32>} : memref<9x9xf32, #tpu.memory_space<vmem>>, vector<7x7xf32>,
      %c0_643 = arith.constant 0 : index
      %c0_644 = arith.constant 0 : index
      %1490 = vector.load %arg8[%c0_643, %c0_644] : memref<9x9xf32, #tpu.memory_space<vmem>>, vector<9x9xf32>
      %c0_645 = arith.constant 0 : index
      %c0_646 = arith.constant 0 : index
      %1491 = vector.load %arg9[%c0_645, %c0_646] : memref<9x9xf32, #tpu.memory_space<vmem>>, vector<9x9xf32>
      %1492 = vector.extract_strided_slice %1490 {offsets = [0, 0], sizes = [7, 7], strides = [1, 1]} : vector<9x9xf32> to vector<7x7xf32>
      %cst_647 = arith.constant -0.333333343 : f32
      %1493 = vector.broadcast %cst_647 : f32 to vector<7x7xf32>
      %1494 = arith.mulf %1493, %1492 : vector<7x7xf32>
      %1495 = vector.extract_strided_slice %1490 {offsets = [0, 1], sizes = [7, 7], strides = [1, 1]} : vector<9x9xf32> to vector<7x7xf32>
      %cst_648 = arith.constant -0.333333343 : f32
      %1496 = vector.broadcast %cst_648 : f32 to vector<7x7xf32>
      %1497 = arith.mulf %1496, %1495 : vector<7x7xf32>
      %1498 = arith.addf %1494, %1497 : vector<7x7xf32>
      %1499 = vector.extract_strided_slice %1490 {offsets = [0, 2], sizes = [7, 7], strides = [1, 1]} : vector<9x9xf32> to vector<7x7xf32>
      %cst_649 = arith.constant -0.333333343 : f32
      %1500 = vector.broadcast %cst_649 : f32 to vector<7x7xf32>
      %1501 = arith.mulf %1500, %1499 : vector<7x7xf32>
      %1502 = arith.addf %1498, %1501 : vector<7x7xf32>
      %1503 = vector.extract_strided_slice %1490 {offsets = [1, 0], sizes = [7, 7], strides = [1, 1]} : vector<9x9xf32> to vector<7x7xf32>
      %cst_650 = arith.constant -0.333333343 : f32
      %1504 = vector.broadcast %cst_650 : f32 to vector<7x7xf32>
      %1505 = arith.mulf %1504, %1503 : vector<7x7xf32>
      %1506 = arith.addf %1502, %1505 : vector<7x7xf32>
      %1507 = vector.extract_strided_slice %1490 {offsets = [1, 1], sizes = [7, 7], strides = [1, 1]} : vector<9x9xf32> to vector<7x7xf32>
      %cst_651 = arith.constant 2.66666675 : f32
      %1508 = vector.broadcast %cst_651 : f32 to vector<7x7xf32>
      %1509 = arith.mulf %1508, %1507 : vector<7x7xf32>
      %1510 = arith.addf %1506, %1509 : vector<7x7xf32>
      %1511 = vector.extract_strided_slice %1490 {offsets = [1, 2], sizes = [7, 7], strides = [1, 1]} : vector<9x9xf32> to vector<7x7xf32>
      %cst_652 = arith.constant -0.333333343 : f32
      %1512 = vector.broadcast %cst_652 : f32 to vector<7x7xf32>
      %1513 = arith.mulf %1512, %1511 : vector<7x7xf32>
      %1514 = arith.addf %1510, %1513 : vector<7x7xf32>
      %1515 = vector.extract_strided_slice %1490 {offsets = [2, 0], sizes = [7, 7], strides = [1, 1]} : vector<9x9xf32> to vector<7x7xf32>
      %cst_653 = arith.constant -0.333333343 : f32
      %1516 = vector.broadcast %cst_653 : f32 to vector<7x7xf32>
      %1517 = arith.mulf %1516, %1515 : vector<7x7xf32>
      %1518 = arith.addf %1514, %1517 : vector<7x7xf32>
      %1519 = vector.extract_strided_slice %1490 {offsets = [2, 1], sizes = [7, 7], strides = [1, 1]} : vector<9x9xf32> to vector<7x7xf32>
      %cst_654 = arith.constant -0.333333343 : f32
      %1520 = vector.broadcast %cst_654 : f32 to vector<7x7xf32>
      %1521 = arith.mulf %1520, %1519 : vector<7x7xf32>
      %1522 = arith.addf %1518, %1521 : vector<7x7xf32>
      %1523 = vector.extract_strided_slice %1490 {offsets = [2, 2], sizes = [7, 7], strides = [1, 1]} : vector<9x9xf32> to vector<7x7xf32>
      %cst_655 = arith.constant -0.333333343 : f32
      %1524 = vector.broadcast %cst_655 : f32 to vector<7x7xf32>
      %1525 = arith.mulf %1524, %1523 : vector<7x7xf32>
      %1526 = arith.addf %1522, %1525 : vector<7x7xf32>
      %1527 = vector.extract_strided_slice %1490 {offsets = [1, 1], sizes = [7, 7], strides = [1, 1]} : vector<9x9xf32> to vector<7x7xf32>
      %1528 = vector.extract_strided_slice %1491 {offsets = [1, 1], sizes = [7, 7], strides = [1, 1]} : vector<9x9xf32> to vector<7x7xf32>
      %1529 = arith.subf %1528, %1526 : vector<7x7xf32>
      %cst_656 = arith.constant 2.500000e-01 : f32
      %1530 = vector.broadcast %cst_656 : f32 to vector<7x7xf32>
      %1531 = arith.mulf %1530, %1529 : vector<7x7xf32>
      %1532 = arith.addf %1527, %1531 : vector<7x7xf32>
      %c1_657 = arith.constant 1 : index
      %c1_658 = arith.constant 1 : index
      %1533 = vector.load %arg8[%c1_657, %c1_658] : memref<9x9xf32, #tpu.memory_space<vmem>>, vector<7x7xf32>
      tpu.vector_store %arg8[%c1_657, %c1_658], %1532 {strides = array<i32>} : memref<9x9xf32, #tpu.memory_space<vmem>>, vector<7x7xf32>,
      %c0_659 = arith.constant 0 : index
      %c0_660 = arith.constant 0 : index
      %1534 = vector.load %arg8[%c0_659, %c0_660] : memref<9x9xf32, #tpu.memory_space<vmem>>, vector<9x9xf32>
      %cst_661 = arith.constant dense<0.000000e+00> : vector<15x9xf32>
      %1535 = tpu.matmul %73, %1534, %cst_661 {dimension_numbers = #tpu.dot_dimension_numbers<[1], [0], [0], [1], [0, 0, 1, 1], [], []>} : vector<15x9xf32>, vector<9x9xf32>, vector<15x9xf32> -> vector<15x9xf32>
      %cst_662 = arith.constant dense<0.000000e+00> : vector<15x15xf32>
      %1536 = tpu.matmul %1535, %109, %cst_662 {dimension_numbers = #tpu.dot_dimension_numbers<[1], [0], [0], [1], [0, 0, 1, 1], [], []>} : vector<15x9xf32>, vector<9x15xf32>, vector<15x15xf32> -> vector<15x15xf32>
      %cst_663 = arith.constant dense<0.000000e+00> : vector<15x9xf32>
      %1537 = tpu.matmul %183, %1534, %cst_663 {dimension_numbers = #tpu.dot_dimension_numbers<[1], [0], [0], [1], [0, 0, 1, 1], [], []>} : vector<15x9xf32>, vector<9x9xf32>, vector<15x9xf32> -> vector<15x9xf32>
      %cst_664 = arith.constant dense<0.000000e+00> : vector<15x15xf32>
      %1538 = tpu.matmul %1537, %219, %cst_664 {dimension_numbers = #tpu.dot_dimension_numbers<[1], [0], [0], [1], [0, 0, 1, 1], [], []>} : vector<15x9xf32>, vector<9x15xf32>, vector<15x15xf32> -> vector<15x15xf32>
      %1539 = arith.addf %1536, %1538 : vector<15x15xf32>
      %cst_665 = arith.constant dense<0.000000e+00> : vector<15x9xf32>
      %1540 = tpu.matmul %293, %1534, %cst_665 {dimension_numbers = #tpu.dot_dimension_numbers<[1], [0], [0], [1], [0, 0, 1, 1], [], []>} : vector<15x9xf32>, vector<9x9xf32>, vector<15x9xf32> -> vector<15x9xf32>
      %cst_666 = arith.constant dense<0.000000e+00> : vector<15x15xf32>
      %1541 = tpu.matmul %1540, %329, %cst_666 {dimension_numbers = #tpu.dot_dimension_numbers<[1], [0], [0], [1], [0, 0, 1, 1], [], []>} : vector<15x9xf32>, vector<9x15xf32>, vector<15x15xf32> -> vector<15x15xf32>
      %1542 = arith.addf %1539, %1541 : vector<15x15xf32>
      %c0_667 = arith.constant 0 : index
      %c0_668 = arith.constant 0 : index
      %1543 = vector.load %arg6[%c0_667, %c0_668] : memref<17x17xf32, #tpu.memory_space<vmem>>, vector<17x17xf32>
      %1544 = vector.extract_strided_slice %1543 {offsets = [1, 1], sizes = [15, 15], strides = [1, 1]} : vector<17x17xf32> to vector<15x15xf32>
      %1545 = arith.addf %1544, %1542 : vector<15x15xf32>
      %c1_669 = arith.constant 1 : index
      %c1_670 = arith.constant 1 : index
      %1546 = vector.load %arg6[%c1_669, %c1_670] : memref<17x17xf32, #tpu.memory_space<vmem>>, vector<15x15xf32>
      tpu.vector_store %arg6[%c1_669, %c1_670], %1545 {strides = array<i32>} : memref<17x17xf32, #tpu.memory_space<vmem>>, vector<15x15xf32>,
      %c0_671 = arith.constant 0 : index
      %c0_672 = arith.constant 0 : index
      %1547 = vector.load %arg6[%c0_671, %c0_672] : memref<17x17xf32, #tpu.memory_space<vmem>>, vector<17x17xf32>
      %c0_673 = arith.constant 0 : index
      %c0_674 = arith.constant 0 : index
      %1548 = vector.load %arg7[%c0_673, %c0_674] : memref<17x17xf32, #tpu.memory_space<vmem>>, vector<17x17xf32>
      %1549 = vector.extract_strided_slice %1547 {offsets = [0, 0], sizes = [15, 15], strides = [1, 1]} : vector<17x17xf32> to vector<15x15xf32>
      %cst_675 = arith.constant -0.333333343 : f32
      %1550 = vector.broadcast %cst_675 : f32 to vector<15x15xf32>
      %1551 = arith.mulf %1550, %1549 : vector<15x15xf32>
      %1552 = vector.extract_strided_slice %1547 {offsets = [0, 1], sizes = [15, 15], strides = [1, 1]} : vector<17x17xf32> to vector<15x15xf32>
      %cst_676 = arith.constant -0.333333343 : f32
      %1553 = vector.broadcast %cst_676 : f32 to vector<15x15xf32>
      %1554 = arith.mulf %1553, %1552 : vector<15x15xf32>
      %1555 = arith.addf %1551, %1554 : vector<15x15xf32>
      %1556 = vector.extract_strided_slice %1547 {offsets = [0, 2], sizes = [15, 15], strides = [1, 1]} : vector<17x17xf32> to vector<15x15xf32>
      %cst_677 = arith.constant -0.333333343 : f32
      %1557 = vector.broadcast %cst_677 : f32 to vector<15x15xf32>
      %1558 = arith.mulf %1557, %1556 : vector<15x15xf32>
      %1559 = arith.addf %1555, %1558 : vector<15x15xf32>
      %1560 = vector.extract_strided_slice %1547 {offsets = [1, 0], sizes = [15, 15], strides = [1, 1]} : vector<17x17xf32> to vector<15x15xf32>
      %cst_678 = arith.constant -0.333333343 : f32
      %1561 = vector.broadcast %cst_678 : f32 to vector<15x15xf32>
      %1562 = arith.mulf %1561, %1560 : vector<15x15xf32>
      %1563 = arith.addf %1559, %1562 : vector<15x15xf32>
      %1564 = vector.extract_strided_slice %1547 {offsets = [1, 1], sizes = [15, 15], strides = [1, 1]} : vector<17x17xf32> to vector<15x15xf32>
      %cst_679 = arith.constant 2.66666675 : f32
      %1565 = vector.broadcast %cst_679 : f32 to vector<15x15xf32>
      %1566 = arith.mulf %1565, %1564 : vector<15x15xf32>
      %1567 = arith.addf %1563, %1566 : vector<15x15xf32>
      %1568 = vector.extract_strided_slice %1547 {offsets = [1, 2], sizes = [15, 15], strides = [1, 1]} : vector<17x17xf32> to vector<15x15xf32>
      %cst_680 = arith.constant -0.333333343 : f32
      %1569 = vector.broadcast %cst_680 : f32 to vector<15x15xf32>
      %1570 = arith.mulf %1569, %1568 : vector<15x15xf32>
      %1571 = arith.addf %1567, %1570 : vector<15x15xf32>
      %1572 = vector.extract_strided_slice %1547 {offsets = [2, 0], sizes = [15, 15], strides = [1, 1]} : vector<17x17xf32> to vector<15x15xf32>
      %cst_681 = arith.constant -0.333333343 : f32
      %1573 = vector.broadcast %cst_681 : f32 to vector<15x15xf32>
      %1574 = arith.mulf %1573, %1572 : vector<15x15xf32>
      %1575 = arith.addf %1571, %1574 : vector<15x15xf32>
      %1576 = vector.extract_strided_slice %1547 {offsets = [2, 1], sizes = [15, 15], strides = [1, 1]} : vector<17x17xf32> to vector<15x15xf32>
      %cst_682 = arith.constant -0.333333343 : f32
      %1577 = vector.broadcast %cst_682 : f32 to vector<15x15xf32>
      %1578 = arith.mulf %1577, %1576 : vector<15x15xf32>
      %1579 = arith.addf %1575, %1578 : vector<15x15xf32>
      %1580 = vector.extract_strided_slice %1547 {offsets = [2, 2], sizes = [15, 15], strides = [1, 1]} : vector<17x17xf32> to vector<15x15xf32>
      %cst_683 = arith.constant -0.333333343 : f32
      %1581 = vector.broadcast %cst_683 : f32 to vector<15x15xf32>
      %1582 = arith.mulf %1581, %1580 : vector<15x15xf32>
      %1583 = arith.addf %1579, %1582 : vector<15x15xf32>
      %1584 = vector.extract_strided_slice %1547 {offsets = [1, 1], sizes = [15, 15], strides = [1, 1]} : vector<17x17xf32> to vector<15x15xf32>
      %1585 = vector.extract_strided_slice %1548 {offsets = [1, 1], sizes = [15, 15], strides = [1, 1]} : vector<17x17xf32> to vector<15x15xf32>
      %1586 = arith.subf %1585, %1583 : vector<15x15xf32>
      %cst_684 = arith.constant 2.500000e-01 : f32
      %1587 = vector.broadcast %cst_684 : f32 to vector<15x15xf32>
      %1588 = arith.mulf %1587, %1586 : vector<15x15xf32>
      %1589 = arith.addf %1584, %1588 : vector<15x15xf32>
      %c1_685 = arith.constant 1 : index
      %c1_686 = arith.constant 1 : index
      %1590 = vector.load %arg6[%c1_685, %c1_686] : memref<17x17xf32, #tpu.memory_space<vmem>>, vector<15x15xf32>
      tpu.vector_store %arg6[%c1_685, %c1_686], %1589 {strides = array<i32>} : memref<17x17xf32, #tpu.memory_space<vmem>>, vector<15x15xf32>,
    }
    %c0_446 = arith.constant 0 : index
    %c0_447 = arith.constant 0 : index
    %1046 = vector.load %arg6[%c0_446, %c0_447] : memref<17x17xf32, #tpu.memory_space<vmem>>, vector<17x17xf32>
    %c0_448 = arith.constant 0 : index
    %c0_449 = arith.constant 0 : index
    %c0_450 = arith.constant 0 : index
    %1047 = vector.load %arg3[%c0_448, %c0_449, %c0_450] : memref<1x17x17xf32, #tpu.memory_space<vmem>>, vector<1x17x17xf32>
    %1048 = vector.shape_cast %1047 : vector<1x17x17xf32> to vector<17x17xf32>
    %1049 = vector.shape_cast %1046 : vector<17x17xf32> to vector<1x17x17xf32>
    tpu.vector_store %arg3[%c0_448, %c0_449, %c0_450], %1049 {strides = array<i32>} : memref<1x17x17xf32, #tpu.memory_space<vmem>>, vector<1x17x17xf32>,
    return
  }
  func.func @transform_0(%arg0: i32) -> (i32, i32, i32) {
    %c0_i32 = arith.constant 0 : i32
    %c0_i32_0 = arith.constant 0 : i32
    %c0_i32_1 = arith.constant 0 : i32
    return %arg0, %c0_i32, %c0_i32_0 : i32, i32, i32
  }
  func.func @transform_1(%arg0: i32) -> (i32, i32, i32) {
    %c0_i32 = arith.constant 0 : i32
    %c0_i32_0 = arith.constant 0 : i32
    %c0_i32_1 = arith.constant 0 : i32
    return %arg0, %c0_i32, %c0_i32_0 : i32, i32, i32
  }
  func.func @transform_2(%arg0: i32) -> (i32, i32, i32) {
    %c0_i32 = arith.constant 0 : i32
    %c0_i32_0 = arith.constant 0 : i32
    %c0_i32_1 = arith.constant 0 : i32
    return %arg0, %c0_i32, %c0_i32_0 : i32, i32, i32
  }
  func.func @transform_3(%arg0: i32) -> (i32, i32, i32) {
    %c0_i32 = arith.constant 0 : i32
    %c0_i32_0 = arith.constant 0 : i32
    %c0_i32_1 = arith.constant 0 : i32
    return %arg0, %c0_i32, %c0_i32_0 : i32, i32, i32
  }
  func.func @transform_4(%arg0: i32) -> (i32, i32, i32) {
    %c0_i32 = arith.constant 0 : i32
    %c0_i32_0 = arith.constant 0 : i32
    %c0_i32_1 = arith.constant 0 : i32
    return %arg0, %c0_i32, %c0_i32_0 : i32, i32, i32
  }
}

</mosaic_0001>

<bundles_post_ra>
// kernel: _forward_impl.1
= control target key start
LH: loop header
LB: loop body
LE: loop exit
PB: predicated region body
PF: predicated region fallthrough
CT: control target
= control target key end

     0   :  { %s8657_s15 = smov 0   ;;  %s10026_s0 = inlined_call_operand.vmem [shape: f32[2,17,17], index: 0, kind: input, shape index: {}]   ;;  %s10027_s1 = inlined_call_operand.vmem [shape: f32[2,17,17], index: 1, kind: input, shape index: {}]   ;;  %s10028_s2 = inlined_call_operand.vmem [shape: f32[2,17,17], index: 2, kind: output, shape index: {0}]   ;;  %s10029_s3 = inlined_call_operand.vmem [shape: f32[2,17,17], index: 3, kind: output, shape index: {1}]   ;;  %s10030_s4 = inlined_call_operand.vmem [shape: f32[2,17,17], index: 4, kind: output, shape index: {2}]  }
   0x1 LB: > { %s7772_s16 = sadd.s32 4294967295, %s8608_s15   ;;  %p7776_p0 = scmp.ge.s32.totalorder %s8608_s15, 1  ;;  %s8608_s15 = sphi %s8657_s15, %s15_s15  }
   0x2   : > { %p177_p1 = scmp.lt.s32.totalorder %s8608_s15, 3 }
   0x4   : > { %p178_p2 = pnand %p7776_p0, %p177_p1 }
   0x5   : > { %p218_p3 = scmp.lt.s32.totalorder (!%p178_p2), %s7772_s16, 1  ;;  %s8619_s30 = smov (!%p178_p2), 127  }
   0x6   : > { %181 = sbr.rel (%p178_p2) target bundleno = 13176 (0x3378), region = 28  ;;  %s8620_s5 = smov (!%p178_p2), 126  }
   0x7   : > { %s8621_s9 = smov (!%p178_p2), 1   ;;  %s9157_s10 = smov (!%p178_p2), 0  }
   0xb   : > { %v243_v0 = vlaneseq  ;;  %vm10031_vm0 = vcmask 131072   ;;  %v8618_v1 = vmov 0.0   ;;  %s10108_s16 = smov (!%p218_p3, %s7772_s16), 1 }
   0xc   : > { %436 = vst.msk [vmem:[#allocation3 + $0x10] sm:$0x1] %vm10031_vm0, %v8618_v1  ;;  %549 = vst.msk [vmem:[#allocation2 + $0x10] sm:$0x1] %vm10031_vm0, %v8618_v1  ;;  %s8673_s17 = smul.u32 24, %s10108_s16 }
   0xd   : > { %v8669_v2 = vshrl.u32 %v243_v0, 7  ;;  %v8671_v3 = vand.u32 127, %v243_v0 }
   0xe   : > { %s8692_s20 = scalar_lea.vmem %s10028_s2, %s8673_s17  ;;  %s8704_s23 = scalar_lea.vmem %s10029_s3, %s8673_s17 }
   0xf   : > { %v8676_v4 = vadd.s32 8, %v8669_v2  ;;  %v7782_v5 = vadd.s32 4294967295, %v8669_v2  ;;  %vm264_vm1 = vcmp.ge.s32.totalorder %v8671_v3, 1  ;;  %vm265_vm2 = vcmp.le.s32.totalorder %v8671_v3, 7  ;;  %s8710_s26 = scalar_lea.vmem %s10030_s4, %s8673_s17  ;;  %s8981_s29 = scalar_lea.vmem %s10026_s0, %s8673_s17 }
  0x10   : > { %v7784_v6 = vadd.s32 4294967295, %v8671_v3  ;;  %v8683_v7 = vmul.u32 2, %v8671_v3  ;;  %v8686_v8 = vmul.u32 2, %v8669_v2  ;;  %vm10033_vm3 = vcmp.ge.s32.totalorder %v8669_v2, 1  ;;  %vm8714_vm4 = vmand %vm264_vm1, %vm265_vm2  ;;  %v429_v40 = vld [vmem:[%s8981_s29] sm:$0xff]  ;;  %s227_s8 = scalar_lea.vmem %s10027_s1, %s8673_s17 }
  0x11   : > { %v8694_v9 = vmul.u32 2, %v7782_v5  ;;  %v8698_v10 = vmul.u32 2, %v8676_v4  ;;  %vm384_vm7 = vcmp.le.s32.totalorder %v8671_v3, 3  ;;  %v469_v19 = vmul.f32 0.0069444445, %v429_v40 }
  0x12   : > { %v8718_v12 = vmul.u32 2, %v7784_v6  ;;  %v7785_v13 = vadd.s32 4294967294, %v8683_v7  ;;  %v8722_v14 = vadd.s32 4294967294, %v8686_v8  ;;  %v311_v15 = vadd.s32 1, %v8686_v8 }
  0x13   : > { %vm252_vm5 = vcmp.eq.s32.totalorder %v8671_v3, %v8694_v9  ;;  %v8728_v16 = vadd.s32 4294967294, %v8698_v10  ;;  %v312_v17 = vadd.s32 1, %v8698_v10  ;;  %vm321_vm6 = vcmp.eq.s32.totalorder %v8671_v3, %v8686_v8  ;;  %v541_v18 = vld [vmem:[#allocation3 + $0x10] sm:$0x1] }
  0x14   : > { %vm8736_vm8 = vmand %vm252_vm5, %vm10033_vm3  ;;  %vm10032_vm9 = vcmp.eq.s32.totalorder %v8669_v2, %v8718_v12  ;;  %vm270_vm10 = vcmp.eq.s32.totalorder %v8676_v4, %v8718_v12  ;;  %v8745_v20 = vadd.s32 1, %v8718_v12  ;;  %v8748_v21 = vadd.s32 2, %v8718_v12  ;;  %544 = vst.msk [vmem:[%s8710_s26 + $0x10] sm:$0x1] %vm10031_vm0, %v541_v18 }
  0x15   : > { %v8756_v22 = vsel %vm8736_vm8, 1.0, %v8618_v1  ;;  %vm8763_vm12 = vmand %vm8714_vm4, %vm10032_vm9  ;;  %vm297_vm13 = vcmp.eq.s32.totalorder %v8669_v2, %v7785_v13  ;;  %vm298_vm14 = vcmp.eq.s32.totalorder %v8676_v4, %v7785_v13  ;;  %vm305_vm15 = vcmp.eq.s32.totalorder %v8671_v3, %v8722_v14 }
  0x16   : > { %vm8773_vm2 = vmand %vm8714_vm4, %vm270_vm10  ;;  %v273_v25 = vsel %vm8763_vm12, 0.0625, %v8618_v1  ;;  %vm10034_vm5 = vcmp.eq.s32.totalorder %v8669_v2, %v8745_v20  ;;  %vm279_vm0 = vcmp.eq.s32.totalorder %v8676_v4, %v8745_v20  ;;  %vm10035_vm9 = vcmp.eq.s32.totalorder %v8669_v2, %v8748_v21 }
  0x17   : > { %v274_v26 = vsel %vm8773_vm2, 0.0625, %v8618_v1  ;;  %vm8794_vm10 = vmand %vm8714_vm4, %vm10034_vm5  ;;  %vm288_vm3 = vcmp.eq.s32.totalorder %v8676_v4, %v8748_v21  ;;  %v8801_v28 = vsel %vm297_vm13, 1.0, %v8618_v1  ;;  %v8804_v29 = vsel %vm298_vm14, 1.0, %v8618_v1 }
  0x18   : > { %vm8808_vm11 = vmand %vm8714_vm4, %vm279_vm0  ;;  %v282_v31 = vsel %vm8794_vm10, 0.125, %v8618_v1  ;;  %vm306_vm5 = vcmp.eq.s32.totalorder %v8671_v3, %v8728_v16  ;;  %v307_v32 = vsel %vm305_vm15, 0.25, %v8618_v1  ;;  %v7788_v33 = vadd.s32 4294967294, %v311_v15 }
  0x19   : > { %v283_v34 = vsel %vm8808_vm11, 0.125, %v8618_v1  ;;  %v284_v35 = vadd.f32 %v282_v31, %v273_v25  ;;  %vm8829_vm0 = vmand %vm8714_vm4, %vm10035_vm9  ;;  %v308_v37 = vsel %vm306_vm5, 0.25, %v8618_v1  ;;  %v7789_v38 = vadd.s32 4294967294, %v312_v17 }
  0x1a   : > { %v285_v39 = vadd.f32 %v283_v34, %v274_v26  ;;  %vm8839_vm13 = vmand %vm8714_vm4, %vm288_vm3  ;;  %v291_v41 = vsel %vm8829_vm0, 0.0625, %v8618_v1  ;;  %vm315_vm14 = vcmp.eq.s32.totalorder %v8671_v3, %v7788_v33  ;;  %vm322_vm9 = vcmp.eq.s32.totalorder %v8671_v3, %v8698_v10 }
  0x1b   : > { %v292_v42 = vsel %vm8839_vm13, 0.0625, %v8618_v1  ;;  %v8852_v43 = vadd.f32 %v291_v41, %v284_v35  ;;  %vm316_vm3 = vcmp.eq.s32.totalorder %v8671_v3, %v7789_v38  ;;  %v317_v44 = vsel %vm315_vm14, 0.5, %v8618_v1  ;;  %vm8890_vm4 = vmand %vm264_vm1, %vm384_vm7 }
  0x1c   : > { %v8858_v45 = vadd.f32 %v292_v42, %v285_v39  ;;  %v318_v46 = vsel %vm316_vm3, 0.5, %v8618_v1  ;;  %v319_v47 = vadd.f32 %v317_v44, %v307_v32  ;;  %v323_v48 = vsel %vm321_vm6, 0.25, %v8618_v1 }
  0x1d   : > { %v320_v49 = vadd.f32 %v318_v46, %v308_v37  ;;  %v324_v50 = vsel %vm322_vm9, 0.25, %v8618_v1  ;;  %v327_v51 = vadd.s32 1, %v8694_v9  ;;  %v337_v52 = vsel %vm8763_vm12, 0.125, %v8618_v1 }
  0x1e   : > { %v8875_v53 = vadd.f32 %v323_v48, %v319_v47  ;;  %v338_v54 = vsel %vm8773_vm2, 0.125, %v8618_v1  ;;  %v341_v55 = vsel %vm8794_vm10, 0.25, %v8618_v1  ;;  %v342_v56 = vsel %vm8808_vm11, 0.25, %v8618_v1  ;;  %v430_v47 = vld [vmem:[%s8981_s29 + $0x8] sm:$0xff] }
  0x1f   : > { %v8894_v58 = vadd.f32 %v324_v50, %v320_v49  ;;  %vm329_vm12 = vcmp.eq.s32.totalorder %v8671_v3, %v327_v51  ;;  %v343_v59 = vadd.f32 %v341_v55, %v337_v52  ;;  %v344_v60 = vadd.f32 %v342_v56, %v338_v54 }
  0x20   : > { %vm10061_vm2 = vcmp.le.s32.totalorder %v8669_v2, 3  ;;  %vm10064_vm11 = vcmp.ge.s32.totalorder %v8669_v2, 1  ;;  %v345_v63 = vsel %vm8829_vm0, 0.125, %v8618_v1  ;;  %v346_v0 = vsel %vm8839_vm13, 0.125, %v8618_v1 }
  0x21   : > { %vm8901_vm10 = vmand %vm8736_vm8, %vm10061_vm2  ;;  %v349_v5 = vadd.s32 1, %v8683_v7  ;;  %v355_v6 = vsel %vm305_vm15, 0.5, %v8618_v1  ;;  %v8927_v13 = vadd.f32 %v345_v63, %v343_v59  ;;  %v8929_v15 = vadd.f32 %v346_v0, %v344_v60 }
  0x22   : > { %vm8907_vm7 = vmand %vm329_vm12, %vm10064_vm11  ;;  %v356_v17 = vsel %vm306_vm5, 0.5, %v8618_v1  ;;  %vm10067_vm0 = vcmp.eq.s32.totalorder %v8669_v2, %v8718_v12  ;;  %v359_v23 = vsel %vm315_vm14, 1.0, %v8618_v1  ;;  %v360_v24 = vsel %vm316_vm3, 1.0, %v8618_v1 }
  0x23   : > { %v8925_v11 = vsel %vm8907_vm7, 1.0, %v8618_v1  ;;  %vm8940_vm15 = vmand %vm8890_vm4, %vm10067_vm0  ;;  %v7790_v18 = vadd.s32 4294967294, %v349_v5  ;;  %v363_v16 = vsel %vm321_vm6, 0.5, %v8618_v1  ;;  %vm10070_vm5 = vcmp.eq.s32.totalorder %v8669_v2, %v8745_v20 }
  0x24   : > { %vm8959_vm13 = vmand %vm8890_vm4, %vm10070_vm5  ;;  %v361_v26 = vadd.f32 %v359_v23, %v355_v6  ;;  %v362_v27 = vadd.f32 %v360_v24, %v356_v17  ;;  %v364_v30 = vsel %vm322_vm9, 0.5, %v8618_v1  ;;  %v367_v31 = vadd.s32 2, %v8694_v9  ;;  %v431_v17 = vld [vmem:[%s8981_s29 + $0x10] sm:$0x1] }
  0x25   : > { %vm10073_vm6 = vcmp.eq.s32.totalorder %v8669_v2, %v8748_v21  ;;  %vm351_vm3 = vcmp.eq.s32.totalorder %v8669_v2, %v7790_v18  ;;  %vm352_vm9 = vcmp.eq.s32.totalorder %v8676_v4, %v7790_v18  ;;  %vm377_vm12 = vcmp.eq.s32.totalorder %v8669_v2, %v8683_v7 }
  0x26   : > { %vm8973_vm14 = vmand %vm8890_vm4, %vm10073_vm6  ;;  %vm378_vm2 = vcmp.eq.s32.totalorder %v8676_v4, %v8683_v7  ;;  %vm10076_vm4 = vcmp.le.s32.totalorder %v8669_v2, 3  ;;  %v8994_v9 = vsel %vm351_vm3, 1.0, %v8618_v1  ;;  %v8997_v10 = vsel %vm352_vm9, 1.0, %v8618_v1 }
  0x27   : > { %vm395_vm11 = vmand %vm8907_vm7, %vm10076_vm4  ;;  %v8999_v32 = vadd.f32 %v363_v16, %v361_v26  ;;  %v9001_v33 = vadd.f32 %v364_v30, %v362_v27  ;;  %vm369_vm0 = vcmp.eq.s32.totalorder %v8671_v3, %v367_v31  ;;  %v9005_v4 = vsel %vm377_vm12, 1.0, %v8618_v1 }
  0x28   : > { %v9008_v7 = vsel %vm378_vm2, 1.0, %v8618_v1  ;;  %v9013_v34 = vsel %vm8901_vm10, 1.0, %v8618_v1  ;;  %vm10077_vm5 = vcmp.ge.s32.totalorder %v8669_v2, 1  ;;  %v387_v36 = vsel %vm8940_vm15, 0.0625, %v8618_v1  ;;  %vm10080_vm10 = vmmov %vm10076_vm4 }
  0x29   : > { %vm9017_vm6 = vmand %vm369_vm0, %vm10077_vm5  ;;  %v390_v37 = vsel %vm8959_vm13, 0.125, %v8618_v1  ;;  %v393_v38 = vsel %vm8973_vm14, 0.0625, %v8618_v1  ;;  %v9031_v39 = vsel %vm395_vm11, 1.0, %v8618_v1  ;;  %v397_v44 = vsel %vm8940_vm15, 0.125, %v8618_v1 }
  0x2a   : > { %v9037_v41 = vsel %vm9017_vm6, 1.0, %v8618_v1  ;;  %v391_v42 = vadd.f32 %v390_v37, %v387_v36  ;;  %v399_v46 = vsel %vm8959_vm13, 0.25, %v8618_v1  ;;  %vm403_vm3 = vmand %vm9017_vm6, %vm10080_vm10  ;;  %v401_v49 = vsel %vm8973_vm14, 0.125, %v8618_v1 }
  0x2b   : > { %v400_v48 = vadd.f32 %v399_v46, %v397_v44  ;;  %v9054_v50 = vsel %vm403_vm3, 1.0, %v8618_v1  ;;  %vm405_vm15 = vcmp.le.s32.totalorder %v8669_v2, 1  ;;  %vm408_vm9 = vcmp.le.s32.totalorder %v8671_v3, 1 }
  0x2c   : > { %v9057_v51 = vadd.f32 %v393_v38, %v391_v42  ;;  %vm406_vm13 = vmand %vm8736_vm8, %vm405_vm15  ;;  %v439_v52 = vmul.f32 0.0017361111, %v429_v40  ;;  %v9064_v54 = vmul.f32 0.00043402778, %v429_v40  ;;  %v440_v59 = vmul.f32 0.0017361111, %v430_v47 }
  0x2d   : > { %v9066_v55 = vadd.f32 %v401_v49, %v400_v48  ;;  %v9069_v56 = vsel %vm406_vm13, 1.0, %v8618_v1  ;;  %vm9073_vm14 = vmand %vm264_vm1, %vm408_vm9  ;;  %vm10083_vm8 = vcmp.eq.s32.totalorder %v8669_v2, %v8718_v12  ;;  %v438_v3 = vmul.f32 0.00043402778, %v430_v47 }
  0x2e   : > { %vm410_vm12 = vmand %vm9073_vm14, %vm10083_vm8  ;;  %443 = vrot.lane.b32.xlu0 %v439_v52, %s8619_s30  ;;  %453 = vrot.lane.b32.xlu1 %v9064_v54, %s8620_s5  ;;  %v470_v60 = vmul.f32 0.0069444445, %v430_v47  ;;  %vm10084_vm1 = vcmp.eq.s32.totalorder %v8669_v2, %v8745_v20  ;;  %vm461_vm4 = vcmask 1046528   ;;  %vm10085_vm11 = vcmp.eq.s32.totalorder %v8669_v2, %v8748_v21 }
  0x2f   : > { %v411_v61 = vsel %vm410_vm12, 0.0625, %v8618_v1  ;;  %vm413_vm2 = vmand %vm9073_vm14, %vm10084_vm1  ;;  %v421_v12 = vsel %vm410_vm12, 0.125, %v8618_v1  ;;  %v473_v5 = vrot.slane %v469_v19, 1  ;;  %v462_v16 = vrot.slane %v439_v52, 1 }
  0x30   : > { %v414_v63 = vsel %vm413_vm2, 0.125, %v8618_v1  ;;  %vm416_vm0 = vmand %vm9073_vm14, %vm10085_vm11  ;;  %v423_v0 = vsel %vm413_vm2, 0.25, %v8618_v1  ;;  %v474_v6 = vrot.slane %v470_v60, 1  ;;  %v463_v62 = vrot.slane %v440_v59, 1 }
  0x31   : > { %v415_v20 = vadd.f32 %v414_v63, %v411_v61  ;;  %v417_v14 = vsel %vm416_vm0, 0.0625, %v8618_v1  ;;  %vm419_vm5 = vmand %vm8907_vm7, %vm405_vm15  ;;  %v424_v18 = vadd.f32 %v423_v0, %v421_v12  ;;  %v425_v23 = vsel %vm416_vm0, 0.125, %v8618_v1 }
  0x32   : > { %v9107_v21 = vsel %vm419_vm5, 1.0, %v8618_v1  ;;  %vm427_vm10 = vmand %vm9017_vm6, %vm405_vm15  ;;  %445 = vrot.lane.b32.xlu0 %v440_v59, %s8619_s30  ;;  %455 = vrot.lane.b32.xlu1 %v438_v3, %s8620_s5  ;;  %v475_v24 = vsel %vm461_vm4, %v473_v5, %v474_v6  ;;  %v504_v30 = vmul.f32 0.0017361111, %v431_v17  ;;  %vm494_vm7 = vcmask 1045504  }
  0x33   : > { %v9116_v25 = vadd.f32 %v417_v14, %v415_v20  ;;  %v9118_v26 = vadd.f32 %v425_v23, %v424_v18  ;;  %v9121_v27 = vsel %vm427_vm10, 1.0, %v8618_v1  ;;  %v506_v2 = vrot.slane %v439_v52, 2  ;;  %v546_v20 = vld [vmem:[%s227_s8 + $0x8] sm:$0xff] }
  0x34   : > { %v507_v31 = vrot.slane %v440_v59, 2  ;;  %v464_v8 = vsel %vm461_vm4, %v462_v16, %v463_v62  ;;  %v509_v35 = vrot.slane %v504_v30, 2  ;;  %v492_v36 = vmul.f32 0.00043402778, %v431_v17  ;;  %v545_v17 = vld [vmem:[%s227_s8] sm:$0xff] }
  0x35   : > { %vm432_vm6 = vcmask 138240   ;;  %v496_v40 = vrot.slane %v438_v3, 2  ;;  %v495_v44 = vrot.slane %v9064_v54, 2  ;;  %vm550_vm3 = vcmask 130057  }
  0x36   : > { %476 = vrot.lane.b32.xlu0 %v475_v24, %s8619_s30  ;;  %478 = vrot.lane.b32.xlu1 %v474_v6, %s8619_s30  ;;  %434 = vst.msk [vmem:[#allocation3 + $0x8] sm:$0xff] %vm432_vm6, %v8618_v1  ;;  %433 = vst.msk [vmem:[#allocation3] sm:$0xff] %vm432_vm6, %v8618_v1  ;;  %v508_v37 = vsel %vm494_vm7, %v506_v2, %v507_v31  ;;  %v510_v38 = vsel %vm494_vm7, %v507_v31, %v509_v35  ;;  %v498_v42 = vrot.slane %v492_v36, 2  ;;  %vm535_vm15 = vcmask 130056  }
  0x37   : > { %547 = vst.msk [vmem:[#allocation2] sm:$0xff] %vm432_vm6, %v8618_v1  ;;  %548 = vst.msk [vmem:[#allocation2 + $0x8] sm:$0xff] %vm432_vm6, %v8618_v1  ;;  %v497_v1 = vsel %vm494_vm7, %v495_v44, %v496_v40  ;;  %vm537_vm13 = vcmask 129032  }
  0x38   : > { %v499_v46 = vsel %vm494_vm7, %v496_v40, %v498_v42  ;;  %551 = vst.msk [vmem:[#allocation2] sm:$0xfe] %vm550_vm3, %v545_v17 }
  0x39   : > { %552 = vst.msk [vmem:[#allocation2 + $0x8] sm:$0xff] %vm535_vm15, %v546_v20 }
  0x3a   : > { %484 = vrot.lane.b32.xlu0 %v464_v8, %s8620_s5  ;;  %486 = vrot.lane.b32.xlu1 %v463_v62, %s8620_s5 }
  0x3e   : > { %511 = vrot.lane.b32.xlu0 %v508_v37, %s8619_s30  ;;  %513 = vrot.lane.b32.xlu1 %v510_v38, %s8619_s30 }
  0x42   : > { %521 = vrot.lane.b32.xlu1 %v499_v46, %s8620_s5  ;;  %519 = vrot.lane.b32.xlu0 %v497_v1, %s8620_s5 }
  0xa0   : > { %v444_v47 = vpop.permute.xlu0 %443  ;;  %v454_v48 = vpop.permute.xlu1 %453 }
  0xa1   : > { %v449_v49 = vadd.f32 %v444_v47, %v9064_v54 }
  0xa3   : > { %v459_v59 = vadd.f32 %v454_v48, %v449_v49 }
  0xa4   : > { %v446_v52 = vpop.permute.xlu0 %445  ;;  %v456_v57 = vpop.permute.xlu1 %455 }
  0xa5   : > { %v450_v19 = vadd.f32 %v446_v52, %v438_v3  ;;  %v467_v63 = vadd.f32 %v464_v8, %v459_v59 }
  0xa7   : > { %v460_v60 = vadd.f32 %v456_v57, %v450_v19 }
  0xa8   : > { %v477_v61 = vpop.permute.xlu0 %476  ;;  %v479_v12 = vpop.permute.xlu1 %478 }
  0xa9   : > { %v468_v0 = vadd.f32 %v463_v62, %v460_v60  ;;  %v482_v5 = vadd.f32 %v477_v61, %v467_v63 }
  0xab   : > { %v483_v6 = vadd.f32 %v479_v12, %v468_v0 }
  0xac   : > { %v485_v54 = vpop.permute.xlu0 %484  ;;  %v487_v14 = vpop.permute.xlu1 %486 }
  0xad   : > { %v490_v3 = vadd.f32 %v485_v54, %v482_v5  ;;  %v491_v18 = vadd.f32 %v487_v14, %v483_v6 }
  0xaf   : > { %v502_v23 = vadd.f32 %v497_v1, %v490_v3  ;;  %v503_v24 = vadd.f32 %v499_v46, %v491_v18 }
  0xb0   : > { %v512_v16 = vpop.permute.xlu0 %511  ;;  %v514_v62 = vpop.permute.xlu1 %513 }
  0xb1   : > { %v517_v30 = vadd.f32 %v512_v16, %v502_v23  ;;  %v518_v2 = vadd.f32 %v514_v62, %v503_v24 }
  0xb4   : > { %v522_v31 = vpop.permute.xlu1 %521  ;;  %v520_v8 = vpop.permute.xlu0 %519 }
  0xb5   : > { %v526_v35 = vadd.f32 %v522_v31, %v518_v2  ;;  %v525_v36 = vadd.f32 %v520_v8, %v517_v30 }
  0xb7   : > { %531 = vrot.lane.b32.xlu1 %v526_v35, %s8621_s9  ;;  %529 = vrot.lane.b32.xlu0 %v525_v36, %s8621_s9 }
 0x129   : > { %v532_v37 = vpop.permute.xlu1 %531  ;;  %v530_v38 = vpop.permute.xlu0 %529 }
 0x12a   : > { %538 = vst.msk [vmem:[#allocation3 + $0x9] sm:$0x7f] %vm537_vm13, %v532_v37 }
 0x12b   : > { %536 = vst.msk [vmem:[#allocation3 + $0x1] sm:$0xff] %vm535_vm15, %v530_v38 }
 0x132   : > { %v539_v40 = vld [vmem:[#allocation3] sm:$0xff]  ;;  %v540_v42 = vld [vmem:[#allocation3 + $0x8] sm:$0xff] }
 0x133   : > { %542 = vst.msk [vmem:[%s8710_s26] sm:$0xff] %vm432_vm6, %v539_v40  ;;  %543 = vst.msk [vmem:[%s8710_s26 + $0x8] sm:$0xff] %vm432_vm6, %v540_v42 }
 0x134 LB: >> { %v9162_v44 = vld [vmem:[#allocation2] sm:$0xff]  ;;  %v9164_v46 = vld [vmem:[#allocation2 + $0x8] sm:$0xff]  ;;  %s8622_s11 = smov 126   ;;  %s8623_s12 = smov 127   ;;  %v561_v59 = vld [vmem:[#allocation2 + $0x10] sm:$0x1]  ;;  %s8612_s10 = sphi %s9157_s10, %s558_s10  }
 0x135   : >> { %v564_v1 = vmul.f32 -0.33333334, %v9162_v44  ;;  %v592_v47 = vmul.f32 2.6666667, %v9164_v46  ;;  %v591_v48 = vmul.f32 2.6666667, %v9162_v44 }
 0x136   : >> { %v565_v49 = vmul.f32 -0.33333334, %v9164_v46  ;;  %v614_v12 = vmul.f32 -0.33333334, %v561_v59  ;;  %vm643_vm9 = vcmask 1040384   ;;  %s8624_s13 = smov 1  }
 0x137   : >> { %576 = vrot.lane.b32.xlu1 %v564_v1, %s8622_s11  ;;  %568 = vrot.lane.b32.xlu0 %v564_v1, %s8623_s12  ;;  %v596_v52 = vrot.slane %v592_v47, 1  ;;  %v595_v57 = vrot.slane %v591_v48, 1  ;;  %v584_v61 = vrot.slane %v564_v1, 1  ;;  %v616_v6 = vrot.slane %v564_v1, 2  ;;  %s558_s10 = sadd.s32 1, %s8612_s10  }
 0x138   : >> { %v585_v60 = vrot.slane %v565_v49, 1  ;;  %v617_v0 = vrot.slane %v565_v49, 2  ;;  %v619_v5 = vrot.slane %v614_v12, 2  ;;  %vm10041_vm14 = vcmask 121856   ;;  %p555_p4 = scmp.ge.s32.totalorder %s558_s10, 2  }
 0x139   : >> { %v597_v19 = vsel %vm461_vm4, %v595_v57, %v596_v52  ;;  %8151 = vmatprep.mubr.msk.f32.mxu0 %vm10041_vm14, %v8756_v22  ;;  %8158 = vmatprep.mubr.msk.f32.mxu1 %vm10041_vm14, %v8925_v11  ;;  %vm1263_vm8 = vcmask 72704   ;;  %vm10040_vm12 = vcmask 65536   ;;  %vm1319_vm1 = vcmask 64521   ;;  %s9590_s14 = smov (%p555_p4), 0  }
 0x13a   : >> { %v586_v63 = vsel %vm461_vm4, %v584_v61, %v585_v60  ;;  %v620_v17 = vsel %vm494_vm7, %v617_v0, %v619_v5  ;;  %v618_v20 = vsel %vm494_vm7, %v616_v6, %v617_v0  ;;  %v9189_v5 = vld [vmem:[#allocation3] sm:$0xff]  ;;  %v9191_v6 = vld [vmem:[#allocation3 + $0x8] sm:$0xff]  ;;  %vm8626_vm2 = vmmov 0  }
 0x13b   : >> { %578 = vrot.lane.b32.xlu1 %v565_v49, %s8622_s11  ;;  %570 = vrot.lane.b32.xlu0 %v565_v49, %s8623_s12  ;;  %vm10036_vm11 = vcmask 56320   ;;  %vm10037_vm0 = vcmask 36864   ;;  %vm1869_vm5 = vcmask 27657   ;;  %vm1922_vm10 = vcmask 1042432  }
 0x13c   : >> { %vm10039_vm13 = vcmask 23552  }
 0x13f   : >> { %600 = vrot.lane.b32.xlu1 %v596_v52, %s8623_s12  ;;  %598 = vrot.lane.b32.xlu0 %v597_v19, %s8623_s12 }
 0x143   : >> { %608 = vrot.lane.b32.xlu1 %v585_v60, %s8622_s11  ;;  %606 = vrot.lane.b32.xlu0 %v586_v63, %s8622_s11 }
 0x147   : >> { %627 = vrot.lane.b32.xlu1 %v620_v17, %s8623_s12  ;;  %625 = vrot.lane.b32.xlu0 %v618_v20, %s8623_s12 }
 0x14b   : >> { %635 = vrot.lane.b32.xlu1 %v620_v17, %s8622_s11  ;;  %633 = vrot.lane.b32.xlu0 %v618_v20, %s8622_s11 }
 0x1a9   : >> { %v577_v54 = vpop.permute.xlu1 %576  ;;  %v569_v14 = vpop.permute.xlu0 %568 }
 0x1aa   : >> { %v574_v3 = vadd.f32 %v569_v14, %v564_v1 }
 0x1ac   : >> { %v582_v24 = vadd.f32 %v577_v54, %v574_v3 }
 0x1ad   : >> { %v579_v18 = vpop.permute.xlu1 %578  ;;  %v571_v23 = vpop.permute.xlu0 %570 }
 0x1ae   : >> { %v575_v16 = vadd.f32 %v571_v23, %v565_v49  ;;  %v589_v8 = vadd.f32 %v586_v63, %v582_v24 }
 0x1b0   : >> { %v583_v62 = vadd.f32 %v579_v18, %v575_v16 }
 0x1b1   : >> { %v601_v30 = vpop.permute.xlu1 %600  ;;  %v599_v2 = vpop.permute.xlu0 %598 }
 0x1b2   : >> { %v590_v31 = vadd.f32 %v585_v60, %v583_v62  ;;  %v604_v36 = vadd.f32 %v599_v2, %v589_v8 }
 0x1b4   : >> { %v605_v35 = vadd.f32 %v601_v30, %v590_v31 }
 0x1b5   : >> { %v609_v37 = vpop.permute.xlu1 %608  ;;  %v607_v38 = vpop.permute.xlu0 %606 }
 0x1b6   : >> { %v613_v40 = vadd.f32 %v609_v37, %v605_v35  ;;  %v612_v42 = vadd.f32 %v607_v38, %v604_v36 }
 0x1b8   : >> { %v624_v47 = vadd.f32 %v620_v17, %v613_v40  ;;  %v623_v48 = vadd.f32 %v618_v20, %v612_v42 }
 0x1b9   : >> { %v628_v52 = vpop.permute.xlu1 %627  ;;  %v626_v57 = vpop.permute.xlu0 %625 }
 0x1ba   : >> { %v632_v1 = vadd.f32 %v628_v52, %v624_v47  ;;  %v631_v59 = vadd.f32 %v626_v57, %v623_v48 }
 0x1bd   : >> { %v636_v19 = vpop.permute.xlu1 %635  ;;  %v634_v61 = vpop.permute.xlu0 %633 }
 0x1be   : >> { %v640_v49 = vadd.f32 %v636_v19, %v632_v1  ;;  %v639_v12 = vadd.f32 %v634_v61, %v631_v59 }
 0x1c0   : >> { %v645_v0 = vrot.slane %v640_v49, 7  ;;  %v644_v60 = vrot.slane %v639_v12, 7 }
 0x1c2   : >> { %647 = vrot.lane.b32.xlu0 %v644_v60, %s8624_s13  ;;  %v646_v63 = vsel %vm643_vm9, %v644_v60, %v645_v0 }
 0x1c3   : >> { %649 = vrot.lane.b32.xlu1 %v646_v63, %s8624_s13 }
 0x234   : >> { %v648_v17 = vpop.permute.xlu0 %647 }
 0x235   : >> { %v653_v20 = vsub.f32 %v9189_v5, %v648_v17  ;;  %v650_v54 = vpop.permute.xlu1 %649 }
 0x236   : >> { %v654_v14 = vsub.f32 %v9191_v6, %v650_v54 }
 0x237   : >> { %v655_v3 = vmul.f32 0.25, %v653_v20 }
 0x238   : >> { %v656_v18 = vmul.f32 0.25, %v654_v14 }
 0x239   : >> { %v657_v23 = vadd.f32 %v655_v3, %v9162_v44  ;;  %v663_v44 = vld [vmem:[#allocation2 + $0x10] sm:$0x1] }
 0x23a   : >> { %v658_v24 = vadd.f32 %v656_v18, %v9164_v46  ;;  %v716_v40 = vmul.f32 -0.33333334, %v663_v44 }
 0x23b   : >> { %659 = vst.msk [vmem:[#allocation2] sm:$0xfe] %vm550_vm3, %v657_v23 }
 0x23c   : >> { %660 = vst.msk [vmem:[#allocation2 + $0x8] sm:$0xff] %vm535_vm15, %v658_v24  ;;  %v721_v52 = vrot.slane %v716_v40, 2 }
 0x242   : >> { %v661_v16 = vld [vmem:[#allocation2] sm:$0xff] }
 0x243   : >> { %v666_v62 = vmul.f32 -0.33333334, %v661_v16  ;;  %v662_v30 = vld [vmem:[#allocation2 + $0x8] sm:$0xff]  ;;  %v693_v31 = vmul.f32 2.6666667, %v661_v16 }
 0x244   : >> { %v667_v2 = vmul.f32 -0.33333334, %v662_v30  ;;  %v694_v8 = vmul.f32 2.6666667, %v662_v30 }
 0x245   : >> { %670 = vrot.lane.b32.xlu0 %v666_v62, %s8623_s12  ;;  %v697_v35 = vrot.slane %v693_v31, 1  ;;  %v686_v37 = vrot.slane %v666_v62, 1  ;;  %v718_v47 = vrot.slane %v666_v62, 2 }
 0x246   : >> { %672 = vrot.lane.b32.xlu1 %v667_v2, %s8623_s12  ;;  %v698_v36 = vrot.slane %v694_v8, 1  ;;  %v687_v38 = vrot.slane %v667_v2, 1  ;;  %v719_v48 = vrot.slane %v667_v2, 2 }
 0x248   : >> { %v699_v46 = vsel %vm461_vm4, %v697_v35, %v698_v36  ;;  %v688_v42 = vsel %vm461_vm4, %v686_v37, %v687_v38  ;;  %v720_v57 = vsel %vm494_vm7, %v718_v47, %v719_v48  ;;  %v722_v1 = vsel %vm494_vm7, %v719_v48, %v721_v52 }
 0x249   : >> { %678 = vrot.lane.b32.xlu0 %v666_v62, %s8622_s11 }
 0x24a   : >> { %680 = vrot.lane.b32.xlu1 %v667_v2, %s8622_s11 }
 0x24d   : >> { %700 = vrot.lane.b32.xlu0 %v699_v46, %s8623_s12 }
 0x24e   : >> { %702 = vrot.lane.b32.xlu1 %v698_v36, %s8623_s12 }
 0x251   : >> { %708 = vrot.lane.b32.xlu0 %v688_v42, %s8622_s11 }
 0x252   : >> { %710 = vrot.lane.b32.xlu1 %v687_v38, %s8622_s11 }
 0x255   : >> { %727 = vrot.lane.b32.xlu0 %v720_v57, %s8623_s12 }
 0x256   : >> { %729 = vrot.lane.b32.xlu1 %v722_v1, %s8623_s12 }
 0x259   : >> { %735 = vrot.lane.b32.xlu0 %v720_v57, %s8622_s11 }
 0x25a   : >> { %737 = vrot.lane.b32.xlu1 %v722_v1, %s8622_s11 }
 0x2b7   : >> { %v671_v59 = vpop.permute.xlu0 %670 }
 0x2b8   : >> { %v673_v19 = vpop.permute.xlu1 %672  ;;  %v676_v61 = vadd.f32 %v671_v59, %v666_v62 }
 0x2b9   : >> { %v677_v49 = vadd.f32 %v673_v19, %v667_v2 }
 0x2bb   : >> { %v679_v12 = vpop.permute.xlu0 %678 }
 0x2bc   : >> { %v684_v0 = vadd.f32 %v679_v12, %v676_v61  ;;  %v681_v60 = vpop.permute.xlu1 %680 }
 0x2bd   : >> { %v685_v63 = vadd.f32 %v681_v60, %v677_v49 }
 0x2be   : >> { %v691_v17 = vadd.f32 %v688_v42, %v684_v0 }
 0x2bf   : >> { %v701_v20 = vpop.permute.xlu0 %700  ;;  %v692_v54 = vadd.f32 %v687_v38, %v685_v63 }
 0x2c0   : >> { %v703_v14 = vpop.permute.xlu1 %702  ;;  %v706_v3 = vadd.f32 %v701_v20, %v691_v17 }
 0x2c1   : >> { %v707_v18 = vadd.f32 %v703_v14, %v692_v54 }
 0x2c3   : >> { %v709_v23 = vpop.permute.xlu0 %708 }
 0x2c4   : >> { %v714_v24 = vadd.f32 %v709_v23, %v706_v3  ;;  %v711_v16 = vpop.permute.xlu1 %710 }
 0x2c5   : >> { %v715_v30 = vadd.f32 %v711_v16, %v707_v18 }
 0x2c6   : >> { %v725_v31 = vadd.f32 %v720_v57, %v714_v24 }
 0x2c7   : >> { %v728_v8 = vpop.permute.xlu0 %727  ;;  %v726_v35 = vadd.f32 %v722_v1, %v715_v30 }
 0x2c8   : >> { %v730_v36 = vpop.permute.xlu1 %729  ;;  %v733_v62 = vadd.f32 %v728_v8, %v725_v31 }
 0x2c9   : >> { %v734_v2 = vadd.f32 %v730_v36, %v726_v35 }
 0x2cb   : >> { %v736_v44 = vpop.permute.xlu0 %735 }
 0x2cc   : >> { %v741_v46 = vadd.f32 %v736_v44, %v733_v62  ;;  %v738_v37 = vpop.permute.xlu1 %737 }
 0x2cd   : >> { %v742_v40 = vadd.f32 %v738_v37, %v734_v2 }
 0x2ce   : >> { %v745_v42 = vrot.slane %v741_v46, 7 }
 0x2cf   : >> { %v746_v47 = vrot.slane %v742_v40, 7 }
 0x2d0   : >> { %748 = vrot.lane.b32.xlu1 %v745_v42, %s8624_s13 }
 0x2d1   : >> { %v747_v38 = vsel %vm643_vm9, %v745_v42, %v746_v47 }
 0x2d2   : >> { %750 = vrot.lane.b32.xlu0 %v747_v38, %s8624_s13 }
 0x342   : >> { %v749_v48 = vpop.permute.xlu1 %748 }
 0x343   : >> { %v754_v52 = vsub.f32 %v9189_v5, %v749_v48  ;;  %v8625_v5 = vmov 0.0  }
 0x344   : >> { %v751_v57 = vpop.permute.xlu0 %750  ;;  %1267 = vst.msk [vmem:[#allocation4] sm:$0xff] %vm1263_vm8, %v8625_v5 }
 0x345   : >> { %v755_v1 = vsub.f32 %v9191_v6, %v751_v57  ;;  %v758_v59 = vrot.slane %v754_v52, 1  ;;  %1268 = vst.msk [vmem:[#allocation4 + $0x8] sm:$0x1] %vm10040_vm12, %v8625_v5 }
 0x346   : >> { %1823 = vst.msk [vmem:[#allocation6] sm:$0x1f] %vm10037_vm0, %v8625_v5 }
 0x347   : >> { %v759_v19 = vrot.slane %v755_v1, 1 }
 0x349   : >> { %763 = vrot.lane.b32.xlu0 %v759_v19, %s8623_s12  ;;  %v760_v61 = vsel %vm461_vm4, %v758_v59, %v759_v19 }
 0x34a   : >> { %761 = vrot.lane.b32.xlu1 %v760_v61, %s8623_s12 }
 0x34b   : >> { %v9252_v6 = vld [vmem:[#allocation4] sm:$0xff] }
 0x34c   : >> { %v1270_v0 = vld [vmem:[#allocation4 + $0x8] sm:$0x1]  ;;  %v1272_v60 = vmul.f32 -0.33333334, %v9252_v6  ;;  %v1285_v63 = vmul.f32 2.6666667, %v9252_v6 }
 0x34d   : >> { %v1296_v17 = vmul.f32 -0.33333334, %v1270_v0 }
 0x34e   : >> { %1274 = vrot.lane.b32.xlu0 %v1272_v60, %s8623_s12  ;;  %1278 = vrot.lane.b32.xlu1 %v1272_v60, %s8622_s11  ;;  %v1287_v20 = vrot.slane %v1285_v63, 1  ;;  %v1282_v54 = vrot.slane %v1272_v60, 1  ;;  %v1298_v14 = vrot.slane %v1272_v60, 2 }
 0x34f   : >> { %v1299_v3 = vrot.slane %v1296_v17, 2 }
 0x351   : >> { %v1300_v18 = vsel %vm494_vm7, %v1298_v14, %v1299_v3 }
 0x352   : >> { %1288 = vrot.lane.b32.xlu0 %v1287_v20, %s8623_s12  ;;  %1292 = vrot.lane.b32.xlu1 %v1282_v54, %s8622_s11 }
 0x356   : >> { %1303 = vrot.lane.b32.xlu0 %v1300_v18, %s8623_s12  ;;  %1307 = vrot.lane.b32.xlu1 %v1300_v18, %s8622_s11 }
 0x3bb   : >> { %v764_v49 = vpop.permute.xlu0 %763 }
 0x3bc   : >> { %8147 = vmatprep.subr.msk.mxu0 %vm461_vm4, %v764_v49  ;;  %8154 = vmatprep.subr.msk.mxu1 %vm461_vm4, %v764_v49  ;;  %v762_v12 = vpop.permute.xlu1 %761 }
 0x3bd   : >> { %8148 = vmatpush3.msk.msra.mxu0 %vm461_vm4, %v764_v49  ;;  %8155 = vmatpush3.msk.msra.mxu1 %vm461_vm4, %v764_v49 }
 0x3be   : >> { %8149 = vmatprep.subr.mxu0 %v762_v12  ;;  %8156 = vmatprep.subr.mxu1 %v762_v12 }
 0x3bf   : >> { %8150 = vmatpush3.msra.mxu0 %v762_v12  ;;  %8157 = vmatpush3.msra.mxu1 %v762_v12 }
 0x3c0   : >> { %8152 = vmatmul.mubr.f32.vlgmr.msra.gmra.mxu0 %v8625_v5  ;;  %8159 = vmatmul.mubr.f32.vlgmr.msra.gmra.mxu1 %v8625_v5  ;;  %v1275_v31 = vpop.permute.xlu0 %1274  ;;  %v1279_v8 = vpop.permute.xlu1 %1278 }
 0x3c1   : >> { %8161 = vmatprep.subr.msk.mxu0 %vm461_vm4, %v8929_v15  ;;  %8168 = vmatprep.subr.msk.mxu1 %vm461_vm4, %v8858_v45  ;;  %v1277_v35 = vadd.f32 %v1275_v31, %v1272_v60 }
 0x3c2   : >> { %8162 = vmatpush3.msk.msra.mxu0 %vm461_vm4, %v8929_v15  ;;  %8169 = vmatpush3.msk.msra.mxu1 %vm461_vm4, %v8858_v45 }
 0x3c3   : >> { %8163 = vmatprep.subr.mxu0 %v8927_v13  ;;  %8170 = vmatprep.subr.mxu1 %v8852_v43  ;;  %v1281_v36 = vadd.f32 %v1279_v8, %v1277_v35 }
 0x3c4   : >> { %8164 = vmatpush3.msra.mxu0 %v8927_v13  ;;  %8171 = vmatpush3.msra.mxu1 %v8852_v43  ;;  %v1289_v62 = vpop.permute.xlu0 %1288  ;;  %v1293_v44 = vpop.permute.xlu1 %1292 }
 0x3c5   : >> { %8175 = vmatprep.subr.msk.mxu0 %vm461_vm4, %v764_v49  ;;  %8182 = vmatprep.subr.msk.mxu1 %vm461_vm4, %v8858_v45  ;;  %v1284_v2 = vadd.f32 %v1282_v54, %v1281_v36 }
 0x3c7   : >> { %v1291_v46 = vadd.f32 %v1289_v62, %v1284_v2 }
 0x3c8   : >> { %v1304_v40 = vpop.permute.xlu0 %1303  ;;  %v1308_v47 = vpop.permute.xlu1 %1307 }
 0x3c9   : >> { %v1295_v37 = vadd.f32 %v1293_v44, %v1291_v46 }
 0x3cb   : >> { %v1302_v42 = vadd.f32 %v1300_v18, %v1295_v37  ;;  %v1322_v18 = vld [vmem:[#allocation4 + $0x8] sm:$0x1] }
 0x3cd   : >> { %v1306_v38 = vadd.f32 %v1304_v40, %v1302_v42 }
 0x3cf   : >> { %v1310_v48 = vadd.f32 %v1308_v47, %v1306_v38 }
 0x3d1   : >> { %v1312_v52 = vrot.slane %v1310_v48, 7 }
 0x3d3   : >> { %1313 = vrot.lane.b32.xlu0 %v1312_v52, %s8624_s13 }
 0x445   : >> { %v1314_v17 = vpop.permute.xlu0 %1313 }
 0x480   : >> { %v8153_v23 = vpop.f32.mrf.mxu0  ;;  %v8160_v24 = vpop.f32.mrf.mxu1 }
 0x482   : >> { %v841_v16 = vpop.f32.mrf.mxu0  ;;  %v922_v30 = vpop.f32.mrf.mxu1 }
 0x483   : >> { %8165 = vmatprep.mubr.msk.f32.mxu0 %vm10041_vm14, %v922_v30  ;;  %8172 = vmatprep.mubr.msk.f32.mxu1 %vm10041_vm14, %v841_v16  ;;  %v1348_v30 = vmul.f32 -0.33333334, %v1322_v18 }
 0x484   : >> { %8166 = vmatmul.mubr.msk.f32.vlgmr.msra.gmra.mxu0 %vm10041_vm14, %v8160_v24  ;;  %8173 = vmatmul.mubr.msk.f32.vlgmr.msra.gmra.mxu1 %vm10041_vm14, %v8153_v23 }
 0x485   : >> { %8176 = vmatpush3.msk.msra.mxu0 %vm461_vm4, %v764_v49  ;;  %8179 = vmatprep.mubr.msk.f32.mxu0 %vm10041_vm14, %v9037_v41  ;;  %v1351_v36 = vrot.slane %v1348_v30, 2 }
 0x486   : >> { %8177 = vmatprep.subr.mxu0 %v762_v12  ;;  %8183 = vmatpush3.msk.msra.mxu1 %vm461_vm4, %v8858_v45 }
 0x487   : >> { %8178 = vmatpush3.msra.mxu0 %v762_v12  ;;  %8184 = vmatprep.subr.mxu1 %v8852_v43 }
 0x488   : >> { %8180 = vmatmul.mubr.f32.vlgmr.msra.gmra.mxu0 %v8625_v5  ;;  %8185 = vmatpush3.msra.mxu1 %v8852_v43 }
 0x489   : >> { %8189 = vmatprep.subr.mxu0 %v8625_v5  ;;  %8194 = vmatprep.subr.mxu1 %v8625_v5 }
 0x48a   : >> { %8191 = vmatprep.mubr.msk.f32.mxu0 %vm8626_vm2, %v8625_v5 }
 0x544   : >> { %v8167_v57 = vpop.f32.mrf.mxu0  ;;  %v8174_v61 = vpop.f32.mrf.mxu1 }
 0x546   : >> { %v1006_v1 = vpop.f32.mrf.mxu0  ;;  %v1090_v49 = vpop.f32.mrf.mxu1 }
 0x547   : >> { %v1091_v0 = vadd.f32 %v1090_v49, %v1006_v1 }
 0x548   : >> { %v8181_v59 = vpop.f32.mrf.mxu0 }
 0x54a   : >> { %v1171_v19 = vpop.f32.mrf.mxu0 }
 0x54b   : >> { %8186 = vmatprep.mubr.msk.f32.mxu1 %vm10041_vm14, %v1171_v19 }
 0x54c   : >> { %8187 = vmatmul.mubr.msk.f32.vlgmr.msra.gmra.mxu1 %vm10041_vm14, %v8181_v59 }
 0x54d   : >> { %8196 = vmatprep.mubr.msk.f32.mxu1 %vm8626_vm2, %v8625_v5 }
 0x60c   : >> { %v8188_v12 = vpop.f32.mrf.mxu1 }
 0x60e   : >> { %v1252_v60 = vpop.f32.mrf.mxu1 }
 0x60f   : >> { %v1261_v63 = vadd.f32 %v1252_v60, %v1091_v0  ;;  %v1824_v60 = vld [vmem:[#allocation6] sm:$0x1f] }
 0x611   : >> { %1264 = vst.msk [vmem:[#allocation5] sm:$0xff] %vm1263_vm8, %v1261_v63  ;;  %v1826_v63 = vmul.f32 -0.33333334, %v1824_v60 }
 0x618   : >> { %v9281_v20 = vld [vmem:[#allocation5] sm:$0xff] }
 0x619   : >> { %v1316_v54 = vsub.f32 %v9281_v20, %v1314_v17  ;;  %v1839_v17 = vmul.f32 2.6666667, %v1824_v60 }
 0x61b   : >> { %v1317_v14 = vmul.f32 0.25, %v1316_v54  ;;  %v1841_v54 = vrot.slane %v1839_v17, 1 }
 0x61d   : >> { %v1318_v3 = vadd.f32 %v1317_v14, %v9252_v6  ;;  %v1836_v14 = vrot.slane %v1826_v63, 1 }
 0x61f   : >> { %1320 = vst.msk [vmem:[#allocation4] sm:$0xfe] %vm1319_vm1, %v1318_v3  ;;  %v1850_v3 = vrot.slane %v1826_v63, 2 }
 0x626   : >> { %v9286_v23 = vld [vmem:[#allocation4] sm:$0xff] }
 0x627   : >> { %v1324_v24 = vmul.f32 -0.33333334, %v9286_v23  ;;  %v1337_v16 = vmul.f32 2.6666667, %v9286_v23 }
 0x629   : >> { %1330 = vrot.lane.b32.xlu0 %v1324_v24, %s8622_s11  ;;  %1326 = vrot.lane.b32.xlu1 %v1324_v24, %s8623_s12  ;;  %v1339_v31 = vrot.slane %v1337_v16, 1  ;;  %v1334_v8 = vrot.slane %v1324_v24, 1  ;;  %v1350_v35 = vrot.slane %v1324_v24, 2 }
 0x62b   : >> { %v1352_v6 = vsel %vm494_vm7, %v1350_v35, %v1351_v36 }
 0x62d   : >> { %1340 = vrot.lane.b32.xlu1 %v1339_v31, %s8623_s12  ;;  %1344 = vrot.lane.b32.xlu0 %v1334_v8, %s8622_s11 }
 0x631   : >> { %1355 = vrot.lane.b32.xlu1 %v1352_v6, %s8623_s12  ;;  %1359 = vrot.lane.b32.xlu0 %v1352_v6, %s8622_s11 }
 0x69b   : >> { %v1327_v62 = vpop.permute.xlu1 %1326  ;;  %v1331_v44 = vpop.permute.xlu0 %1330 }
 0x69c   : >> { %v1329_v2 = vadd.f32 %v1327_v62, %v1324_v24 }
 0x69e   : >> { %v1333_v46 = vadd.f32 %v1331_v44, %v1329_v2 }
 0x69f   : >> { %v1341_v40 = vpop.permute.xlu1 %1340  ;;  %v1345_v47 = vpop.permute.xlu0 %1344 }
 0x6a0   : >> { %v1336_v37 = vadd.f32 %v1334_v8, %v1333_v46 }
 0x6a2   : >> { %v1343_v42 = vadd.f32 %v1341_v40, %v1336_v37 }
 0x6a3   : >> { %v1356_v52 = vpop.permute.xlu1 %1355  ;;  %v1360_v1 = vpop.permute.xlu0 %1359 }
 0x6a4   : >> { %v1347_v38 = vadd.f32 %v1345_v47, %v1343_v42 }
 0x6a6   : >> { %v1354_v48 = vadd.f32 %v1352_v6, %v1347_v38 }
 0x6a8   : >> { %v1358_v57 = vadd.f32 %v1356_v52, %v1354_v48 }
 0x6aa   : >> { %v1362_v59 = vadd.f32 %v1360_v1, %v1358_v57 }
 0x6ac   : >> { %v1364_v19 = vrot.slane %v1362_v59, 7 }
 0x6ae   : >> { %1365 = vrot.lane.b32.xlu1 %v1364_v19, %s8624_s13 }
 0x6b2   : >> { %1828 = vrot.lane.b32.xlu1 %v1826_v63, %s8623_s12 }
 0x6b6   : >> { %1842 = vrot.lane.b32.xlu1 %v1841_v54, %s8623_s12 }
 0x6ba   : >> { %1853 = vrot.lane.b32.xlu1 %v1850_v3, %s8623_s12 }
 0x720   : >> { %v1366_v61 = vpop.permute.xlu1 %1365 }
 0x721   : >> { %v1368_v49 = vsub.f32 %v9281_v20, %v1366_v61 }
 0x723   : >> { %v1370_v12 = vrot.slane %v1368_v49, 1 }
 0x724   : >> { %v1829_v31 = vpop.permute.xlu1 %1828 }
 0x725   : >> { %1371 = vrot.lane.b32.xlu0 %v1370_v12, %s8623_s12  ;;  %v1831_v35 = vadd.f32 %v1829_v31, %v1826_v63 }
 0x728   : >> { %v1843_v6 = vpop.permute.xlu1 %1842 }
 0x729   : >> { %1832 = vrot.lane.b32.xlu0 %v1826_v63, %s8622_s11 }
 0x72c   : >> { %v1854_v37 = vpop.permute.xlu1 %1853 }
 0x72d   : >> { %1846 = vrot.lane.b32.xlu0 %v1836_v14, %s8622_s11 }
 0x731   : >> { %1857 = vrot.lane.b32.xlu0 %v1850_v3, %s8622_s11 }
 0x797   : >> { %v1372_v0 = vpop.permute.xlu0 %1371 }
 0x798   : >> { %8190 = vmatpush3.msk.msra.mxu0 %vm461_vm4, %v1372_v0  ;;  %8195 = vmatpush3.msk.msra.mxu1 %vm461_vm4, %v1372_v0 }
 0x799   : >> { %8192 = vmatmul.mubr.msk.f32.vlgmr.msra.gmra.mxu0 %vm10036_vm11, %v9013_v34  ;;  %8197 = vmatmul.mubr.msk.f32.vlgmr.msra.gmra.mxu1 %vm10036_vm11, %v9031_v39 }
 0x79a   : >> { %8199 = vmatprep.subr.mxu0 %v8625_v5  ;;  %8204 = vmatprep.subr.mxu1 %v8625_v5 }
 0x79b   : >> { %8200 = vmatpush3.msk.msra.mxu0 %vm461_vm4, %v9066_v55  ;;  %8201 = vmatprep.mubr.msk.f32.mxu0 %vm8626_vm2, %v8625_v5  ;;  %v1833_v8 = vpop.permute.xlu0 %1832 }
 0x79c   : >> { %8205 = vmatpush3.msk.msra.mxu1 %vm461_vm4, %v9057_v51  ;;  %8206 = vmatprep.mubr.msk.f32.mxu1 %vm8626_vm2, %v8625_v5  ;;  %v1835_v36 = vadd.f32 %v1833_v8, %v1831_v35 }
 0x79d   : >> { %8209 = vmatprep.subr.mxu0 %v8625_v5  ;;  %8214 = vmatprep.subr.mxu1 %v8625_v5 }
 0x79e   : >> { %v1838_v62 = vadd.f32 %v1836_v14, %v1835_v36 }
 0x79f   : >> { %v1847_v2 = vpop.permute.xlu0 %1846 }
 0x7a0   : >> { %v1845_v44 = vadd.f32 %v1843_v6, %v1838_v62 }
 0x7a2   : >> { %v1849_v46 = vadd.f32 %v1847_v2, %v1845_v44 }
 0x7a3   : >> { %v1858_v42 = vpop.permute.xlu0 %1857 }
 0x7a4   : >> { %v1852_v40 = vadd.f32 %v1850_v3, %v1849_v46 }
 0x7a6   : >> { %v1856_v47 = vadd.f32 %v1854_v37, %v1852_v40 }
 0x7a8   : >> { %v1860_v38 = vadd.f32 %v1858_v42, %v1856_v47 }
 0x7aa   : >> { %v1862_v48 = vrot.slane %v1860_v38, 7 }
 0x7ac   : >> { %1863 = vrot.lane.b32.xlu1 %v1862_v48, %s8624_s13 }
 0x81e   : >> { %v1864_v17 = vpop.permute.xlu1 %1863 }
 0x859   : >> { %v1445_v18 = vpop.f32.mrf.mxu0  ;;  %v1518_v24 = vpop.f32.mrf.mxu1 }
 0x85a   : >> { %8202 = vmatmul.mubr.msk.f32.vlgmr.msra.gmra.mxu0 %vm10036_vm11, %v1518_v24  ;;  %8207 = vmatmul.mubr.msk.f32.vlgmr.msra.gmra.mxu1 %vm10036_vm11, %v1445_v18 }
 0x85b   : >> { %8210 = vmatpush3.msk.msra.mxu0 %vm461_vm4, %v1372_v0  ;;  %v8198_v16 = vpop.f32.mrf.mxu1  ;;  %8211 = vmatprep.mubr.msk.f32.mxu0 %vm8626_vm2, %v8625_v5  ;;  %v8193_v30 = vpop.f32.mrf.mxu0 }
 0x85c   : >> { %8215 = vmatpush3.msk.msra.mxu1 %vm461_vm4, %v9057_v51  ;;  %8216 = vmatprep.mubr.msk.f32.mxu1 %vm8626_vm2, %v8625_v5 }
 0x85d   : >> { %8219 = vmatprep.subr.mxu0 %v8625_v5  ;;  %8224 = vmatprep.subr.mxu1 %v8625_v5 }
 0x85e   : >> { %8212 = vmatmul.mubr.msk.f32.vlgmr.msra.gmra.mxu0 %vm10036_vm11, %v9054_v50 }
 0x85f   : >> { %8221 = vmatprep.mubr.msk.f32.mxu0 %vm8626_vm2, %v8625_v5 }
 0x91a   : >> { %v1594_v52 = vpop.f32.mrf.mxu0  ;;  %v1670_v57 = vpop.f32.mrf.mxu1 }
 0x91b   : >> { %v1671_v1 = vadd.f32 %v1670_v57, %v1594_v52 }
 0x91c   : >> { %v8203_v59 = vpop.f32.mrf.mxu0  ;;  %v8208_v19 = vpop.f32.mrf.mxu1 }
 0x91e   : >> { %v1743_v61 = vpop.f32.mrf.mxu0 }
 0x91f   : >> { %8217 = vmatmul.mubr.msk.f32.vlgmr.msra.gmra.mxu1 %vm10036_vm11, %v1743_v61  ;;  %vm10042_vm11 = vcmask 18432  }
 0x920   : >> { %v8213_v49 = vpop.f32.mrf.mxu0  ;;  %8226 = vmatprep.mubr.msk.f32.mxu1 %vm8626_vm2, %v8625_v5  ;;  %2369 = vst.msk [vmem:[#allocation8] sm:$0x7] %vm10042_vm11, %v8625_v5 }
 0x9df   : >> { %v1816_v12 = vpop.f32.mrf.mxu1 }
 0x9e0   : >> { %v1820_v0 = vadd.f32 %v1816_v12, %v1671_v1  ;;  %v2370_v12 = vld [vmem:[#allocation8] sm:$0x7] }
 0x9e1   : >> { %v8218_v63 = vpop.f32.mrf.mxu1 }
 0x9e2   : >> { %1822 = vst.msk [vmem:[#allocation7] sm:$0x1f] %vm10037_vm0, %v1820_v0  ;;  %v2372_v0 = vmul.f32 -0.33333334, %v2370_v12  ;;  %v2385_v63 = vmul.f32 2.6666667, %v2370_v12 }
 0x9e3   : >> { %vm10038_vm0 = vcmask 9225  }
 0x9e9   : >> { %v1825_v54 = vld [vmem:[#allocation7] sm:$0x1f] }
 0x9ea   : >> { %v1866_v14 = vsub.f32 %v1825_v54, %v1864_v17  ;;  %v1872_v1 = vld [vmem:[#allocation7] sm:$0x1f]  ;;  %v2387_v17 = vrot.slane %v2385_v63, 1  ;;  %v2382_v54 = vrot.slane %v2372_v0, 1 }
 0x9ec   : >> { %v1867_v3 = vmul.f32 0.25, %v1866_v14  ;;  %v2396_v14 = vrot.slane %v2372_v0, 2 }
 0x9ee   : >> { %v1868_v18 = vadd.f32 %v1867_v3, %v1824_v60 }
 0x9f0   : >> { %1870 = vst.msk [vmem:[#allocation6] sm:$0xe] %vm1869_vm5, %v1868_v18 }
 0x9f7   : >> { %v1871_v24 = vld [vmem:[#allocation6] sm:$0x1f] }
 0x9f8   : >> { %v1873_v16 = vmul.f32 -0.33333334, %v1871_v24  ;;  %v1886_v30 = vmul.f32 2.6666667, %v1871_v24 }
 0x9fa   : >> { %1879 = vrot.lane.b32.xlu1 %v1873_v16, %s8622_s11  ;;  %1875 = vrot.lane.b32.xlu0 %v1873_v16, %s8623_s12  ;;  %v1888_v31 = vrot.slane %v1886_v30, 1  ;;  %v1883_v8 = vrot.slane %v1873_v16, 1  ;;  %v1897_v35 = vrot.slane %v1873_v16, 2 }
 0x9fe   : >> { %1889 = vrot.lane.b32.xlu0 %v1888_v31, %s8623_s12  ;;  %1893 = vrot.lane.b32.xlu1 %v1883_v8, %s8622_s11 }
 0xa02   : >> { %1900 = vrot.lane.b32.xlu0 %v1897_v35, %s8623_s12  ;;  %1904 = vrot.lane.b32.xlu1 %v1897_v35, %s8622_s11 }
 0xa6c   : >> { %v1876_v60 = vpop.permute.xlu0 %1875  ;;  %v1880_v6 = vpop.permute.xlu1 %1879 }
 0xa6d   : >> { %v1878_v36 = vadd.f32 %v1876_v60, %v1873_v16 }
 0xa6f   : >> { %v1882_v62 = vadd.f32 %v1880_v6, %v1878_v36 }
 0xa70   : >> { %v1890_v44 = vpop.permute.xlu0 %1889  ;;  %v1894_v37 = vpop.permute.xlu1 %1893 }
 0xa71   : >> { %v1885_v2 = vadd.f32 %v1883_v8, %v1882_v62 }
 0xa73   : >> { %v1892_v46 = vadd.f32 %v1890_v44, %v1885_v2 }
 0xa74   : >> { %v1901_v47 = vpop.permute.xlu0 %1900  ;;  %v1905_v48 = vpop.permute.xlu1 %1904 }
 0xa75   : >> { %v1896_v40 = vadd.f32 %v1894_v37, %v1892_v46 }
 0xa77   : >> { %v1899_v42 = vadd.f32 %v1897_v35, %v1896_v40 }
 0xa79   : >> { %v1903_v38 = vadd.f32 %v1901_v47, %v1899_v42 }
 0xa7b   : >> { %v1907_v52 = vadd.f32 %v1905_v48, %v1903_v38 }
 0xa7d   : >> { %v1909_v57 = vrot.slane %v1907_v52, 7 }
 0xa7f   : >> { %1910 = vrot.lane.b32.xlu0 %v1909_v57, %s8624_s13 }
 0xa83   : >> { %2374 = vrot.lane.b32.xlu0 %v2372_v0, %s8623_s12 }
 0xa87   : >> { %2388 = vrot.lane.b32.xlu0 %v2387_v17, %s8623_s12 }
 0xa8b   : >> { %2399 = vrot.lane.b32.xlu0 %v2396_v14, %s8623_s12 }
 0xaf1   : >> { %v1911_v59 = vpop.permute.xlu0 %1910 }
 0xaf2   : >> { %v1913_v19 = vsub.f32 %v1872_v1, %v1911_v59 }
 0xaf4   : >> { %v1915_v61 = vrot.slane %v1913_v19, 1 }
 0xaf5   : >> { %v2375_v30 = vpop.permute.xlu0 %2374 }
 0xaf6   : >> { %1916 = vrot.lane.b32.xlu1 %v1915_v61, %s8623_s12  ;;  %v2377_v8 = vadd.f32 %v2375_v30, %v2372_v0 }
 0xaf9   : >> { %v2389_v60 = vpop.permute.xlu0 %2388 }
 0xafa   : >> { %2378 = vrot.lane.b32.xlu1 %v2372_v0, %s8622_s11 }
 0xafd   : >> { %v2400_v44 = vpop.permute.xlu0 %2399 }
 0xafe   : >> { %2392 = vrot.lane.b32.xlu1 %v2382_v54, %s8622_s11 }
 0xb02   : >> { %2403 = vrot.lane.b32.xlu1 %v2396_v14, %s8622_s11 }
 0xb68   : >> { %v1917_v49 = vpop.permute.xlu1 %1916 }
 0xb69   : >> { %8220 = vmatpush3.msk.msra.mxu0 %vm1922_vm10, %v1917_v49  ;;  %8225 = vmatpush3.msk.msra.mxu1 %vm1922_vm10, %v1917_v49 }
 0xb6a   : >> { %8222 = vmatmul.mubr.msk.f32.vlgmr.msra.gmra.mxu0 %vm10039_vm13, %v9069_v56  ;;  %8227 = vmatmul.mubr.msk.f32.vlgmr.msra.gmra.mxu1 %vm10039_vm13, %v9107_v21 }
 0xb6b   : >> { %8229 = vmatprep.subr.mxu0 %v8625_v5  ;;  %8234 = vmatprep.subr.mxu1 %v8625_v5 }
 0xb6c   : >> { %8230 = vmatpush3.msk.msra.mxu0 %vm1922_vm10, %v9118_v26  ;;  %8231 = vmatprep.mubr.msk.f32.mxu0 %vm8626_vm2, %v8625_v5  ;;  %v2379_v31 = vpop.permute.xlu1 %2378 }
 0xb6d   : >> { %8235 = vmatpush3.msk.msra.mxu1 %vm1922_vm10, %v9116_v25  ;;  %8236 = vmatprep.mubr.msk.f32.mxu1 %vm8626_vm2, %v8625_v5  ;;  %v2381_v35 = vadd.f32 %v2379_v31, %v2377_v8 }
 0xb6e   : >> { %8239 = vmatprep.subr.mxu0 %v8625_v5  ;;  %8244 = vmatprep.subr.mxu1 %v8625_v5 }
 0xb6f   : >> { %v2384_v36 = vadd.f32 %v2382_v54, %v2381_v35 }
 0xb70   : >> { %v2393_v6 = vpop.permute.xlu1 %2392 }
 0xb71   : >> { %v2391_v62 = vadd.f32 %v2389_v60, %v2384_v36 }
 0xb73   : >> { %v2395_v2 = vadd.f32 %v2393_v6, %v2391_v62 }
 0xb74   : >> { %v2404_v37 = vpop.permute.xlu1 %2403 }
 0xb75   : >> { %v2398_v46 = vadd.f32 %v2396_v14, %v2395_v2 }
 0xb77   : >> { %v2402_v40 = vadd.f32 %v2400_v44, %v2398_v46 }
 0xb79   : >> { %v2406_v42 = vadd.f32 %v2404_v37, %v2402_v40 }
 0xb7b   : >> { %v2408_v47 = vrot.slane %v2406_v42, 7 }
 0xb7d   : >> { %2409 = vrot.lane.b32.xlu0 %v2408_v47, %s8624_s13 }
 0xbef   : >> { %v2410_v63 = vpop.permute.xlu0 %2409 }
 0xc2a   : >> { %v1991_v3 = vpop.f32.mrf.mxu0  ;;  %v2064_v18 = vpop.f32.mrf.mxu1 }
 0xc2b   : >> { %8232 = vmatmul.mubr.msk.f32.vlgmr.msra.gmra.mxu0 %vm10039_vm13, %v2064_v18  ;;  %8237 = vmatmul.mubr.msk.f32.vlgmr.msra.gmra.mxu1 %vm10039_vm13, %v1991_v3 }
 0xc2c   : >> { %8240 = vmatpush3.msk.msra.mxu0 %vm1922_vm10, %v1917_v49  ;;  %v8228_v24 = vpop.f32.mrf.mxu1  ;;  %8241 = vmatprep.mubr.msk.f32.mxu0 %vm8626_vm2, %v8625_v5  ;;  %v8223_v16 = vpop.f32.mrf.mxu0 }
 0xc2d   : >> { %8245 = vmatpush3.msk.msra.mxu1 %vm1922_vm10, %v9116_v25  ;;  %8246 = vmatprep.mubr.msk.f32.mxu1 %vm8626_vm2, %v8625_v5 }
 0xc2e   : >> { %8249 = vmatprep.subr.mxu0 %v8625_v5  ;;  %8254 = vmatprep.subr.mxu1 %v8625_v5 }
 0xc2f   : >> { %8242 = vmatmul.mubr.msk.f32.vlgmr.msra.gmra.mxu0 %vm10039_vm13, %v9121_v27 }
 0xc30   : >> { %8251 = vmatprep.mubr.msk.f32.mxu0 %vm8626_vm2, %v8625_v5 }
 0xceb   : >> { %v2140_v38 = vpop.f32.mrf.mxu0  ;;  %v2216_v48 = vpop.f32.mrf.mxu1 }
 0xcec   : >> { %v2217_v52 = vadd.f32 %v2216_v48, %v2140_v38 }
 0xced   : >> { %v8233_v57 = vpop.f32.mrf.mxu0  ;;  %v8238_v1 = vpop.f32.mrf.mxu1 }
 0xcef   : >> { %v2289_v59 = vpop.f32.mrf.mxu0 }
 0xcf0   : >> { %8247 = vmatmul.mubr.msk.f32.vlgmr.msra.gmra.mxu1 %vm10039_vm13, %v2289_v59 }
 0xcf1   : >> { %v8243_v19 = vpop.f32.mrf.mxu0  ;;  %8256 = vmatprep.mubr.msk.f32.mxu1 %vm8626_vm2, %v8625_v5 }
 0xdb0   : >> { %v2362_v61 = vpop.f32.mrf.mxu1 }
 0xdb1   : >> { %v2366_v49 = vadd.f32 %v2362_v61, %v2217_v52 }
 0xdb2   : >> { %v8248_v0 = vpop.f32.mrf.mxu1 }
 0xdb3   : >> { %2368 = vst.msk [vmem:[#allocation9] sm:$0x7] %vm10042_vm11, %v2366_v49 }
 0xdba   : >> { %v2371_v17 = vld [vmem:[#allocation9] sm:$0x7] }
 0xdbb   : >> { %v2412_v54 = vsub.f32 %v2371_v17, %v2410_v63  ;;  %v2418_v52 = vld [vmem:[#allocation9] sm:$0x7] }
 0xdbd   : >> { %v2413_v14 = vmul.f32 0.25, %v2412_v54 }
 0xdbf   : >> { %v2414_v3 = vadd.f32 %v2413_v14, %v2370_v12 }
 0xdc1   : >> { %2416 = vst.msk [vmem:[#allocation8] sm:$0x2] %vm10038_vm0, %v2414_v3 }
 0xdc8   : >> { %v2417_v18 = vld [vmem:[#allocation8] sm:$0x7] }
 0xdc9   : >> { %v2419_v24 = vmul.f32 -0.33333334, %v2417_v18  ;;  %v2432_v16 = vmul.f32 2.6666667, %v2417_v18 }
 0xdcb   : >> { %2425 = vrot.lane.b32.xlu0 %v2419_v24, %s8622_s11  ;;  %2421 = vrot.lane.b32.xlu1 %v2419_v24, %s8623_s12  ;;  %v2434_v30 = vrot.slane %v2432_v16, 1  ;;  %v2429_v31 = vrot.slane %v2419_v24, 1  ;;  %v2443_v8 = vrot.slane %v2419_v24, 2 }
 0xdcf   : >> { %2435 = vrot.lane.b32.xlu1 %v2434_v30, %s8623_s12  ;;  %2439 = vrot.lane.b32.xlu0 %v2429_v31, %s8622_s11 }
 0xdd3   : >> { %2446 = vrot.lane.b32.xlu1 %v2443_v8, %s8623_s12  ;;  %2450 = vrot.lane.b32.xlu0 %v2443_v8, %s8622_s11 }
 0xe3d   : >> { %v2422_v12 = vpop.permute.xlu1 %2421  ;;  %v2426_v60 = vpop.permute.xlu0 %2425 }
 0xe3e   : >> { %v2424_v35 = vadd.f32 %v2422_v12, %v2419_v24 }
 0xe40   : >> { %v2428_v36 = vadd.f32 %v2426_v60, %v2424_v35  ;;  %v2912_v60 = vld [vmem:[#allocation6] sm:$0x1f] }
 0xe41   : >> { %v2436_v62 = vpop.permute.xlu1 %2435  ;;  %v2440_v44 = vpop.permute.xlu0 %2439 }
 0xe42   : >> { %v2431_v6 = vadd.f32 %v2429_v31, %v2428_v36 }
 0xe44   : >> { %v2438_v2 = vadd.f32 %v2436_v62, %v2431_v6 }
 0xe45   : >> { %v2447_v40 = vpop.permute.xlu1 %2446  ;;  %v2451_v47 = vpop.permute.xlu0 %2450 }
 0xe46   : >> { %v2442_v46 = vadd.f32 %v2440_v44, %v2438_v2 }
 0xe48   : >> { %v2445_v37 = vadd.f32 %v2443_v8, %v2442_v46 }
 0xe4a   : >> { %v2449_v42 = vadd.f32 %v2447_v40, %v2445_v37 }
 0xe4c   : >> { %v2453_v38 = vadd.f32 %v2451_v47, %v2449_v42 }
 0xe4e   : >> { %v2455_v48 = vrot.slane %v2453_v38, 7 }
 0xe50   : >> { %2456 = vrot.lane.b32.xlu1 %v2455_v48, %s8624_s13 }
 0xec2   : >> { %v2457_v57 = vpop.permute.xlu1 %2456 }
 0xec3   : >> { %v2459_v1 = vsub.f32 %v2418_v52, %v2457_v57 }
 0xec5   : >> { %v2460_v59 = vmul.f32 0.25, %v2459_v1 }
 0xec7   : >> { %v2461_v19 = vadd.f32 %v2460_v59, %v2417_v18 }
 0xec9   : >> { %2462 = vst.msk [vmem:[#allocation8] sm:$0x2] %vm10038_vm0, %v2461_v19  ;;  %vm2970_vm0 = vcmask 1044480  }
 0xed0   : >> { %v2463_v61 = vld [vmem:[#allocation8] sm:$0x7] }
 0xed1   : >> { %8250 = vmatpush3.msk.msra.mxu0 %vm1922_vm10, %v2463_v61  ;;  %8255 = vmatpush3.msk.msra.mxu1 %vm1922_vm10, %v2463_v61 }
 0xed2   : >> { %8252 = vmatmul.mubr.msk.f32.vlgmr.msra.gmra.mxu0 %vm10039_vm13, %v8801_v28  ;;  %8257 = vmatmul.mubr.msk.f32.vlgmr.msra.gmra.mxu1 %vm10039_vm13, %v8994_v9 }
 0xed3   : >> { %8259 = vmatprep.subr.mxu0 %v8625_v5  ;;  %8264 = vmatprep.subr.mxu1 %v8625_v5 }
 0xed4   : >> { %8260 = vmatpush3.msk.msra.mxu0 %vm1922_vm10, %v8999_v32  ;;  %8261 = vmatprep.mubr.msk.f32.mxu0 %vm8626_vm2, %v8625_v5 }
 0xed5   : >> { %8265 = vmatpush3.msk.msra.mxu1 %vm1922_vm10, %v8875_v53  ;;  %8266 = vmatprep.mubr.msk.f32.mxu1 %vm8626_vm2, %v8625_v5 }
 0xed6   : >> { %8269 = vmatprep.subr.mxu0 %v8625_v5  ;;  %8274 = vmatprep.subr.mxu1 %v8625_v5 }
 0xf92   : >> { %v2536_v49 = vpop.f32.mrf.mxu0  ;;  %v2609_v0 = vpop.f32.mrf.mxu1 }
 0xf93   : >> { %8262 = vmatmul.mubr.msk.f32.vlgmr.msra.gmra.mxu0 %vm10039_vm13, %v2609_v0  ;;  %8267 = vmatmul.mubr.msk.f32.vlgmr.msra.gmra.mxu1 %vm10039_vm13, %v2536_v49 }
 0xf94   : >> { %8270 = vmatpush3.msk.msra.mxu0 %vm1922_vm10, %v2463_v61  ;;  %v8258_v63 = vpop.f32.mrf.mxu1  ;;  %8271 = vmatprep.mubr.msk.f32.mxu0 %vm8626_vm2, %v8625_v5  ;;  %v8253_v17 = vpop.f32.mrf.mxu0 }
 0xf95   : >> { %8275 = vmatpush3.msk.msra.mxu1 %vm1922_vm10, %v8875_v53  ;;  %8276 = vmatprep.mubr.msk.f32.mxu1 %vm8626_vm2, %v8625_v5 }
 0xf96   : >> { %8279 = vmatprep.subr.mxu0 %v8625_v5  ;;  %8284 = vmatprep.subr.mxu1 %v8625_v5 }
 0xf97   : >> { %8272 = vmatmul.mubr.msk.f32.vlgmr.msra.gmra.mxu0 %vm10039_vm13, %v9005_v4 }
 0xf98   : >> { %8281 = vmatprep.mubr.msk.f32.mxu0 %vm8626_vm2, %v8625_v5 }
0x1053   : >> { %v2685_v54 = vpop.f32.mrf.mxu0  ;;  %v2761_v14 = vpop.f32.mrf.mxu1 }
0x1054   : >> { %v2762_v3 = vadd.f32 %v2761_v14, %v2685_v54  ;;  %v2921_v14 = vld [vmem:[#allocation7] sm:$0x1f] }
0x1055   : >> { %v8263_v18 = vpop.f32.mrf.mxu0  ;;  %v8268_v24 = vpop.f32.mrf.mxu1 }
0x1057   : >> { %v2834_v16 = vpop.f32.mrf.mxu0 }
0x1058   : >> { %8277 = vmatmul.mubr.msk.f32.vlgmr.msra.gmra.mxu1 %vm10039_vm13, %v2834_v16  ;;  %vm2967_vm13 = vcmask 39936  }
0x1059   : >> { %v8273_v30 = vpop.f32.mrf.mxu0  ;;  %8286 = vmatprep.mubr.msk.f32.mxu1 %vm8626_vm2, %v8625_v5 }
0x1118   : >> { %v2907_v31 = vpop.f32.mrf.mxu1 }
0x1119   : >> { %v2911_v8 = vadd.f32 %v2907_v31, %v2762_v3 }
0x111a   : >> { %v8278_v12 = vpop.f32.mrf.mxu1 }
0x111b   : >> { %v2914_v35 = vrot.slane %v2911_v8, 7 }
0x111d   : >> { %2915 = vrot.lane.b32.xlu0 %v2914_v35, %s8624_s13 }
0x118f   : >> { %v2916_v36 = vpop.permute.xlu0 %2915 }
0x1190   : >> { %v2918_v6 = vadd.f32 %v2916_v36, %v2912_v60 }
0x1192   : >> { %2919 = vst.msk [vmem:[#allocation6] sm:$0xe] %vm1869_vm5, %v2918_v6 }
0x1199   : >> { %v2920_v62 = vld [vmem:[#allocation6] sm:$0x1f] }
0x119a   : >> { %v2922_v2 = vmul.f32 -0.33333334, %v2920_v62  ;;  %v2935_v44 = vmul.f32 2.6666667, %v2920_v62 }
0x119c   : >> { %2928 = vrot.lane.b32.xlu0 %v2922_v2, %s8622_s11  ;;  %2924 = vrot.lane.b32.xlu1 %v2922_v2, %s8623_s12  ;;  %v2937_v46 = vrot.slane %v2935_v44, 1  ;;  %v2932_v37 = vrot.slane %v2922_v2, 1  ;;  %v2946_v40 = vrot.slane %v2922_v2, 2 }
0x11a0   : >> { %2938 = vrot.lane.b32.xlu1 %v2937_v46, %s8623_s12  ;;  %2942 = vrot.lane.b32.xlu0 %v2932_v37, %s8622_s11 }
0x11a4   : >> { %2949 = vrot.lane.b32.xlu1 %v2946_v40, %s8623_s12  ;;  %2953 = vrot.lane.b32.xlu0 %v2946_v40, %s8622_s11 }
0x120e   : >> { %v2925_v42 = vpop.permute.xlu1 %2924  ;;  %v2929_v38 = vpop.permute.xlu0 %2928 }
0x120f   : >> { %v2927_v47 = vadd.f32 %v2925_v42, %v2922_v2 }
0x1211   : >> { %v2931_v48 = vadd.f32 %v2929_v38, %v2927_v47 }
0x1212   : >> { %v2939_v57 = vpop.permute.xlu1 %2938  ;;  %v2943_v59 = vpop.permute.xlu0 %2942 }
0x1213   : >> { %v2934_v52 = vadd.f32 %v2932_v37, %v2931_v48  ;;  %v3421_v48 = vld [vmem:[#allocation4 + $0x8] sm:$0x1] }
0x1215   : >> { %v2941_v1 = vadd.f32 %v2939_v57, %v2934_v52 }
0x1216   : >> { %v2950_v49 = vpop.permute.xlu1 %2949  ;;  %v2954_v63 = vpop.permute.xlu0 %2953 }
0x1217   : >> { %v2945_v19 = vadd.f32 %v2943_v59, %v2941_v1  ;;  %v3447_v59 = vmul.f32 -0.33333334, %v3421_v48 }
0x1219   : >> { %v2948_v61 = vadd.f32 %v2946_v40, %v2945_v19 }
0x121b   : >> { %v2952_v0 = vadd.f32 %v2950_v49, %v2948_v61 }
0x121d   : >> { %v2956_v17 = vadd.f32 %v2954_v63, %v2952_v0  ;;  %v3450_v0 = vrot.slane %v3447_v59, 2 }
0x121f   : >> { %v2958_v54 = vrot.slane %v2956_v17, 7 }
0x1221   : >> { %2959 = vrot.lane.b32.xlu1 %v2958_v54, %s8624_s13 }
0x1293   : >> { %v2960_v3 = vpop.permute.xlu1 %2959 }
0x1294   : >> { %v2962_v18 = vsub.f32 %v2921_v14, %v2960_v3 }
0x1296   : >> { %v2963_v24 = vmul.f32 0.25, %v2962_v18 }
0x1298   : >> { %v2964_v16 = vadd.f32 %v2963_v24, %v2920_v62 }
0x129a   : >> { %2965 = vst.msk [vmem:[#allocation6] sm:$0xe] %vm1869_vm5, %v2964_v16 }
0x12a1   : >> { %v2966_v30 = vld [vmem:[#allocation6] sm:$0x1f] }
0x12a2   : >> { %8280 = vmatpush3.msk.msra.mxu0 %vm2970_vm0, %v2966_v30  ;;  %8285 = vmatpush3.msk.msra.mxu1 %vm2970_vm0, %v2966_v30 }
0x12a3   : >> { %8287 = vmatmul.mubr.msk.f32.vlgmr.msra.gmra.mxu1 %vm2967_vm13, %v8994_v9  ;;  %8282 = vmatmul.mubr.msk.f32.vlgmr.msra.gmra.mxu0 %vm2967_vm13, %v8801_v28 }
0x12a4   : >> { %8289 = vmatprep.subr.mxu0 %v8625_v5  ;;  %8291 = vmatprep.mubr.msk.f32.mxu0 %vm8626_vm2, %v8625_v5 }
0x12a5   : >> { %8290 = vmatpush3.msk.msra.mxu0 %vm2970_vm0, %v8999_v32  ;;  %8294 = vmatprep.subr.mxu1 %v8625_v5 }
0x12a6   : >> { %8299 = vmatprep.subr.mxu0 %v8625_v5  ;;  %8295 = vmatpush3.msk.msra.mxu1 %vm2970_vm0, %v8875_v53 }
0x12a7   : >> { %8296 = vmatprep.mubr.msk.f32.mxu1 %vm8626_vm2, %v8625_v5  ;;  %8304 = vmatprep.subr.mxu1 %v8625_v5 }
0x1363   : >> { %v3112_v31 = vpop.f32.mrf.mxu1  ;;  %v3040_v8 = vpop.f32.mrf.mxu0 }
0x1364   : >> { %8292 = vmatmul.mubr.msk.f32.vlgmr.msra.gmra.mxu0 %vm2967_vm13, %v3112_v31  ;;  %8297 = vmatmul.mubr.msk.f32.vlgmr.msra.gmra.mxu1 %vm2967_vm13, %v3040_v8 }
0x1365   : >> { %8300 = vmatpush3.msk.msra.mxu0 %vm2970_vm0, %v2966_v30  ;;  %v8288_v12 = vpop.f32.mrf.mxu1  ;;  %8301 = vmatprep.mubr.msk.f32.mxu0 %vm8626_vm2, %v8625_v5  ;;  %v8283_v35 = vpop.f32.mrf.mxu0 }
0x1366   : >> { %8305 = vmatpush3.msk.msra.mxu1 %vm2970_vm0, %v8875_v53  ;;  %8306 = vmatprep.mubr.msk.f32.mxu1 %vm8626_vm2, %v8625_v5  ;;  %v3472_v12 = vld [vmem:[#allocation4 + $0x8] sm:$0x1]  ;;  %vm10086_vm2 = vcmask (%p555_p4), 131072  }
0x1367   : >> { %8309 = vmatprep.subr.msk.mxu0 %vm643_vm9, %v3472_v12  ;;  %8316 = vmatprep.subr.msk.mxu1 %vm643_vm9, %v3472_v12 }
0x1368   : >> { %8302 = vmatmul.mubr.msk.f32.vlgmr.msra.gmra.mxu0 %vm2967_vm13, %v9005_v4 }
0x1369   : >> { %8313 = vmatprep.mubr.msk.f32.mxu0 %vm1263_vm8, %v8801_v28  ;;  %8310 = vmatpush3.msk.msra.mxu0 %vm643_vm9, %v3472_v12 }
0x1424   : >> { %v3187_v60 = vpop.f32.mrf.mxu0  ;;  %v3262_v36 = vpop.f32.mrf.mxu1 }
0x1425   : >> { %v3263_v6 = vadd.f32 %v3262_v36, %v3187_v60 }
0x1426   : >> { %v8293_v62 = vpop.f32.mrf.mxu0  ;;  %v8298_v2 = vpop.f32.mrf.mxu1 }
0x1428   : >> { %v3334_v44 = vpop.f32.mrf.mxu0 }
0x1429   : >> { %8307 = vmatmul.mubr.msk.f32.vlgmr.msra.gmra.mxu1 %vm2967_vm13, %v3334_v44 }
0x142a   : >> { %v8303_v46 = vpop.f32.mrf.mxu0  ;;  %8320 = vmatprep.mubr.msk.f32.mxu1 %vm1263_vm8, %v8994_v9  ;;  %8317 = vmatpush3.msk.msra.mxu1 %vm643_vm9, %v3472_v12 }
0x14e9   : >> { %v3407_v37 = vpop.f32.mrf.mxu1 }
0x14ea   : >> { %v3411_v5 = vadd.f32 %v3407_v37, %v3263_v6 }
0x14eb   : >> { %v8308_v40 = vpop.f32.mrf.mxu1 }
0x14ec   : >> { %v3414_v42 = vrot.slane %v3411_v5, 7 }
0x14ee   : >> { %3415 = vrot.lane.b32.xlu0 %v3414_v42, %s8624_s13 }
0x1560   : >> { %v3416_v47 = vpop.permute.xlu0 %3415 }
0x1561   : >> { %v3418_v38 = vadd.f32 %v3416_v47, %v9286_v23 }
0x1563   : >> { %3419 = vst.msk [vmem:[#allocation4] sm:$0xfe] %vm1319_vm1, %v3418_v38 }
0x156a   : >> { %v3420_v52 = vld [vmem:[#allocation4] sm:$0xff] }
0x156b   : >> { %v3423_v57 = vmul.f32 -0.33333334, %v3420_v52  ;;  %v3436_v1 = vmul.f32 2.6666667, %v3420_v52 }
0x156d   : >> { %3429 = vrot.lane.b32.xlu0 %v3423_v57, %s8622_s11  ;;  %3425 = vrot.lane.b32.xlu1 %v3423_v57, %s8623_s12  ;;  %v3438_v19 = vrot.slane %v3436_v1, 1  ;;  %v3433_v61 = vrot.slane %v3423_v57, 1  ;;  %v3449_v49 = vrot.slane %v3423_v57, 2 }
0x156f   : >> { %v3451_v23 = vsel %vm494_vm7, %v3449_v49, %v3450_v0 }
0x1571   : >> { %3439 = vrot.lane.b32.xlu1 %v3438_v19, %s8623_s12  ;;  %3443 = vrot.lane.b32.xlu0 %v3433_v61, %s8622_s11 }
0x1575   : >> { %3454 = vrot.lane.b32.xlu1 %v3451_v23, %s8623_s12  ;;  %3458 = vrot.lane.b32.xlu0 %v3451_v23, %s8622_s11 }
0x15df   : >> { %v3426_v63 = vpop.permute.xlu1 %3425  ;;  %v3430_v54 = vpop.permute.xlu0 %3429 }
0x15e0   : >> { %v3428_v17 = vadd.f32 %v3426_v63, %v3423_v57 }
0x15e2   : >> { %v3432_v14 = vadd.f32 %v3430_v54, %v3428_v17 }
0x15e3   : >> { %v3440_v18 = vpop.permute.xlu1 %3439  ;;  %v3444_v16 = vpop.permute.xlu0 %3443 }
0x15e4   : >> { %v3435_v3 = vadd.f32 %v3433_v61, %v3432_v14  ;;  %v3967_v14 = vld [vmem:[#allocation2] sm:$0xff] }
0x15e6   : >> { %v3442_v24 = vadd.f32 %v3440_v18, %v3435_v3 }
0x15e7   : >> { %v3455_v8 = vpop.permute.xlu1 %3454  ;;  %v3459_v60 = vpop.permute.xlu0 %3458 }
0x15e8   : >> { %v3446_v30 = vadd.f32 %v3444_v16, %v3442_v24  ;;  %v3968_v24 = vld [vmem:[#allocation2 + $0x8] sm:$0xff] }
0x15ea   : >> { %v3453_v31 = vadd.f32 %v3451_v23, %v3446_v30 }
0x15ec   : >> { %v3457_v35 = vadd.f32 %v3455_v8, %v3453_v31 }
0x15ee   : >> { %v3461_v36 = vadd.f32 %v3459_v60, %v3457_v35 }
0x15f0   : >> { %v3463_v6 = vrot.slane %v3461_v36, 7 }
0x15f2   : >> { %3464 = vrot.lane.b32.xlu1 %v3463_v6, %s8624_s13 }
0x1664   : >> { %v3465_v62 = vpop.permute.xlu1 %3464 }
0x1665   : >> { %v3467_v2 = vsub.f32 %v9281_v20, %v3465_v62 }
0x1667   : >> { %v3468_v44 = vmul.f32 0.25, %v3467_v2  ;;  %v3986_v2 = vld [vmem:[#allocation2 + $0x10] sm:$0x1] }
0x1669   : >> { %v3469_v46 = vadd.f32 %v3468_v44, %v3420_v52 }
0x166b   : >> { %3470 = vst.msk [vmem:[#allocation4] sm:$0xfe] %vm1319_vm1, %v3469_v46 }
0x1672   : >> { %v3471_v37 = vld [vmem:[#allocation4] sm:$0xff] }
0x1673   : >> { %8311 = vmatprep.subr.mxu0 %v3471_v37  ;;  %8318 = vmatprep.subr.mxu1 %v3471_v37 }
0x1674   : >> { %8312 = vmatpush3.msra.mxu0 %v3471_v37  ;;  %8319 = vmatpush3.msra.mxu1 %v3471_v37 }
0x1675   : >> { %8314 = vmatmul.mubr.msk.f32.vlgmr.msra.gmra.mxu0 %vm1263_vm8, %v8804_v29  ;;  %8321 = vmatmul.mubr.msk.f32.vlgmr.msra.gmra.mxu1 %vm1263_vm8, %v8997_v10 }
0x1676   : >> { %8323 = vmatprep.subr.msk.mxu0 %vm643_vm9, %v9001_v33  ;;  %8330 = vmatprep.subr.msk.mxu1 %vm643_vm9, %v8894_v58 }
0x1677   : >> { %8324 = vmatpush3.msk.msra.mxu0 %vm643_vm9, %v9001_v33  ;;  %8331 = vmatpush3.msk.msra.mxu1 %vm643_vm9, %v8894_v58 }
0x1678   : >> { %8325 = vmatprep.subr.mxu0 %v8999_v32  ;;  %8332 = vmatprep.subr.mxu1 %v8875_v53 }
0x1679   : >> { %8326 = vmatpush3.msra.mxu0 %v8999_v32  ;;  %8333 = vmatpush3.msra.mxu1 %v8875_v53 }
0x167a   : >> { %8337 = vmatprep.subr.msk.mxu0 %vm643_vm9, %v3472_v12  ;;  %8344 = vmatprep.subr.msk.mxu1 %vm643_vm9, %v8894_v58 }
0x1735   : >> { %v8315_v20 = vpop.f32.mrf.mxu0  ;;  %v8322_v5 = vpop.f32.mrf.mxu1 }
0x1737   : >> { %v3547_v40 = vpop.f32.mrf.mxu0  ;;  %v3627_v42 = vpop.f32.mrf.mxu1 }
0x1738   : >> { %8327 = vmatprep.mubr.msk.f32.mxu0 %vm1263_vm8, %v3627_v42  ;;  %8334 = vmatprep.mubr.msk.f32.mxu1 %vm1263_vm8, %v3547_v40 }
0x1739   : >> { %8328 = vmatmul.mubr.msk.f32.vlgmr.msra.gmra.mxu0 %vm1263_vm8, %v8322_v5  ;;  %8335 = vmatmul.mubr.msk.f32.vlgmr.msra.gmra.mxu1 %vm1263_vm8, %v8315_v20  ;;  %v4039_v20 = vmul.f32 -0.33333334, %v3986_v2 }
0x173a   : >> { %8338 = vmatpush3.msk.msra.mxu0 %vm643_vm9, %v3472_v12  ;;  %8341 = vmatprep.mubr.msk.f32.mxu0 %vm1263_vm8, %v9005_v4 }
0x173b   : >> { %8339 = vmatprep.subr.mxu0 %v3471_v37  ;;  %8345 = vmatpush3.msk.msra.mxu1 %vm643_vm9, %v8894_v58 }
0x173c   : >> { %8340 = vmatpush3.msra.mxu0 %v3471_v37  ;;  %8346 = vmatprep.subr.mxu1 %v8875_v53 }
0x173d   : >> { %8342 = vmatmul.mubr.msk.f32.vlgmr.msra.gmra.mxu0 %vm1263_vm8, %v9008_v7  ;;  %8347 = vmatpush3.msra.mxu1 %v8875_v53 }
0x17f9   : >> { %v8329_v47 = vpop.f32.mrf.mxu0  ;;  %v8336_v57 = vpop.f32.mrf.mxu1 }
0x17fa   : >> { %v3801_v59 = vadd.f32 %v8336_v57, %v8329_v47  ;;  %v4044_v47 = vrot.slane %v4039_v20, 2 }
0x17fb   : >> { %v3711_v38 = vpop.f32.mrf.mxu0  ;;  %v3795_v1 = vpop.f32.mrf.mxu1 }
0x17fc   : >> { %v3796_v61 = vadd.f32 %v3795_v1, %v3711_v38 }
0x17fd   : >> { %v8343_v48 = vpop.f32.mrf.mxu0 }
0x17ff   : >> { %v3875_v52 = vpop.f32.mrf.mxu0 }
0x1800   : >> { %8348 = vmatprep.mubr.msk.f32.mxu1 %vm1263_vm8, %v3875_v52 }
0x1801   : >> { %8349 = vmatmul.mubr.msk.f32.vlgmr.msra.gmra.mxu1 %vm1263_vm8, %v8343_v48 }
0x18c1   : >> { %v8350_v19 = vpop.f32.mrf.mxu1 }
0x18c2   : >> { %v3966_v49 = vadd.f32 %v8350_v19, %v3801_v59 }
0x18c3   : >> { %v3956_v0 = vpop.f32.mrf.mxu1 }
0x18c4   : >> { %v3965_v23 = vadd.f32 %v3956_v0, %v3796_v61  ;;  %v3972_v63 = vrot.slane %v3966_v49, 7 }
0x18c6   : >> { %v3971_v17 = vrot.slane %v3965_v23, 7 }
0x18c8   : >> { %3974 = vrot.lane.b32.xlu0 %v3971_v17, %s8624_s13  ;;  %v3973_v54 = vsel %vm643_vm9, %v3971_v17, %v3972_v63 }
0x18c9   : >> { %3976 = vrot.lane.b32.xlu1 %v3973_v54, %s8624_s13 }
0x193a   : >> { %v3975_v3 = vpop.permute.xlu0 %3974 }
0x193b   : >> { %v3980_v18 = vadd.f32 %v3975_v3, %v3967_v14  ;;  %v3977_v16 = vpop.permute.xlu1 %3976 }
0x193c   : >> { %v3981_v30 = vadd.f32 %v3977_v16, %v3968_v24 }
0x193d   : >> { %3982 = vst.msk [vmem:[#allocation2] sm:$0xfe] %vm550_vm3, %v3980_v18 }
0x193e   : >> { %3983 = vst.msk [vmem:[#allocation2 + $0x8] sm:$0xff] %vm535_vm15, %v3981_v30 }
0x1944   : >> { %v9550_v31 = vld [vmem:[#allocation2] sm:$0xff] }
0x1945   : >> { %v3989_v8 = vmul.f32 -0.33333334, %v9550_v31  ;;  %v9553_v12 = vld [vmem:[#allocation2 + $0x8] sm:$0xff]  ;;  %v4016_v60 = vmul.f32 2.6666667, %v9550_v31 }
0x1946   : >> { %v3990_v35 = vmul.f32 -0.33333334, %v9553_v12  ;;  %v4017_v36 = vmul.f32 2.6666667, %v9553_v12 }
0x1947   : >> { %3993 = vrot.lane.b32.xlu0 %v3989_v8, %s8623_s12  ;;  %v4020_v6 = vrot.slane %v4016_v60, 1  ;;  %v4009_v46 = vrot.slane %v3989_v8, 1  ;;  %v4041_v40 = vrot.slane %v3989_v8, 2 }
0x1948   : >> { %3995 = vrot.lane.b32.xlu1 %v3990_v35, %s8623_s12  ;;  %v4021_v62 = vrot.slane %v4017_v36, 1  ;;  %v4010_v37 = vrot.slane %v3990_v35, 1  ;;  %v4042_v42 = vrot.slane %v3990_v35, 2 }
0x194a   : >> { %v4022_v44 = vsel %vm461_vm4, %v4020_v6, %v4021_v62  ;;  %v4011_v5 = vsel %vm461_vm4, %v4009_v46, %v4010_v37  ;;  %v4043_v38 = vsel %vm494_vm7, %v4041_v40, %v4042_v42  ;;  %v4045_v48 = vsel %vm494_vm7, %v4042_v42, %v4044_v47  ;;  %v3987_v42 = vld [vmem:[#allocation3] sm:$0xff] }
0x194b   : >> { %4001 = vrot.lane.b32.xlu0 %v3989_v8, %s8622_s11 }
0x194c   : >> { %4003 = vrot.lane.b32.xlu1 %v3990_v35, %s8622_s11 }
0x194f   : >> { %4023 = vrot.lane.b32.xlu0 %v4022_v44, %s8623_s12 }
0x1950   : >> { %4025 = vrot.lane.b32.xlu1 %v4021_v62, %s8623_s12 }
0x1953   : >> { %4031 = vrot.lane.b32.xlu0 %v4011_v5, %s8622_s11 }
0x1954   : >> { %4033 = vrot.lane.b32.xlu1 %v4010_v37, %s8622_s11 }
0x1957   : >> { %4050 = vrot.lane.b32.xlu0 %v4043_v38, %s8623_s12 }
0x1958   : >> { %4052 = vrot.lane.b32.xlu1 %v4045_v48, %s8623_s12 }
0x195b   : >> { %4058 = vrot.lane.b32.xlu0 %v4043_v38, %s8622_s11 }
0x195c   : >> { %4060 = vrot.lane.b32.xlu1 %v4045_v48, %s8622_s11 }
0x19b9   : >> { %v3994_v52 = vpop.permute.xlu0 %3993 }
0x19ba   : >> { %v3996_v57 = vpop.permute.xlu1 %3995  ;;  %v3999_v1 = vadd.f32 %v3994_v52, %v3989_v8 }
0x19bb   : >> { %v4000_v59 = vadd.f32 %v3996_v57, %v3990_v35 }
0x19bd   : >> { %v4002_v19 = vpop.permute.xlu0 %4001 }
0x19be   : >> { %v4007_v61 = vadd.f32 %v4002_v19, %v3999_v1  ;;  %v4004_v49 = vpop.permute.xlu1 %4003 }
0x19bf   : >> { %v4008_v0 = vadd.f32 %v4004_v49, %v4000_v59 }
0x19c0   : >> { %v4014_v23 = vadd.f32 %v4011_v5, %v4007_v61 }
0x19c1   : >> { %v4024_v63 = vpop.permute.xlu0 %4023  ;;  %v4015_v17 = vadd.f32 %v4010_v37, %v4008_v0 }
0x19c2   : >> { %v4026_v54 = vpop.permute.xlu1 %4025  ;;  %v4029_v14 = vadd.f32 %v4024_v63, %v4014_v23  ;;  %v4087_v23 = vld [vmem:[#allocation2 + $0x10] sm:$0x1] (%p555_p4) }
0x19c3   : >> { %v4030_v3 = vadd.f32 %v4026_v54, %v4015_v17  ;;  %4090 = vst.msk [vmem:[%s8704_s23 + $0x10] sm:$0x1] (%p555_p4), %vm10086_vm2, %v4087_v23 }
0x19c5   : >> { %v4032_v18 = vpop.permute.xlu0 %4031 }
0x19c6   : >> { %v4037_v24 = vadd.f32 %v4032_v18, %v4029_v14  ;;  %v4034_v16 = vpop.permute.xlu1 %4033 }
0x19c7   : >> { %v4038_v30 = vadd.f32 %v4034_v16, %v4030_v3 }
0x19c8   : >> { %v4048_v60 = vadd.f32 %v4043_v38, %v4037_v24  ;;  %v3988_v38 = vld [vmem:[#allocation3 + $0x8] sm:$0xff] }
0x19c9   : >> { %v4051_v36 = vpop.permute.xlu0 %4050  ;;  %v4049_v6 = vadd.f32 %v4045_v48, %v4038_v30 }
0x19ca   : >> { %v4053_v62 = vpop.permute.xlu1 %4052  ;;  %v4056_v8 = vadd.f32 %v4051_v36, %v4048_v60 }
0x19cb   : >> { %v4057_v35 = vadd.f32 %v4053_v62, %v4049_v6 }
0x19cd   : >> { %v4059_v2 = vpop.permute.xlu0 %4058 }
0x19ce   : >> { %v4064_v44 = vadd.f32 %v4059_v2, %v4056_v8  ;;  %v4061_v46 = vpop.permute.xlu1 %4060 }
0x19cf   : >> { %v4065_v20 = vadd.f32 %v4061_v46, %v4057_v35 }
0x19d0   : >> { %v4068_v5 = vrot.slane %v4064_v44, 7 }
0x19d1   : >> { %v4069_v40 = vrot.slane %v4065_v20, 7 }
0x19d2   : >> { %4071 = vrot.lane.b32.xlu0 %v4068_v5, %s8624_s13 }
0x19d3   : >> { %v4070_v37 = vsel %vm643_vm9, %v4068_v5, %v4069_v40 }
0x19d4   : >> { %4073 = vrot.lane.b32.xlu1 %v4070_v37, %s8624_s13 }
0x1a44   : >> { %v4072_v47 = vpop.permute.xlu0 %4071 }
0x1a45   : >> { %v4077_v52 = vsub.f32 %v3987_v42, %v4072_v47 }
0x1a46   : >> { %v4074_v48 = vpop.permute.xlu1 %4073 }
0x1a47   : >> { %v4079_v57 = vmul.f32 0.25, %v4077_v52  ;;  %v4078_v1 = vsub.f32 %v3988_v38, %v4074_v48 }
0x1a49   : >> { %v4081_v59 = vadd.f32 %v4079_v57, %v9550_v31  ;;  %v4080_v19 = vmul.f32 0.25, %v4078_v1  ;;  %557 = sbr.rel (!%p555_p4) target bundleno = 308 (0x134), region = 99 }
0x1a4b   : >> { %4083 = vst.msk [vmem:[#allocation2] sm:$0xfe] %vm550_vm3, %v4081_v59  ;;  %v4082_v61 = vadd.f32 %v4080_v19, %v9553_v12 }
0x1a4d   : >> { %4084 = vst.msk [vmem:[#allocation2 + $0x8] sm:$0xff] %vm535_vm15, %v4082_v61 }
0x1a52   : > { %v4085_v49 = vld [vmem:[#allocation2] sm:$0xff] }
0x1a53   : > { %4088 = vst.msk [vmem:[%s8704_s23] sm:$0xff] %vm432_vm6, %v4085_v49 }
0x1a54   : > { %v4086_v0 = vld [vmem:[#allocation2 + $0x8] sm:$0xff] }
0x1a55   : > { %4089 = vst.msk [vmem:[%s8704_s23 + $0x8] sm:$0xff] %vm432_vm6, %v4086_v0 }
0x1a56 LB: >> { %v9595_v31 = vld [vmem:[#allocation2] sm:$0xff]  ;;  %v9597_v12 = vld [vmem:[#allocation2 + $0x8] sm:$0xff]  ;;  %vm10087_vm14 = vcmask 121856   ;;  %s8627_s16 = smov 126   ;;  %s8628_s17 = smov 127   ;;  %vm10088_vm12 = vcmask 65536   ;;  %s8616_s14 = sphi %s9590_s14, %s4096_s14  }
0x1a57   : >> { %8355 = vmatprep.mubr.msk.f32.mxu0 %vm10087_vm14, %v8756_v22  ;;  %8362 = vmatprep.mubr.msk.f32.mxu1 %vm10087_vm14, %v8925_v11  ;;  %v4102_v63 = vmul.f32 -0.33333334, %v9595_v31  ;;  %v4130_v17 = vmul.f32 2.6666667, %v9597_v12  ;;  %v4129_v54 = vmul.f32 2.6666667, %v9595_v31 }
0x1a58   : >> { %v4103_v14 = vmul.f32 -0.33333334, %v9597_v12  ;;  %v4099_v24 = vld [vmem:[#allocation2 + $0x10] sm:$0x1]  ;;  %s8629_s18 = smov 1   ;;  %vm10089_vm2 = vcmask 36864  }
0x1a59   : >> { %4114 = vrot.lane.b32.xlu1 %v4102_v63, %s8627_s16  ;;  %4106 = vrot.lane.b32.xlu0 %v4102_v63, %s8628_s17  ;;  %v4134_v3 = vrot.slane %v4130_v17, 1  ;;  %v4133_v18 = vrot.slane %v4129_v54, 1  ;;  %v4122_v60 = vrot.slane %v4102_v63, 1  ;;  %v4152_v36 = vmul.f32 -0.33333334, %v4099_v24  ;;  %s4096_s14 = sadd.s32 1, %s8616_s14  }
0x1a5a   : >> { %v4123_v30 = vrot.slane %v4103_v14, 1  ;;  %v4155_v62 = vrot.slane %v4103_v14, 2  ;;  %v4154_v35 = vrot.slane %v4102_v63, 2  ;;  %vm10090_vm11 = vcmask 18432   ;;  %p4093_p5 = scmp.ge.s32.totalorder %s4096_s14, 4  }
0x1a5b   : >> { %v4135_v16 = vsel %vm461_vm4, %v4133_v18, %v4134_v3  ;;  %v4157_v8 = vrot.slane %v4152_v36, 2 }
0x1a5c   : >> { %v4124_v6 = vsel %vm461_vm4, %v4122_v60, %v4123_v30  ;;  %v4156_v44 = vsel %vm494_vm7, %v4154_v35, %v4155_v62  ;;  %v9628_v35 = vld [vmem:[#allocation3 + $0x8] sm:$0xff] }
0x1a5d   : >> { %4116 = vrot.lane.b32.xlu1 %v4103_v14, %s8627_s16  ;;  %4108 = vrot.lane.b32.xlu0 %v4103_v14, %s8628_s17  ;;  %v4158_v2 = vsel %vm494_vm7, %v4155_v62, %v4157_v8 }
0x1a61   : >> { %4138 = vrot.lane.b32.xlu1 %v4134_v3, %s8628_s17  ;;  %4136 = vrot.lane.b32.xlu0 %v4135_v16, %s8628_s17 }
0x1a65   : >> { %4146 = vrot.lane.b32.xlu1 %v4123_v30, %s8627_s16  ;;  %4144 = vrot.lane.b32.xlu0 %v4124_v6, %s8627_s16 }
0x1a69   : >> { %4165 = vrot.lane.b32.xlu1 %v4158_v2, %s8628_s17  ;;  %4163 = vrot.lane.b32.xlu0 %v4156_v44, %s8628_s17 }
0x1a6d   : >> { %4173 = vrot.lane.b32.xlu1 %v4158_v2, %s8627_s16  ;;  %4171 = vrot.lane.b32.xlu0 %v4156_v44, %s8627_s16 }
0x1acb   : >> { %v4115_v46 = vpop.permute.xlu1 %4114  ;;  %v4107_v20 = vpop.permute.xlu0 %4106 }
0x1acc   : >> { %v4112_v5 = vadd.f32 %v4107_v20, %v4102_v63 }
0x1ace   : >> { %v4120_v42 = vadd.f32 %v4115_v46, %v4112_v5 }
0x1acf   : >> { %v4117_v40 = vpop.permute.xlu1 %4116  ;;  %v4109_v37 = vpop.permute.xlu0 %4108 }
0x1ad0   : >> { %v4113_v47 = vadd.f32 %v4109_v37, %v4103_v14  ;;  %v4127_v1 = vadd.f32 %v4124_v6, %v4120_v42  ;;  %v9626_v6 = vld [vmem:[#allocation3] sm:$0xff] }
0x1ad2   : >> { %v4121_v38 = vadd.f32 %v4117_v40, %v4113_v47 }
0x1ad3   : >> { %v4139_v52 = vpop.permute.xlu1 %4138  ;;  %v4137_v48 = vpop.permute.xlu0 %4136 }
0x1ad4   : >> { %v4128_v57 = vadd.f32 %v4123_v30, %v4121_v38  ;;  %v4142_v19 = vadd.f32 %v4137_v48, %v4127_v1 }
0x1ad6   : >> { %v4143_v59 = vadd.f32 %v4139_v52, %v4128_v57 }
0x1ad7   : >> { %v4147_v61 = vpop.permute.xlu1 %4146  ;;  %v4145_v49 = vpop.permute.xlu0 %4144 }
0x1ad8   : >> { %v4151_v0 = vadd.f32 %v4147_v61, %v4143_v59  ;;  %v4150_v23 = vadd.f32 %v4145_v49, %v4142_v19 }
0x1ada   : >> { %v4162_v17 = vadd.f32 %v4158_v2, %v4151_v0  ;;  %v4161_v54 = vadd.f32 %v4156_v44, %v4150_v23 }
0x1adb   : >> { %v4166_v3 = vpop.permute.xlu1 %4165  ;;  %v4164_v18 = vpop.permute.xlu0 %4163 }
0x1adc   : >> { %v4170_v63 = vadd.f32 %v4166_v3, %v4162_v17  ;;  %v4169_v24 = vadd.f32 %v4164_v18, %v4161_v54 }
0x1adf   : >> { %v4174_v16 = vpop.permute.xlu1 %4173  ;;  %v4172_v60 = vpop.permute.xlu0 %4171 }
0x1ae0   : >> { %v4178_v14 = vadd.f32 %v4174_v16, %v4170_v63  ;;  %v4177_v36 = vadd.f32 %v4172_v60, %v4169_v24 }
0x1ae2   : >> { %v4183_v62 = vrot.slane %v4178_v14, 7  ;;  %v4182_v8 = vrot.slane %v4177_v36, 7 }
0x1ae4   : >> { %4185 = vrot.lane.b32.xlu0 %v4182_v8, %s8629_s18  ;;  %v4184_v30 = vsel %vm643_vm9, %v4182_v8, %v4183_v62 }
0x1ae5   : >> { %4187 = vrot.lane.b32.xlu1 %v4184_v30, %s8629_s18 }
0x1b56   : >> { %v4186_v2 = vpop.permute.xlu0 %4185 }
0x1b57   : >> { %v4191_v44 = vsub.f32 %v9626_v6, %v4186_v2  ;;  %v4188_v46 = vpop.permute.xlu1 %4187 }
0x1b58   : >> { %v4192_v20 = vsub.f32 %v9628_v35, %v4188_v46 }
0x1b59   : >> { %v4193_v5 = vmul.f32 0.25, %v4191_v44 }
0x1b5a   : >> { %v4194_v40 = vmul.f32 0.25, %v4192_v20 }
0x1b5b   : >> { %v4195_v37 = vadd.f32 %v4193_v5, %v9595_v31  ;;  %v4201_v31 = vld [vmem:[#allocation2 + $0x10] sm:$0x1] }
0x1b5c   : >> { %v4196_v42 = vadd.f32 %v4194_v40, %v9597_v12  ;;  %v4254_v0 = vmul.f32 -0.33333334, %v4201_v31 }
0x1b5d   : >> { %4197 = vst.msk [vmem:[#allocation2] sm:$0xfe] %vm550_vm3, %v4195_v37 }
0x1b5e   : >> { %4198 = vst.msk [vmem:[#allocation2 + $0x8] sm:$0xff] %vm535_vm15, %v4196_v42  ;;  %v4259_v3 = vrot.slane %v4254_v0, 2 }
0x1b64   : >> { %v4199_v47 = vld [vmem:[#allocation2] sm:$0xff] }
0x1b65   : >> { %v4204_v38 = vmul.f32 -0.33333334, %v4199_v47  ;;  %v4200_v52 = vld [vmem:[#allocation2 + $0x8] sm:$0xff]  ;;  %v4231_v57 = vmul.f32 2.6666667, %v4199_v47 }
0x1b66   : >> { %v4205_v48 = vmul.f32 -0.33333334, %v4200_v52  ;;  %v4232_v1 = vmul.f32 2.6666667, %v4200_v52 }
0x1b67   : >> { %4208 = vrot.lane.b32.xlu0 %v4204_v38, %s8628_s17  ;;  %v4235_v59 = vrot.slane %v4231_v57, 1  ;;  %v4224_v61 = vrot.slane %v4204_v38, 1  ;;  %v4256_v17 = vrot.slane %v4204_v38, 2 }
0x1b68   : >> { %4210 = vrot.lane.b32.xlu1 %v4205_v48, %s8628_s17  ;;  %v4236_v19 = vrot.slane %v4232_v1, 1  ;;  %v4225_v49 = vrot.slane %v4205_v48, 1  ;;  %v4257_v54 = vrot.slane %v4205_v48, 2 }
0x1b6a   : >> { %v4237_v12 = vsel %vm461_vm4, %v4235_v59, %v4236_v19  ;;  %v4226_v23 = vsel %vm461_vm4, %v4224_v61, %v4225_v49  ;;  %v4258_v18 = vsel %vm494_vm7, %v4256_v17, %v4257_v54  ;;  %v4260_v63 = vsel %vm494_vm7, %v4257_v54, %v4259_v3 }
0x1b6b   : >> { %4216 = vrot.lane.b32.xlu0 %v4204_v38, %s8627_s16  ;;  %v8630_v54 = vmov 0.0  }
0x1b6c   : >> { %4218 = vrot.lane.b32.xlu1 %v4205_v48, %s8627_s16  ;;  %4805 = vst.msk [vmem:[#allocation4] sm:$0xff] %vm1263_vm8, %v8630_v54 }
0x1b6d   : >> { %4806 = vst.msk [vmem:[#allocation4 + $0x8] sm:$0x1] %vm10088_vm12, %v8630_v54  ;;  %vm10091_vm12 = vcmask 56320  }
0x1b6e   : >> { %5361 = vst.msk [vmem:[#allocation6] sm:$0x1f] %vm10089_vm2, %v8630_v54  ;;  %vm8631_vm2 = vmmov 0  }
0x1b6f   : >> { %4238 = vrot.lane.b32.xlu0 %v4237_v12, %s8628_s17  ;;  %5907 = vst.msk [vmem:[#allocation8] sm:$0x7] %vm10090_vm11, %v8630_v54 }
0x1b70   : >> { %4240 = vrot.lane.b32.xlu1 %v4236_v19, %s8628_s17 }
0x1b73   : >> { %4246 = vrot.lane.b32.xlu0 %v4226_v23, %s8627_s16 }
0x1b74   : >> { %4248 = vrot.lane.b32.xlu1 %v4225_v49, %s8627_s16 }
0x1b77   : >> { %4265 = vrot.lane.b32.xlu0 %v4258_v18, %s8628_s17 }
0x1b78   : >> { %4267 = vrot.lane.b32.xlu1 %v4260_v63, %s8628_s17 }
0x1b7b   : >> { %4273 = vrot.lane.b32.xlu0 %v4258_v18, %s8627_s16 }
0x1b7c   : >> { %4275 = vrot.lane.b32.xlu1 %v4260_v63, %s8627_s16 }
0x1bd9   : >> { %v4209_v24 = vpop.permute.xlu0 %4208 }
0x1bda   : >> { %v4211_v16 = vpop.permute.xlu1 %4210  ;;  %v4214_v60 = vadd.f32 %v4209_v24, %v4204_v38 }
0x1bdb   : >> { %v4215_v14 = vadd.f32 %v4211_v16, %v4205_v48 }
0x1bdd   : >> { %v4217_v36 = vpop.permute.xlu0 %4216 }
0x1bde   : >> { %v4222_v62 = vadd.f32 %v4217_v36, %v4214_v60  ;;  %v4219_v8 = vpop.permute.xlu1 %4218 }
0x1bdf   : >> { %v4223_v30 = vadd.f32 %v4219_v8, %v4215_v14 }
0x1be0   : >> { %v4229_v2 = vadd.f32 %v4226_v23, %v4222_v62 }
0x1be1   : >> { %v4239_v44 = vpop.permute.xlu0 %4238  ;;  %v4230_v46 = vadd.f32 %v4225_v49, %v4223_v30 }
0x1be2   : >> { %v4241_v20 = vpop.permute.xlu1 %4240  ;;  %v4244_v5 = vadd.f32 %v4239_v44, %v4229_v2 }
0x1be3   : >> { %v4245_v40 = vadd.f32 %v4241_v20, %v4230_v46 }
0x1be5   : >> { %v4247_v37 = vpop.permute.xlu0 %4246 }
0x1be6   : >> { %v4252_v42 = vadd.f32 %v4247_v37, %v4244_v5  ;;  %v4249_v47 = vpop.permute.xlu1 %4248 }
0x1be7   : >> { %v4253_v52 = vadd.f32 %v4249_v47, %v4245_v40 }
0x1be8   : >> { %v4263_v57 = vadd.f32 %v4258_v18, %v4252_v42 }
0x1be9   : >> { %v4266_v1 = vpop.permute.xlu0 %4265  ;;  %v4264_v59 = vadd.f32 %v4260_v63, %v4253_v52 }
0x1bea   : >> { %v4268_v19 = vpop.permute.xlu1 %4267  ;;  %v4271_v38 = vadd.f32 %v4266_v1, %v4263_v57 }
0x1beb   : >> { %v4272_v48 = vadd.f32 %v4268_v19, %v4264_v59 }
0x1bed   : >> { %v4274_v31 = vpop.permute.xlu0 %4273 }
0x1bee   : >> { %v4279_v12 = vadd.f32 %v4274_v31, %v4271_v38  ;;  %v4276_v61 = vpop.permute.xlu1 %4275 }
0x1bef   : >> { %v4280_v0 = vadd.f32 %v4276_v61, %v4272_v48 }
0x1bf0   : >> { %v4283_v23 = vrot.slane %v4279_v12, 7 }
0x1bf1   : >> { %v4284_v17 = vrot.slane %v4280_v0, 7 }
0x1bf2   : >> { %4286 = vrot.lane.b32.xlu1 %v4283_v23, %s8629_s18 }
0x1bf3   : >> { %v4285_v49 = vsel %vm643_vm9, %v4283_v23, %v4284_v17 }
0x1bf4   : >> { %4288 = vrot.lane.b32.xlu0 %v4285_v49, %s8629_s18 }
0x1c64   : >> { %v4287_v3 = vpop.permute.xlu1 %4286 }
0x1c65   : >> { %v4292_v18 = vsub.f32 %v9626_v6, %v4287_v3  ;;  %v9689_v6 = vld [vmem:[#allocation4] sm:$0xff] }
0x1c66   : >> { %v4289_v63 = vpop.permute.xlu0 %4288  ;;  %v4810_v8 = vmul.f32 -0.33333334, %v9689_v6  ;;  %v4823_v30 = vmul.f32 2.6666667, %v9689_v6 }
0x1c67   : >> { %v4293_v24 = vsub.f32 %v9628_v35, %v4289_v63  ;;  %v4296_v16 = vrot.slane %v4292_v18, 1  ;;  %v4808_v35 = vld [vmem:[#allocation4 + $0x8] sm:$0x1] }
0x1c68   : >> { %v4834_v2 = vmul.f32 -0.33333334, %v4808_v35  ;;  %v4825_v44 = vrot.slane %v4823_v30, 1  ;;  %v4820_v46 = vrot.slane %v4810_v8, 1  ;;  %v4836_v20 = vrot.slane %v4810_v8, 2 }
0x1c69   : >> { %v4297_v60 = vrot.slane %v4293_v24, 1 }
0x1c6a   : >> { %v4837_v5 = vrot.slane %v4834_v2, 2 }
0x1c6b   : >> { %4301 = vrot.lane.b32.xlu0 %v4297_v60, %s8628_s17  ;;  %v4298_v14 = vsel %vm461_vm4, %v4296_v16, %v4297_v60 }
0x1c6c   : >> { %4299 = vrot.lane.b32.xlu1 %v4298_v14, %s8628_s17  ;;  %v4838_v40 = vsel %vm494_vm7, %v4836_v20, %v4837_v5 }
0x1c6f   : >> { %4812 = vrot.lane.b32.xlu0 %v4810_v8, %s8628_s17 }
0x1c70   : >> { %4816 = vrot.lane.b32.xlu1 %v4810_v8, %s8627_s16 }
0x1c73   : >> { %4826 = vrot.lane.b32.xlu0 %v4825_v44, %s8628_s17 }
0x1c74   : >> { %4830 = vrot.lane.b32.xlu1 %v4820_v46, %s8627_s16 }
0x1c77   : >> { %4841 = vrot.lane.b32.xlu0 %v4838_v40, %s8628_s17 }
0x1c78   : >> { %4845 = vrot.lane.b32.xlu1 %v4838_v40, %s8627_s16 }
0x1cdd   : >> { %v4302_v36 = vpop.permute.xlu0 %4301 }
0x1cde   : >> { %8351 = vmatprep.subr.msk.mxu0 %vm461_vm4, %v4302_v36  ;;  %8358 = vmatprep.subr.msk.mxu1 %vm461_vm4, %v4302_v36  ;;  %v4300_v62 = vpop.permute.xlu1 %4299 }
0x1cdf   : >> { %8352 = vmatpush3.msk.msra.mxu0 %vm461_vm4, %v4302_v36  ;;  %8359 = vmatpush3.msk.msra.mxu1 %vm461_vm4, %v4302_v36 }
0x1ce0   : >> { %8353 = vmatprep.subr.mxu0 %v4300_v62  ;;  %8360 = vmatprep.subr.mxu1 %v4300_v62 }
0x1ce1   : >> { %8354 = vmatpush3.msra.mxu0 %v4300_v62  ;;  %8361 = vmatpush3.msra.mxu1 %v4300_v62  ;;  %v4813_v57 = vpop.permute.xlu0 %4812 }
0x1ce2   : >> { %8356 = vmatmul.mubr.f32.vlgmr.msra.gmra.mxu0 %v8630_v54  ;;  %8363 = vmatmul.mubr.f32.vlgmr.msra.gmra.mxu1 %v8630_v54  ;;  %v4817_v1 = vpop.permute.xlu1 %4816  ;;  %v4815_v59 = vadd.f32 %v4813_v57, %v4810_v8 }
0x1ce3   : >> { %8365 = vmatprep.subr.msk.mxu0 %vm461_vm4, %v8929_v15  ;;  %8372 = vmatprep.subr.msk.mxu1 %vm461_vm4, %v8858_v45 }
0x1ce4   : >> { %8366 = vmatpush3.msk.msra.mxu0 %vm461_vm4, %v8929_v15  ;;  %8373 = vmatpush3.msk.msra.mxu1 %vm461_vm4, %v8858_v45  ;;  %v4819_v19 = vadd.f32 %v4817_v1, %v4815_v59 }
0x1ce5   : >> { %8367 = vmatprep.subr.mxu0 %v8927_v13  ;;  %8374 = vmatprep.subr.mxu1 %v8852_v43  ;;  %v4827_v38 = vpop.permute.xlu0 %4826 }
0x1ce6   : >> { %8368 = vmatpush3.msra.mxu0 %v8927_v13  ;;  %8375 = vmatpush3.msra.mxu1 %v8852_v43  ;;  %v4822_v48 = vadd.f32 %v4820_v46, %v4819_v19  ;;  %v4831_v31 = vpop.permute.xlu1 %4830 }
0x1ce7   : >> { %8379 = vmatprep.subr.msk.mxu0 %vm461_vm4, %v4302_v36  ;;  %8386 = vmatprep.subr.msk.mxu1 %vm461_vm4, %v8858_v45 }
0x1ce8   : >> { %v4829_v12 = vadd.f32 %v4827_v38, %v4822_v48 }
0x1ce9   : >> { %v4842_v0 = vpop.permute.xlu0 %4841 }
0x1cea   : >> { %v4833_v61 = vadd.f32 %v4831_v31, %v4829_v12  ;;  %v4846_v17 = vpop.permute.xlu1 %4845 }
0x1cec   : >> { %v4840_v23 = vadd.f32 %v4838_v40, %v4833_v61  ;;  %v4860_v40 = vld [vmem:[#allocation4 + $0x8] sm:$0x1] }
0x1cee   : >> { %v4844_v49 = vadd.f32 %v4842_v0, %v4840_v23 }
0x1cf0   : >> { %v4848_v3 = vadd.f32 %v4846_v17, %v4844_v49 }
0x1cf2   : >> { %v4850_v18 = vrot.slane %v4848_v3, 7 }
0x1cf4   : >> { %4851 = vrot.lane.b32.xlu0 %v4850_v18, %s8629_s18 }
0x1d66   : >> { %v4852_v2 = vpop.permute.xlu0 %4851 }
0x1da2   : >> { %v8357_v37 = vpop.f32.mrf.mxu0  ;;  %v8364_v42 = vpop.f32.mrf.mxu1 }
0x1da4   : >> { %v4379_v47 = vpop.f32.mrf.mxu0  ;;  %v4460_v52 = vpop.f32.mrf.mxu1 }
0x1da5   : >> { %8369 = vmatprep.mubr.msk.f32.mxu0 %vm10087_vm14, %v4460_v52  ;;  %8376 = vmatprep.mubr.msk.f32.mxu1 %vm10087_vm14, %v4379_v47  ;;  %v4886_v52 = vmul.f32 -0.33333334, %v4860_v40 }
0x1da6   : >> { %8370 = vmatmul.mubr.msk.f32.vlgmr.msra.gmra.mxu0 %vm10087_vm14, %v8364_v42  ;;  %8377 = vmatmul.mubr.msk.f32.vlgmr.msra.gmra.mxu1 %vm10087_vm14, %v8357_v37 }
0x1da7   : >> { %8380 = vmatpush3.msk.msra.mxu0 %vm461_vm4, %v4302_v36  ;;  %8383 = vmatprep.mubr.msk.f32.mxu0 %vm10087_vm14, %v9037_v41  ;;  %v4889_v19 = vrot.slane %v4886_v52, 2 }
0x1da8   : >> { %8381 = vmatprep.subr.mxu0 %v4300_v62  ;;  %8387 = vmatpush3.msk.msra.mxu1 %vm461_vm4, %v8858_v45 }
0x1da9   : >> { %8382 = vmatpush3.msra.mxu0 %v4300_v62  ;;  %8388 = vmatprep.subr.mxu1 %v8852_v43 }
0x1daa   : >> { %8384 = vmatmul.mubr.f32.vlgmr.msra.gmra.mxu0 %v8630_v54  ;;  %8389 = vmatpush3.msra.mxu1 %v8852_v43 }
0x1dab   : >> { %8393 = vmatprep.subr.mxu0 %v8630_v54  ;;  %8398 = vmatprep.subr.mxu1 %v8630_v54 }
0x1dac   : >> { %8395 = vmatprep.mubr.msk.f32.mxu0 %vm8631_vm2, %v8630_v54 }
0x1e66   : >> { %v8371_v63 = vpop.f32.mrf.mxu0  ;;  %v8378_v14 = vpop.f32.mrf.mxu1 }
0x1e68   : >> { %v4544_v24 = vpop.f32.mrf.mxu0  ;;  %v4628_v36 = vpop.f32.mrf.mxu1 }
0x1e69   : >> { %v4629_v35 = vadd.f32 %v4628_v36, %v4544_v24 }
0x1e6a   : >> { %v8385_v16 = vpop.f32.mrf.mxu0 }
0x1e6c   : >> { %v4709_v60 = vpop.f32.mrf.mxu0 }
0x1e6d   : >> { %8390 = vmatprep.mubr.msk.f32.mxu1 %vm10087_vm14, %v4709_v60 }
0x1e6e   : >> { %8391 = vmatmul.mubr.msk.f32.vlgmr.msra.gmra.mxu1 %vm10087_vm14, %v8385_v16  ;;  %vm10092_vm14 = vmmov %vm10091_vm12 }
0x1e6f   : >> { %8400 = vmatprep.mubr.msk.f32.mxu1 %vm8631_vm2, %v8630_v54 }
0x1f2e   : >> { %v8392_v62 = vpop.f32.mrf.mxu1 }
0x1f30   : >> { %v4790_v8 = vpop.f32.mrf.mxu1 }
0x1f31   : >> { %v4799_v30 = vadd.f32 %v4790_v8, %v4629_v35  ;;  %v5362_v8 = vld [vmem:[#allocation6] sm:$0x1f] }
0x1f33   : >> { %4802 = vst.msk [vmem:[#allocation5] sm:$0xff] %vm1263_vm8, %v4799_v30  ;;  %v5364_v30 = vmul.f32 -0.33333334, %v5362_v8 }
0x1f3a   : >> { %v9718_v44 = vld [vmem:[#allocation5] sm:$0xff] }
0x1f3b   : >> { %v4854_v46 = vsub.f32 %v9718_v44, %v4852_v2  ;;  %v5377_v2 = vmul.f32 2.6666667, %v5362_v8 }
0x1f3d   : >> { %v4855_v20 = vmul.f32 0.25, %v4854_v46  ;;  %v5379_v46 = vrot.slane %v5377_v2, 1 }
0x1f3f   : >> { %v4856_v5 = vadd.f32 %v4855_v20, %v9689_v6  ;;  %v5374_v20 = vrot.slane %v5364_v30, 1 }
0x1f41   : >> { %4858 = vst.msk [vmem:[#allocation4] sm:$0xfe] %vm1319_vm1, %v4856_v5  ;;  %v5388_v5 = vrot.slane %v5364_v30, 2 }
0x1f48   : >> { %v9723_v37 = vld [vmem:[#allocation4] sm:$0xff] }
0x1f49   : >> { %v4862_v42 = vmul.f32 -0.33333334, %v9723_v37  ;;  %v4875_v47 = vmul.f32 2.6666667, %v9723_v37 }
0x1f4b   : >> { %4868 = vrot.lane.b32.xlu0 %v4862_v42, %s8627_s16  ;;  %4864 = vrot.lane.b32.xlu1 %v4862_v42, %s8628_s17  ;;  %v4877_v57 = vrot.slane %v4875_v47, 1  ;;  %v4872_v1 = vrot.slane %v4862_v42, 1  ;;  %v4888_v59 = vrot.slane %v4862_v42, 2 }
0x1f4d   : >> { %v4890_v6 = vsel %vm494_vm7, %v4888_v59, %v4889_v19 }
0x1f4f   : >> { %4878 = vrot.lane.b32.xlu1 %v4877_v57, %s8628_s17  ;;  %4882 = vrot.lane.b32.xlu0 %v4872_v1, %s8627_s16 }
0x1f53   : >> { %4893 = vrot.lane.b32.xlu1 %v4890_v6, %s8628_s17  ;;  %4897 = vrot.lane.b32.xlu0 %v4890_v6, %s8627_s16 }
0x1fbd   : >> { %v4865_v38 = vpop.permute.xlu1 %4864  ;;  %v4869_v31 = vpop.permute.xlu0 %4868 }
0x1fbe   : >> { %v4867_v48 = vadd.f32 %v4865_v38, %v4862_v42 }
0x1fc0   : >> { %v4871_v12 = vadd.f32 %v4869_v31, %v4867_v48 }
0x1fc1   : >> { %v4879_v0 = vpop.permute.xlu1 %4878  ;;  %v4883_v17 = vpop.permute.xlu0 %4882 }
0x1fc2   : >> { %v4874_v61 = vadd.f32 %v4872_v1, %v4871_v12 }
0x1fc4   : >> { %v4881_v23 = vadd.f32 %v4879_v0, %v4874_v61 }
0x1fc5   : >> { %v4894_v18 = vpop.permute.xlu1 %4893  ;;  %v4898_v24 = vpop.permute.xlu0 %4897 }
0x1fc6   : >> { %v4885_v49 = vadd.f32 %v4883_v17, %v4881_v23 }
0x1fc8   : >> { %v4892_v3 = vadd.f32 %v4890_v6, %v4885_v49 }
0x1fca   : >> { %v4896_v63 = vadd.f32 %v4894_v18, %v4892_v3 }
0x1fcc   : >> { %v4900_v16 = vadd.f32 %v4898_v24, %v4896_v63 }
0x1fce   : >> { %v4902_v60 = vrot.slane %v4900_v16, 7 }
0x1fd0   : >> { %4903 = vrot.lane.b32.xlu1 %v4902_v60, %s8629_s18 }
0x1fd4   : >> { %5366 = vrot.lane.b32.xlu1 %v5364_v30, %s8628_s17 }
0x1fd8   : >> { %5380 = vrot.lane.b32.xlu1 %v5379_v46, %s8628_s17 }
0x1fdc   : >> { %5391 = vrot.lane.b32.xlu1 %v5388_v5, %s8628_s17 }
0x2042   : >> { %v4904_v14 = vpop.permute.xlu1 %4903 }
0x2043   : >> { %v4906_v36 = vsub.f32 %v9718_v44, %v4904_v14 }
0x2045   : >> { %v4908_v62 = vrot.slane %v4906_v36, 1 }
0x2046   : >> { %v5367_v57 = vpop.permute.xlu1 %5366 }
0x2047   : >> { %4909 = vrot.lane.b32.xlu0 %v4908_v62, %s8628_s17  ;;  %v5369_v59 = vadd.f32 %v5367_v57, %v5364_v30 }
0x204a   : >> { %v5381_v6 = vpop.permute.xlu1 %5380 }
0x204b   : >> { %5370 = vrot.lane.b32.xlu0 %v5364_v30, %s8627_s16 }
0x204e   : >> { %v5392_v61 = vpop.permute.xlu1 %5391 }
0x204f   : >> { %5384 = vrot.lane.b32.xlu0 %v5374_v20, %s8627_s16 }
0x2053   : >> { %5395 = vrot.lane.b32.xlu0 %v5388_v5, %s8627_s16 }
0x20b9   : >> { %v4910_v35 = vpop.permute.xlu0 %4909 }
0x20ba   : >> { %8394 = vmatpush3.msk.msra.mxu0 %vm461_vm4, %v4910_v35  ;;  %8399 = vmatpush3.msk.msra.mxu1 %vm461_vm4, %v4910_v35 }
0x20bb   : >> { %8396 = vmatmul.mubr.msk.f32.vlgmr.msra.gmra.mxu0 %vm10091_vm12, %v9013_v34  ;;  %8401 = vmatmul.mubr.msk.f32.vlgmr.msra.gmra.mxu1 %vm10092_vm14, %v9031_v39  ;;  %vm10093_vm14 = vmmov %vm10091_vm12 }
0x20bc   : >> { %8403 = vmatprep.subr.mxu0 %v8630_v54  ;;  %8408 = vmatprep.subr.mxu1 %v8630_v54 }
0x20bd   : >> { %8404 = vmatpush3.msk.msra.mxu0 %vm461_vm4, %v9066_v55  ;;  %8405 = vmatprep.mubr.msk.f32.mxu0 %vm8631_vm2, %v8630_v54  ;;  %v5371_v1 = vpop.permute.xlu0 %5370 }
0x20be   : >> { %8409 = vmatpush3.msk.msra.mxu1 %vm461_vm4, %v9057_v51  ;;  %8410 = vmatprep.mubr.msk.f32.mxu1 %vm8631_vm2, %v8630_v54  ;;  %v5373_v19 = vadd.f32 %v5371_v1, %v5369_v59 }
0x20bf   : >> { %8413 = vmatprep.subr.mxu0 %v8630_v54  ;;  %8418 = vmatprep.subr.mxu1 %v8630_v54 }
0x20c0   : >> { %v5376_v38 = vadd.f32 %v5374_v20, %v5373_v19 }
0x20c1   : >> { %v5385_v48 = vpop.permute.xlu0 %5384 }
0x20c2   : >> { %v5383_v31 = vadd.f32 %v5381_v6, %v5376_v38 }
0x20c4   : >> { %v5387_v12 = vadd.f32 %v5385_v48, %v5383_v31 }
0x20c5   : >> { %v5396_v23 = vpop.permute.xlu0 %5395 }
0x20c6   : >> { %v5390_v0 = vadd.f32 %v5388_v5, %v5387_v12 }
0x20c8   : >> { %v5394_v17 = vadd.f32 %v5392_v61, %v5390_v0 }
0x20ca   : >> { %v5398_v49 = vadd.f32 %v5396_v23, %v5394_v17 }
0x20cc   : >> { %v5400_v3 = vrot.slane %v5398_v49, 7 }
0x20ce   : >> { %5401 = vrot.lane.b32.xlu1 %v5400_v3, %s8629_s18 }
0x2140   : >> { %v5402_v2 = vpop.permute.xlu1 %5401 }
0x217b   : >> { %v4983_v40 = vpop.f32.mrf.mxu0  ;;  %v5056_v42 = vpop.f32.mrf.mxu1 }
0x217c   : >> { %8406 = vmatmul.mubr.msk.f32.vlgmr.msra.gmra.mxu0 %vm10093_vm14, %v5056_v42  ;;  %8411 = vmatmul.mubr.msk.f32.vlgmr.msra.gmra.mxu1 %vm10091_vm12, %v4983_v40  ;;  %vm10094_vm14 = vmmov %vm10091_vm12 }
0x217d   : >> { %8414 = vmatpush3.msk.msra.mxu0 %vm461_vm4, %v4910_v35  ;;  %v8402_v47 = vpop.f32.mrf.mxu1  ;;  %8415 = vmatprep.mubr.msk.f32.mxu0 %vm8631_vm2, %v8630_v54  ;;  %v8397_v52 = vpop.f32.mrf.mxu0 }
0x217e   : >> { %8419 = vmatpush3.msk.msra.mxu1 %vm461_vm4, %v9057_v51  ;;  %8420 = vmatprep.mubr.msk.f32.mxu1 %vm8631_vm2, %v8630_v54 }
0x217f   : >> { %8423 = vmatprep.subr.mxu0 %v8630_v54  ;;  %8428 = vmatprep.subr.mxu1 %v8630_v54 }
0x2180   : >> { %8416 = vmatmul.mubr.msk.f32.vlgmr.msra.gmra.mxu0 %vm10094_vm14, %v9054_v50  ;;  %vm10095_vm14 = vcmask 36864  }
0x2181   : >> { %8425 = vmatprep.mubr.msk.f32.mxu0 %vm8631_vm2, %v8630_v54 }
0x223c   : >> { %v5132_v18 = vpop.f32.mrf.mxu0  ;;  %v5208_v63 = vpop.f32.mrf.mxu1 }
0x223d   : >> { %v5209_v24 = vadd.f32 %v5208_v63, %v5132_v18 }
0x223e   : >> { %v8407_v16 = vpop.f32.mrf.mxu0  ;;  %v8412_v60 = vpop.f32.mrf.mxu1 }
0x2240   : >> { %v5281_v14 = vpop.f32.mrf.mxu0 }
0x2241   : >> { %8421 = vmatmul.mubr.msk.f32.vlgmr.msra.gmra.mxu1 %vm10091_vm12, %v5281_v14  ;;  %vm10096_vm12 = vcmask 23552  }
0x2242   : >> { %v8417_v36 = vpop.f32.mrf.mxu0  ;;  %8430 = vmatprep.mubr.msk.f32.mxu1 %vm8631_vm2, %v8630_v54 }
0x2301   : >> { %v5354_v62 = vpop.f32.mrf.mxu1 }
0x2302   : >> { %v5358_v35 = vadd.f32 %v5354_v62, %v5209_v24  ;;  %v5908_v62 = vld [vmem:[#allocation8] sm:$0x7] }
0x2303   : >> { %v8422_v30 = vpop.f32.mrf.mxu1 }
0x2304   : >> { %5360 = vst.msk [vmem:[#allocation7] sm:$0x1f] %vm10095_vm14, %v5358_v35  ;;  %vm10097_vm14 = vmmov %vm10096_vm12  ;;  %v5910_v35 = vmul.f32 -0.33333334, %v5908_v62  ;;  %v5923_v30 = vmul.f32 2.6666667, %v5908_v62 }
0x230b   : >> { %v5363_v46 = vld [vmem:[#allocation7] sm:$0x1f] }
0x230c   : >> { %v5404_v20 = vsub.f32 %v5363_v46, %v5402_v2  ;;  %v5410_v24 = vld [vmem:[#allocation7] sm:$0x1f]  ;;  %v5925_v2 = vrot.slane %v5923_v30, 1  ;;  %v5920_v46 = vrot.slane %v5910_v35, 1 }
0x230e   : >> { %v5405_v5 = vmul.f32 0.25, %v5404_v20  ;;  %v5934_v20 = vrot.slane %v5910_v35, 2 }
0x2310   : >> { %v5406_v40 = vadd.f32 %v5405_v5, %v5362_v8 }
0x2312   : >> { %5408 = vst.msk [vmem:[#allocation6] sm:$0xe] %vm1869_vm5, %v5406_v40 }
0x2319   : >> { %v5409_v42 = vld [vmem:[#allocation6] sm:$0x1f] }
0x231a   : >> { %v5411_v47 = vmul.f32 -0.33333334, %v5409_v42  ;;  %v5424_v52 = vmul.f32 2.6666667, %v5409_v42 }
0x231c   : >> { %5417 = vrot.lane.b32.xlu1 %v5411_v47, %s8627_s16  ;;  %5413 = vrot.lane.b32.xlu0 %v5411_v47, %s8628_s17  ;;  %v5426_v57 = vrot.slane %v5424_v52, 1  ;;  %v5421_v1 = vrot.slane %v5411_v47, 1  ;;  %v5435_v59 = vrot.slane %v5411_v47, 2 }
0x2320   : >> { %5427 = vrot.lane.b32.xlu0 %v5426_v57, %s8628_s17  ;;  %5431 = vrot.lane.b32.xlu1 %v5421_v1, %s8627_s16 }
0x2324   : >> { %5438 = vrot.lane.b32.xlu0 %v5435_v59, %s8628_s17  ;;  %5442 = vrot.lane.b32.xlu1 %v5435_v59, %s8627_s16 }
0x238e   : >> { %v5414_v8 = vpop.permute.xlu0 %5413  ;;  %v5418_v6 = vpop.permute.xlu1 %5417 }
0x238f   : >> { %v5416_v19 = vadd.f32 %v5414_v8, %v5411_v47 }
0x2391   : >> { %v5420_v38 = vadd.f32 %v5418_v6, %v5416_v19 }
0x2392   : >> { %v5428_v31 = vpop.permute.xlu0 %5427  ;;  %v5432_v61 = vpop.permute.xlu1 %5431 }
0x2393   : >> { %v5423_v48 = vadd.f32 %v5421_v1, %v5420_v38 }
0x2395   : >> { %v5430_v12 = vadd.f32 %v5428_v31, %v5423_v48 }
0x2396   : >> { %v5439_v17 = vpop.permute.xlu0 %5438  ;;  %v5443_v3 = vpop.permute.xlu1 %5442 }
0x2397   : >> { %v5434_v0 = vadd.f32 %v5432_v61, %v5430_v12 }
0x2399   : >> { %v5437_v23 = vadd.f32 %v5435_v59, %v5434_v0 }
0x239b   : >> { %v5441_v49 = vadd.f32 %v5439_v17, %v5437_v23 }
0x239d   : >> { %v5445_v18 = vadd.f32 %v5443_v3, %v5441_v49 }
0x239f   : >> { %v5447_v63 = vrot.slane %v5445_v18, 7 }
0x23a1   : >> { %5448 = vrot.lane.b32.xlu0 %v5447_v63, %s8629_s18 }
0x23a5   : >> { %5912 = vrot.lane.b32.xlu0 %v5910_v35, %s8628_s17 }
0x23a9   : >> { %5926 = vrot.lane.b32.xlu0 %v5925_v2, %s8628_s17 }
0x23ad   : >> { %5937 = vrot.lane.b32.xlu0 %v5934_v20, %s8628_s17 }
0x2413   : >> { %v5449_v16 = vpop.permute.xlu0 %5448 }
0x2414   : >> { %v5451_v60 = vsub.f32 %v5410_v24, %v5449_v16 }
0x2416   : >> { %v5453_v14 = vrot.slane %v5451_v60, 1 }
0x2417   : >> { %v5913_v52 = vpop.permute.xlu0 %5912 }
0x2418   : >> { %5454 = vrot.lane.b32.xlu1 %v5453_v14, %s8628_s17  ;;  %v5915_v1 = vadd.f32 %v5913_v52, %v5910_v35 }
0x241b   : >> { %v5927_v8 = vpop.permute.xlu0 %5926 }
0x241c   : >> { %5916 = vrot.lane.b32.xlu1 %v5910_v35, %s8627_s16 }
0x241f   : >> { %v5938_v31 = vpop.permute.xlu0 %5937 }
0x2420   : >> { %5930 = vrot.lane.b32.xlu1 %v5920_v46, %s8627_s16 }
0x2424   : >> { %5941 = vrot.lane.b32.xlu1 %v5934_v20, %s8627_s16 }
0x248a   : >> { %v5455_v36 = vpop.permute.xlu1 %5454 }
0x248b   : >> { %8424 = vmatpush3.msk.msra.mxu0 %vm1922_vm10, %v5455_v36  ;;  %8429 = vmatpush3.msk.msra.mxu1 %vm1922_vm10, %v5455_v36 }
0x248c   : >> { %8426 = vmatmul.mubr.msk.f32.vlgmr.msra.gmra.mxu0 %vm10096_vm12, %v9069_v56  ;;  %8431 = vmatmul.mubr.msk.f32.vlgmr.msra.gmra.mxu1 %vm10097_vm14, %v9107_v21  ;;  %vm10098_vm14 = vmmov %vm10096_vm12 }
0x248d   : >> { %8433 = vmatprep.subr.mxu0 %v8630_v54  ;;  %8438 = vmatprep.subr.mxu1 %v8630_v54 }
0x248e   : >> { %8434 = vmatpush3.msk.msra.mxu0 %vm1922_vm10, %v9118_v26  ;;  %8435 = vmatprep.mubr.msk.f32.mxu0 %vm8631_vm2, %v8630_v54  ;;  %v5917_v57 = vpop.permute.xlu1 %5916 }
0x248f   : >> { %8439 = vmatpush3.msk.msra.mxu1 %vm1922_vm10, %v9116_v25  ;;  %8440 = vmatprep.mubr.msk.f32.mxu1 %vm8631_vm2, %v8630_v54  ;;  %v5919_v59 = vadd.f32 %v5917_v57, %v5915_v1 }
0x2490   : >> { %8443 = vmatprep.subr.mxu0 %v8630_v54  ;;  %8448 = vmatprep.subr.mxu1 %v8630_v54 }
0x2491   : >> { %v5922_v19 = vadd.f32 %v5920_v46, %v5919_v59 }
0x2492   : >> { %v5931_v6 = vpop.permute.xlu1 %5930 }
0x2493   : >> { %v5929_v38 = vadd.f32 %v5927_v8, %v5922_v19 }
0x2495   : >> { %v5933_v48 = vadd.f32 %v5931_v6, %v5929_v38 }
0x2496   : >> { %v5942_v61 = vpop.permute.xlu1 %5941 }
0x2497   : >> { %v5936_v12 = vadd.f32 %v5934_v20, %v5933_v48 }
0x2499   : >> { %v5940_v0 = vadd.f32 %v5938_v31, %v5936_v12 }
0x249b   : >> { %v5944_v23 = vadd.f32 %v5942_v61, %v5940_v0 }
0x249d   : >> { %v5946_v17 = vrot.slane %v5944_v23, 7 }
0x249f   : >> { %5947 = vrot.lane.b32.xlu0 %v5946_v17, %s8629_s18 }
0x2511   : >> { %v5948_v30 = vpop.permute.xlu0 %5947 }
0x254c   : >> { %v5529_v5 = vpop.f32.mrf.mxu0  ;;  %v5602_v40 = vpop.f32.mrf.mxu1 }
0x254d   : >> { %8436 = vmatmul.mubr.msk.f32.vlgmr.msra.gmra.mxu0 %vm10096_vm12, %v5602_v40  ;;  %8441 = vmatmul.mubr.msk.f32.vlgmr.msra.gmra.mxu1 %vm10098_vm14, %v5529_v5  ;;  %vm10099_vm14 = vmmov %vm10096_vm12 }
0x254e   : >> { %8444 = vmatpush3.msk.msra.mxu0 %vm1922_vm10, %v5455_v36  ;;  %v8432_v42 = vpop.f32.mrf.mxu1  ;;  %8445 = vmatprep.mubr.msk.f32.mxu0 %vm8631_vm2, %v8630_v54  ;;  %v8427_v47 = vpop.f32.mrf.mxu0 }
0x254f   : >> { %8449 = vmatpush3.msk.msra.mxu1 %vm1922_vm10, %v9116_v25  ;;  %8450 = vmatprep.mubr.msk.f32.mxu1 %vm8631_vm2, %v8630_v54 }
0x2550   : >> { %8453 = vmatprep.subr.mxu0 %v8630_v54  ;;  %8458 = vmatprep.subr.mxu1 %v8630_v54 }
0x2551   : >> { %8446 = vmatmul.mubr.msk.f32.vlgmr.msra.gmra.mxu0 %vm10096_vm12, %v9121_v27  ;;  %vm10100_vm12 = vcmask 9225  }
0x2552   : >> { %8455 = vmatprep.mubr.msk.f32.mxu0 %vm8631_vm2, %v8630_v54 }
0x260d   : >> { %v5678_v49 = vpop.f32.mrf.mxu0  ;;  %v5754_v3 = vpop.f32.mrf.mxu1 }
0x260e   : >> { %v5755_v18 = vadd.f32 %v5754_v3, %v5678_v49 }
0x260f   : >> { %v8437_v63 = vpop.f32.mrf.mxu0  ;;  %v8442_v24 = vpop.f32.mrf.mxu1 }
0x2611   : >> { %v5827_v16 = vpop.f32.mrf.mxu0 }
0x2612   : >> { %8451 = vmatmul.mubr.msk.f32.vlgmr.msra.gmra.mxu1 %vm10099_vm14, %v5827_v16  ;;  %vm10101_vm14 = vmmov %vm10100_vm12 }
0x2613   : >> { %v8447_v60 = vpop.f32.mrf.mxu0  ;;  %8460 = vmatprep.mubr.msk.f32.mxu1 %vm8631_vm2, %v8630_v54 }
0x26d2   : >> { %v5900_v14 = vpop.f32.mrf.mxu1 }
0x26d3   : >> { %v5904_v36 = vadd.f32 %v5900_v14, %v5755_v18 }
0x26d4   : >> { %v8452_v35 = vpop.f32.mrf.mxu1 }
0x26d5   : >> { %5906 = vst.msk [vmem:[#allocation9] sm:$0x7] %vm10090_vm11, %v5904_v36 }
0x26dc   : >> { %v5909_v2 = vld [vmem:[#allocation9] sm:$0x7] }
0x26dd   : >> { %v5950_v46 = vsub.f32 %v5909_v2, %v5948_v30  ;;  %v5956_v18 = vld [vmem:[#allocation9] sm:$0x7] }
0x26df   : >> { %v5951_v20 = vmul.f32 0.25, %v5950_v46 }
0x26e1   : >> { %v5952_v5 = vadd.f32 %v5951_v20, %v5908_v62 }
0x26e3   : >> { %5954 = vst.msk [vmem:[#allocation8] sm:$0x2] %vm10100_vm12, %v5952_v5  ;;  %vm10102_vm12 = vcmask 23552  }
0x26e4   : >> { %vm10103_vm11 = vmmov %vm10102_vm12 }
0x26ea   : >> { %v5955_v40 = vld [vmem:[#allocation8] sm:$0x7] }
0x26eb   : >> { %v5957_v42 = vmul.f32 -0.33333334, %v5955_v40  ;;  %v5970_v47 = vmul.f32 2.6666667, %v5955_v40 }
0x26ed   : >> { %5963 = vrot.lane.b32.xlu0 %v5957_v42, %s8627_s16  ;;  %5959 = vrot.lane.b32.xlu1 %v5957_v42, %s8628_s17  ;;  %v5972_v52 = vrot.slane %v5970_v47, 1  ;;  %v5967_v57 = vrot.slane %v5957_v42, 1  ;;  %v5981_v1 = vrot.slane %v5957_v42, 2 }
0x26f1   : >> { %5973 = vrot.lane.b32.xlu1 %v5972_v52, %s8628_s17  ;;  %5977 = vrot.lane.b32.xlu0 %v5967_v57, %s8627_s16 }
0x26f5   : >> { %5984 = vrot.lane.b32.xlu1 %v5981_v1, %s8628_s17  ;;  %5988 = vrot.lane.b32.xlu0 %v5981_v1, %s8627_s16 }
0x275f   : >> { %v5960_v62 = vpop.permute.xlu1 %5959  ;;  %v5964_v8 = vpop.permute.xlu0 %5963 }
0x2760   : >> { %v5962_v59 = vadd.f32 %v5960_v62, %v5957_v42 }
0x2762   : >> { %v5966_v19 = vadd.f32 %v5964_v8, %v5962_v59  ;;  %v6450_v8 = vld [vmem:[#allocation6] sm:$0x1f] }
0x2763   : >> { %v5974_v38 = vpop.permute.xlu1 %5973  ;;  %v5978_v31 = vpop.permute.xlu0 %5977 }
0x2764   : >> { %v5969_v6 = vadd.f32 %v5967_v57, %v5966_v19 }
0x2766   : >> { %v5976_v48 = vadd.f32 %v5974_v38, %v5969_v6 }
0x2767   : >> { %v5985_v0 = vpop.permute.xlu1 %5984  ;;  %v5989_v17 = vpop.permute.xlu0 %5988 }
0x2768   : >> { %v5980_v12 = vadd.f32 %v5978_v31, %v5976_v48 }
0x276a   : >> { %v5983_v61 = vadd.f32 %v5981_v1, %v5980_v12 }
0x276c   : >> { %v5987_v23 = vadd.f32 %v5985_v0, %v5983_v61 }
0x276e   : >> { %v5991_v49 = vadd.f32 %v5989_v17, %v5987_v23 }
0x2770   : >> { %v5993_v3 = vrot.slane %v5991_v49, 7 }
0x2772   : >> { %5994 = vrot.lane.b32.xlu1 %v5993_v3, %s8629_s18 }
0x27e4   : >> { %v5995_v63 = vpop.permute.xlu1 %5994 }
0x27e5   : >> { %v5997_v24 = vsub.f32 %v5956_v18, %v5995_v63 }
0x27e7   : >> { %v5998_v16 = vmul.f32 0.25, %v5997_v24 }
0x27e9   : >> { %v5999_v60 = vadd.f32 %v5998_v16, %v5955_v40 }
0x27eb   : >> { %6000 = vst.msk [vmem:[#allocation8] sm:$0x2] %vm10101_vm14, %v5999_v60  ;;  %vm10104_vm14 = vmmov %vm10103_vm11 }
0x27f2   : >> { %v6001_v14 = vld [vmem:[#allocation8] sm:$0x7] }
0x27f3   : >> { %8454 = vmatpush3.msk.msra.mxu0 %vm1922_vm10, %v6001_v14  ;;  %8459 = vmatpush3.msk.msra.mxu1 %vm1922_vm10, %v6001_v14 }
0x27f4   : >> { %8456 = vmatmul.mubr.msk.f32.vlgmr.msra.gmra.mxu0 %vm10102_vm12, %v8801_v28  ;;  %8461 = vmatmul.mubr.msk.f32.vlgmr.msra.gmra.mxu1 %vm10103_vm11, %v8994_v9  ;;  %vm10105_vm12 = vmmov %vm10103_vm11 }
0x27f5   : >> { %8463 = vmatprep.subr.mxu0 %v8630_v54  ;;  %8468 = vmatprep.subr.mxu1 %v8630_v54 }
0x27f6   : >> { %8464 = vmatpush3.msk.msra.mxu0 %vm1922_vm10, %v8999_v32  ;;  %8465 = vmatprep.mubr.msk.f32.mxu0 %vm8631_vm2, %v8630_v54 }
0x27f7   : >> { %8469 = vmatpush3.msk.msra.mxu1 %vm1922_vm10, %v8875_v53  ;;  %8470 = vmatprep.mubr.msk.f32.mxu1 %vm8631_vm2, %v8630_v54 }
0x27f8   : >> { %8473 = vmatprep.subr.mxu0 %v8630_v54  ;;  %8478 = vmatprep.subr.mxu1 %v8630_v54 }
0x28b4   : >> { %v6074_v36 = vpop.f32.mrf.mxu0  ;;  %v6147_v35 = vpop.f32.mrf.mxu1 }
0x28b5   : >> { %8466 = vmatmul.mubr.msk.f32.vlgmr.msra.gmra.mxu0 %vm10103_vm11, %v6147_v35  ;;  %8471 = vmatmul.mubr.msk.f32.vlgmr.msra.gmra.mxu1 %vm10104_vm14, %v6074_v36 }
0x28b6   : >> { %8474 = vmatpush3.msk.msra.mxu0 %vm1922_vm10, %v6001_v14  ;;  %v8462_v30 = vpop.f32.mrf.mxu1  ;;  %8475 = vmatprep.mubr.msk.f32.mxu0 %vm8631_vm2, %v8630_v54  ;;  %v8457_v2 = vpop.f32.mrf.mxu0 }
0x28b7   : >> { %8479 = vmatpush3.msk.msra.mxu1 %vm1922_vm10, %v8875_v53  ;;  %8480 = vmatprep.mubr.msk.f32.mxu1 %vm8631_vm2, %v8630_v54 }
0x28b8   : >> { %8483 = vmatprep.subr.mxu0 %v8630_v54  ;;  %8488 = vmatprep.subr.mxu1 %v8630_v54 }
0x28b9   : >> { %8476 = vmatmul.mubr.msk.f32.vlgmr.msra.gmra.mxu0 %vm10105_vm12, %v9005_v4 }
0x28ba   : >> { %8485 = vmatprep.mubr.msk.f32.mxu0 %vm8631_vm2, %v8630_v54 }
0x2975   : >> { %v6223_v46 = vpop.f32.mrf.mxu0  ;;  %v6299_v20 = vpop.f32.mrf.mxu1 }
0x2976   : >> { %v6300_v5 = vadd.f32 %v6299_v20, %v6223_v46  ;;  %v6459_v20 = vld [vmem:[#allocation7] sm:$0x1f] }
0x2977   : >> { %v8467_v40 = vpop.f32.mrf.mxu0  ;;  %v8472_v42 = vpop.f32.mrf.mxu1 }
0x2979   : >> { %v6372_v47 = vpop.f32.mrf.mxu0 }
0x297a   : >> { %8481 = vmatmul.mubr.msk.f32.vlgmr.msra.gmra.mxu1 %vm10103_vm11, %v6372_v47 }
0x297b   : >> { %v8477_v52 = vpop.f32.mrf.mxu0  ;;  %8490 = vmatprep.mubr.msk.f32.mxu1 %vm8631_vm2, %v8630_v54 }
0x2a3a   : >> { %v6445_v57 = vpop.f32.mrf.mxu1 }
0x2a3b   : >> { %v6449_v1 = vadd.f32 %v6445_v57, %v6300_v5 }
0x2a3c   : >> { %v8482_v62 = vpop.f32.mrf.mxu1 }
0x2a3d   : >> { %v6452_v59 = vrot.slane %v6449_v1, 7 }
0x2a3f   : >> { %6453 = vrot.lane.b32.xlu0 %v6452_v59, %s8629_s18 }
0x2ab1   : >> { %v6454_v19 = vpop.permute.xlu0 %6453 }
0x2ab2   : >> { %v6456_v6 = vadd.f32 %v6454_v19, %v6450_v8 }
0x2ab4   : >> { %6457 = vst.msk [vmem:[#allocation6] sm:$0xe] %vm1869_vm5, %v6456_v6 }
0x2abb   : >> { %v6458_v38 = vld [vmem:[#allocation6] sm:$0x1f] }
0x2abc   : >> { %v6460_v48 = vmul.f32 -0.33333334, %v6458_v38  ;;  %v6473_v31 = vmul.f32 2.6666667, %v6458_v38 }
0x2abe   : >> { %6466 = vrot.lane.b32.xlu0 %v6460_v48, %s8627_s16  ;;  %6462 = vrot.lane.b32.xlu1 %v6460_v48, %s8628_s17  ;;  %v6475_v12 = vrot.slane %v6473_v31, 1  ;;  %v6470_v61 = vrot.slane %v6460_v48, 1  ;;  %v6484_v0 = vrot.slane %v6460_v48, 2 }
0x2ac2   : >> { %6476 = vrot.lane.b32.xlu1 %v6475_v12, %s8628_s17  ;;  %6480 = vrot.lane.b32.xlu0 %v6470_v61, %s8627_s16 }
0x2ac6   : >> { %6487 = vrot.lane.b32.xlu1 %v6484_v0, %s8628_s17  ;;  %6491 = vrot.lane.b32.xlu0 %v6484_v0, %s8627_s16 }
0x2b30   : >> { %v6463_v23 = vpop.permute.xlu1 %6462  ;;  %v6467_v49 = vpop.permute.xlu0 %6466 }
0x2b31   : >> { %v6465_v17 = vadd.f32 %v6463_v23, %v6460_v48 }
0x2b33   : >> { %v6469_v3 = vadd.f32 %v6467_v49, %v6465_v17 }
0x2b34   : >> { %v6477_v63 = vpop.permute.xlu1 %6476  ;;  %v6481_v16 = vpop.permute.xlu0 %6480 }
0x2b35   : >> { %v6472_v18 = vadd.f32 %v6470_v61, %v6469_v3  ;;  %v6959_v3 = vld [vmem:[#allocation4 + $0x8] sm:$0x1] }
0x2b37   : >> { %v6479_v24 = vadd.f32 %v6477_v63, %v6472_v18 }
0x2b38   : >> { %v6488_v36 = vpop.permute.xlu1 %6487  ;;  %v6492_v30 = vpop.permute.xlu0 %6491 }
0x2b39   : >> { %v6483_v60 = vadd.f32 %v6481_v16, %v6479_v24  ;;  %v6985_v16 = vmul.f32 -0.33333334, %v6959_v3 }
0x2b3b   : >> { %v6486_v14 = vadd.f32 %v6484_v0, %v6483_v60 }
0x2b3d   : >> { %v6490_v35 = vadd.f32 %v6488_v36, %v6486_v14 }
0x2b3f   : >> { %v6494_v2 = vadd.f32 %v6492_v30, %v6490_v35  ;;  %v6988_v35 = vrot.slane %v6985_v16, 2 }
0x2b41   : >> { %v6496_v46 = vrot.slane %v6494_v2, 7 }
0x2b43   : >> { %6497 = vrot.lane.b32.xlu1 %v6496_v46, %s8629_s18 }
0x2bb5   : >> { %v6498_v5 = vpop.permute.xlu1 %6497 }
0x2bb6   : >> { %v6500_v40 = vsub.f32 %v6459_v20, %v6498_v5 }
0x2bb8   : >> { %v6501_v42 = vmul.f32 0.25, %v6500_v40 }
0x2bba   : >> { %v6502_v47 = vadd.f32 %v6501_v42, %v6458_v38 }
0x2bbc   : >> { %6503 = vst.msk [vmem:[#allocation6] sm:$0xe] %vm1869_vm5, %v6502_v47 }
0x2bc3   : >> { %v6504_v52 = vld [vmem:[#allocation6] sm:$0x1f] }
0x2bc4   : >> { %8484 = vmatpush3.msk.msra.mxu0 %vm2970_vm0, %v6504_v52  ;;  %8489 = vmatpush3.msk.msra.mxu1 %vm2970_vm0, %v6504_v52 }
0x2bc5   : >> { %8491 = vmatmul.mubr.msk.f32.vlgmr.msra.gmra.mxu1 %vm2967_vm13, %v8994_v9  ;;  %8486 = vmatmul.mubr.msk.f32.vlgmr.msra.gmra.mxu0 %vm2967_vm13, %v8801_v28 }
0x2bc6   : >> { %8493 = vmatprep.subr.mxu0 %v8630_v54  ;;  %8495 = vmatprep.mubr.msk.f32.mxu0 %vm8631_vm2, %v8630_v54 }
0x2bc7   : >> { %8494 = vmatpush3.msk.msra.mxu0 %vm2970_vm0, %v8999_v32  ;;  %8498 = vmatprep.subr.mxu1 %v8630_v54 }
0x2bc8   : >> { %8503 = vmatprep.subr.mxu0 %v8630_v54  ;;  %8499 = vmatpush3.msk.msra.mxu1 %vm2970_vm0, %v8875_v53 }
0x2bc9   : >> { %8500 = vmatprep.mubr.msk.f32.mxu1 %vm8631_vm2, %v8630_v54  ;;  %8508 = vmatprep.subr.mxu1 %v8630_v54 }
0x2c85   : >> { %v6650_v57 = vpop.f32.mrf.mxu1  ;;  %v6578_v1 = vpop.f32.mrf.mxu0 }
0x2c86   : >> { %8496 = vmatmul.mubr.msk.f32.vlgmr.msra.gmra.mxu0 %vm2967_vm13, %v6650_v57  ;;  %8501 = vmatmul.mubr.msk.f32.vlgmr.msra.gmra.mxu1 %vm2967_vm13, %v6578_v1 }
0x2c87   : >> { %8504 = vmatpush3.msk.msra.mxu0 %vm2970_vm0, %v6504_v52  ;;  %v8492_v62 = vpop.f32.mrf.mxu1  ;;  %8505 = vmatprep.mubr.msk.f32.mxu0 %vm8631_vm2, %v8630_v54  ;;  %v8487_v59 = vpop.f32.mrf.mxu0 }
0x2c88   : >> { %8509 = vmatpush3.msk.msra.mxu1 %vm2970_vm0, %v8875_v53  ;;  %8510 = vmatprep.mubr.msk.f32.mxu1 %vm8631_vm2, %v8630_v54  ;;  %v7010_v62 = vld [vmem:[#allocation4 + $0x8] sm:$0x1]  ;;  %vm10106_vm2 = vcmask (%p4093_p5), 131072  }
0x2c89   : >> { %8513 = vmatprep.subr.msk.mxu0 %vm643_vm9, %v7010_v62  ;;  %8520 = vmatprep.subr.msk.mxu1 %vm643_vm9, %v7010_v62 }
0x2c8a   : >> { %8506 = vmatmul.mubr.msk.f32.vlgmr.msra.gmra.mxu0 %vm2967_vm13, %v9005_v4 }
0x2c8b   : >> { %8517 = vmatprep.mubr.msk.f32.mxu0 %vm1263_vm8, %v8801_v28  ;;  %8514 = vmatpush3.msk.msra.mxu0 %vm643_vm9, %v7010_v62 }
0x2d46   : >> { %v6725_v8 = vpop.f32.mrf.mxu0  ;;  %v6800_v19 = vpop.f32.mrf.mxu1 }
0x2d47   : >> { %v6801_v6 = vadd.f32 %v6800_v19, %v6725_v8 }
0x2d48   : >> { %v8497_v38 = vpop.f32.mrf.mxu0  ;;  %v8502_v48 = vpop.f32.mrf.mxu1 }
0x2d4a   : >> { %v6872_v31 = vpop.f32.mrf.mxu0 }
0x2d4b   : >> { %8511 = vmatmul.mubr.msk.f32.vlgmr.msra.gmra.mxu1 %vm2967_vm13, %v6872_v31 }
0x2d4c   : >> { %v8507_v12 = vpop.f32.mrf.mxu0  ;;  %8524 = vmatprep.mubr.msk.f32.mxu1 %vm1263_vm8, %v8994_v9  ;;  %8521 = vmatpush3.msk.msra.mxu1 %vm643_vm9, %v7010_v62 }
0x2e0b   : >> { %v6945_v61 = vpop.f32.mrf.mxu1 }
0x2e0c   : >> { %v6949_v54 = vadd.f32 %v6945_v61, %v6801_v6 }
0x2e0d   : >> { %v8512_v0 = vpop.f32.mrf.mxu1 }
0x2e0e   : >> { %v6952_v23 = vrot.slane %v6949_v54, 7 }
0x2e10   : >> { %6953 = vrot.lane.b32.xlu0 %v6952_v23, %s8629_s18 }
0x2e82   : >> { %v6954_v17 = vpop.permute.xlu0 %6953 }
0x2e83   : >> { %v6956_v49 = vadd.f32 %v6954_v17, %v9723_v37 }
0x2e85   : >> { %6957 = vst.msk [vmem:[#allocation4] sm:$0xfe] %vm1319_vm1, %v6956_v49 }
0x2e8c   : >> { %v6958_v18 = vld [vmem:[#allocation4] sm:$0xff] }
0x2e8d   : >> { %v6961_v63 = vmul.f32 -0.33333334, %v6958_v18  ;;  %v6974_v24 = vmul.f32 2.6666667, %v6958_v18 }
0x2e8f   : >> { %6967 = vrot.lane.b32.xlu0 %v6961_v63, %s8627_s16  ;;  %6963 = vrot.lane.b32.xlu1 %v6961_v63, %s8628_s17  ;;  %v6976_v60 = vrot.slane %v6974_v24, 1  ;;  %v6971_v14 = vrot.slane %v6961_v63, 1  ;;  %v6987_v36 = vrot.slane %v6961_v63, 2 }
0x2e91   : >> { %v6989_v37 = vsel %vm494_vm7, %v6987_v36, %v6988_v35 }
0x2e93   : >> { %6977 = vrot.lane.b32.xlu1 %v6976_v60, %s8628_s17  ;;  %6981 = vrot.lane.b32.xlu0 %v6971_v14, %s8627_s16 }
0x2e97   : >> { %6992 = vrot.lane.b32.xlu1 %v6989_v37, %s8628_s17  ;;  %6996 = vrot.lane.b32.xlu0 %v6989_v37, %s8627_s16 }
0x2f01   : >> { %v6964_v30 = vpop.permute.xlu1 %6963  ;;  %v6968_v46 = vpop.permute.xlu0 %6967 }
0x2f02   : >> { %v6966_v2 = vadd.f32 %v6964_v30, %v6961_v63 }
0x2f04   : >> { %v6970_v20 = vadd.f32 %v6968_v46, %v6966_v2 }
0x2f05   : >> { %v6978_v40 = vpop.permute.xlu1 %6977  ;;  %v6982_v47 = vpop.permute.xlu0 %6981 }
0x2f06   : >> { %v6973_v5 = vadd.f32 %v6971_v14, %v6970_v20  ;;  %v7505_v20 = vld [vmem:[#allocation2] sm:$0xff] }
0x2f08   : >> { %v6980_v42 = vadd.f32 %v6978_v40, %v6973_v5 }
0x2f09   : >> { %v6993_v1 = vpop.permute.xlu1 %6992  ;;  %v6997_v8 = vpop.permute.xlu0 %6996 }
0x2f0a   : >> { %v6984_v52 = vadd.f32 %v6982_v47, %v6980_v42  ;;  %v7506_v42 = vld [vmem:[#allocation2 + $0x8] sm:$0xff] }
0x2f0c   : >> { %v6991_v57 = vadd.f32 %v6989_v37, %v6984_v52 }
0x2f0e   : >> { %v6995_v59 = vadd.f32 %v6993_v1, %v6991_v57 }
0x2f10   : >> { %v6999_v19 = vadd.f32 %v6997_v8, %v6995_v59 }
0x2f12   : >> { %v7001_v6 = vrot.slane %v6999_v19, 7 }
0x2f14   : >> { %7002 = vrot.lane.b32.xlu1 %v7001_v6, %s8629_s18 }
0x2f86   : >> { %v7003_v38 = vpop.permute.xlu1 %7002 }
0x2f87   : >> { %v7005_v48 = vsub.f32 %v9718_v44, %v7003_v38 }
0x2f89   : >> { %v7006_v31 = vmul.f32 0.25, %v7005_v48  ;;  %v7524_v48 = vld [vmem:[#allocation2 + $0x10] sm:$0x1] }
0x2f8b   : >> { %v7007_v12 = vadd.f32 %v7006_v31, %v6958_v18 }
0x2f8d   : >> { %7008 = vst.msk [vmem:[#allocation4] sm:$0xfe] %vm1319_vm1, %v7007_v12 }
0x2f94   : >> { %v7009_v61 = vld [vmem:[#allocation4] sm:$0xff] }
0x2f95   : >> { %8515 = vmatprep.subr.mxu0 %v7009_v61  ;;  %8522 = vmatprep.subr.mxu1 %v7009_v61 }
0x2f96   : >> { %8516 = vmatpush3.msra.mxu0 %v7009_v61  ;;  %8523 = vmatpush3.msra.mxu1 %v7009_v61 }
0x2f97   : >> { %8518 = vmatmul.mubr.msk.f32.vlgmr.msra.gmra.mxu0 %vm1263_vm8, %v8804_v29  ;;  %8525 = vmatmul.mubr.msk.f32.vlgmr.msra.gmra.mxu1 %vm1263_vm8, %v8997_v10 }
0x2f98   : >> { %8527 = vmatprep.subr.msk.mxu0 %vm643_vm9, %v9001_v33  ;;  %8534 = vmatprep.subr.msk.mxu1 %vm643_vm9, %v8894_v58 }
0x2f99   : >> { %8528 = vmatpush3.msk.msra.mxu0 %vm643_vm9, %v9001_v33  ;;  %8535 = vmatpush3.msk.msra.mxu1 %vm643_vm9, %v8894_v58 }
0x2f9a   : >> { %8529 = vmatprep.subr.mxu0 %v8999_v32  ;;  %8536 = vmatprep.subr.mxu1 %v8875_v53 }
0x2f9b   : >> { %8530 = vmatpush3.msra.mxu0 %v8999_v32  ;;  %8537 = vmatpush3.msra.mxu1 %v8875_v53 }
0x2f9c   : >> { %8541 = vmatprep.subr.msk.mxu0 %vm643_vm9, %v7010_v62  ;;  %8548 = vmatprep.subr.msk.mxu1 %vm643_vm9, %v8894_v58 }
0x3057   : >> { %v8519_v44 = vpop.f32.mrf.mxu0  ;;  %v8526_v54 = vpop.f32.mrf.mxu1 }
0x3059   : >> { %v7085_v0 = vpop.f32.mrf.mxu0  ;;  %v7165_v23 = vpop.f32.mrf.mxu1 }
0x305a   : >> { %8531 = vmatprep.mubr.msk.f32.mxu0 %vm1263_vm8, %v7165_v23  ;;  %8538 = vmatprep.mubr.msk.f32.mxu1 %vm1263_vm8, %v7085_v0 }
0x305b   : >> { %8532 = vmatmul.mubr.msk.f32.vlgmr.msra.gmra.mxu0 %vm1263_vm8, %v8526_v54  ;;  %8539 = vmatmul.mubr.msk.f32.vlgmr.msra.gmra.mxu1 %vm1263_vm8, %v8519_v44  ;;  %v7577_v44 = vmul.f32 -0.33333334, %v7524_v48 }
0x305c   : >> { %8542 = vmatpush3.msk.msra.mxu0 %vm643_vm9, %v7010_v62  ;;  %8545 = vmatprep.mubr.msk.f32.mxu0 %vm1263_vm8, %v9005_v4 }
0x305d   : >> { %8543 = vmatprep.subr.mxu0 %v7009_v61  ;;  %8549 = vmatpush3.msk.msra.mxu1 %vm643_vm9, %v8894_v58 }
0x305e   : >> { %8544 = vmatpush3.msra.mxu0 %v7009_v61  ;;  %8550 = vmatprep.subr.mxu1 %v8875_v53 }
0x305f   : >> { %8546 = vmatmul.mubr.msk.f32.vlgmr.msra.gmra.mxu0 %vm1263_vm8, %v9008_v7  ;;  %8551 = vmatpush3.msra.mxu1 %v8875_v53 }
0x311b   : >> { %v8533_v17 = vpop.f32.mrf.mxu0  ;;  %v8540_v63 = vpop.f32.mrf.mxu1 }
0x311c   : >> { %v7339_v16 = vadd.f32 %v8540_v63, %v8533_v17  ;;  %v7582_v17 = vrot.slane %v7577_v44, 2 }
0x311d   : >> { %v7249_v49 = vpop.f32.mrf.mxu0  ;;  %v7333_v24 = vpop.f32.mrf.mxu1 }
0x311e   : >> { %v7334_v14 = vadd.f32 %v7333_v24, %v7249_v49 }
0x311f   : >> { %v8547_v3 = vpop.f32.mrf.mxu0 }
0x3121   : >> { %v7413_v18 = vpop.f32.mrf.mxu0 }
0x3122   : >> { %8552 = vmatprep.mubr.msk.f32.mxu1 %vm1263_vm8, %v7413_v18 }
0x3123   : >> { %8553 = vmatmul.mubr.msk.f32.vlgmr.msra.gmra.mxu1 %vm1263_vm8, %v8547_v3 }
0x31e3   : >> { %v8554_v60 = vpop.f32.mrf.mxu1 }
0x31e4   : >> { %v7504_v36 = vadd.f32 %v8554_v60, %v7339_v16 }
0x31e5   : >> { %v7494_v35 = vpop.f32.mrf.mxu1 }
0x31e6   : >> { %v7503_v37 = vadd.f32 %v7494_v35, %v7334_v14  ;;  %v7510_v30 = vrot.slane %v7504_v36, 7 }
0x31e8   : >> { %v7509_v2 = vrot.slane %v7503_v37, 7 }
0x31ea   : >> { %7512 = vrot.lane.b32.xlu0 %v7509_v2, %s8629_s18  ;;  %v7511_v46 = vsel %vm643_vm9, %v7509_v2, %v7510_v30 }
0x31eb   : >> { %7514 = vrot.lane.b32.xlu1 %v7511_v46, %s8629_s18 }
0x325c   : >> { %v7513_v5 = vpop.permute.xlu0 %7512 }
0x325d   : >> { %v7518_v40 = vadd.f32 %v7513_v5, %v7505_v20  ;;  %v7515_v47 = vpop.permute.xlu1 %7514 }
0x325e   : >> { %v7519_v52 = vadd.f32 %v7515_v47, %v7506_v42 }
0x325f   : >> { %7520 = vst.msk [vmem:[#allocation2] sm:$0xfe] %vm550_vm3, %v7518_v40 }
0x3260   : >> { %7521 = vst.msk [vmem:[#allocation2 + $0x8] sm:$0xff] %vm535_vm15, %v7519_v52 }
0x3266   : >> { %v9983_v57 = vld [vmem:[#allocation2] sm:$0xff] }
0x3267   : >> { %v7527_v1 = vmul.f32 -0.33333334, %v9983_v57  ;;  %v9986_v62 = vld [vmem:[#allocation2 + $0x8] sm:$0xff]  ;;  %v7554_v8 = vmul.f32 2.6666667, %v9983_v57 }
0x3268   : >> { %v7528_v59 = vmul.f32 -0.33333334, %v9986_v62  ;;  %v7555_v19 = vmul.f32 2.6666667, %v9986_v62 }
0x3269   : >> { %7531 = vrot.lane.b32.xlu0 %v7527_v1, %s8628_s17  ;;  %v7558_v6 = vrot.slane %v7554_v8, 1  ;;  %v7547_v12 = vrot.slane %v7527_v1, 1  ;;  %v7579_v0 = vrot.slane %v7527_v1, 2 }
0x326a   : >> { %7533 = vrot.lane.b32.xlu1 %v7528_v59, %s8628_s17  ;;  %v7559_v38 = vrot.slane %v7555_v19, 1  ;;  %v7548_v61 = vrot.slane %v7528_v59, 1  ;;  %v7580_v23 = vrot.slane %v7528_v59, 2 }
0x326c   : >> { %v7560_v31 = vsel %vm461_vm4, %v7558_v6, %v7559_v38  ;;  %v7549_v54 = vsel %vm461_vm4, %v7547_v12, %v7548_v61  ;;  %v7581_v49 = vsel %vm494_vm7, %v7579_v0, %v7580_v23  ;;  %v7583_v3 = vsel %vm494_vm7, %v7580_v23, %v7582_v17  ;;  %v7525_v23 = vld [vmem:[#allocation3] sm:$0xff] }
0x326d   : >> { %7539 = vrot.lane.b32.xlu0 %v7527_v1, %s8627_s16 }
0x326e   : >> { %7541 = vrot.lane.b32.xlu1 %v7528_v59, %s8627_s16 }
0x3271   : >> { %7561 = vrot.lane.b32.xlu0 %v7560_v31, %s8628_s17 }
0x3272   : >> { %7563 = vrot.lane.b32.xlu1 %v7559_v38, %s8628_s17 }
0x3275   : >> { %7569 = vrot.lane.b32.xlu0 %v7549_v54, %s8627_s16 }
0x3276   : >> { %7571 = vrot.lane.b32.xlu1 %v7548_v61, %s8627_s16 }
0x3279   : >> { %7588 = vrot.lane.b32.xlu0 %v7581_v49, %s8628_s17 }
0x327a   : >> { %7590 = vrot.lane.b32.xlu1 %v7583_v3, %s8628_s17 }
0x327d   : >> { %7596 = vrot.lane.b32.xlu0 %v7581_v49, %s8627_s16 }
0x327e   : >> { %7598 = vrot.lane.b32.xlu1 %v7583_v3, %s8627_s16 }
0x32db   : >> { %v7532_v18 = vpop.permute.xlu0 %7531 }
0x32dc   : >> { %v7534_v63 = vpop.permute.xlu1 %7533  ;;  %v7537_v24 = vadd.f32 %v7532_v18, %v7527_v1 }
0x32dd   : >> { %v7538_v16 = vadd.f32 %v7534_v63, %v7528_v59 }
0x32df   : >> { %v7540_v60 = vpop.permute.xlu0 %7539 }
0x32e0   : >> { %v7545_v14 = vadd.f32 %v7540_v60, %v7537_v24  ;;  %v7542_v36 = vpop.permute.xlu1 %7541 }
0x32e1   : >> { %v7546_v35 = vadd.f32 %v7542_v36, %v7538_v16 }
0x32e2   : >> { %v7552_v37 = vadd.f32 %v7549_v54, %v7545_v14 }
0x32e3   : >> { %v7562_v30 = vpop.permute.xlu0 %7561  ;;  %v7553_v2 = vadd.f32 %v7548_v61, %v7546_v35 }
0x32e4   : >> { %v7564_v46 = vpop.permute.xlu1 %7563  ;;  %v7567_v20 = vadd.f32 %v7562_v30, %v7552_v37  ;;  %v7625_v37 = vld [vmem:[#allocation2 + $0x10] sm:$0x1] (%p4093_p5) }
0x32e5   : >> { %v7568_v5 = vadd.f32 %v7564_v46, %v7553_v2  ;;  %7628 = vst.msk [vmem:[%s8692_s20 + $0x10] sm:$0x1] (%p4093_p5), %vm10106_vm2, %v7625_v37 }
0x32e7   : >> { %v7570_v40 = vpop.permute.xlu0 %7569 }
0x32e8   : >> { %v7575_v42 = vadd.f32 %v7570_v40, %v7567_v20  ;;  %v7572_v47 = vpop.permute.xlu1 %7571 }
0x32e9   : >> { %v7576_v52 = vadd.f32 %v7572_v47, %v7568_v5 }
0x32ea   : >> { %v7586_v8 = vadd.f32 %v7581_v49, %v7575_v42  ;;  %v7526_v49 = vld [vmem:[#allocation3 + $0x8] sm:$0xff] }
0x32eb   : >> { %v7589_v19 = vpop.permute.xlu0 %7588  ;;  %v7587_v6 = vadd.f32 %v7583_v3, %v7576_v52 }
0x32ec   : >> { %v7591_v38 = vpop.permute.xlu1 %7590  ;;  %v7594_v1 = vadd.f32 %v7589_v19, %v7586_v8 }
0x32ed   : >> { %v7595_v59 = vadd.f32 %v7591_v38, %v7587_v6 }
0x32ef   : >> { %v7597_v48 = vpop.permute.xlu0 %7596 }
0x32f0   : >> { %v7602_v31 = vadd.f32 %v7597_v48, %v7594_v1  ;;  %v7599_v12 = vpop.permute.xlu1 %7598 }
0x32f1   : >> { %v7603_v44 = vadd.f32 %v7599_v12, %v7595_v59 }
0x32f2   : >> { %v7606_v54 = vrot.slane %v7602_v31, 7 }
0x32f3   : >> { %v7607_v0 = vrot.slane %v7603_v44, 7 }
0x32f4   : >> { %7609 = vrot.lane.b32.xlu0 %v7606_v54, %s8629_s18 }
0x32f5   : >> { %v7608_v61 = vsel %vm643_vm9, %v7606_v54, %v7607_v0 }
0x32f6   : >> { %7611 = vrot.lane.b32.xlu1 %v7608_v61, %s8629_s18 }
0x3366   : >> { %v7610_v17 = vpop.permute.xlu0 %7609 }
0x3367   : >> { %v7615_v18 = vsub.f32 %v7525_v23, %v7610_v17 }
0x3368   : >> { %v7612_v3 = vpop.permute.xlu1 %7611 }
0x3369   : >> { %v7617_v63 = vmul.f32 0.25, %v7615_v18  ;;  %v7616_v24 = vsub.f32 %v7526_v49, %v7612_v3 }
0x336b   : >> { %v7619_v16 = vadd.f32 %v7617_v63, %v9983_v57  ;;  %v7618_v60 = vmul.f32 0.25, %v7616_v24  ;;  %4095 = sbr.rel (!%p4093_p5) target bundleno = 6742 (0x1a56), region = 110 }
0x336d   : >> { %7621 = vst.msk [vmem:[#allocation2] sm:$0xfe] %vm550_vm3, %v7619_v16  ;;  %v7620_v14 = vadd.f32 %v7618_v60, %v9986_v62 }
0x336f   : >> { %7622 = vst.msk [vmem:[#allocation2 + $0x8] sm:$0xff] %vm535_vm15, %v7620_v14 }
0x3374   : > { %v7623_v36 = vld [vmem:[#allocation2] sm:$0xff] }
0x3375   : > { %7626 = vst.msk [vmem:[%s8692_s20] sm:$0xff] %vm432_vm6, %v7623_v36 }
0x3376   : > { %v7624_v35 = vld [vmem:[#allocation2 + $0x8] sm:$0xff] }
0x3377   : > { %7627 = vst.msk [vmem:[%s8692_s20 + $0x8] sm:$0xff] %vm432_vm6, %v7624_v35 }
0x3378 PF: > { %s15_s15 = sadd.s32 1, %s8608_s15  }
0x3379   : > { %p12_p6 = scmp.ge.s32.totalorder %s15_s15, 4  }
0x337b   :  { %14 = sbr.rel (!%p12_p6) target bundleno = 1 (0x1), region = 121 }

</bundles_post_ra>
